<compile_context>
chip_gen: v7x
topology: tpu7x:2x2x1
jax: 0.10.0
libtpu: 0.0.40
codegen_flags: <defaults>
</compile_context>

<pallas_src>
import jax
import jax.numpy as jnp
from jax.experimental import pallas as pl
from jax.experimental.pallas import tpu as pltpu


# ---------------------------------------------------------------------------
# Tiling constants
# ---------------------------------------------------------------------------
TM_CONV1 = 768     # fused conv1+pool GEMM M-tile (rows = pooled positions)
TM_CONV2 = 640     # conv2 GEMM M-tile
TK_FC = 10240      # fc1 K-tile: 20000 -> 20480 = 2 K-steps (5.24 MB bf16 blocks)


def _round_up(x, m):
    return ((x + m - 1) // m) * m


# ---------------------------------------------------------------------------
# Pallas kernels
# ---------------------------------------------------------------------------
def conv1_pool_kernel(a_ref, w_ref, b_ref, o_ref):
    """Fused conv1 GEMM + bias + 2x2 max-pool.

    a_ref: (tm, 128) bf16 -- per row: the 4 pool-window patches, 32 K each.
    w_ref: (128, 512) bf16 block-diagonal weight (quarter q -> lanes q*128..).
    b_ref: (1, 512) f32.  o_ref: (tm, 128) bf16 pooled output (16 real chans).
    """
    y = jnp.dot(a_ref[...], w_ref[...],
                preferred_element_type=jnp.float32) + b_ref[...]
    m = jnp.maximum(jnp.maximum(y[:, 0:128], y[:, 128:256]),
                    jnp.maximum(y[:, 256:384], y[:, 384:512]))
    o_ref[...] = m.astype(o_ref.dtype)


def conv2_gemm_kernel(a_ref, w_ref, b_ref, o_ref):
    """Single-K-step GEMM with fused bias (conv2 has no activation)."""
    o_ref[...] = (jnp.dot(a_ref[...], w_ref[...],
                          preferred_element_type=jnp.float32)
                  + b_ref[...]).astype(o_ref.dtype)


def fc_stack_kernel(x_ref, w1_ref, b1_ref, w2_ref, b2_ref, w3_ref, b3_ref,
                    o_ref, acc_ref):
    """Fused Linear(20000,256)+ReLU -> Linear(256,256)+ReLU -> Linear(256,1).

    Grid iterates over the fc1 K reduction (bf16 weight stream, f32 accumulate);
    fc2/fc3 run in the epilogue of the last K step.
    """
    k = pl.program_id(0)

    @pl.when(k == 0)
    def _():
        acc_ref[...] = jnp.zeros_like(acc_ref)

    acc_ref[...] += jnp.dot(x_ref[...], w1_ref[...],
                            preferred_element_type=jnp.float32)

    @pl.when(k == pl.num_programs(0) - 1)
    def _():
        h1 = jnp.maximum(acc_ref[...] + b1_ref[...], 0.0).astype(jnp.bfloat16)
        h2 = jnp.maximum(
            jnp.dot(h1, w2_ref[...], preferred_element_type=jnp.float32)
            + b2_ref[...], 0.0).astype(jnp.bfloat16)
        o_ref[...] = (jnp.dot(h2, w3_ref[...],
                              preferred_element_type=jnp.float32)
                      + b3_ref[...])


# ---------------------------------------------------------------------------
# Wrappers
# ---------------------------------------------------------------------------
def conv1_pool(a, w4, b4, tm=TM_CONV1):
    """a: (B*729, 128) bf16; w4: (128, 512) bf16; b4: (1, 512) f32.
    Returns (round_up(M, tm), 128) bf16 pooled conv1 feature rows."""
    M, K = a.shape
    Mp = _round_up(M, tm)
    if Mp != M:
        a = jnp.pad(a, ((0, Mp - M), (0, 0)))
    return pl.pallas_call(
        conv1_pool_kernel,
        out_shape=jax.ShapeDtypeStruct((Mp, 128), jnp.bfloat16),
        grid_spec=pltpu.PrefetchScalarGridSpec(
            num_scalar_prefetch=0,
            grid=(Mp // tm,),
            in_specs=[
                pl.BlockSpec((tm, K), lambda i: (i, 0)),
                pl.BlockSpec((K, 512), lambda i: (0, 0)),
                pl.BlockSpec((1, 512), lambda i: (0, 0)),
            ],
            out_specs=pl.BlockSpec((tm, 128), lambda i: (i, 0)),
        ),
        compiler_params=pltpu.CompilerParams(
            dimension_semantics=("parallel",)),
    )(a, w4, b4)


def conv2_gemm(a, w_p, b_p, tm=TM_CONV2):
    """a: (M, 144) bf16; w_p: (144, 128) bf16; b_p: (1, 128) f32.
    Returns (round_up(M, tm), 128) bf16.  Single K block; grid over M only."""
    M, K = a.shape
    Kw, N = w_p.shape
    assert K == Kw
    Mp = _round_up(M, tm)
    if Mp != M:
        a = jnp.pad(a, ((0, Mp - M), (0, 0)))
    return pl.pallas_call(
        conv2_gemm_kernel,
        out_shape=jax.ShapeDtypeStruct((Mp, N), jnp.bfloat16),
        grid_spec=pltpu.PrefetchScalarGridSpec(
            num_scalar_prefetch=0,
            grid=(Mp // tm,),
            in_specs=[
                pl.BlockSpec((tm, K), lambda i: (i, 0)),
                pl.BlockSpec((K, N), lambda i: (0, 0)),
                pl.BlockSpec((1, N), lambda i: (0, 0)),
            ],
            out_specs=pl.BlockSpec((tm, N), lambda i: (i, 0)),
        ),
        compiler_params=pltpu.CompilerParams(
            dimension_semantics=("parallel",)),
    )(a, w_p, b_p)


def fc_stack(x_p, w1, b1, w2, b2, w3, b3):
    """x_p: (Mp, 20480) bf16; w1: (20480, 256) bf16; w2: (256, 256) bf16;
    w3: (256, 128) bf16; biases f32.  Returns (Mp, 128) f32."""
    Mp, Kp = x_p.shape
    N1 = w1.shape[1]
    N3 = w3.shape[1]
    return pl.pallas_call(
        fc_stack_kernel,
        out_shape=jax.ShapeDtypeStruct((Mp, N3), jnp.float32),
        grid_spec=pltpu.PrefetchScalarGridSpec(
            num_scalar_prefetch=0,
            grid=(Kp // TK_FC,),
            in_specs=[
                pl.BlockSpec((Mp, TK_FC), lambda k: (0, k)),
                pl.BlockSpec((TK_FC, N1), lambda k: (k, 0)),
                pl.BlockSpec((1, N1), lambda k: (0, 0)),
                pl.BlockSpec((N1, N1), lambda k: (0, 0)),
                pl.BlockSpec((1, N1), lambda k: (0, 0)),
                pl.BlockSpec((N1, N3), lambda k: (0, 0)),
                pl.BlockSpec((1, N3), lambda k: (0, 0)),
            ],
            out_specs=pl.BlockSpec((Mp, N3), lambda k: (0, 0)),
            scratch_shapes=[pltpu.VMEM((Mp, N1), jnp.float32)],
        ),
        compiler_params=pltpu.CompilerParams(
            dimension_semantics=("arbitrary",),
            vmem_limit_bytes=32 * 1024 * 1024),   # explicit headroom (v7x: 64 MiB phys)
    )(x_p, w1, b1, w2, b2, w3, b3)


# ---------------------------------------------------------------------------
# im2col builders (cheap XLA slicing / reshape; all tiny at this model size)
# ---------------------------------------------------------------------------
def conv1_pool_im2col(x):
    """x: (B, 56, 56, 3) bf16 -> (B*27*27, 128) bf16.

    Row (b, h2, w2) holds the four 3x3x3 patches of the 2x2 pool window at the
    pooled position, each zero-padded 27 -> 32 along K; lane index =
    hp*64 + wq*32 + (dh*3+dw)*3 + c, matching the block-diagonal weight."""
    B = x.shape[0]
    cols = [x[:, dh:dh + 54, dw:dw + 54, :] for dh in range(3) for dw in range(3)]
    cols.append(jnp.zeros((B, 54, 54, 5), x.dtype))           # pad K 27 -> 32
    pat = jnp.concatenate(cols, axis=-1)                       # (B, 54, 54, 32)
    pat = pat.reshape(B, 27, 2, 27, 2, 32).transpose(0, 1, 3, 2, 4, 5)
    return pat.reshape(B * 27 * 27, 128)


def conv2_im2col(p1):
    """p1: (B, 27, 27, 128) bf16 (16 real channels) -> (B*25*25, 144) bf16.
    Patch order (dh, dw, c); natural K=144, no lane-width padding."""
    B = p1.shape[0]
    cols = [p1[:, dh:dh + 25, dw:dw + 25, :16]
            for dh in range(3) for dw in range(3)]
    return jnp.concatenate(cols, axis=-1).reshape(B * 25 * 25, 144)


# ---------------------------------------------------------------------------
# Parameters
# ---------------------------------------------------------------------------
def init_params(key):
    """Raw parameters with PyTorch-style init.  fc1_w is stored as W^T with rows
    in the NHWC flatten order (h, w, c) used by this implementation; loading a
    real PyTorch checkpoint (flatten order (c, h, w)) would need a one-time row
    permutation of fc1_w."""
    ks = jax.random.split(key, 10)

    def uni(k, shape, fan_in):
        bound = 1.0 / jnp.sqrt(fan_in)
        return jax.random.uniform(k, shape, jnp.float32, -bound, bound)

    return {
        "conv1_w": uni(ks[0], (16, 3, 3, 3), 3 * 9),
        "conv1_b": uni(ks[1], (16,), 3 * 9),
        "conv2_w": uni(ks[2], (32, 16, 3, 3), 16 * 9),
        "conv2_b": uni(ks[3], (32,), 16 * 9),
        "fc1_w": uni(ks[4], (32 * 25 * 25, 256), 32 * 25 * 25),  # W^T, NHWC rows
        "fc1_b": uni(ks[5], (256,), 32 * 25 * 25),
        "fc2_w": uni(ks[6], (256, 256), 256),
        "fc2_b": uni(ks[7], (256,), 256),
        "fc3_w": uni(ks[8], (256, 1), 256),
        "fc3_b": uni(ks[9], (1,), 256),
    }


def prepare_params(p):
    """One-time prep: GEMM-form conv weights, zero-pad to lane-dense shapes,
    build the 4-way block-diagonal conv1 weight for the fused conv+pool kernel,
    cast weights to bf16 (MXU native).  Biases stay f32 (added to f32 acc)."""
    # conv1: (O,I,KH,KW) -> rows (dh,dw,c), cols o
    c1 = p["conv1_w"].transpose(2, 3, 1, 0).reshape(27, 16)
    w1c = jnp.zeros((128, 512), jnp.float32)
    b1c = jnp.zeros((1, 512), jnp.float32)
    for q in range(4):                       # pool-window quarter q = hp*2 + wq
        w1c = w1c.at[q * 32:q * 32 + 27, q * 128:q * 128 + 16].set(c1)
        b1c = b1c.at[0, q * 128:q * 128 + 16].set(p["conv1_b"])

    c2 = p["conv2_w"].transpose(2, 3, 1, 0).reshape(144, 32)
    w2c = jnp.zeros((144, 128), jnp.float32).at[:, :32].set(c2)
    b2c = jnp.zeros((1, 128), jnp.float32).at[0, :32].set(p["conv2_b"])

    k_fc1 = _round_up(p["fc1_w"].shape[0], TK_FC)             # 20480
    w1f = jnp.zeros((k_fc1, 256), jnp.float32).at[:p["fc1_w"].shape[0]].set(p["fc1_w"])
    w3f = jnp.zeros((256, 128), jnp.float32).at[:, :1].set(p["fc3_w"])
    b3f = jnp.zeros((1, 128), jnp.float32).at[0, :1].set(p["fc3_b"])

    return {
        "c1_w": w1c.astype(jnp.bfloat16), "c1_b": b1c,
        "c2_w": w2c.astype(jnp.bfloat16), "c2_b": b2c,
        "fc1_w": w1f.astype(jnp.bfloat16), "fc1_b": p["fc1_b"][None, :],
        "fc2_w": p["fc2_w"].astype(jnp.bfloat16), "fc2_b": p["fc2_b"][None, :],
        "fc3_w": w3f.astype(jnp.bfloat16), "fc3_b": b3f,
    }


# ---------------------------------------------------------------------------
# Forward pass (matches NeuralNetwork.forward)
# ---------------------------------------------------------------------------
def forward(pp, x):
    """x: (B, 3, 56, 56) f32 NCHW (like PyTorch).  Returns (B, 1) f32 logits.
    Activations are bf16 with f32 accumulation (intentional inference tolerance)."""
    B = x.shape[0]
    x = jnp.transpose(x, (0, 2, 3, 1)).astype(jnp.bfloat16)      # NHWC, bf16

    # conv1 (3->16, k=3, valid) + MaxPool2d(2,2): fused GEMM + pool epilogue
    a1 = conv1_pool_im2col(x)                                    # (B*729, 128)
    p1 = conv1_pool(a1, pp["c1_w"], pp["c1_b"])                  # (Mp1, 128)
    p1 = p1[:B * 729].reshape(B, 27, 27, 128)                    # pooled NHWC, 16 real C

    # conv2 (16->32, k=3, valid): natural K=144, single-K-step GEMM
    a2 = conv2_im2col(p1)                                        # (B*625, 144)
    y2 = conv2_gemm(a2, pp["c2_w"], pp["c2_b"])                  # (Mp2, 128)

    # flatten (NHWC order, matches fc1_w rows) + fused fc1/ReLU/fc2/ReLU/fc3.
    # The slice/reshape/pad glue is tiny (<1 MB) and is left to XLA fusion.
    xf = y2[:B * 625, :32].reshape(B, 625 * 32)                  # (B, 20000) bf16
    mp = _round_up(B, 16)
    kp = pp["fc1_w"].shape[0]
    xf = jnp.pad(xf, ((0, mp - B), (0, kp - xf.shape[1])))       # (mp, 20480)
    logits = fc_stack(xf, pp["fc1_w"], pp["fc1_b"], pp["fc2_w"], pp["fc2_b"],
                      pp["fc3_w"], pp["fc3_b"])                  # (mp, 128) f32
    return logits[:B, :1]


if __name__ == "__main__":
    key = jax.random.PRNGKey(0)
    pkey, xkey = jax.random.split(key)
    params = init_params(pkey)
    prepped = prepare_params(params)          # one-time weight prep (bf16, padded)

    # Input implied by the module: 56x56 RGB images (NCHW), small batch.
    x = jax.random.normal(xkey, (2, 3, 56, 56), jnp.float32)

    fwd = jax.jit(forward)
    logits = fwd(prepped, x)
    jax.block_until_ready(logits)
    assert logits.shape == (2, 1), logits.shape
    assert bool(jnp.all(jnp.isfinite(logits)))
    print("KERNEL_OK")
</pallas_src>

<mosaic_0001>
module attributes {stable_mosaic.version = 11 : i64} {
  func.func @conv1_pool_kernel(%arg0: i32, %arg1: memref<768x128xbf16, #tpu.memory_space<vmem>>, %arg2: memref<128x512xbf16, #tpu.memory_space<vmem>>, %arg3: memref<1x512xf32, #tpu.memory_space<vmem>>, %arg4: memref<768x128xbf16, #tpu.memory_space<vmem>>) attributes {dimension_semantics = [#tpu.dimension_semantics<parallel>], iteration_bounds = array<i64: 2>, scalar_prefetch = 0 : i64, scratch_operands = 0 : i64, tpu.core_type = #tpu.core_type<tc>, window_params = [{transform_indices = @transform_0, window_bounds = array<i64: 768, 128>}, {pipeline_mode = #tpu.pipeline_mode<synchronous>, transform_indices = @transform_1, window_bounds = array<i64: 128, 512>}, {pipeline_mode = #tpu.pipeline_mode<synchronous>, transform_indices = @transform_2, window_bounds = array<i64: 1, 512>}, {transform_indices = @transform_3, window_bounds = array<i64: 768, 128>}]} {
    %c0 = arith.constant 0 : index
    %c0_0 = arith.constant 0 : index
    %0 = vector.load %arg1[%c0, %c0_0] : memref<768x128xbf16, #tpu.memory_space<vmem>>, vector<768x128xbf16>
    %c0_1 = arith.constant 0 : index
    %c0_2 = arith.constant 0 : index
    %1 = vector.load %arg2[%c0_1, %c0_2] : memref<128x512xbf16, #tpu.memory_space<vmem>>, vector<128x512xbf16>
    %cst = arith.constant dense<0.000000e+00> : vector<768x512xf32>
    %2 = tpu.matmul %0, %1, %cst {dimension_numbers = #tpu.dot_dimension_numbers<[1], [0], [0], [1], [0, 0, 1, 1], [], []>} : vector<768x128xbf16>, vector<128x512xbf16>, vector<768x512xf32> -> vector<768x512xf32>
    %c0_3 = arith.constant 0 : index
    %c0_4 = arith.constant 0 : index
    %3 = vector.load %arg3[%c0_3, %c0_4] : memref<1x512xf32, #tpu.memory_space<vmem>>, vector<1x512xf32>
    %4 = vector.broadcast %3 : vector<1x512xf32> to vector<768x512xf32>
    %5 = arith.addf %2, %4 : vector<768x512xf32>
    %6 = vector.extract_strided_slice %5 {offsets = [0, 0], sizes = [768, 128], strides = [1, 1]} : vector<768x512xf32> to vector<768x128xf32>
    %7 = vector.extract_strided_slice %5 {offsets = [0, 128], sizes = [768, 128], strides = [1, 1]} : vector<768x512xf32> to vector<768x128xf32>
    %8 = arith.maximumf %6, %7 : vector<768x128xf32>
    %9 = vector.extract_strided_slice %5 {offsets = [0, 256], sizes = [768, 128], strides = [1, 1]} : vector<768x512xf32> to vector<768x128xf32>
    %10 = vector.extract_strided_slice %5 {offsets = [0, 384], sizes = [768, 128], strides = [1, 1]} : vector<768x512xf32> to vector<768x128xf32>
    %11 = arith.maximumf %9, %10 : vector<768x128xf32>
    %12 = arith.maximumf %8, %11 : vector<768x128xf32>
    %13 = arith.truncf %12 : vector<768x128xf32> to vector<768x128xbf16>
    %c0_5 = arith.constant 0 : index
    %c0_6 = arith.constant 0 : index
    %14 = vector.load %arg4[%c0_5, %c0_6] : memref<768x128xbf16, #tpu.memory_space<vmem>>, vector<768x128xbf16>
    tpu.vector_store %arg4[%c0_5, %c0_6], %13 {strides = array<i32>} : memref<768x128xbf16, #tpu.memory_space<vmem>>, vector<768x128xbf16>,
    return
  }
  func.func @transform_0(%arg0: i32) -> (i32, i32) {
    %c0_i32 = arith.constant 0 : i32
    %c0_i32_0 = arith.constant 0 : i32
    return %arg0, %c0_i32 : i32, i32
  }
  func.func @transform_1(%arg0: i32) -> (i32, i32) {
    %c0_i32 = arith.constant 0 : i32
    %c0_i32_0 = arith.constant 0 : i32
    %c0_i32_1 = arith.constant 0 : i32
    return %c0_i32, %c0_i32_0 : i32, i32
  }
  func.func @transform_2(%arg0: i32) -> (i32, i32) {
    %c0_i32 = arith.constant 0 : i32
    %c0_i32_0 = arith.constant 0 : i32
    %c0_i32_1 = arith.constant 0 : i32
    return %c0_i32, %c0_i32_0 : i32, i32
  }
  func.func @transform_3(%arg0: i32) -> (i32, i32) {
    %c0_i32 = arith.constant 0 : i32
    %c0_i32_0 = arith.constant 0 : i32
    return %arg0, %c0_i32 : i32, i32
  }
}

module attributes {stable_mosaic.version = 11 : i64} {
  func.func @conv2_gemm_kernel(%arg0: i32, %arg1: memref<640x144xbf16, #tpu.memory_space<vmem>>, %arg2: memref<144x128xbf16, #tpu.memory_space<vmem>>, %arg3: memref<1x128xf32, #tpu.memory_space<vmem>>, %arg4: memref<640x128xbf16, #tpu.memory_space<vmem>>) attributes {dimension_semantics = [#tpu.dimension_semantics<parallel>], iteration_bounds = array<i64: 2>, scalar_prefetch = 0 : i64, scratch_operands = 0 : i64, tpu.core_type = #tpu.core_type<tc>, window_params = [{transform_indices = @transform_0, window_bounds = array<i64: 640, 144>}, {pipeline_mode = #tpu.pipeline_mode<synchronous>, transform_indices = @transform_1, window_bounds = array<i64: 144, 128>}, {pipeline_mode = #tpu.pipeline_mode<synchronous>, transform_indices = @transform_2, window_bounds = array<i64: 1, 128>}, {transform_indices = @transform_3, window_bounds = array<i64: 640, 128>}]} {
    %c0 = arith.constant 0 : index
    %c0_0 = arith.constant 0 : index
    %0 = vector.load %arg1[%c0, %c0_0] : memref<640x144xbf16, #tpu.memory_space<vmem>>, vector<640x144xbf16>
    %c0_1 = arith.constant 0 : index
    %c0_2 = arith.constant 0 : index
    %1 = vector.load %arg2[%c0_1, %c0_2] : memref<144x128xbf16, #tpu.memory_space<vmem>>, vector<144x128xbf16>
    %cst = arith.constant dense<0.000000e+00> : vector<640x128xf32>
    %2 = tpu.matmul %0, %1, %cst {dimension_numbers = #tpu.dot_dimension_numbers<[1], [0], [0], [1], [0, 0, 1, 1], [], []>} : vector<640x144xbf16>, vector<144x128xbf16>, vector<640x128xf32> -> vector<640x128xf32>
    %c0_3 = arith.constant 0 : index
    %c0_4 = arith.constant 0 : index
    %3 = vector.load %arg3[%c0_3, %c0_4] : memref<1x128xf32, #tpu.memory_space<vmem>>, vector<1x128xf32>
    %4 = vector.broadcast %3 : vector<1x128xf32> to vector<640x128xf32>
    %5 = arith.addf %2, %4 : vector<640x128xf32>
    %6 = arith.truncf %5 : vector<640x128xf32> to vector<640x128xbf16>
    %c0_5 = arith.constant 0 : index
    %c0_6 = arith.constant 0 : index
    %7 = vector.load %arg4[%c0_5, %c0_6] : memref<640x128xbf16, #tpu.memory_space<vmem>>, vector<640x128xbf16>
    tpu.vector_store %arg4[%c0_5, %c0_6], %6 {strides = array<i32>} : memref<640x128xbf16, #tpu.memory_space<vmem>>, vector<640x128xbf16>,
    return
  }
  func.func @transform_0(%arg0: i32) -> (i32, i32) {
    %c0_i32 = arith.constant 0 : i32
    %c0_i32_0 = arith.constant 0 : i32
    return %arg0, %c0_i32 : i32, i32
  }
  func.func @transform_1(%arg0: i32) -> (i32, i32) {
    %c0_i32 = arith.constant 0 : i32
    %c0_i32_0 = arith.constant 0 : i32
    %c0_i32_1 = arith.constant 0 : i32
    return %c0_i32, %c0_i32_0 : i32, i32
  }
  func.func @transform_2(%arg0: i32) -> (i32, i32) {
    %c0_i32 = arith.constant 0 : i32
    %c0_i32_0 = arith.constant 0 : i32
    %c0_i32_1 = arith.constant 0 : i32
    return %c0_i32, %c0_i32_0 : i32, i32
  }
  func.func @transform_3(%arg0: i32) -> (i32, i32) {
    %c0_i32 = arith.constant 0 : i32
    %c0_i32_0 = arith.constant 0 : i32
    return %arg0, %c0_i32 : i32, i32
  }
}

module attributes {stable_mosaic.version = 11 : i64} {
  func.func @fc_stack_kernel(%arg0: i32, %arg1: memref<16x10240xbf16, #tpu.memory_space<vmem>>, %arg2: memref<10240x256xbf16, #tpu.memory_space<vmem>>, %arg3: memref<1x256xf32, #tpu.memory_space<vmem>>, %arg4: memref<256x256xbf16, #tpu.memory_space<vmem>>, %arg5: memref<1x256xf32, #tpu.memory_space<vmem>>, %arg6: memref<256x128xbf16, #tpu.memory_space<vmem>>, %arg7: memref<1x128xf32, #tpu.memory_space<vmem>>, %arg8: memref<16x128xf32, #tpu.memory_space<vmem>>, %arg9: memref<16x256xf32, #tpu.memory_space<vmem>>) attributes {dimension_semantics = [#tpu.dimension_semantics<arbitrary>], iteration_bounds = array<i64: 2>, scalar_prefetch = 0 : i64, scratch_operands = 1 : i64, tpu.core_type = #tpu.core_type<tc>, window_params = [{transform_indices = @transform_0, window_bounds = array<i64: 16, 10240>}, {transform_indices = @transform_1, window_bounds = array<i64: 10240, 256>}, {pipeline_mode = #tpu.pipeline_mode<synchronous>, transform_indices = @transform_2, window_bounds = array<i64: 1, 256>}, {pipeline_mode = #tpu.pipeline_mode<synchronous>, transform_indices = @transform_3, window_bounds = array<i64: 256, 256>}, {pipeline_mode = #tpu.pipeline_mode<synchronous>, transform_indices = @transform_4, window_bounds = array<i64: 1, 256>}, {pipeline_mode = #tpu.pipeline_mode<synchronous>, transform_indices = @transform_5, window_bounds = array<i64: 256, 128>}, {pipeline_mode = #tpu.pipeline_mode<synchronous>, transform_indices = @transform_6, window_bounds = array<i64: 1, 128>}, {pipeline_mode = #tpu.pipeline_mode<synchronous>, transform_indices = @transform_7, window_bounds = array<i64: 16, 128>}]} {
    %c0_i32 = arith.constant 0 : i32
    %0 = arith.cmpi eq, %arg0, %c0_i32 : i32
    %1 = arith.extui %0 : i1 to i32
    %c0_i32_0 = arith.constant 0 : i32
    %2 = arith.cmpi ne, %1, %c0_i32_0 : i32
    scf.if %2 {
      %cst_9 = arith.constant 0.000000e+00 : f32
      %12 = vector.broadcast %cst_9 : f32 to vector<16x256xf32>
      %c0_10 = arith.constant 0 : index
      %c0_11 = arith.constant 0 : index
      %13 = vector.load %arg9[%c0_10, %c0_11] : memref<16x256xf32, #tpu.memory_space<vmem>>, vector<16x256xf32>
      tpu.vector_store %arg9[%c0_10, %c0_11], %12 {strides = array<i32>} : memref<16x256xf32, #tpu.memory_space<vmem>>, vector<16x256xf32>,
    } else {
    }
    %c0 = arith.constant 0 : index
    %c0_1 = arith.constant 0 : index
    %3 = vector.load %arg9[%c0, %c0_1] : memref<16x256xf32, #tpu.memory_space<vmem>>, vector<16x256xf32>
    %c0_2 = arith.constant 0 : index
    %c0_3 = arith.constant 0 : index
    %4 = vector.load %arg1[%c0_2, %c0_3] : memref<16x10240xbf16, #tpu.memory_space<vmem>>, vector<16x10240xbf16>
    %c0_4 = arith.constant 0 : index
    %c0_5 = arith.constant 0 : index
    %5 = vector.load %arg2[%c0_4, %c0_5] : memref<10240x256xbf16, #tpu.memory_space<vmem>>, vector<10240x256xbf16>
    %cst = arith.constant dense<0.000000e+00> : vector<16x256xf32>
    %6 = tpu.matmul %4, %5, %cst {dimension_numbers = #tpu.dot_dimension_numbers<[1], [0], [0], [1], [0, 0, 1, 1], [], []>} : vector<16x10240xbf16>, vector<10240x256xbf16>, vector<16x256xf32> -> vector<16x256xf32>
    %7 = arith.addf %3, %6 : vector<16x256xf32>
    %c0_6 = arith.constant 0 : index
    %c0_7 = arith.constant 0 : index
    %8 = vector.load %arg9[%c0_6, %c0_7] : memref<16x256xf32, #tpu.memory_space<vmem>>, vector<16x256xf32>
    tpu.vector_store %arg9[%c0_6, %c0_7], %7 {strides = array<i32>} : memref<16x256xf32, #tpu.memory_space<vmem>>, vector<16x256xf32>,
    %c1_i32 = arith.constant 1 : i32
    %9 = arith.cmpi eq, %arg0, %c1_i32 : i32
    %10 = arith.extui %9 : i1 to i32
    %c0_i32_8 = arith.constant 0 : i32
    %11 = arith.cmpi ne, %10, %c0_i32_8 : i32
    scf.if %11 {
      %c0_9 = arith.constant 0 : index
      %c0_10 = arith.constant 0 : index
      %12 = vector.load %arg9[%c0_9, %c0_10] : memref<16x256xf32, #tpu.memory_space<vmem>>, vector<16x256xf32>
      %c0_11 = arith.constant 0 : index
      %c0_12 = arith.constant 0 : index
      %13 = vector.load %arg3[%c0_11, %c0_12] : memref<1x256xf32, #tpu.memory_space<vmem>>, vector<1x256xf32>
      %14 = vector.broadcast %13 : vector<1x256xf32> to vector<16x256xf32>
      %15 = arith.addf %12, %14 : vector<16x256xf32>
      %cst_13 = arith.constant 0.000000e+00 : f32
      %16 = vector.broadcast %cst_13 : f32 to vector<16x256xf32>
      %17 = arith.maximumf %15, %16 : vector<16x256xf32>
      %18 = arith.truncf %17 : vector<16x256xf32> to vector<16x256xbf16>
      %c0_14 = arith.constant 0 : index
      %c0_15 = arith.constant 0 : index
      %19 = vector.load %arg4[%c0_14, %c0_15] : memref<256x256xbf16, #tpu.memory_space<vmem>>, vector<256x256xbf16>
      %cst_16 = arith.constant dense<0.000000e+00> : vector<16x256xf32>
      %20 = tpu.matmul %18, %19, %cst_16 {dimension_numbers = #tpu.dot_dimension_numbers<[1], [0], [0], [1], [0, 0, 1, 1], [], []>} : vector<16x256xbf16>, vector<256x256xbf16>, vector<16x256xf32> -> vector<16x256xf32>
      %c0_17 = arith.constant 0 : index
      %c0_18 = arith.constant 0 : index
      %21 = vector.load %arg5[%c0_17, %c0_18] : memref<1x256xf32, #tpu.memory_space<vmem>>, vector<1x256xf32>
      %22 = vector.broadcast %21 : vector<1x256xf32> to vector<16x256xf32>
      %23 = arith.addf %20, %22 : vector<16x256xf32>
      %cst_19 = arith.constant 0.000000e+00 : f32
      %24 = vector.broadcast %cst_19 : f32 to vector<16x256xf32>
      %25 = arith.maximumf %23, %24 : vector<16x256xf32>
      %26 = arith.truncf %25 : vector<16x256xf32> to vector<16x256xbf16>
      %c0_20 = arith.constant 0 : index
      %c0_21 = arith.constant 0 : index
      %27 = vector.load %arg6[%c0_20, %c0_21] : memref<256x128xbf16, #tpu.memory_space<vmem>>, vector<256x128xbf16>
      %cst_22 = arith.constant dense<0.000000e+00> : vector<16x128xf32>
      %28 = tpu.matmul %26, %27, %cst_22 {dimension_numbers = #tpu.dot_dimension_numbers<[1], [0], [0], [1], [0, 0, 1, 1], [], []>} : vector<16x256xbf16>, vector<256x128xbf16>, vector<16x128xf32> -> vector<16x128xf32>
      %c0_23 = arith.constant 0 : index
      %c0_24 = arith.constant 0 : index
      %29 = vector.load %arg7[%c0_23, %c0_24] : memref<1x128xf32, #tpu.memory_space<vmem>>, vector<1x128xf32>
      %30 = vector.broadcast %29 : vector<1x128xf32> to vector<16x128xf32>
      %31 = arith.addf %28, %30 : vector<16x128xf32>
      %c0_25 = arith.constant 0 : index
      %c0_26 = arith.constant 0 : index
      %32 = vector.load %arg8[%c0_25, %c0_26] : memref<16x128xf32, #tpu.memory_space<vmem>>, vector<16x128xf32>
      tpu.vector_store %arg8[%c0_25, %c0_26], %31 {strides = array<i32>} : memref<16x128xf32, #tpu.memory_space<vmem>>, vector<16x128xf32>,
    } else {
    }
    return
  }
  func.func @transform_0(%arg0: i32) -> (i32, i32) {
    %c0_i32 = arith.constant 0 : i32
    %c0_i32_0 = arith.constant 0 : i32
    return %c0_i32, %arg0 : i32, i32
  }
  func.func @transform_1(%arg0: i32) -> (i32, i32) {
    %c0_i32 = arith.constant 0 : i32
    %c0_i32_0 = arith.constant 0 : i32
    return %arg0, %c0_i32 : i32, i32
  }
  func.func @transform_2(%arg0: i32) -> (i32, i32) {
    %c0_i32 = arith.constant 0 : i32
    %c0_i32_0 = arith.constant 0 : i32
    %c0_i32_1 = arith.constant 0 : i32
    return %c0_i32, %c0_i32_0 : i32, i32
  }
  func.func @transform_3(%arg0: i32) -> (i32, i32) {
    %c0_i32 = arith.constant 0 : i32
    %c0_i32_0 = arith.constant 0 : i32
    %c0_i32_1 = arith.constant 0 : i32
    return %c0_i32, %c0_i32_0 : i32, i32
  }
  func.func @transform_4(%arg0: i32) -> (i32, i32) {
    %c0_i32 = arith.constant 0 : i32
    %c0_i32_0 = arith.constant 0 : i32
    %c0_i32_1 = arith.constant 0 : i32
    return %c0_i32, %c0_i32_0 : i32, i32
  }
  func.func @transform_5(%arg0: i32) -> (i32, i32) {
    %c0_i32 = arith.constant 0 : i32
    %c0_i32_0 = arith.constant 0 : i32
    %c0_i32_1 = arith.constant 0 : i32
    return %c0_i32, %c0_i32_0 : i32, i32
  }
  func.func @transform_6(%arg0: i32) -> (i32, i32) {
    %c0_i32 = arith.constant 0 : i32
    %c0_i32_0 = arith.constant 0 : i32
    %c0_i32_1 = arith.constant 0 : i32
    return %c0_i32, %c0_i32_0 : i32, i32
  }
  func.func @transform_7(%arg0: i32) -> (i32, i32) {
    %c0_i32 = arith.constant 0 : i32
    %c0_i32_0 = arith.constant 0 : i32
    %c0_i32_1 = arith.constant 0 : i32
    return %c0_i32, %c0_i32_0 : i32, i32
  }
}

</mosaic_0001>

<bundles_post_ra>
// kernel: forward.3
= control target key start
LH: loop header
LB: loop body
LE: loop exit
PB: predicated region body
PF: predicated region fallthrough
CT: control target
= control target key end

     0   :  { %s3325_s12 = smov 0   ;;  %s4036_s0 = inlined_call_operand.vmem [shape: bf16[1536,128], index: 0, kind: input, shape index: {}]   ;;  %s4037_s1 = inlined_call_operand.vmem [shape: bf16[128,512], index: 1, kind: input, shape index: {}]   ;;  %s4038_s2 = inlined_call_operand.vmem [shape: f32[1,512], index: 2, kind: input, shape index: {}]   ;;  %s4039_s3 = inlined_call_operand.vmem [shape: bf16[1536,128], index: 3, kind: output, shape index: {}]  }
   0x1 LB: > { %s2623_s13 = sadd.s32 4294967295, %s3302_s12   ;;  %p2627_p0 = scmp.ge.s32.totalorder %s3302_s12, 1  ;;  %s3302_s12 = sphi %s3325_s12, %s13_s12  }
   0x2   : > { %p138_p1 = scmp.lt.s32.totalorder %s3302_s12, 3 }
   0x4   : > { %p139_p2 = pnand %p2627_p0, %p138_p1 }
   0x5   : > { %v3200_v0 = vld [vmem:[%s4037_s1 + $0x4] ss:$16 sps:$4 sm:$0xff] (!%p139_p2)   ;;  %v3202_v1 = vld [vmem:[%s4037_s1 + $0xc] ss:$16 sps:$4 sm:$0xff] (!%p139_p2)   ;;  %v3304_v2 = vmov (!%p139_p2), 0   ;;  %s162_s30 = smul.u32 (!%p139_p2), 96, %s2623_s13  ;;  %v305_v59 = vlaneseq (!%p139_p2) }
   0x6   : > { %142 = sbr.rel (%p139_p2) target bundleno = 639 (0x27f), region = 32  ;;  %805 = vmatprep.mubr.bf16.mxu0 (!%p139_p2), %v3304_v2  ;;  %1318 = vmatprep.mubr.bf16.mxu1 (!%p139_p2), %v3304_v2  ;;  %v3204_v3 = vld [vmem:[%s4037_s1] ss:$16 sps:$4 sm:$0xff] (!%p139_p2)   ;;  %v3205_v4 = vld [vmem:[%s4037_s1 + $0x8] ss:$16 sps:$4 sm:$0xff] (!%p139_p2)  }
   0x7   : > { %773 = vmatprep.subr.bf16.mxu0 (!%p139_p2), %v3200_v0  ;;  %1286 = vmatprep.subr.bf16.mxu1 (!%p139_p2), %v3202_v1  ;;  %v3206_v5 = vld [vmem:[%s4037_s1 + $0x24] ss:$16 sps:$4 sm:$0xff] (!%p139_p2)   ;;  %v3208_v6 = vld [vmem:[%s4037_s1 + $0x2c] ss:$16 sps:$4 sm:$0xff] (!%p139_p2)   ;;  %v3210_v7 = vld [vmem:[%s4037_s1 + $0x20] ss:$16 sps:$4 sm:$0xff] (!%p139_p2)  }
   0x8   : > { %774 = vmatpush1.bf16.msra.mxu0 (!%p139_p2), %v3204_v3  ;;  %1287 = vmatpush1.bf16.msra.mxu1 (!%p139_p2), %v3205_v4  ;;  %v3211_v8 = vld [vmem:[%s4037_s1 + $0x28] ss:$16 sps:$4 sm:$0xff] (!%p139_p2)   ;;  %v3212_v9 = vld [vmem:[%s4037_s1 + $0x44] ss:$16 sps:$4 sm:$0xff] (!%p139_p2)   ;;  %v3214_v10 = vld [vmem:[%s4037_s1 + $0x4c] ss:$16 sps:$4 sm:$0xff] (!%p139_p2)  }
   0x9   : > { %775 = vmatprep.subr.bf16.mxu0 (!%p139_p2), %v3206_v5  ;;  %1288 = vmatprep.subr.bf16.mxu1 (!%p139_p2), %v3208_v6  ;;  %v3216_v11 = vld [vmem:[%s4037_s1 + $0x40] ss:$16 sps:$4 sm:$0xff] (!%p139_p2)   ;;  %v3217_v12 = vld [vmem:[%s4037_s1 + $0x48] ss:$16 sps:$4 sm:$0xff] (!%p139_p2)   ;;  %v3218_v13 = vld [vmem:[%s4037_s1 + $0x64] ss:$16 sps:$4 sm:$0xff] (!%p139_p2)  }
   0xa   : > { %v3220_v14 = vld [vmem:[%s4037_s1 + $0x6c] ss:$16 sps:$4 sm:$0xff] (!%p139_p2)   ;;  %p163_p3 = scmp.lt.s32.totalorder (!%p139_p2), %s162_s30, 191  ;;  %v3222_v15 = vld [vmem:[%s4037_s1 + $0x60] ss:$16 sps:$4 sm:$0xff] (!%p139_p2)   ;;  %v306_v60 = vshrl.u32 (!%p139_p2), %v305_v59, 7 }
   0xb   : > { %v3223_v16 = vld [vmem:[%s4037_s1 + $0x68] ss:$16 sps:$4 sm:$0xff] (!%p139_p2)   ;;  %v3224_v17 = vld [vmem:[%s4037_s1 + $0x84] ss:$16 sps:$4 sm:$0xff] (!%p139_p2)   ;;  %v3226_v18 = vld [vmem:[%s4037_s1 + $0x8c] ss:$16 sps:$4 sm:$0xff] (!%p139_p2)  }
   0xc   : > { %776 = vmatpush1.bf16.msra.mxu0 (!%p139_p2), %v3210_v7  ;;  %1289 = vmatpush1.bf16.msra.mxu1 (!%p139_p2), %v3211_v8  ;;  %v3228_v19 = vld [vmem:[%s4037_s1 + $0x80] ss:$16 sps:$4 sm:$0xff] (!%p139_p2)   ;;  %v3229_v20 = vld [vmem:[%s4037_s1 + $0x88] ss:$16 sps:$4 sm:$0xff] (!%p139_p2)   ;;  %v3230_v21 = vld [vmem:[%s4037_s1 + $0xa4] ss:$16 sps:$4 sm:$0xff] (!%p139_p2)  }
   0xd   : > { %777 = vmatprep.subr.bf16.mxu0 %v3212_v9  ;;  %1290 = vmatprep.subr.bf16.mxu1 %v3214_v10  ;;  %s4041_s30 = smov (!%p163_p3, %s162_s30), 191  ;;  %v3232_v22 = vld [vmem:[%s4037_s1 + $0xac] ss:$16 sps:$4 sm:$0xff]   ;;  %v3234_v23 = vld [vmem:[%s4037_s1 + $0xa0] ss:$16 sps:$4 sm:$0xff]   ;;  %v307_v62 = vsub.s32 0, %v306_v60 }
   0xe   : > { %s2628_s7 = sshll.u32 %s4041_s30, 2  ;;  %v3235_v24 = vld [vmem:[%s4037_s1 + $0xa8] ss:$16 sps:$4 sm:$0xff]   ;;  %v3236_v25 = vld [vmem:[%s4037_s1 + $0xc4] ss:$16 sps:$4 sm:$0xff]   ;;  %v315_v63 = vsub.s32 2, %v306_v60 }
   0xf   : > { %s3418_s17 = scalar_lea.vmem %s4036_s0, %s2628_s7  ;;  %v3238_v26 = vld [vmem:[%s4037_s1 + $0xcc] ss:$16 sps:$4 sm:$0xff]   ;;  %v3240_v27 = vld [vmem:[%s4037_s1 + $0xc0] ss:$16 sps:$4 sm:$0xff]   ;;  %v3241_v28 = vld [vmem:[%s4037_s1 + $0xc8] ss:$16 sps:$4 sm:$0xff]   ;;  %s3549_s11 = scalar_lea.vmem %s4039_s3, %s2628_s7 }
  0x10   : > { %778 = vmatpush1.bf16.msra.mxu0 %v3216_v11  ;;  %1291 = vmatpush1.bf16.msra.mxu1 %v3217_v12  ;;  %v3242_v29 = vld [vmem:[%s4037_s1 + $0xe4] ss:$16 sps:$4 sm:$0xff]   ;;  %v3244_v30 = vld [vmem:[%s4037_s1 + $0xec] ss:$16 sps:$4 sm:$0xff]   ;;  %v3246_v31 = vld [vmem:[%s4037_s1 + $0xe0] ss:$16 sps:$4 sm:$0xff]  }
  0x11   : > { %779 = vmatprep.subr.bf16.mxu0 %v3218_v13  ;;  %1292 = vmatprep.subr.bf16.mxu1 %v3220_v14  ;;  %v3247_v32 = vld [vmem:[%s4037_s1 + $0xe8] ss:$16 sps:$4 sm:$0xff]   ;;  %v3248_v33 = vld [vmem:[%s3418_s17] sm:$0xff]   ;;  %v3250_v35 = vld [vmem:[%s3418_s17 + $0x10] sm:$0xff]   ;;  %v311_v1 = vsub.s32 1, %v306_v60  ;;  %v319_v3 = vsub.s32 3, %v306_v60 }
  0x12   : > { %v3249_v34 = vld [vmem:[%s3418_s17 + $0x8] sm:$0xff]   ;;  %v3251_v36 = vld [vmem:[%s3418_s17 + $0x18] sm:$0xff]   ;;  %v3252_v37 = vld [vmem:[%s3418_s17 + $0x20] sm:$0xff]  }
  0x13   : > { %v3253_v38 = vld [vmem:[%s3418_s17 + $0x28] sm:$0xff]   ;;  %v3254_v39 = vld [vmem:[%s3418_s17 + $0x30] sm:$0xff]   ;;  %v3255_v40 = vld [vmem:[%s3418_s17 + $0x38] sm:$0xff]  }
  0x14   : > { %780 = vmatpush1.bf16.msra.mxu0 %v3222_v15  ;;  %1293 = vmatpush1.bf16.msra.mxu1 %v3223_v16  ;;  %v3256_v41 = vld [vmem:[%s3418_s17 + $0x40] sm:$0xff]   ;;  %v3257_v42 = vld [vmem:[%s3418_s17 + $0x48] sm:$0xff]   ;;  %v3258_v43 = vld [vmem:[%s3418_s17 + $0x50] sm:$0xff]  }
  0x15   : > { %781 = vmatprep.subr.bf16.mxu0 %v3224_v17  ;;  %1294 = vmatprep.subr.bf16.mxu1 %v3226_v18  ;;  %v3259_v44 = vld [vmem:[%s3418_s17 + $0x58] sm:$0xff]   ;;  %v3260_v45 = vld [vmem:[%s3418_s17 + $0x60] sm:$0xff]   ;;  %v3261_v46 = vld [vmem:[%s3418_s17 + $0x68] sm:$0xff]  }
  0x16   : > { %v3262_v47 = vld [vmem:[%s3418_s17 + $0x70] sm:$0xff]   ;;  %v3263_v48 = vld [vmem:[%s3418_s17 + $0x78] sm:$0xff]   ;;  %v3264_v49 = vld [vmem:[%s3418_s17 + $0x80] sm:$0xff]  }
  0x17   : > { %v3265_v50 = vld [vmem:[%s3418_s17 + $0x88] sm:$0xff]   ;;  %v3266_v51 = vld [vmem:[%s3418_s17 + $0x90] sm:$0xff]   ;;  %v3267_v52 = vld [vmem:[%s3418_s17 + $0x98] sm:$0xff]  }
  0x18   : > { %782 = vmatpush1.bf16.msra.mxu0 %v3228_v19  ;;  %1295 = vmatpush1.bf16.msra.mxu1 %v3229_v20  ;;  %v3268_v53 = vld [vmem:[%s3418_s17 + $0xa0] sm:$0xff]   ;;  %v3269_v54 = vld [vmem:[%s3418_s17 + $0xa8] sm:$0xff]   ;;  %v3270_v55 = vld [vmem:[%s3418_s17 + $0xb0] sm:$0xff]  }
  0x19   : > { %783 = vmatprep.subr.bf16.mxu0 %v3230_v21  ;;  %1296 = vmatprep.subr.bf16.mxu1 %v3232_v22  ;;  %v3271_v56 = vld [vmem:[%s3418_s17 + $0xb8] sm:$0xff]   ;;  %v3272_v57 = vld [vmem:[%s3418_s17 + $0xc0] sm:$0xff]   ;;  %v3273_v58 = vld [vmem:[%s3418_s17 + $0xc8] sm:$0xff]  }
  0x1a   : > { %v3274_v61 = vld [vmem:[%s3418_s17 + $0xd0] sm:$0xff]   ;;  %v303_v0 = vld [vmem:[%s4038_s2] sm:$0xf]  ;;  %v3275_v14 = vld [vmem:[%s3418_s17 + $0xd8] sm:$0xff]  }
  0x1b   : > { %v3523_v4 = vrot.slane %v303_v0, %v307_v62  ;;  %v3525_v5 = vrot.slane %v303_v0, %v315_v63  ;;  %v3527_v6 = vrot.slane %v303_v0, %v311_v1  ;;  %v3529_v7 = vrot.slane %v303_v0, %v319_v3 }
  0x1c   : > { %784 = vmatpush1.bf16.msra.mxu0 %v3234_v23  ;;  %1297 = vmatpush1.bf16.msra.mxu1 %v3235_v24 }
  0x1d   : > { %785 = vmatprep.subr.bf16.mxu0 %v3236_v25  ;;  %1298 = vmatprep.subr.bf16.mxu1 %v3238_v26 }
  0x20   : > { %786 = vmatpush1.bf16.msra.mxu0 %v3240_v27  ;;  %1299 = vmatpush1.bf16.msra.mxu1 %v3241_v28 }
  0x21   : > { %787 = vmatprep.subr.bf16.mxu0 %v3242_v29  ;;  %1300 = vmatprep.subr.bf16.mxu1 %v3244_v30 }
  0x24   : > { %788 = vmatpush1.bf16.msra.mxu0 %v3246_v31  ;;  %1301 = vmatpush1.bf16.msra.mxu1 %v3247_v32 }
  0x27   : > { %806 = vmatmul.mubr.bf16.vlgmr.msra.gmra.mrb[0].mxu0 %v3248_v33  ;;  %1319 = vmatmul.mubr.bf16.vlgmr.msra.gmra.mrb[0].mxu1 %v3248_v33 }
  0x28   : > { %815 = vmatprep.mubr.bf16.mxu0 %v3304_v2  ;;  %1328 = vmatprep.mubr.bf16.mxu1 %v3304_v2 }
  0x2f   : > { %816 = vmatmul.mubr.bf16.gmra.mrb[4].mxu0 %v3249_v34  ;;  %1329 = vmatmul.mubr.bf16.gmra.mrb[4].mxu1 %v3249_v34 }
  0x30   : > { %825 = vmatprep.mubr.bf16.mxu0 %v3304_v2  ;;  %1338 = vmatprep.mubr.bf16.mxu1 %v3304_v2 }
  0x37   : > { %826 = vmatmul.mubr.bf16.gmra.mrb[8].mxu0 %v3250_v35  ;;  %1339 = vmatmul.mubr.bf16.gmra.mrb[8].mxu1 %v3250_v35 }
  0x38   : > { %835 = vmatprep.mubr.bf16.mxu0 %v3304_v2  ;;  %1348 = vmatprep.mubr.bf16.mxu1 %v3304_v2 }
  0x3f   : > { %836 = vmatmul.mubr.bf16.gmra.mrb[12].mxu0 %v3251_v36  ;;  %1349 = vmatmul.mubr.bf16.gmra.mrb[12].mxu1 %v3251_v36 }
  0x40   : > { %845 = vmatprep.mubr.bf16.mxu0 %v3304_v2  ;;  %1358 = vmatprep.mubr.bf16.mxu1 %v3304_v2 }
  0x47   : > { %846 = vmatmul.mubr.bf16.gmra.mrb[16].mxu0 %v3252_v37  ;;  %1359 = vmatmul.mubr.bf16.gmra.mrb[16].mxu1 %v3252_v37  ;;  %v3276_v37 = vld [vmem:[%s3418_s17 + $0xe0] sm:$0xff]  }
  0x48   : > { %855 = vmatprep.mubr.bf16.mxu0 %v3304_v2  ;;  %1368 = vmatprep.mubr.bf16.mxu1 %v3304_v2 }
  0x4f   : > { %856 = vmatmul.mubr.bf16.gmra.mrb[20].mxu0 %v3253_v38  ;;  %1369 = vmatmul.mubr.bf16.gmra.mrb[20].mxu1 %v3253_v38 }
  0x50   : > { %865 = vmatprep.mubr.bf16.mxu0 %v3304_v2  ;;  %1378 = vmatprep.mubr.bf16.mxu1 %v3304_v2 }
  0x57   : > { %866 = vmatmul.mubr.bf16.gmra.mrb[24].mxu0 %v3254_v39  ;;  %1379 = vmatmul.mubr.bf16.gmra.mrb[24].mxu1 %v3254_v39 }
  0x58   : > { %875 = vmatprep.mubr.bf16.mxu0 %v3304_v2  ;;  %1388 = vmatprep.mubr.bf16.mxu1 %v3304_v2 }
  0x5f   : > { %876 = vmatmul.mubr.bf16.gmra.mrb[28].mxu0 %v3255_v40  ;;  %1389 = vmatmul.mubr.bf16.gmra.mrb[28].mxu1 %v3255_v40 }
  0x60   : > { %885 = vmatprep.mubr.bf16.mxu0 %v3304_v2  ;;  %1398 = vmatprep.mubr.bf16.mxu1 %v3304_v2 }
  0x67   : > { %886 = vmatmul.mubr.bf16.gmra.mrb[32].mxu0 %v3256_v41  ;;  %1399 = vmatmul.mubr.bf16.gmra.mrb[32].mxu1 %v3256_v41 }
  0x68   : > { %895 = vmatprep.mubr.bf16.mxu0 %v3304_v2  ;;  %1408 = vmatprep.mubr.bf16.mxu1 %v3304_v2 }
  0x6f   : > { %896 = vmatmul.mubr.bf16.gmra.mrb[36].mxu0 %v3257_v42  ;;  %1409 = vmatmul.mubr.bf16.gmra.mrb[36].mxu1 %v3257_v42 }
  0x70   : > { %905 = vmatprep.mubr.bf16.mxu0 %v3304_v2  ;;  %1418 = vmatprep.mubr.bf16.mxu1 %v3304_v2 }
  0x77   : > { %906 = vmatmul.mubr.bf16.gmra.mrb[40].mxu0 %v3258_v43  ;;  %1419 = vmatmul.mubr.bf16.gmra.mrb[40].mxu1 %v3258_v43 }
  0x78   : > { %915 = vmatprep.mubr.bf16.mxu0 %v3304_v2  ;;  %1428 = vmatprep.mubr.bf16.mxu1 %v3304_v2 }
  0x7f   : > { %916 = vmatmul.mubr.bf16.gmra.mrb[44].mxu0 %v3259_v44  ;;  %1429 = vmatmul.mubr.bf16.gmra.mrb[44].mxu1 %v3259_v44 }
  0x80   : > { %925 = vmatprep.mubr.bf16.mxu0 %v3304_v2  ;;  %1438 = vmatprep.mubr.bf16.mxu1 %v3304_v2 }
  0x87   : > { %926 = vmatmul.mubr.bf16.gmra.mrb[48].mxu0 %v3260_v45  ;;  %1439 = vmatmul.mubr.bf16.gmra.mrb[48].mxu1 %v3260_v45 }
  0x88   : > { %935 = vmatprep.mubr.bf16.mxu0 %v3304_v2  ;;  %1448 = vmatprep.mubr.bf16.mxu1 %v3304_v2 }
  0x8f   : > { %936 = vmatmul.mubr.bf16.gmra.mrb[52].mxu0 %v3261_v46  ;;  %1449 = vmatmul.mubr.bf16.gmra.mrb[52].mxu1 %v3261_v46 }
  0x90   : > { %945 = vmatprep.mubr.bf16.mxu0 %v3304_v2  ;;  %1458 = vmatprep.mubr.bf16.mxu1 %v3304_v2 }
  0x97   : > { %946 = vmatmul.mubr.bf16.gmra.mrb[56].mxu0 %v3262_v47  ;;  %1459 = vmatmul.mubr.bf16.gmra.mrb[56].mxu1 %v3262_v47 }
  0x98   : > { %955 = vmatprep.mubr.bf16.mxu0 %v3304_v2  ;;  %1468 = vmatprep.mubr.bf16.mxu1 %v3304_v2 }
  0x9f   : > { %956 = vmatmul.mubr.bf16.gmra.mrb[60].mxu0 %v3263_v48  ;;  %1469 = vmatmul.mubr.bf16.gmra.mrb[60].mxu1 %v3263_v48 }
  0xa0   : > { %965 = vmatprep.mubr.bf16.mxu0 %v3304_v2  ;;  %1478 = vmatprep.mubr.bf16.mxu1 %v3304_v2 }
  0xa7   : > { %966 = vmatmul.mubr.bf16.gmra.mrb[64].mxu0 %v3264_v49  ;;  %1479 = vmatmul.mubr.bf16.gmra.mrb[64].mxu1 %v3264_v49 }
  0xa8   : > { %975 = vmatprep.mubr.bf16.mxu0 %v3304_v2  ;;  %1488 = vmatprep.mubr.bf16.mxu1 %v3304_v2 }
  0xaf   : > { %976 = vmatmul.mubr.bf16.gmra.mrb[68].mxu0 %v3265_v50  ;;  %1489 = vmatmul.mubr.bf16.gmra.mrb[68].mxu1 %v3265_v50 }
  0xb0   : > { %985 = vmatprep.mubr.bf16.mxu0 %v3304_v2  ;;  %1498 = vmatprep.mubr.bf16.mxu1 %v3304_v2 }
  0xb7   : > { %986 = vmatmul.mubr.bf16.gmra.mrb[72].mxu0 %v3266_v51  ;;  %1499 = vmatmul.mubr.bf16.gmra.mrb[72].mxu1 %v3266_v51 }
  0xb8   : > { %995 = vmatprep.mubr.bf16.mxu0 %v3304_v2  ;;  %1508 = vmatprep.mubr.bf16.mxu1 %v3304_v2 }
  0xbf   : > { %996 = vmatmul.mubr.bf16.gmra.mrb[76].mxu0 %v3267_v52  ;;  %1509 = vmatmul.mubr.bf16.gmra.mrb[76].mxu1 %v3267_v52 }
  0xc0   : > { %1005 = vmatprep.mubr.bf16.mxu0 %v3304_v2  ;;  %1518 = vmatprep.mubr.bf16.mxu1 %v3304_v2 }
  0xc7   : > { %1006 = vmatmul.mubr.bf16.gmra.mrb[80].mxu0 %v3268_v53  ;;  %1519 = vmatmul.mubr.bf16.gmra.mrb[80].mxu1 %v3268_v53 }
  0xc8   : > { %1015 = vmatprep.mubr.bf16.mxu0 %v3304_v2  ;;  %1528 = vmatprep.mubr.bf16.mxu1 %v3304_v2 }
  0xcf   : > { %1016 = vmatmul.mubr.bf16.gmra.mrb[84].mxu0 %v3269_v54  ;;  %1529 = vmatmul.mubr.bf16.gmra.mrb[84].mxu1 %v3269_v54 }
  0xd0   : > { %1025 = vmatprep.mubr.bf16.mxu0 %v3304_v2  ;;  %1538 = vmatprep.mubr.bf16.mxu1 %v3304_v2 }
  0xd7   : > { %1026 = vmatmul.mubr.bf16.gmra.mrb[88].mxu0 %v3270_v55  ;;  %1539 = vmatmul.mubr.bf16.gmra.mrb[88].mxu1 %v3270_v55 }
  0xd8   : > { %1035 = vmatprep.mubr.bf16.mxu0 %v3304_v2  ;;  %1548 = vmatprep.mubr.bf16.mxu1 %v3304_v2 }
  0xdf   : > { %1036 = vmatmul.mubr.bf16.gmra.mrb[92].mxu0 %v3271_v56  ;;  %1549 = vmatmul.mubr.bf16.gmra.mrb[92].mxu1 %v3271_v56 }
  0xe0   : > { %1045 = vmatprep.mubr.bf16.mxu0 %v3304_v2  ;;  %1558 = vmatprep.mubr.bf16.mxu1 %v3304_v2 }
  0xe7   : > { %1046 = vmatmul.mubr.bf16.gmra.mrb[96].mxu0 %v3272_v57  ;;  %1559 = vmatmul.mubr.bf16.gmra.mrb[96].mxu1 %v3272_v57 }
  0xe8   : > { %1055 = vmatprep.mubr.bf16.mxu0 %v3304_v2  ;;  %1568 = vmatprep.mubr.bf16.mxu1 %v3304_v2 }
  0xef   : > { %1056 = vmatmul.mubr.bf16.gmra.mrb[100].mxu0 %v3273_v58  ;;  %1569 = vmatmul.mubr.bf16.gmra.mrb[100].mxu1 %v3273_v58 }
  0xf0   : > { %1065 = vmatprep.mubr.bf16.mxu0 %v3304_v2  ;;  %1578 = vmatprep.mubr.bf16.mxu1 %v3304_v2 }
  0xf7   : > { %1066 = vmatmul.mubr.bf16.gmra.mrb[104].mxu0 %v3274_v61  ;;  %1579 = vmatmul.mubr.bf16.gmra.mrb[104].mxu1 %v3274_v61  ;;  %v3277_v61 = vld [vmem:[%s3418_s17 + $0xe8] sm:$0xff]  }
  0xf8   : > { %1075 = vmatprep.mubr.bf16.mxu0 %v3304_v2  ;;  %1588 = vmatprep.mubr.bf16.mxu1 %v3304_v2 }
  0xfa   : > { %v807_v8 = vpop.f32.mrb[0].mxu0  ;;  %v1320_v9 = vpop.f32.mrb[0].mxu1 }
  0xfb   : > { %v808_v10 = vadd.f32 %v807_v8, %v3523_v4  ;;  %v1321_v11 = vadd.f32 %v1320_v9, %v3525_v5  ;;  %v809_v12 = vpop.f32.mrb[1].mxu0  ;;  %v1322_v13 = vpop.f32.mrb[1].mxu1 }
  0xfc   : > { %v810_v15 = vadd.f32 %v809_v12, %v3527_v6  ;;  %v1323_v16 = vadd.f32 %v1322_v13, %v3529_v7  ;;  %v811_v17 = vpop.f32.mrb[2].mxu0  ;;  %v1324_v18 = vpop.f32.mrb[2].mxu1 }
  0xfd   : > { %v812_v19 = vadd.f32 %v811_v17, %v3523_v4  ;;  %v1325_v20 = vadd.f32 %v1324_v18, %v3525_v5  ;;  %v813_v21 = vpop.f32.mrb[3].mxu0  ;;  %v1326_v22 = vpop.f32.mrb[3].mxu1 }
  0xfe   : > { %v1799_v23 = vmax.f32 %v808_v10, %v810_v15  ;;  %v1895_v24 = vmax.f32 %v1321_v11, %v1323_v16  ;;  %v814_v25 = vadd.f32 %v813_v21, %v3527_v6  ;;  %v1327_v26 = vadd.f32 %v1326_v22, %v3529_v7 }
  0xff   : > { %1076 = vmatmul.mubr.bf16.gmra.mrb[108].mxu0 %v3275_v14  ;;  %1589 = vmatmul.mubr.bf16.gmra.mrb[108].mxu1 %v3275_v14 }
 0x100   : > { %v1991_v27 = vmax.f32 %v1799_v23, %v1895_v24  ;;  %v1800_v28 = vmax.f32 %v812_v19, %v814_v25  ;;  %v1896_v29 = vmax.f32 %v1325_v20, %v1327_v26  ;;  %1085 = vmatprep.mubr.bf16.mxu0 %v3304_v2  ;;  %1598 = vmatprep.mubr.bf16.mxu1 %v3304_v2  ;;  %v3278_v26 = vld [vmem:[%s3418_s17 + $0xf0] sm:$0xff]  }
 0x102   : > { %v1992_v30 = vmax.f32 %v1800_v28, %v1896_v29  ;;  %v817_v31 = vpop.f32.mrb[4].mxu0  ;;  %v1330_v32 = vpop.f32.mrb[4].mxu1 }
 0x103   : > { %v818_v33 = vadd.f32 %v817_v31, %v3523_v4  ;;  %v1331_v34 = vadd.f32 %v1330_v32, %v3525_v5  ;;  %v819_v35 = vpop.f32.mrb[5].mxu0  ;;  %v1332_v36 = vpop.f32.mrb[5].mxu1 }
 0x104   : > { %v2907_v38 = vpack.c.bf16 %v1992_v30, %v1991_v27  ;;  %v820_v39 = vadd.f32 %v819_v35, %v3527_v6  ;;  %v1333_v40 = vadd.f32 %v1332_v36, %v3529_v7  ;;  %v821_v41 = vpop.f32.mrb[6].mxu0  ;;  %v1334_v42 = vpop.f32.mrb[6].mxu1 }
 0x105   : > { %v822_v43 = vadd.f32 %v821_v41, %v3523_v4  ;;  %v1335_v44 = vadd.f32 %v1334_v42, %v3525_v5  ;;  %v823_v45 = vpop.f32.mrb[7].mxu0  ;;  %v1336_v46 = vpop.f32.mrb[7].mxu1 }
 0x106   : > { %2908 = vst [vmem:[%s3549_s11] sm:$0xff] %v2907_v38   ;;  %v1801_v47 = vmax.f32 %v818_v33, %v820_v39  ;;  %v1897_v48 = vmax.f32 %v1331_v34, %v1333_v40  ;;  %v824_v49 = vadd.f32 %v823_v45, %v3527_v6  ;;  %v1337_v50 = vadd.f32 %v1336_v46, %v3529_v7 }
 0x107   : > { %1086 = vmatmul.mubr.bf16.gmra.mrb[112].mxu0 %v3276_v37  ;;  %1599 = vmatmul.mubr.bf16.gmra.mrb[112].mxu1 %v3276_v37 }
 0x108   : > { %v1993_v51 = vmax.f32 %v1801_v47, %v1897_v48  ;;  %v1802_v52 = vmax.f32 %v822_v43, %v824_v49  ;;  %v1898_v53 = vmax.f32 %v1335_v44, %v1337_v50  ;;  %1095 = vmatprep.mubr.bf16.mxu0 %v3304_v2  ;;  %1608 = vmatprep.mubr.bf16.mxu1 %v3304_v2  ;;  %v3279_v50 = vld [vmem:[%s3418_s17 + $0xf8] sm:$0xff]  }
 0x10a   : > { %v1994_v54 = vmax.f32 %v1802_v52, %v1898_v53  ;;  %v827_v55 = vpop.f32.mrb[8].mxu0  ;;  %v1340_v56 = vpop.f32.mrb[8].mxu1 }
 0x10b   : > { %v828_v57 = vadd.f32 %v827_v55, %v3523_v4  ;;  %v1341_v58 = vadd.f32 %v1340_v56, %v3525_v5  ;;  %v829_v59 = vpop.f32.mrb[9].mxu0  ;;  %v1342_v60 = vpop.f32.mrb[9].mxu1 }
 0x10c   : > { %v2912_v62 = vpack.c.bf16 %v1994_v54, %v1993_v51  ;;  %v830_v63 = vadd.f32 %v829_v59, %v3527_v6  ;;  %v1343_v0 = vadd.f32 %v1342_v60, %v3529_v7  ;;  %v831_v1 = vpop.f32.mrb[10].mxu0  ;;  %v1344_v3 = vpop.f32.mrb[10].mxu1 }
 0x10d   : > { %v832_v8 = vadd.f32 %v831_v1, %v3523_v4  ;;  %v1345_v9 = vadd.f32 %v1344_v3, %v3525_v5  ;;  %v833_v10 = vpop.f32.mrb[11].mxu0  ;;  %v1346_v11 = vpop.f32.mrb[11].mxu1 }
 0x10e   : > { %3144 = vst [vmem:[%s3549_s11 + $0x8] sm:$0xff] %v2912_v62   ;;  %v1803_v12 = vmax.f32 %v828_v57, %v830_v63  ;;  %v1899_v13 = vmax.f32 %v1341_v58, %v1343_v0  ;;  %v834_v14 = vadd.f32 %v833_v10, %v3527_v6  ;;  %v1347_v15 = vadd.f32 %v1346_v11, %v3529_v7 }
 0x10f   : > { %1096 = vmatmul.mubr.bf16.gmra.mrb[116].mxu0 %v3277_v61  ;;  %1609 = vmatmul.mubr.bf16.gmra.mrb[116].mxu1 %v3277_v61 }
 0x110   : > { %v1995_v16 = vmax.f32 %v1803_v12, %v1899_v13  ;;  %v1804_v17 = vmax.f32 %v832_v8, %v834_v14  ;;  %v1900_v18 = vmax.f32 %v1345_v9, %v1347_v15  ;;  %1105 = vmatprep.mubr.bf16.mxu0 %v3304_v2  ;;  %1618 = vmatprep.mubr.bf16.mxu1 %v3304_v2  ;;  %v3280_v15 = vld [vmem:[%s3418_s17 + $0x100] sm:$0xff]  }
 0x112   : > { %v1996_v19 = vmax.f32 %v1804_v17, %v1900_v18  ;;  %v837_v20 = vpop.f32.mrb[12].mxu0  ;;  %v1350_v21 = vpop.f32.mrb[12].mxu1 }
 0x113   : > { %v838_v22 = vadd.f32 %v837_v20, %v3523_v4  ;;  %v1351_v23 = vadd.f32 %v1350_v21, %v3525_v5  ;;  %v839_v24 = vpop.f32.mrb[13].mxu0  ;;  %v1352_v25 = vpop.f32.mrb[13].mxu1 }
 0x114   : > { %v2917_v27 = vpack.c.bf16 %v1996_v19, %v1995_v16  ;;  %v840_v28 = vadd.f32 %v839_v24, %v3527_v6  ;;  %v1353_v29 = vadd.f32 %v1352_v25, %v3529_v7  ;;  %v841_v30 = vpop.f32.mrb[14].mxu0  ;;  %v1354_v31 = vpop.f32.mrb[14].mxu1 }
 0x115   : > { %v842_v32 = vadd.f32 %v841_v30, %v3523_v4  ;;  %v1355_v33 = vadd.f32 %v1354_v31, %v3525_v5  ;;  %v843_v34 = vpop.f32.mrb[15].mxu0  ;;  %v1356_v35 = vpop.f32.mrb[15].mxu1 }
 0x116   : > { %3145 = vst [vmem:[%s3549_s11 + $0x10] sm:$0xff] %v2917_v27   ;;  %v1805_v36 = vmax.f32 %v838_v22, %v840_v28  ;;  %v1901_v37 = vmax.f32 %v1351_v23, %v1353_v29  ;;  %v844_v38 = vadd.f32 %v843_v34, %v3527_v6  ;;  %v1357_v39 = vadd.f32 %v1356_v35, %v3529_v7 }
 0x117   : > { %1106 = vmatmul.mubr.bf16.gmra.mrb[120].mxu0 %v3278_v26  ;;  %1619 = vmatmul.mubr.bf16.gmra.mrb[120].mxu1 %v3278_v26 }
 0x118   : > { %v1997_v40 = vmax.f32 %v1805_v36, %v1901_v37  ;;  %v1806_v41 = vmax.f32 %v842_v32, %v844_v38  ;;  %v1902_v42 = vmax.f32 %v1355_v33, %v1357_v39  ;;  %1115 = vmatprep.mubr.bf16.mxu0 %v3304_v2  ;;  %1628 = vmatprep.mubr.bf16.mxu1 %v3304_v2  ;;  %v3281_v39 = vld [vmem:[%s3418_s17 + $0x108] sm:$0xff]  }
 0x11a   : > { %v1998_v43 = vmax.f32 %v1806_v41, %v1902_v42  ;;  %v847_v44 = vpop.f32.mrb[16].mxu0  ;;  %v1360_v45 = vpop.f32.mrb[16].mxu1 }
 0x11b   : > { %v848_v46 = vadd.f32 %v847_v44, %v3523_v4  ;;  %v1361_v47 = vadd.f32 %v1360_v45, %v3525_v5  ;;  %v849_v48 = vpop.f32.mrb[17].mxu0  ;;  %v1362_v49 = vpop.f32.mrb[17].mxu1 }
 0x11c   : > { %v2922_v51 = vpack.c.bf16 %v1998_v43, %v1997_v40  ;;  %v850_v52 = vadd.f32 %v849_v48, %v3527_v6  ;;  %v1363_v53 = vadd.f32 %v1362_v49, %v3529_v7  ;;  %v851_v54 = vpop.f32.mrb[18].mxu0  ;;  %v1364_v55 = vpop.f32.mrb[18].mxu1 }
 0x11d   : > { %v852_v56 = vadd.f32 %v851_v54, %v3523_v4  ;;  %v1365_v57 = vadd.f32 %v1364_v55, %v3525_v5  ;;  %v853_v58 = vpop.f32.mrb[19].mxu0  ;;  %v1366_v59 = vpop.f32.mrb[19].mxu1 }
 0x11e   : > { %3146 = vst [vmem:[%s3549_s11 + $0x18] sm:$0xff] %v2922_v51   ;;  %v1807_v60 = vmax.f32 %v848_v46, %v850_v52  ;;  %v1903_v61 = vmax.f32 %v1361_v47, %v1363_v53  ;;  %v854_v62 = vadd.f32 %v853_v58, %v3527_v6  ;;  %v1367_v63 = vadd.f32 %v1366_v59, %v3529_v7 }
 0x11f   : > { %1116 = vmatmul.mubr.bf16.gmra.mrb[124].mxu0 %v3279_v50  ;;  %1629 = vmatmul.mubr.bf16.gmra.mrb[124].mxu1 %v3279_v50 }
 0x120   : > { %v1999_v0 = vmax.f32 %v1807_v60, %v1903_v61  ;;  %v1808_v1 = vmax.f32 %v852_v56, %v854_v62  ;;  %v1904_v3 = vmax.f32 %v1365_v57, %v1367_v63  ;;  %1125 = vmatprep.mubr.bf16.mxu0 %v3304_v2  ;;  %1638 = vmatprep.mubr.bf16.mxu1 %v3304_v2  ;;  %v3282_v63 = vld [vmem:[%s3418_s17 + $0x110] sm:$0xff]  }
 0x122   : > { %v2000_v8 = vmax.f32 %v1808_v1, %v1904_v3  ;;  %v857_v9 = vpop.f32.mrb[20].mxu0  ;;  %v1370_v10 = vpop.f32.mrb[20].mxu1 }
 0x123   : > { %v858_v11 = vadd.f32 %v857_v9, %v3523_v4  ;;  %v1371_v12 = vadd.f32 %v1370_v10, %v3525_v5  ;;  %v859_v13 = vpop.f32.mrb[21].mxu0  ;;  %v1372_v14 = vpop.f32.mrb[21].mxu1 }
 0x124   : > { %v2927_v16 = vpack.c.bf16 %v2000_v8, %v1999_v0  ;;  %v860_v17 = vadd.f32 %v859_v13, %v3527_v6  ;;  %v1373_v18 = vadd.f32 %v1372_v14, %v3529_v7  ;;  %v861_v19 = vpop.f32.mrb[22].mxu0  ;;  %v1374_v20 = vpop.f32.mrb[22].mxu1 }
 0x125   : > { %v862_v21 = vadd.f32 %v861_v19, %v3523_v4  ;;  %v1375_v22 = vadd.f32 %v1374_v20, %v3525_v5  ;;  %v863_v23 = vpop.f32.mrb[23].mxu0  ;;  %v1376_v24 = vpop.f32.mrb[23].mxu1 }
 0x126   : > { %3147 = vst [vmem:[%s3549_s11 + $0x20] sm:$0xff] %v2927_v16   ;;  %v1809_v25 = vmax.f32 %v858_v11, %v860_v17  ;;  %v1905_v26 = vmax.f32 %v1371_v12, %v1373_v18  ;;  %v864_v27 = vadd.f32 %v863_v23, %v3527_v6  ;;  %v1377_v28 = vadd.f32 %v1376_v24, %v3529_v7 }
 0x127   : > { %1126 = vmatmul.mubr.bf16.gmra.mrb[128].mxu0 %v3280_v15  ;;  %1639 = vmatmul.mubr.bf16.gmra.mrb[128].mxu1 %v3280_v15 }
 0x128   : > { %v2001_v29 = vmax.f32 %v1809_v25, %v1905_v26  ;;  %v1810_v30 = vmax.f32 %v862_v21, %v864_v27  ;;  %v1906_v31 = vmax.f32 %v1375_v22, %v1377_v28  ;;  %1135 = vmatprep.mubr.bf16.mxu0 %v3304_v2  ;;  %1648 = vmatprep.mubr.bf16.mxu1 %v3304_v2  ;;  %v3283_v28 = vld [vmem:[%s3418_s17 + $0x118] sm:$0xff]  }
 0x12a   : > { %v2002_v32 = vmax.f32 %v1810_v30, %v1906_v31  ;;  %v867_v33 = vpop.f32.mrb[24].mxu0  ;;  %v1380_v34 = vpop.f32.mrb[24].mxu1 }
 0x12b   : > { %v868_v35 = vadd.f32 %v867_v33, %v3523_v4  ;;  %v1381_v36 = vadd.f32 %v1380_v34, %v3525_v5  ;;  %v869_v37 = vpop.f32.mrb[25].mxu0  ;;  %v1382_v38 = vpop.f32.mrb[25].mxu1 }
 0x12c   : > { %v2932_v40 = vpack.c.bf16 %v2002_v32, %v2001_v29  ;;  %v870_v41 = vadd.f32 %v869_v37, %v3527_v6  ;;  %v1383_v42 = vadd.f32 %v1382_v38, %v3529_v7  ;;  %v871_v43 = vpop.f32.mrb[26].mxu0  ;;  %v1384_v44 = vpop.f32.mrb[26].mxu1 }
 0x12d   : > { %v872_v45 = vadd.f32 %v871_v43, %v3523_v4  ;;  %v1385_v46 = vadd.f32 %v1384_v44, %v3525_v5  ;;  %v873_v47 = vpop.f32.mrb[27].mxu0  ;;  %v1386_v48 = vpop.f32.mrb[27].mxu1 }
 0x12e   : > { %3148 = vst [vmem:[%s3549_s11 + $0x28] sm:$0xff] %v2932_v40   ;;  %v1811_v49 = vmax.f32 %v868_v35, %v870_v41  ;;  %v1907_v50 = vmax.f32 %v1381_v36, %v1383_v42  ;;  %v874_v51 = vadd.f32 %v873_v47, %v3527_v6  ;;  %v1387_v52 = vadd.f32 %v1386_v48, %v3529_v7 }
 0x12f   : > { %1136 = vmatmul.mubr.bf16.gmra.mrb[132].mxu0 %v3281_v39  ;;  %1649 = vmatmul.mubr.bf16.gmra.mrb[132].mxu1 %v3281_v39 }
 0x130   : > { %v2003_v53 = vmax.f32 %v1811_v49, %v1907_v50  ;;  %v1812_v54 = vmax.f32 %v872_v45, %v874_v51  ;;  %v1908_v55 = vmax.f32 %v1385_v46, %v1387_v52  ;;  %1145 = vmatprep.mubr.bf16.mxu0 %v3304_v2  ;;  %1658 = vmatprep.mubr.bf16.mxu1 %v3304_v2  ;;  %v3284_v52 = vld [vmem:[%s3418_s17 + $0x120] sm:$0xff]  }
 0x132   : > { %v2004_v56 = vmax.f32 %v1812_v54, %v1908_v55  ;;  %v877_v57 = vpop.f32.mrb[28].mxu0  ;;  %v1390_v58 = vpop.f32.mrb[28].mxu1 }
 0x133   : > { %v878_v59 = vadd.f32 %v877_v57, %v3523_v4  ;;  %v1391_v60 = vadd.f32 %v1390_v58, %v3525_v5  ;;  %v879_v61 = vpop.f32.mrb[29].mxu0  ;;  %v1392_v62 = vpop.f32.mrb[29].mxu1 }
 0x134   : > { %v2937_v0 = vpack.c.bf16 %v2004_v56, %v2003_v53  ;;  %v880_v1 = vadd.f32 %v879_v61, %v3527_v6  ;;  %v1393_v3 = vadd.f32 %v1392_v62, %v3529_v7  ;;  %v881_v8 = vpop.f32.mrb[30].mxu0  ;;  %v1394_v9 = vpop.f32.mrb[30].mxu1 }
 0x135   : > { %v882_v10 = vadd.f32 %v881_v8, %v3523_v4  ;;  %v1395_v11 = vadd.f32 %v1394_v9, %v3525_v5  ;;  %v883_v12 = vpop.f32.mrb[31].mxu0  ;;  %v1396_v13 = vpop.f32.mrb[31].mxu1 }
 0x136   : > { %3149 = vst [vmem:[%s3549_s11 + $0x30] sm:$0xff] %v2937_v0   ;;  %v1813_v14 = vmax.f32 %v878_v59, %v880_v1  ;;  %v1909_v15 = vmax.f32 %v1391_v60, %v1393_v3  ;;  %v884_v16 = vadd.f32 %v883_v12, %v3527_v6  ;;  %v1397_v17 = vadd.f32 %v1396_v13, %v3529_v7 }
 0x137   : > { %1146 = vmatmul.mubr.bf16.gmra.mrb[136].mxu0 %v3282_v63  ;;  %1659 = vmatmul.mubr.bf16.gmra.mrb[136].mxu1 %v3282_v63 }
 0x138   : > { %v2005_v18 = vmax.f32 %v1813_v14, %v1909_v15  ;;  %v1814_v19 = vmax.f32 %v882_v10, %v884_v16  ;;  %v1910_v20 = vmax.f32 %v1395_v11, %v1397_v17  ;;  %1155 = vmatprep.mubr.bf16.mxu0 %v3304_v2  ;;  %1668 = vmatprep.mubr.bf16.mxu1 %v3304_v2  ;;  %v3285_v17 = vld [vmem:[%s3418_s17 + $0x128] sm:$0xff]  }
 0x13a   : > { %v2006_v21 = vmax.f32 %v1814_v19, %v1910_v20  ;;  %v887_v22 = vpop.f32.mrb[32].mxu0  ;;  %v1400_v23 = vpop.f32.mrb[32].mxu1 }
 0x13b   : > { %v888_v24 = vadd.f32 %v887_v22, %v3523_v4  ;;  %v1401_v25 = vadd.f32 %v1400_v23, %v3525_v5  ;;  %v889_v26 = vpop.f32.mrb[33].mxu0  ;;  %v1402_v27 = vpop.f32.mrb[33].mxu1 }
 0x13c   : > { %v2942_v29 = vpack.c.bf16 %v2006_v21, %v2005_v18  ;;  %v890_v30 = vadd.f32 %v889_v26, %v3527_v6  ;;  %v1403_v31 = vadd.f32 %v1402_v27, %v3529_v7  ;;  %v891_v32 = vpop.f32.mrb[34].mxu0  ;;  %v1404_v33 = vpop.f32.mrb[34].mxu1 }
 0x13d   : > { %v892_v34 = vadd.f32 %v891_v32, %v3523_v4  ;;  %v1405_v35 = vadd.f32 %v1404_v33, %v3525_v5  ;;  %v893_v36 = vpop.f32.mrb[35].mxu0  ;;  %v1406_v37 = vpop.f32.mrb[35].mxu1 }
 0x13e   : > { %3150 = vst [vmem:[%s3549_s11 + $0x38] sm:$0xff] %v2942_v29   ;;  %v1815_v38 = vmax.f32 %v888_v24, %v890_v30  ;;  %v1911_v39 = vmax.f32 %v1401_v25, %v1403_v31  ;;  %v894_v40 = vadd.f32 %v893_v36, %v3527_v6  ;;  %v1407_v41 = vadd.f32 %v1406_v37, %v3529_v7 }
 0x13f   : > { %1156 = vmatmul.mubr.bf16.gmra.mrb[140].mxu0 %v3283_v28  ;;  %1669 = vmatmul.mubr.bf16.gmra.mrb[140].mxu1 %v3283_v28 }
 0x140   : > { %v2007_v42 = vmax.f32 %v1815_v38, %v1911_v39  ;;  %v1816_v43 = vmax.f32 %v892_v34, %v894_v40  ;;  %v1912_v44 = vmax.f32 %v1405_v35, %v1407_v41  ;;  %1165 = vmatprep.mubr.bf16.mxu0 %v3304_v2  ;;  %1678 = vmatprep.mubr.bf16.mxu1 %v3304_v2  ;;  %v3286_v41 = vld [vmem:[%s3418_s17 + $0x130] sm:$0xff]  }
 0x142   : > { %v2008_v45 = vmax.f32 %v1816_v43, %v1912_v44  ;;  %v897_v46 = vpop.f32.mrb[36].mxu0  ;;  %v1410_v47 = vpop.f32.mrb[36].mxu1 }
 0x143   : > { %v898_v48 = vadd.f32 %v897_v46, %v3523_v4  ;;  %v1411_v49 = vadd.f32 %v1410_v47, %v3525_v5  ;;  %v899_v50 = vpop.f32.mrb[37].mxu0  ;;  %v1412_v51 = vpop.f32.mrb[37].mxu1 }
 0x144   : > { %v2947_v53 = vpack.c.bf16 %v2008_v45, %v2007_v42  ;;  %v900_v54 = vadd.f32 %v899_v50, %v3527_v6  ;;  %v1413_v55 = vadd.f32 %v1412_v51, %v3529_v7  ;;  %v901_v56 = vpop.f32.mrb[38].mxu0  ;;  %v1414_v57 = vpop.f32.mrb[38].mxu1 }
 0x145   : > { %v902_v58 = vadd.f32 %v901_v56, %v3523_v4  ;;  %v1415_v59 = vadd.f32 %v1414_v57, %v3525_v5  ;;  %v903_v60 = vpop.f32.mrb[39].mxu0  ;;  %v1416_v61 = vpop.f32.mrb[39].mxu1 }
 0x146   : > { %3151 = vst [vmem:[%s3549_s11 + $0x40] sm:$0xff] %v2947_v53   ;;  %v1817_v62 = vmax.f32 %v898_v48, %v900_v54  ;;  %v1913_v63 = vmax.f32 %v1411_v49, %v1413_v55  ;;  %v904_v0 = vadd.f32 %v903_v60, %v3527_v6  ;;  %v1417_v1 = vadd.f32 %v1416_v61, %v3529_v7 }
 0x147   : > { %1166 = vmatmul.mubr.bf16.gmra.mrb[144].mxu0 %v3284_v52  ;;  %1679 = vmatmul.mubr.bf16.gmra.mrb[144].mxu1 %v3284_v52 }
 0x148   : > { %v2009_v3 = vmax.f32 %v1817_v62, %v1913_v63  ;;  %v1818_v8 = vmax.f32 %v902_v58, %v904_v0  ;;  %v1914_v9 = vmax.f32 %v1415_v59, %v1417_v1  ;;  %1175 = vmatprep.mubr.bf16.mxu0 %v3304_v2  ;;  %1688 = vmatprep.mubr.bf16.mxu1 %v3304_v2  ;;  %v3287_v1 = vld [vmem:[%s3418_s17 + $0x138] sm:$0xff]  }
 0x14a   : > { %v2010_v10 = vmax.f32 %v1818_v8, %v1914_v9  ;;  %v907_v11 = vpop.f32.mrb[40].mxu0  ;;  %v1420_v12 = vpop.f32.mrb[40].mxu1 }
 0x14b   : > { %v908_v13 = vadd.f32 %v907_v11, %v3523_v4  ;;  %v1421_v14 = vadd.f32 %v1420_v12, %v3525_v5  ;;  %v909_v15 = vpop.f32.mrb[41].mxu0  ;;  %v1422_v16 = vpop.f32.mrb[41].mxu1 }
 0x14c   : > { %v2952_v18 = vpack.c.bf16 %v2010_v10, %v2009_v3  ;;  %v910_v19 = vadd.f32 %v909_v15, %v3527_v6  ;;  %v1423_v20 = vadd.f32 %v1422_v16, %v3529_v7  ;;  %v911_v21 = vpop.f32.mrb[42].mxu0  ;;  %v1424_v22 = vpop.f32.mrb[42].mxu1 }
 0x14d   : > { %v912_v23 = vadd.f32 %v911_v21, %v3523_v4  ;;  %v1425_v24 = vadd.f32 %v1424_v22, %v3525_v5  ;;  %v913_v25 = vpop.f32.mrb[43].mxu0  ;;  %v1426_v26 = vpop.f32.mrb[43].mxu1 }
 0x14e   : > { %3152 = vst [vmem:[%s3549_s11 + $0x48] sm:$0xff] %v2952_v18   ;;  %v1819_v27 = vmax.f32 %v908_v13, %v910_v19  ;;  %v1915_v28 = vmax.f32 %v1421_v14, %v1423_v20  ;;  %v914_v29 = vadd.f32 %v913_v25, %v3527_v6  ;;  %v1427_v30 = vadd.f32 %v1426_v26, %v3529_v7 }
 0x14f   : > { %1176 = vmatmul.mubr.bf16.gmra.mrb[148].mxu0 %v3285_v17  ;;  %1689 = vmatmul.mubr.bf16.gmra.mrb[148].mxu1 %v3285_v17 }
 0x150   : > { %v2011_v31 = vmax.f32 %v1819_v27, %v1915_v28  ;;  %v1820_v32 = vmax.f32 %v912_v23, %v914_v29  ;;  %v1916_v33 = vmax.f32 %v1425_v24, %v1427_v30  ;;  %1185 = vmatprep.mubr.bf16.mxu0 %v3304_v2  ;;  %1698 = vmatprep.mubr.bf16.mxu1 %v3304_v2  ;;  %v3288_v30 = vld [vmem:[%s3418_s17 + $0x140] sm:$0xff]  }
 0x152   : > { %v2012_v34 = vmax.f32 %v1820_v32, %v1916_v33  ;;  %v917_v35 = vpop.f32.mrb[44].mxu0  ;;  %v1430_v36 = vpop.f32.mrb[44].mxu1 }
 0x153   : > { %v918_v37 = vadd.f32 %v917_v35, %v3523_v4  ;;  %v1431_v38 = vadd.f32 %v1430_v36, %v3525_v5  ;;  %v919_v39 = vpop.f32.mrb[45].mxu0  ;;  %v1432_v40 = vpop.f32.mrb[45].mxu1 }
 0x154   : > { %v2957_v42 = vpack.c.bf16 %v2012_v34, %v2011_v31  ;;  %v920_v43 = vadd.f32 %v919_v39, %v3527_v6  ;;  %v1433_v44 = vadd.f32 %v1432_v40, %v3529_v7  ;;  %v921_v45 = vpop.f32.mrb[46].mxu0  ;;  %v1434_v46 = vpop.f32.mrb[46].mxu1 }
 0x155   : > { %v922_v47 = vadd.f32 %v921_v45, %v3523_v4  ;;  %v1435_v48 = vadd.f32 %v1434_v46, %v3525_v5  ;;  %v923_v49 = vpop.f32.mrb[47].mxu0  ;;  %v1436_v50 = vpop.f32.mrb[47].mxu1 }
 0x156   : > { %3153 = vst [vmem:[%s3549_s11 + $0x50] sm:$0xff] %v2957_v42   ;;  %v1821_v51 = vmax.f32 %v918_v37, %v920_v43  ;;  %v1917_v52 = vmax.f32 %v1431_v38, %v1433_v44  ;;  %v924_v53 = vadd.f32 %v923_v49, %v3527_v6  ;;  %v1437_v54 = vadd.f32 %v1436_v50, %v3529_v7 }
 0x157   : > { %1186 = vmatmul.mubr.bf16.gmra.mrb[152].mxu0 %v3286_v41  ;;  %1699 = vmatmul.mubr.bf16.gmra.mrb[152].mxu1 %v3286_v41 }
 0x158   : > { %v2013_v55 = vmax.f32 %v1821_v51, %v1917_v52  ;;  %v1822_v56 = vmax.f32 %v922_v47, %v924_v53  ;;  %v1918_v57 = vmax.f32 %v1435_v48, %v1437_v54  ;;  %1195 = vmatprep.mubr.bf16.mxu0 %v3304_v2  ;;  %1708 = vmatprep.mubr.bf16.mxu1 %v3304_v2  ;;  %v3289_v54 = vld [vmem:[%s3418_s17 + $0x148] sm:$0xff]  }
 0x15a   : > { %v2014_v58 = vmax.f32 %v1822_v56, %v1918_v57  ;;  %v927_v59 = vpop.f32.mrb[48].mxu0  ;;  %v1440_v60 = vpop.f32.mrb[48].mxu1 }
 0x15b   : > { %v928_v61 = vadd.f32 %v927_v59, %v3523_v4  ;;  %v1441_v62 = vadd.f32 %v1440_v60, %v3525_v5  ;;  %v929_v63 = vpop.f32.mrb[49].mxu0  ;;  %v1442_v0 = vpop.f32.mrb[49].mxu1 }
 0x15c   : > { %v2962_v3 = vpack.c.bf16 %v2014_v58, %v2013_v55  ;;  %v930_v8 = vadd.f32 %v929_v63, %v3527_v6  ;;  %v1443_v9 = vadd.f32 %v1442_v0, %v3529_v7  ;;  %v931_v10 = vpop.f32.mrb[50].mxu0  ;;  %v1444_v11 = vpop.f32.mrb[50].mxu1 }
 0x15d   : > { %v932_v12 = vadd.f32 %v931_v10, %v3523_v4  ;;  %v1445_v13 = vadd.f32 %v1444_v11, %v3525_v5  ;;  %v933_v14 = vpop.f32.mrb[51].mxu0  ;;  %v1446_v15 = vpop.f32.mrb[51].mxu1 }
 0x15e   : > { %3154 = vst [vmem:[%s3549_s11 + $0x58] sm:$0xff] %v2962_v3   ;;  %v1823_v16 = vmax.f32 %v928_v61, %v930_v8  ;;  %v1919_v17 = vmax.f32 %v1441_v62, %v1443_v9  ;;  %v934_v18 = vadd.f32 %v933_v14, %v3527_v6  ;;  %v1447_v19 = vadd.f32 %v1446_v15, %v3529_v7 }
 0x15f   : > { %1196 = vmatmul.mubr.bf16.gmra.mrb[156].mxu0 %v3287_v1  ;;  %1709 = vmatmul.mubr.bf16.gmra.mrb[156].mxu1 %v3287_v1 }
 0x160   : > { %v2015_v20 = vmax.f32 %v1823_v16, %v1919_v17  ;;  %v1824_v21 = vmax.f32 %v932_v12, %v934_v18  ;;  %v1920_v22 = vmax.f32 %v1445_v13, %v1447_v19  ;;  %1205 = vmatprep.mubr.bf16.mxu0 %v3304_v2  ;;  %1718 = vmatprep.mubr.bf16.mxu1 %v3304_v2  ;;  %v3290_v19 = vld [vmem:[%s3418_s17 + $0x150] sm:$0xff]  }
 0x162   : > { %v2016_v23 = vmax.f32 %v1824_v21, %v1920_v22  ;;  %v937_v24 = vpop.f32.mrb[52].mxu0  ;;  %v1450_v25 = vpop.f32.mrb[52].mxu1 }
 0x163   : > { %v938_v26 = vadd.f32 %v937_v24, %v3523_v4  ;;  %v1451_v27 = vadd.f32 %v1450_v25, %v3525_v5  ;;  %v939_v28 = vpop.f32.mrb[53].mxu0  ;;  %v1452_v29 = vpop.f32.mrb[53].mxu1 }
 0x164   : > { %v2967_v31 = vpack.c.bf16 %v2016_v23, %v2015_v20  ;;  %v940_v32 = vadd.f32 %v939_v28, %v3527_v6  ;;  %v1453_v33 = vadd.f32 %v1452_v29, %v3529_v7  ;;  %v941_v34 = vpop.f32.mrb[54].mxu0  ;;  %v1454_v35 = vpop.f32.mrb[54].mxu1 }
 0x165   : > { %v942_v36 = vadd.f32 %v941_v34, %v3523_v4  ;;  %v1455_v37 = vadd.f32 %v1454_v35, %v3525_v5  ;;  %v943_v38 = vpop.f32.mrb[55].mxu0  ;;  %v1456_v39 = vpop.f32.mrb[55].mxu1 }
 0x166   : > { %3155 = vst [vmem:[%s3549_s11 + $0x60] sm:$0xff] %v2967_v31   ;;  %v1825_v40 = vmax.f32 %v938_v26, %v940_v32  ;;  %v1921_v41 = vmax.f32 %v1451_v27, %v1453_v33  ;;  %v944_v42 = vadd.f32 %v943_v38, %v3527_v6  ;;  %v1457_v43 = vadd.f32 %v1456_v39, %v3529_v7 }
 0x167   : > { %1206 = vmatmul.mubr.bf16.gmra.mrb[160].mxu0 %v3288_v30  ;;  %1719 = vmatmul.mubr.bf16.gmra.mrb[160].mxu1 %v3288_v30 }
 0x168   : > { %v2017_v44 = vmax.f32 %v1825_v40, %v1921_v41  ;;  %v1826_v45 = vmax.f32 %v942_v36, %v944_v42  ;;  %v1922_v46 = vmax.f32 %v1455_v37, %v1457_v43  ;;  %1215 = vmatprep.mubr.bf16.mxu0 %v3304_v2  ;;  %1728 = vmatprep.mubr.bf16.mxu1 %v3304_v2  ;;  %v3291_v43 = vld [vmem:[%s3418_s17 + $0x158] sm:$0xff]  }
 0x16a   : > { %v2018_v47 = vmax.f32 %v1826_v45, %v1922_v46  ;;  %v947_v48 = vpop.f32.mrb[56].mxu0  ;;  %v1460_v49 = vpop.f32.mrb[56].mxu1 }
 0x16b   : > { %v948_v50 = vadd.f32 %v947_v48, %v3523_v4  ;;  %v1461_v51 = vadd.f32 %v1460_v49, %v3525_v5  ;;  %v949_v52 = vpop.f32.mrb[57].mxu0  ;;  %v1462_v53 = vpop.f32.mrb[57].mxu1 }
 0x16c   : > { %v2972_v55 = vpack.c.bf16 %v2018_v47, %v2017_v44  ;;  %v950_v56 = vadd.f32 %v949_v52, %v3527_v6  ;;  %v1463_v57 = vadd.f32 %v1462_v53, %v3529_v7  ;;  %v951_v58 = vpop.f32.mrb[58].mxu0  ;;  %v1464_v59 = vpop.f32.mrb[58].mxu1 }
 0x16d   : > { %v952_v60 = vadd.f32 %v951_v58, %v3523_v4  ;;  %v1465_v61 = vadd.f32 %v1464_v59, %v3525_v5  ;;  %v953_v62 = vpop.f32.mrb[59].mxu0  ;;  %v1466_v63 = vpop.f32.mrb[59].mxu1 }
 0x16e   : > { %3156 = vst [vmem:[%s3549_s11 + $0x68] sm:$0xff] %v2972_v55   ;;  %v1827_v0 = vmax.f32 %v948_v50, %v950_v56  ;;  %v1923_v1 = vmax.f32 %v1461_v51, %v1463_v57  ;;  %v954_v3 = vadd.f32 %v953_v62, %v3527_v6  ;;  %v1467_v8 = vadd.f32 %v1466_v63, %v3529_v7 }
 0x16f   : > { %1216 = vmatmul.mubr.bf16.gmra.mrb[164].mxu0 %v3289_v54  ;;  %1729 = vmatmul.mubr.bf16.gmra.mrb[164].mxu1 %v3289_v54 }
 0x170   : > { %v2019_v9 = vmax.f32 %v1827_v0, %v1923_v1  ;;  %v1828_v10 = vmax.f32 %v952_v60, %v954_v3  ;;  %v1924_v11 = vmax.f32 %v1465_v61, %v1467_v8  ;;  %1225 = vmatprep.mubr.bf16.mxu0 %v3304_v2  ;;  %1738 = vmatprep.mubr.bf16.mxu1 %v3304_v2  ;;  %v3292_v8 = vld [vmem:[%s3418_s17 + $0x160] sm:$0xff]  }
 0x172   : > { %v2020_v12 = vmax.f32 %v1828_v10, %v1924_v11  ;;  %v957_v13 = vpop.f32.mrb[60].mxu0  ;;  %v1470_v14 = vpop.f32.mrb[60].mxu1 }
 0x173   : > { %v958_v15 = vadd.f32 %v957_v13, %v3523_v4  ;;  %v1471_v16 = vadd.f32 %v1470_v14, %v3525_v5  ;;  %v959_v17 = vpop.f32.mrb[61].mxu0  ;;  %v1472_v18 = vpop.f32.mrb[61].mxu1 }
 0x174   : > { %v2977_v20 = vpack.c.bf16 %v2020_v12, %v2019_v9  ;;  %v960_v21 = vadd.f32 %v959_v17, %v3527_v6  ;;  %v1473_v22 = vadd.f32 %v1472_v18, %v3529_v7  ;;  %v961_v23 = vpop.f32.mrb[62].mxu0  ;;  %v1474_v24 = vpop.f32.mrb[62].mxu1 }
 0x175   : > { %v962_v25 = vadd.f32 %v961_v23, %v3523_v4  ;;  %v1475_v26 = vadd.f32 %v1474_v24, %v3525_v5  ;;  %v963_v27 = vpop.f32.mrb[63].mxu0  ;;  %v1476_v28 = vpop.f32.mrb[63].mxu1 }
 0x176   : > { %3157 = vst [vmem:[%s3549_s11 + $0x70] sm:$0xff] %v2977_v20   ;;  %v1829_v29 = vmax.f32 %v958_v15, %v960_v21  ;;  %v1925_v30 = vmax.f32 %v1471_v16, %v1473_v22  ;;  %v964_v31 = vadd.f32 %v963_v27, %v3527_v6  ;;  %v1477_v32 = vadd.f32 %v1476_v28, %v3529_v7 }
 0x177   : > { %1226 = vmatmul.mubr.bf16.gmra.mrb[168].mxu0 %v3290_v19  ;;  %1739 = vmatmul.mubr.bf16.gmra.mrb[168].mxu1 %v3290_v19 }
 0x178   : > { %v2021_v33 = vmax.f32 %v1829_v29, %v1925_v30  ;;  %v1830_v34 = vmax.f32 %v962_v25, %v964_v31  ;;  %v1926_v35 = vmax.f32 %v1475_v26, %v1477_v32  ;;  %1235 = vmatprep.mubr.bf16.mxu0 %v3304_v2  ;;  %1748 = vmatprep.mubr.bf16.mxu1 %v3304_v2  ;;  %v3293_v32 = vld [vmem:[%s3418_s17 + $0x168] sm:$0xff]  }
 0x17a   : > { %v2022_v36 = vmax.f32 %v1830_v34, %v1926_v35  ;;  %v967_v37 = vpop.f32.mrb[64].mxu0  ;;  %v1480_v38 = vpop.f32.mrb[64].mxu1 }
 0x17b   : > { %v968_v39 = vadd.f32 %v967_v37, %v3523_v4  ;;  %v1481_v40 = vadd.f32 %v1480_v38, %v3525_v5  ;;  %v969_v41 = vpop.f32.mrb[65].mxu0  ;;  %v1482_v42 = vpop.f32.mrb[65].mxu1 }
 0x17c   : > { %v2982_v44 = vpack.c.bf16 %v2022_v36, %v2021_v33  ;;  %v970_v45 = vadd.f32 %v969_v41, %v3527_v6  ;;  %v1483_v46 = vadd.f32 %v1482_v42, %v3529_v7  ;;  %v971_v47 = vpop.f32.mrb[66].mxu0  ;;  %v1484_v48 = vpop.f32.mrb[66].mxu1 }
 0x17d   : > { %v972_v49 = vadd.f32 %v971_v47, %v3523_v4  ;;  %v1485_v50 = vadd.f32 %v1484_v48, %v3525_v5  ;;  %v973_v51 = vpop.f32.mrb[67].mxu0  ;;  %v1486_v52 = vpop.f32.mrb[67].mxu1 }
 0x17e   : > { %3158 = vst [vmem:[%s3549_s11 + $0x78] sm:$0xff] %v2982_v44   ;;  %v1831_v53 = vmax.f32 %v968_v39, %v970_v45  ;;  %v1927_v54 = vmax.f32 %v1481_v40, %v1483_v46  ;;  %v974_v55 = vadd.f32 %v973_v51, %v3527_v6  ;;  %v1487_v56 = vadd.f32 %v1486_v52, %v3529_v7 }
 0x17f   : > { %1236 = vmatmul.mubr.bf16.gmra.mrb[172].mxu0 %v3291_v43  ;;  %1749 = vmatmul.mubr.bf16.gmra.mrb[172].mxu1 %v3291_v43 }
 0x180   : > { %v2023_v57 = vmax.f32 %v1831_v53, %v1927_v54  ;;  %v1832_v58 = vmax.f32 %v972_v49, %v974_v55  ;;  %v1928_v59 = vmax.f32 %v1485_v50, %v1487_v56  ;;  %1245 = vmatprep.mubr.bf16.mxu0 %v3304_v2  ;;  %1758 = vmatprep.mubr.bf16.mxu1 %v3304_v2  ;;  %v3294_v56 = vld [vmem:[%s3418_s17 + $0x170] sm:$0xff]  }
 0x182   : > { %v2024_v60 = vmax.f32 %v1832_v58, %v1928_v59  ;;  %v977_v61 = vpop.f32.mrb[68].mxu0  ;;  %v1490_v62 = vpop.f32.mrb[68].mxu1 }
 0x183   : > { %v978_v63 = vadd.f32 %v977_v61, %v3523_v4  ;;  %v1491_v0 = vadd.f32 %v1490_v62, %v3525_v5  ;;  %v979_v1 = vpop.f32.mrb[69].mxu0  ;;  %v1492_v3 = vpop.f32.mrb[69].mxu1 }
 0x184   : > { %v2987_v9 = vpack.c.bf16 %v2024_v60, %v2023_v57  ;;  %v980_v10 = vadd.f32 %v979_v1, %v3527_v6  ;;  %v1493_v11 = vadd.f32 %v1492_v3, %v3529_v7  ;;  %v981_v12 = vpop.f32.mrb[70].mxu0  ;;  %v1494_v13 = vpop.f32.mrb[70].mxu1 }
 0x185   : > { %v982_v14 = vadd.f32 %v981_v12, %v3523_v4  ;;  %v1495_v15 = vadd.f32 %v1494_v13, %v3525_v5  ;;  %v983_v16 = vpop.f32.mrb[71].mxu0  ;;  %v1496_v17 = vpop.f32.mrb[71].mxu1 }
 0x186   : > { %3159 = vst [vmem:[%s3549_s11 + $0x80] sm:$0xff] %v2987_v9   ;;  %v1833_v18 = vmax.f32 %v978_v63, %v980_v10  ;;  %v1929_v19 = vmax.f32 %v1491_v0, %v1493_v11  ;;  %v984_v20 = vadd.f32 %v983_v16, %v3527_v6  ;;  %v1497_v21 = vadd.f32 %v1496_v17, %v3529_v7 }
 0x187   : > { %1246 = vmatmul.mubr.bf16.gmra.mrb[176].mxu0 %v3292_v8  ;;  %1759 = vmatmul.mubr.bf16.gmra.mrb[176].mxu1 %v3292_v8 }
 0x188   : > { %v2025_v22 = vmax.f32 %v1833_v18, %v1929_v19  ;;  %v1834_v23 = vmax.f32 %v982_v14, %v984_v20  ;;  %v1930_v24 = vmax.f32 %v1495_v15, %v1497_v21  ;;  %1255 = vmatprep.mubr.bf16.mxu0 %v3304_v2  ;;  %1768 = vmatprep.mubr.bf16.mxu1 %v3304_v2  ;;  %v3295_v21 = vld [vmem:[%s3418_s17 + $0x178] sm:$0xff]  }
 0x18a   : > { %v2026_v25 = vmax.f32 %v1834_v23, %v1930_v24  ;;  %v987_v26 = vpop.f32.mrb[72].mxu0  ;;  %v1500_v27 = vpop.f32.mrb[72].mxu1 }
 0x18b   : > { %v988_v28 = vadd.f32 %v987_v26, %v3523_v4  ;;  %v1501_v29 = vadd.f32 %v1500_v27, %v3525_v5  ;;  %v989_v30 = vpop.f32.mrb[73].mxu0  ;;  %v1502_v31 = vpop.f32.mrb[73].mxu1 }
 0x18c   : > { %v2992_v33 = vpack.c.bf16 %v2026_v25, %v2025_v22  ;;  %v990_v34 = vadd.f32 %v989_v30, %v3527_v6  ;;  %v1503_v35 = vadd.f32 %v1502_v31, %v3529_v7  ;;  %v991_v36 = vpop.f32.mrb[74].mxu0  ;;  %v1504_v37 = vpop.f32.mrb[74].mxu1 }
 0x18d   : > { %v992_v38 = vadd.f32 %v991_v36, %v3523_v4  ;;  %v1505_v39 = vadd.f32 %v1504_v37, %v3525_v5  ;;  %v993_v40 = vpop.f32.mrb[75].mxu0  ;;  %v1506_v41 = vpop.f32.mrb[75].mxu1 }
 0x18e   : > { %3160 = vst [vmem:[%s3549_s11 + $0x88] sm:$0xff] %v2992_v33   ;;  %v1835_v42 = vmax.f32 %v988_v28, %v990_v34  ;;  %v1931_v43 = vmax.f32 %v1501_v29, %v1503_v35  ;;  %v994_v44 = vadd.f32 %v993_v40, %v3527_v6  ;;  %v1507_v45 = vadd.f32 %v1506_v41, %v3529_v7 }
 0x18f   : > { %1256 = vmatmul.mubr.bf16.gmra.mrb[180].mxu0 %v3293_v32  ;;  %1769 = vmatmul.mubr.bf16.gmra.mrb[180].mxu1 %v3293_v32 }
 0x190   : > { %v2027_v46 = vmax.f32 %v1835_v42, %v1931_v43  ;;  %v1836_v47 = vmax.f32 %v992_v38, %v994_v44  ;;  %v1932_v48 = vmax.f32 %v1505_v39, %v1507_v45  ;;  %1265 = vmatprep.mubr.bf16.mxu0 %v3304_v2  ;;  %1778 = vmatprep.mubr.bf16.mxu1 %v3304_v2 }
 0x192   : > { %v2028_v49 = vmax.f32 %v1836_v47, %v1932_v48  ;;  %v997_v50 = vpop.f32.mrb[76].mxu0  ;;  %v1510_v51 = vpop.f32.mrb[76].mxu1 }
 0x193   : > { %v998_v52 = vadd.f32 %v997_v50, %v3523_v4  ;;  %v1511_v53 = vadd.f32 %v1510_v51, %v3525_v5  ;;  %v999_v54 = vpop.f32.mrb[77].mxu0  ;;  %v1512_v55 = vpop.f32.mrb[77].mxu1 }
 0x194   : > { %v2997_v57 = vpack.c.bf16 %v2028_v49, %v2027_v46  ;;  %v1000_v58 = vadd.f32 %v999_v54, %v3527_v6  ;;  %v1513_v59 = vadd.f32 %v1512_v55, %v3529_v7  ;;  %v1001_v60 = vpop.f32.mrb[78].mxu0  ;;  %v1514_v61 = vpop.f32.mrb[78].mxu1 }
 0x195   : > { %v1002_v62 = vadd.f32 %v1001_v60, %v3523_v4  ;;  %v1515_v63 = vadd.f32 %v1514_v61, %v3525_v5  ;;  %v1003_v0 = vpop.f32.mrb[79].mxu0  ;;  %v1516_v1 = vpop.f32.mrb[79].mxu1 }
 0x196   : > { %3161 = vst [vmem:[%s3549_s11 + $0x90] sm:$0xff] %v2997_v57   ;;  %v1837_v3 = vmax.f32 %v998_v52, %v1000_v58  ;;  %v1933_v8 = vmax.f32 %v1511_v53, %v1513_v59  ;;  %v1004_v9 = vadd.f32 %v1003_v0, %v3527_v6  ;;  %v1517_v10 = vadd.f32 %v1516_v1, %v3529_v7 }
 0x197   : > { %1266 = vmatmul.mubr.bf16.gmra.mrb[184].mxu0 %v3294_v56  ;;  %1779 = vmatmul.mubr.bf16.gmra.mrb[184].mxu1 %v3294_v56 }
 0x198   : > { %v2029_v11 = vmax.f32 %v1837_v3, %v1933_v8  ;;  %v1838_v12 = vmax.f32 %v1002_v62, %v1004_v9  ;;  %v1934_v13 = vmax.f32 %v1515_v63, %v1517_v10  ;;  %1275 = vmatprep.mubr.bf16.mxu0 %v3304_v2  ;;  %1788 = vmatprep.mubr.bf16.mxu1 %v3304_v2 }
 0x19a   : > { %v2030_v14 = vmax.f32 %v1838_v12, %v1934_v13  ;;  %v1007_v15 = vpop.f32.mrb[80].mxu0  ;;  %v1520_v16 = vpop.f32.mrb[80].mxu1 }
 0x19b   : > { %v1008_v17 = vadd.f32 %v1007_v15, %v3523_v4  ;;  %v1521_v18 = vadd.f32 %v1520_v16, %v3525_v5  ;;  %v1009_v19 = vpop.f32.mrb[81].mxu0  ;;  %v1522_v20 = vpop.f32.mrb[81].mxu1 }
 0x19c   : > { %v3002_v22 = vpack.c.bf16 %v2030_v14, %v2029_v11  ;;  %v1010_v23 = vadd.f32 %v1009_v19, %v3527_v6  ;;  %v1523_v24 = vadd.f32 %v1522_v20, %v3529_v7  ;;  %v1011_v25 = vpop.f32.mrb[82].mxu0  ;;  %v1524_v26 = vpop.f32.mrb[82].mxu1 }
 0x19d   : > { %v1012_v2 = vadd.f32 %v1011_v25, %v3523_v4  ;;  %v1525_v27 = vadd.f32 %v1524_v26, %v3525_v5  ;;  %v1013_v28 = vpop.f32.mrb[83].mxu0  ;;  %v1526_v29 = vpop.f32.mrb[83].mxu1 }
 0x19e   : > { %3162 = vst [vmem:[%s3549_s11 + $0x98] sm:$0xff] %v3002_v22   ;;  %v1839_v30 = vmax.f32 %v1008_v17, %v1010_v23  ;;  %v1935_v31 = vmax.f32 %v1521_v18, %v1523_v24  ;;  %v1014_v32 = vadd.f32 %v1013_v28, %v3527_v6  ;;  %v1527_v33 = vadd.f32 %v1526_v29, %v3529_v7 }
 0x19f   : > { %1276 = vmatmul.mubr.bf16.gmra.mrb[188].mxu0 %v3295_v21  ;;  %1789 = vmatmul.mubr.bf16.gmra.mrb[188].mxu1 %v3295_v21 }
 0x1a0   : > { %v2031_v34 = vmax.f32 %v1839_v30, %v1935_v31  ;;  %v1840_v35 = vmax.f32 %v1012_v2, %v1014_v32  ;;  %v1936_v36 = vmax.f32 %v1525_v27, %v1527_v33 }
 0x1a2   : > { %v2032_v37 = vmax.f32 %v1840_v35, %v1936_v36  ;;  %v1017_v38 = vpop.f32.mrb[84].mxu0  ;;  %v1530_v39 = vpop.f32.mrb[84].mxu1 }
 0x1a3   : > { %v1018_v40 = vadd.f32 %v1017_v38, %v3523_v4  ;;  %v1531_v41 = vadd.f32 %v1530_v39, %v3525_v5  ;;  %v1019_v42 = vpop.f32.mrb[85].mxu0  ;;  %v1532_v43 = vpop.f32.mrb[85].mxu1 }
 0x1a4   : > { %v3007_v44 = vpack.c.bf16 %v2032_v37, %v2031_v34  ;;  %v1020_v45 = vadd.f32 %v1019_v42, %v3527_v6  ;;  %v1533_v46 = vadd.f32 %v1532_v43, %v3529_v7  ;;  %v1021_v47 = vpop.f32.mrb[86].mxu0  ;;  %v1534_v48 = vpop.f32.mrb[86].mxu1 }
 0x1a5   : > { %v1022_v49 = vadd.f32 %v1021_v47, %v3523_v4  ;;  %v1535_v50 = vadd.f32 %v1534_v48, %v3525_v5  ;;  %v1023_v51 = vpop.f32.mrb[87].mxu0  ;;  %v1536_v52 = vpop.f32.mrb[87].mxu1 }
 0x1a6   : > { %3163 = vst [vmem:[%s3549_s11 + $0xa0] sm:$0xff] %v3007_v44   ;;  %v1841_v53 = vmax.f32 %v1018_v40, %v1020_v45  ;;  %v1937_v54 = vmax.f32 %v1531_v41, %v1533_v46  ;;  %v1024_v55 = vadd.f32 %v1023_v51, %v3527_v6  ;;  %v1537_v56 = vadd.f32 %v1536_v52, %v3529_v7 }
 0x1a8   : > { %v2033_v57 = vmax.f32 %v1841_v53, %v1937_v54  ;;  %v1842_v58 = vmax.f32 %v1022_v49, %v1024_v55  ;;  %v1938_v59 = vmax.f32 %v1535_v50, %v1537_v56 }
 0x1aa   : > { %v2034_v60 = vmax.f32 %v1842_v58, %v1938_v59  ;;  %v1027_v61 = vpop.f32.mrb[88].mxu0  ;;  %v1540_v62 = vpop.f32.mrb[88].mxu1 }
 0x1ab   : > { %v1028_v63 = vadd.f32 %v1027_v61, %v3523_v4  ;;  %v1541_v0 = vadd.f32 %v1540_v62, %v3525_v5  ;;  %v1029_v1 = vpop.f32.mrb[89].mxu0  ;;  %v1542_v3 = vpop.f32.mrb[89].mxu1 }
 0x1ac   : > { %v3012_v8 = vpack.c.bf16 %v2034_v60, %v2033_v57  ;;  %v1030_v9 = vadd.f32 %v1029_v1, %v3527_v6  ;;  %v1543_v10 = vadd.f32 %v1542_v3, %v3529_v7  ;;  %v1031_v11 = vpop.f32.mrb[90].mxu0  ;;  %v1544_v12 = vpop.f32.mrb[90].mxu1 }
 0x1ad   : > { %v1032_v13 = vadd.f32 %v1031_v11, %v3523_v4  ;;  %v1545_v14 = vadd.f32 %v1544_v12, %v3525_v5  ;;  %v1033_v15 = vpop.f32.mrb[91].mxu0  ;;  %v1546_v16 = vpop.f32.mrb[91].mxu1 }
 0x1ae   : > { %3164 = vst [vmem:[%s3549_s11 + $0xa8] sm:$0xff] %v3012_v8   ;;  %v1843_v17 = vmax.f32 %v1028_v63, %v1030_v9  ;;  %v1939_v18 = vmax.f32 %v1541_v0, %v1543_v10  ;;  %v1034_v19 = vadd.f32 %v1033_v15, %v3527_v6  ;;  %v1547_v20 = vadd.f32 %v1546_v16, %v3529_v7 }
 0x1b0   : > { %v2035_v21 = vmax.f32 %v1843_v17, %v1939_v18  ;;  %v1844_v22 = vmax.f32 %v1032_v13, %v1034_v19  ;;  %v1940_v23 = vmax.f32 %v1545_v14, %v1547_v20 }
 0x1b2   : > { %v2036_v24 = vmax.f32 %v1844_v22, %v1940_v23  ;;  %v1037_v25 = vpop.f32.mrb[92].mxu0  ;;  %v1550_v26 = vpop.f32.mrb[92].mxu1 }
 0x1b3   : > { %v1038_v2 = vadd.f32 %v1037_v25, %v3523_v4  ;;  %v1551_v27 = vadd.f32 %v1550_v26, %v3525_v5  ;;  %v1039_v28 = vpop.f32.mrb[93].mxu0  ;;  %v1552_v29 = vpop.f32.mrb[93].mxu1 }
 0x1b4   : > { %v3017_v30 = vpack.c.bf16 %v2036_v24, %v2035_v21  ;;  %v1040_v31 = vadd.f32 %v1039_v28, %v3527_v6  ;;  %v1553_v32 = vadd.f32 %v1552_v29, %v3529_v7  ;;  %v1041_v33 = vpop.f32.mrb[94].mxu0  ;;  %v1554_v34 = vpop.f32.mrb[94].mxu1 }
 0x1b5   : > { %v1042_v35 = vadd.f32 %v1041_v33, %v3523_v4  ;;  %v1555_v36 = vadd.f32 %v1554_v34, %v3525_v5  ;;  %v1043_v37 = vpop.f32.mrb[95].mxu0  ;;  %v1556_v38 = vpop.f32.mrb[95].mxu1 }
 0x1b6   : > { %3165 = vst [vmem:[%s3549_s11 + $0xb0] sm:$0xff] %v3017_v30   ;;  %v1845_v39 = vmax.f32 %v1038_v2, %v1040_v31  ;;  %v1941_v40 = vmax.f32 %v1551_v27, %v1553_v32  ;;  %v1044_v41 = vadd.f32 %v1043_v37, %v3527_v6  ;;  %v1557_v42 = vadd.f32 %v1556_v38, %v3529_v7 }
 0x1b8   : > { %v2037_v43 = vmax.f32 %v1845_v39, %v1941_v40  ;;  %v1846_v44 = vmax.f32 %v1042_v35, %v1044_v41  ;;  %v1942_v45 = vmax.f32 %v1555_v36, %v1557_v42 }
 0x1ba   : > { %v2038_v46 = vmax.f32 %v1846_v44, %v1942_v45  ;;  %v1047_v47 = vpop.f32.mrb[96].mxu0  ;;  %v1560_v48 = vpop.f32.mrb[96].mxu1 }
 0x1bb   : > { %v1048_v49 = vadd.f32 %v1047_v47, %v3523_v4  ;;  %v1561_v50 = vadd.f32 %v1560_v48, %v3525_v5  ;;  %v1049_v51 = vpop.f32.mrb[97].mxu0  ;;  %v1562_v52 = vpop.f32.mrb[97].mxu1 }
 0x1bc   : > { %v3022_v53 = vpack.c.bf16 %v2038_v46, %v2037_v43  ;;  %v1050_v54 = vadd.f32 %v1049_v51, %v3527_v6  ;;  %v1563_v55 = vadd.f32 %v1562_v52, %v3529_v7  ;;  %v1051_v56 = vpop.f32.mrb[98].mxu0  ;;  %v1564_v57 = vpop.f32.mrb[98].mxu1 }
 0x1bd   : > { %v1052_v58 = vadd.f32 %v1051_v56, %v3523_v4  ;;  %v1565_v59 = vadd.f32 %v1564_v57, %v3525_v5  ;;  %v1053_v60 = vpop.f32.mrb[99].mxu0  ;;  %v1566_v61 = vpop.f32.mrb[99].mxu1 }
 0x1be   : > { %3166 = vst [vmem:[%s3549_s11 + $0xb8] sm:$0xff] %v3022_v53   ;;  %v1847_v62 = vmax.f32 %v1048_v49, %v1050_v54  ;;  %v1943_v63 = vmax.f32 %v1561_v50, %v1563_v55  ;;  %v1054_v0 = vadd.f32 %v1053_v60, %v3527_v6  ;;  %v1567_v1 = vadd.f32 %v1566_v61, %v3529_v7 }
 0x1c0   : > { %v2039_v3 = vmax.f32 %v1847_v62, %v1943_v63  ;;  %v1848_v8 = vmax.f32 %v1052_v58, %v1054_v0  ;;  %v1944_v9 = vmax.f32 %v1565_v59, %v1567_v1 }
 0x1c2   : > { %v2040_v10 = vmax.f32 %v1848_v8, %v1944_v9  ;;  %v1057_v11 = vpop.f32.mrb[100].mxu0  ;;  %v1570_v12 = vpop.f32.mrb[100].mxu1 }
 0x1c3   : > { %v1058_v13 = vadd.f32 %v1057_v11, %v3523_v4  ;;  %v1571_v14 = vadd.f32 %v1570_v12, %v3525_v5  ;;  %v1059_v15 = vpop.f32.mrb[101].mxu0  ;;  %v1572_v16 = vpop.f32.mrb[101].mxu1 }
 0x1c4   : > { %v3027_v17 = vpack.c.bf16 %v2040_v10, %v2039_v3  ;;  %v1060_v18 = vadd.f32 %v1059_v15, %v3527_v6  ;;  %v1573_v19 = vadd.f32 %v1572_v16, %v3529_v7  ;;  %v1061_v20 = vpop.f32.mrb[102].mxu0  ;;  %v1574_v21 = vpop.f32.mrb[102].mxu1 }
 0x1c5   : > { %v1062_v22 = vadd.f32 %v1061_v20, %v3523_v4  ;;  %v1575_v23 = vadd.f32 %v1574_v21, %v3525_v5  ;;  %v1063_v24 = vpop.f32.mrb[103].mxu0  ;;  %v1576_v25 = vpop.f32.mrb[103].mxu1 }
 0x1c6   : > { %3167 = vst [vmem:[%s3549_s11 + $0xc0] sm:$0xff] %v3027_v17   ;;  %v1849_v26 = vmax.f32 %v1058_v13, %v1060_v18  ;;  %v1945_v2 = vmax.f32 %v1571_v14, %v1573_v19  ;;  %v1064_v27 = vadd.f32 %v1063_v24, %v3527_v6  ;;  %v1577_v28 = vadd.f32 %v1576_v25, %v3529_v7 }
 0x1c8   : > { %v2041_v29 = vmax.f32 %v1849_v26, %v1945_v2  ;;  %v1850_v30 = vmax.f32 %v1062_v22, %v1064_v27  ;;  %v1946_v31 = vmax.f32 %v1575_v23, %v1577_v28 }
 0x1ca   : > { %v2042_v32 = vmax.f32 %v1850_v30, %v1946_v31  ;;  %v1067_v33 = vpop.f32.mrb[104].mxu0  ;;  %v1580_v34 = vpop.f32.mrb[104].mxu1 }
 0x1cb   : > { %v1068_v35 = vadd.f32 %v1067_v33, %v3523_v4  ;;  %v1581_v36 = vadd.f32 %v1580_v34, %v3525_v5  ;;  %v1069_v37 = vpop.f32.mrb[105].mxu0  ;;  %v1582_v38 = vpop.f32.mrb[105].mxu1 }
 0x1cc   : > { %v3032_v39 = vpack.c.bf16 %v2042_v32, %v2041_v29  ;;  %v1070_v40 = vadd.f32 %v1069_v37, %v3527_v6  ;;  %v1583_v41 = vadd.f32 %v1582_v38, %v3529_v7  ;;  %v1071_v42 = vpop.f32.mrb[106].mxu0  ;;  %v1584_v43 = vpop.f32.mrb[106].mxu1 }
 0x1cd   : > { %v1072_v44 = vadd.f32 %v1071_v42, %v3523_v4  ;;  %v1585_v45 = vadd.f32 %v1584_v43, %v3525_v5  ;;  %v1073_v46 = vpop.f32.mrb[107].mxu0  ;;  %v1586_v47 = vpop.f32.mrb[107].mxu1 }
 0x1ce   : > { %3168 = vst [vmem:[%s3549_s11 + $0xc8] sm:$0xff] %v3032_v39   ;;  %v1851_v48 = vmax.f32 %v1068_v35, %v1070_v40  ;;  %v1947_v49 = vmax.f32 %v1581_v36, %v1583_v41  ;;  %v1074_v50 = vadd.f32 %v1073_v46, %v3527_v6  ;;  %v1587_v51 = vadd.f32 %v1586_v47, %v3529_v7 }
 0x1d0   : > { %v2043_v52 = vmax.f32 %v1851_v48, %v1947_v49  ;;  %v1852_v53 = vmax.f32 %v1072_v44, %v1074_v50  ;;  %v1948_v54 = vmax.f32 %v1585_v45, %v1587_v51 }
 0x1d2   : > { %v2044_v55 = vmax.f32 %v1852_v53, %v1948_v54  ;;  %v1077_v56 = vpop.f32.mrb[108].mxu0  ;;  %v1590_v57 = vpop.f32.mrb[108].mxu1 }
 0x1d3   : > { %v1078_v58 = vadd.f32 %v1077_v56, %v3523_v4  ;;  %v1591_v59 = vadd.f32 %v1590_v57, %v3525_v5  ;;  %v1079_v60 = vpop.f32.mrb[109].mxu0  ;;  %v1592_v61 = vpop.f32.mrb[109].mxu1 }
 0x1d4   : > { %v3037_v62 = vpack.c.bf16 %v2044_v55, %v2043_v52  ;;  %v1080_v63 = vadd.f32 %v1079_v60, %v3527_v6  ;;  %v1593_v0 = vadd.f32 %v1592_v61, %v3529_v7  ;;  %v1081_v1 = vpop.f32.mrb[110].mxu0  ;;  %v1594_v3 = vpop.f32.mrb[110].mxu1 }
 0x1d5   : > { %v1082_v8 = vadd.f32 %v1081_v1, %v3523_v4  ;;  %v1595_v9 = vadd.f32 %v1594_v3, %v3525_v5  ;;  %v1083_v10 = vpop.f32.mrb[111].mxu0  ;;  %v1596_v11 = vpop.f32.mrb[111].mxu1 }
 0x1d6   : > { %3169 = vst [vmem:[%s3549_s11 + $0xd0] sm:$0xff] %v3037_v62   ;;  %v1853_v12 = vmax.f32 %v1078_v58, %v1080_v63  ;;  %v1949_v13 = vmax.f32 %v1591_v59, %v1593_v0  ;;  %v1084_v14 = vadd.f32 %v1083_v10, %v3527_v6  ;;  %v1597_v15 = vadd.f32 %v1596_v11, %v3529_v7 }
 0x1d8   : > { %v2045_v16 = vmax.f32 %v1853_v12, %v1949_v13  ;;  %v1854_v17 = vmax.f32 %v1082_v8, %v1084_v14  ;;  %v1950_v18 = vmax.f32 %v1595_v9, %v1597_v15 }
 0x1da   : > { %v2046_v19 = vmax.f32 %v1854_v17, %v1950_v18  ;;  %v1087_v20 = vpop.f32.mrb[112].mxu0  ;;  %v1600_v21 = vpop.f32.mrb[112].mxu1 }
 0x1db   : > { %v1088_v22 = vadd.f32 %v1087_v20, %v3523_v4  ;;  %v1601_v23 = vadd.f32 %v1600_v21, %v3525_v5  ;;  %v1089_v24 = vpop.f32.mrb[113].mxu0  ;;  %v1602_v25 = vpop.f32.mrb[113].mxu1 }
 0x1dc   : > { %v3042_v26 = vpack.c.bf16 %v2046_v19, %v2045_v16  ;;  %v1090_v2 = vadd.f32 %v1089_v24, %v3527_v6  ;;  %v1603_v27 = vadd.f32 %v1602_v25, %v3529_v7  ;;  %v1091_v28 = vpop.f32.mrb[114].mxu0  ;;  %v1604_v29 = vpop.f32.mrb[114].mxu1 }
 0x1dd   : > { %v1092_v30 = vadd.f32 %v1091_v28, %v3523_v4  ;;  %v1605_v31 = vadd.f32 %v1604_v29, %v3525_v5  ;;  %v1093_v32 = vpop.f32.mrb[115].mxu0  ;;  %v1606_v33 = vpop.f32.mrb[115].mxu1 }
 0x1de   : > { %3170 = vst [vmem:[%s3549_s11 + $0xd8] sm:$0xff] %v3042_v26   ;;  %v1855_v34 = vmax.f32 %v1088_v22, %v1090_v2  ;;  %v1951_v35 = vmax.f32 %v1601_v23, %v1603_v27  ;;  %v1094_v36 = vadd.f32 %v1093_v32, %v3527_v6  ;;  %v1607_v37 = vadd.f32 %v1606_v33, %v3529_v7 }
 0x1e0   : > { %v2047_v38 = vmax.f32 %v1855_v34, %v1951_v35  ;;  %v1856_v39 = vmax.f32 %v1092_v30, %v1094_v36  ;;  %v1952_v40 = vmax.f32 %v1605_v31, %v1607_v37 }
 0x1e2   : > { %v2048_v41 = vmax.f32 %v1856_v39, %v1952_v40  ;;  %v1097_v42 = vpop.f32.mrb[116].mxu0  ;;  %v1610_v43 = vpop.f32.mrb[116].mxu1 }
 0x1e3   : > { %v1098_v44 = vadd.f32 %v1097_v42, %v3523_v4  ;;  %v1611_v45 = vadd.f32 %v1610_v43, %v3525_v5  ;;  %v1099_v46 = vpop.f32.mrb[117].mxu0  ;;  %v1612_v47 = vpop.f32.mrb[117].mxu1 }
 0x1e4   : > { %v3047_v48 = vpack.c.bf16 %v2048_v41, %v2047_v38  ;;  %v1100_v49 = vadd.f32 %v1099_v46, %v3527_v6  ;;  %v1613_v50 = vadd.f32 %v1612_v47, %v3529_v7  ;;  %v1101_v51 = vpop.f32.mrb[118].mxu0  ;;  %v1614_v52 = vpop.f32.mrb[118].mxu1 }
 0x1e5   : > { %v1102_v53 = vadd.f32 %v1101_v51, %v3523_v4  ;;  %v1615_v54 = vadd.f32 %v1614_v52, %v3525_v5  ;;  %v1103_v55 = vpop.f32.mrb[119].mxu0  ;;  %v1616_v56 = vpop.f32.mrb[119].mxu1 }
 0x1e6   : > { %3171 = vst [vmem:[%s3549_s11 + $0xe0] sm:$0xff] %v3047_v48   ;;  %v1857_v57 = vmax.f32 %v1098_v44, %v1100_v49  ;;  %v1953_v58 = vmax.f32 %v1611_v45, %v1613_v50  ;;  %v1104_v59 = vadd.f32 %v1103_v55, %v3527_v6  ;;  %v1617_v60 = vadd.f32 %v1616_v56, %v3529_v7 }
 0x1e8   : > { %v2049_v61 = vmax.f32 %v1857_v57, %v1953_v58  ;;  %v1858_v62 = vmax.f32 %v1102_v53, %v1104_v59  ;;  %v1954_v63 = vmax.f32 %v1615_v54, %v1617_v60 }
 0x1ea   : > { %v2050_v0 = vmax.f32 %v1858_v62, %v1954_v63  ;;  %v1107_v1 = vpop.f32.mrb[120].mxu0  ;;  %v1620_v3 = vpop.f32.mrb[120].mxu1 }
 0x1eb   : > { %v1108_v8 = vadd.f32 %v1107_v1, %v3523_v4  ;;  %v1621_v9 = vadd.f32 %v1620_v3, %v3525_v5  ;;  %v1109_v10 = vpop.f32.mrb[121].mxu0  ;;  %v1622_v11 = vpop.f32.mrb[121].mxu1 }
 0x1ec   : > { %v3052_v12 = vpack.c.bf16 %v2050_v0, %v2049_v61  ;;  %v1110_v13 = vadd.f32 %v1109_v10, %v3527_v6  ;;  %v1623_v14 = vadd.f32 %v1622_v11, %v3529_v7  ;;  %v1111_v15 = vpop.f32.mrb[122].mxu0  ;;  %v1624_v16 = vpop.f32.mrb[122].mxu1 }
 0x1ed   : > { %v1112_v17 = vadd.f32 %v1111_v15, %v3523_v4  ;;  %v1625_v18 = vadd.f32 %v1624_v16, %v3525_v5  ;;  %v1113_v19 = vpop.f32.mrb[123].mxu0  ;;  %v1626_v20 = vpop.f32.mrb[123].mxu1 }
 0x1ee   : > { %3172 = vst [vmem:[%s3549_s11 + $0xe8] sm:$0xff] %v3052_v12   ;;  %v1859_v21 = vmax.f32 %v1108_v8, %v1110_v13  ;;  %v1955_v22 = vmax.f32 %v1621_v9, %v1623_v14  ;;  %v1114_v23 = vadd.f32 %v1113_v19, %v3527_v6  ;;  %v1627_v24 = vadd.f32 %v1626_v20, %v3529_v7 }
 0x1f0   : > { %v2051_v25 = vmax.f32 %v1859_v21, %v1955_v22  ;;  %v1860_v26 = vmax.f32 %v1112_v17, %v1114_v23  ;;  %v1956_v2 = vmax.f32 %v1625_v18, %v1627_v24 }
 0x1f2   : > { %v2052_v27 = vmax.f32 %v1860_v26, %v1956_v2  ;;  %v1117_v28 = vpop.f32.mrb[124].mxu0  ;;  %v1630_v29 = vpop.f32.mrb[124].mxu1 }
 0x1f3   : > { %v1118_v30 = vadd.f32 %v1117_v28, %v3523_v4  ;;  %v1631_v31 = vadd.f32 %v1630_v29, %v3525_v5  ;;  %v1119_v32 = vpop.f32.mrb[125].mxu0  ;;  %v1632_v33 = vpop.f32.mrb[125].mxu1 }
 0x1f4   : > { %v3057_v34 = vpack.c.bf16 %v2052_v27, %v2051_v25  ;;  %v1120_v35 = vadd.f32 %v1119_v32, %v3527_v6  ;;  %v1633_v36 = vadd.f32 %v1632_v33, %v3529_v7  ;;  %v1121_v37 = vpop.f32.mrb[126].mxu0  ;;  %v1634_v38 = vpop.f32.mrb[126].mxu1 }
 0x1f5   : > { %v1122_v39 = vadd.f32 %v1121_v37, %v3523_v4  ;;  %v1635_v40 = vadd.f32 %v1634_v38, %v3525_v5  ;;  %v1123_v41 = vpop.f32.mrb[127].mxu0  ;;  %v1636_v42 = vpop.f32.mrb[127].mxu1 }
 0x1f6   : > { %3173 = vst [vmem:[%s3549_s11 + $0xf0] sm:$0xff] %v3057_v34   ;;  %v1861_v43 = vmax.f32 %v1118_v30, %v1120_v35  ;;  %v1957_v44 = vmax.f32 %v1631_v31, %v1633_v36  ;;  %v1124_v45 = vadd.f32 %v1123_v41, %v3527_v6  ;;  %v1637_v46 = vadd.f32 %v1636_v42, %v3529_v7 }
 0x1f8   : > { %v2053_v47 = vmax.f32 %v1861_v43, %v1957_v44  ;;  %v1862_v48 = vmax.f32 %v1122_v39, %v1124_v45  ;;  %v1958_v49 = vmax.f32 %v1635_v40, %v1637_v46 }
 0x1fa   : > { %v2054_v50 = vmax.f32 %v1862_v48, %v1958_v49  ;;  %v1127_v51 = vpop.f32.mrb[128].mxu0  ;;  %v1640_v52 = vpop.f32.mrb[128].mxu1 }
 0x1fb   : > { %v1128_v53 = vadd.f32 %v1127_v51, %v3523_v4  ;;  %v1641_v54 = vadd.f32 %v1640_v52, %v3525_v5  ;;  %v1129_v55 = vpop.f32.mrb[129].mxu0  ;;  %v1642_v56 = vpop.f32.mrb[129].mxu1 }
 0x1fc   : > { %v3062_v57 = vpack.c.bf16 %v2054_v50, %v2053_v47  ;;  %v1130_v58 = vadd.f32 %v1129_v55, %v3527_v6  ;;  %v1643_v59 = vadd.f32 %v1642_v56, %v3529_v7  ;;  %v1131_v60 = vpop.f32.mrb[130].mxu0  ;;  %v1644_v61 = vpop.f32.mrb[130].mxu1 }
 0x1fd   : > { %v1132_v62 = vadd.f32 %v1131_v60, %v3523_v4  ;;  %v1645_v63 = vadd.f32 %v1644_v61, %v3525_v5  ;;  %v1133_v0 = vpop.f32.mrb[131].mxu0  ;;  %v1646_v1 = vpop.f32.mrb[131].mxu1 }
 0x1fe   : > { %3174 = vst [vmem:[%s3549_s11 + $0xf8] sm:$0xff] %v3062_v57   ;;  %v1863_v3 = vmax.f32 %v1128_v53, %v1130_v58  ;;  %v1959_v8 = vmax.f32 %v1641_v54, %v1643_v59  ;;  %v1134_v9 = vadd.f32 %v1133_v0, %v3527_v6  ;;  %v1647_v10 = vadd.f32 %v1646_v1, %v3529_v7 }
 0x200   : > { %v2055_v11 = vmax.f32 %v1863_v3, %v1959_v8  ;;  %v1864_v12 = vmax.f32 %v1132_v62, %v1134_v9  ;;  %v1960_v13 = vmax.f32 %v1645_v63, %v1647_v10 }
 0x202   : > { %v2056_v14 = vmax.f32 %v1864_v12, %v1960_v13  ;;  %v1137_v15 = vpop.f32.mrb[132].mxu0  ;;  %v1650_v16 = vpop.f32.mrb[132].mxu1 }
 0x203   : > { %v1138_v17 = vadd.f32 %v1137_v15, %v3523_v4  ;;  %v1651_v18 = vadd.f32 %v1650_v16, %v3525_v5  ;;  %v1139_v19 = vpop.f32.mrb[133].mxu0  ;;  %v1652_v20 = vpop.f32.mrb[133].mxu1 }
 0x204   : > { %v3067_v21 = vpack.c.bf16 %v2056_v14, %v2055_v11  ;;  %v1140_v22 = vadd.f32 %v1139_v19, %v3527_v6  ;;  %v1653_v23 = vadd.f32 %v1652_v20, %v3529_v7  ;;  %v1141_v24 = vpop.f32.mrb[134].mxu0  ;;  %v1654_v25 = vpop.f32.mrb[134].mxu1 }
 0x205   : > { %v1142_v26 = vadd.f32 %v1141_v24, %v3523_v4  ;;  %v1655_v2 = vadd.f32 %v1654_v25, %v3525_v5  ;;  %v1143_v27 = vpop.f32.mrb[135].mxu0  ;;  %v1656_v28 = vpop.f32.mrb[135].mxu1 }
 0x206   : > { %3175 = vst [vmem:[%s3549_s11 + $0x100] sm:$0xff] %v3067_v21   ;;  %v1865_v29 = vmax.f32 %v1138_v17, %v1140_v22  ;;  %v1961_v30 = vmax.f32 %v1651_v18, %v1653_v23  ;;  %v1144_v31 = vadd.f32 %v1143_v27, %v3527_v6  ;;  %v1657_v32 = vadd.f32 %v1656_v28, %v3529_v7 }
 0x208   : > { %v2057_v33 = vmax.f32 %v1865_v29, %v1961_v30  ;;  %v1866_v34 = vmax.f32 %v1142_v26, %v1144_v31  ;;  %v1962_v35 = vmax.f32 %v1655_v2, %v1657_v32 }
 0x20a   : > { %v2058_v36 = vmax.f32 %v1866_v34, %v1962_v35  ;;  %v1147_v37 = vpop.f32.mrb[136].mxu0  ;;  %v1660_v38 = vpop.f32.mrb[136].mxu1 }
 0x20b   : > { %v1148_v39 = vadd.f32 %v1147_v37, %v3523_v4  ;;  %v1661_v40 = vadd.f32 %v1660_v38, %v3525_v5  ;;  %v1149_v41 = vpop.f32.mrb[137].mxu0  ;;  %v1662_v42 = vpop.f32.mrb[137].mxu1 }
 0x20c   : > { %v3072_v43 = vpack.c.bf16 %v2058_v36, %v2057_v33  ;;  %v1150_v44 = vadd.f32 %v1149_v41, %v3527_v6  ;;  %v1663_v45 = vadd.f32 %v1662_v42, %v3529_v7  ;;  %v1151_v46 = vpop.f32.mrb[138].mxu0  ;;  %v1664_v47 = vpop.f32.mrb[138].mxu1 }
 0x20d   : > { %v1152_v48 = vadd.f32 %v1151_v46, %v3523_v4  ;;  %v1665_v49 = vadd.f32 %v1664_v47, %v3525_v5  ;;  %v1153_v50 = vpop.f32.mrb[139].mxu0  ;;  %v1666_v51 = vpop.f32.mrb[139].mxu1 }
 0x20e   : > { %3176 = vst [vmem:[%s3549_s11 + $0x108] sm:$0xff] %v3072_v43   ;;  %v1867_v52 = vmax.f32 %v1148_v39, %v1150_v44  ;;  %v1963_v53 = vmax.f32 %v1661_v40, %v1663_v45  ;;  %v1154_v54 = vadd.f32 %v1153_v50, %v3527_v6  ;;  %v1667_v55 = vadd.f32 %v1666_v51, %v3529_v7 }
 0x210   : > { %v2059_v56 = vmax.f32 %v1867_v52, %v1963_v53  ;;  %v1868_v57 = vmax.f32 %v1152_v48, %v1154_v54  ;;  %v1964_v58 = vmax.f32 %v1665_v49, %v1667_v55 }
 0x212   : > { %v2060_v59 = vmax.f32 %v1868_v57, %v1964_v58  ;;  %v1157_v60 = vpop.f32.mrb[140].mxu0  ;;  %v1670_v61 = vpop.f32.mrb[140].mxu1 }
 0x213   : > { %v1158_v62 = vadd.f32 %v1157_v60, %v3523_v4  ;;  %v1671_v63 = vadd.f32 %v1670_v61, %v3525_v5  ;;  %v1159_v0 = vpop.f32.mrb[141].mxu0  ;;  %v1672_v1 = vpop.f32.mrb[141].mxu1 }
 0x214   : > { %v3077_v3 = vpack.c.bf16 %v2060_v59, %v2059_v56  ;;  %v1160_v8 = vadd.f32 %v1159_v0, %v3527_v6  ;;  %v1673_v9 = vadd.f32 %v1672_v1, %v3529_v7  ;;  %v1161_v10 = vpop.f32.mrb[142].mxu0  ;;  %v1674_v11 = vpop.f32.mrb[142].mxu1 }
 0x215   : > { %v1162_v12 = vadd.f32 %v1161_v10, %v3523_v4  ;;  %v1675_v13 = vadd.f32 %v1674_v11, %v3525_v5  ;;  %v1163_v14 = vpop.f32.mrb[143].mxu0  ;;  %v1676_v15 = vpop.f32.mrb[143].mxu1 }
 0x216   : > { %3177 = vst [vmem:[%s3549_s11 + $0x110] sm:$0xff] %v3077_v3   ;;  %v1869_v16 = vmax.f32 %v1158_v62, %v1160_v8  ;;  %v1965_v17 = vmax.f32 %v1671_v63, %v1673_v9  ;;  %v1164_v18 = vadd.f32 %v1163_v14, %v3527_v6  ;;  %v1677_v19 = vadd.f32 %v1676_v15, %v3529_v7 }
 0x218   : > { %v2061_v20 = vmax.f32 %v1869_v16, %v1965_v17  ;;  %v1870_v21 = vmax.f32 %v1162_v12, %v1164_v18  ;;  %v1966_v22 = vmax.f32 %v1675_v13, %v1677_v19 }
 0x21a   : > { %v2062_v23 = vmax.f32 %v1870_v21, %v1966_v22  ;;  %v1167_v24 = vpop.f32.mrb[144].mxu0  ;;  %v1680_v25 = vpop.f32.mrb[144].mxu1 }
 0x21b   : > { %v1168_v26 = vadd.f32 %v1167_v24, %v3523_v4  ;;  %v1681_v2 = vadd.f32 %v1680_v25, %v3525_v5  ;;  %v1169_v27 = vpop.f32.mrb[145].mxu0  ;;  %v1682_v28 = vpop.f32.mrb[145].mxu1 }
 0x21c   : > { %v3082_v29 = vpack.c.bf16 %v2062_v23, %v2061_v20  ;;  %v1170_v30 = vadd.f32 %v1169_v27, %v3527_v6  ;;  %v1683_v31 = vadd.f32 %v1682_v28, %v3529_v7  ;;  %v1171_v32 = vpop.f32.mrb[146].mxu0  ;;  %v1684_v33 = vpop.f32.mrb[146].mxu1 }
 0x21d   : > { %v1172_v34 = vadd.f32 %v1171_v32, %v3523_v4  ;;  %v1685_v35 = vadd.f32 %v1684_v33, %v3525_v5  ;;  %v1173_v36 = vpop.f32.mrb[147].mxu0  ;;  %v1686_v37 = vpop.f32.mrb[147].mxu1 }
 0x21e   : > { %3178 = vst [vmem:[%s3549_s11 + $0x118] sm:$0xff] %v3082_v29   ;;  %v1871_v38 = vmax.f32 %v1168_v26, %v1170_v30  ;;  %v1967_v39 = vmax.f32 %v1681_v2, %v1683_v31  ;;  %v1174_v40 = vadd.f32 %v1173_v36, %v3527_v6  ;;  %v1687_v41 = vadd.f32 %v1686_v37, %v3529_v7 }
 0x220   : > { %v2063_v42 = vmax.f32 %v1871_v38, %v1967_v39  ;;  %v1872_v43 = vmax.f32 %v1172_v34, %v1174_v40  ;;  %v1968_v44 = vmax.f32 %v1685_v35, %v1687_v41 }
 0x222   : > { %v2064_v45 = vmax.f32 %v1872_v43, %v1968_v44  ;;  %v1177_v46 = vpop.f32.mrb[148].mxu0  ;;  %v1690_v47 = vpop.f32.mrb[148].mxu1 }
 0x223   : > { %v1178_v48 = vadd.f32 %v1177_v46, %v3523_v4  ;;  %v1691_v49 = vadd.f32 %v1690_v47, %v3525_v5  ;;  %v1179_v50 = vpop.f32.mrb[149].mxu0  ;;  %v1692_v51 = vpop.f32.mrb[149].mxu1 }
 0x224   : > { %v3087_v52 = vpack.c.bf16 %v2064_v45, %v2063_v42  ;;  %v1180_v53 = vadd.f32 %v1179_v50, %v3527_v6  ;;  %v1693_v54 = vadd.f32 %v1692_v51, %v3529_v7  ;;  %v1181_v55 = vpop.f32.mrb[150].mxu0  ;;  %v1694_v56 = vpop.f32.mrb[150].mxu1 }
 0x225   : > { %v1182_v57 = vadd.f32 %v1181_v55, %v3523_v4  ;;  %v1695_v58 = vadd.f32 %v1694_v56, %v3525_v5  ;;  %v1183_v59 = vpop.f32.mrb[151].mxu0  ;;  %v1696_v60 = vpop.f32.mrb[151].mxu1 }
 0x226   : > { %3179 = vst [vmem:[%s3549_s11 + $0x120] sm:$0xff] %v3087_v52   ;;  %v1873_v61 = vmax.f32 %v1178_v48, %v1180_v53  ;;  %v1969_v62 = vmax.f32 %v1691_v49, %v1693_v54  ;;  %v1184_v63 = vadd.f32 %v1183_v59, %v3527_v6  ;;  %v1697_v0 = vadd.f32 %v1696_v60, %v3529_v7 }
 0x228   : > { %v2065_v1 = vmax.f32 %v1873_v61, %v1969_v62  ;;  %v1874_v3 = vmax.f32 %v1182_v57, %v1184_v63  ;;  %v1970_v8 = vmax.f32 %v1695_v58, %v1697_v0 }
 0x22a   : > { %v2066_v9 = vmax.f32 %v1874_v3, %v1970_v8  ;;  %v1187_v10 = vpop.f32.mrb[152].mxu0  ;;  %v1700_v11 = vpop.f32.mrb[152].mxu1 }
 0x22b   : > { %v1188_v12 = vadd.f32 %v1187_v10, %v3523_v4  ;;  %v1701_v13 = vadd.f32 %v1700_v11, %v3525_v5  ;;  %v1189_v14 = vpop.f32.mrb[153].mxu0  ;;  %v1702_v15 = vpop.f32.mrb[153].mxu1 }
 0x22c   : > { %v3092_v16 = vpack.c.bf16 %v2066_v9, %v2065_v1  ;;  %v1190_v17 = vadd.f32 %v1189_v14, %v3527_v6  ;;  %v1703_v18 = vadd.f32 %v1702_v15, %v3529_v7  ;;  %v1191_v19 = vpop.f32.mrb[154].mxu0  ;;  %v1704_v20 = vpop.f32.mrb[154].mxu1 }
 0x22d   : > { %v1192_v21 = vadd.f32 %v1191_v19, %v3523_v4  ;;  %v1705_v22 = vadd.f32 %v1704_v20, %v3525_v5  ;;  %v1193_v23 = vpop.f32.mrb[155].mxu0  ;;  %v1706_v24 = vpop.f32.mrb[155].mxu1 }
 0x22e   : > { %3180 = vst [vmem:[%s3549_s11 + $0x128] sm:$0xff] %v3092_v16   ;;  %v1875_v25 = vmax.f32 %v1188_v12, %v1190_v17  ;;  %v1971_v26 = vmax.f32 %v1701_v13, %v1703_v18  ;;  %v1194_v2 = vadd.f32 %v1193_v23, %v3527_v6  ;;  %v1707_v27 = vadd.f32 %v1706_v24, %v3529_v7 }
 0x230   : > { %v2067_v28 = vmax.f32 %v1875_v25, %v1971_v26  ;;  %v1876_v29 = vmax.f32 %v1192_v21, %v1194_v2  ;;  %v1972_v30 = vmax.f32 %v1705_v22, %v1707_v27 }
 0x232   : > { %v2068_v31 = vmax.f32 %v1876_v29, %v1972_v30  ;;  %v1197_v32 = vpop.f32.mrb[156].mxu0  ;;  %v1710_v33 = vpop.f32.mrb[156].mxu1 }
 0x233   : > { %v1198_v34 = vadd.f32 %v1197_v32, %v3523_v4  ;;  %v1711_v35 = vadd.f32 %v1710_v33, %v3525_v5  ;;  %v1199_v36 = vpop.f32.mrb[157].mxu0  ;;  %v1712_v37 = vpop.f32.mrb[157].mxu1 }
 0x234   : > { %v3097_v38 = vpack.c.bf16 %v2068_v31, %v2067_v28  ;;  %v1200_v39 = vadd.f32 %v1199_v36, %v3527_v6  ;;  %v1713_v40 = vadd.f32 %v1712_v37, %v3529_v7  ;;  %v1201_v41 = vpop.f32.mrb[158].mxu0  ;;  %v1714_v42 = vpop.f32.mrb[158].mxu1 }
 0x235   : > { %v1202_v43 = vadd.f32 %v1201_v41, %v3523_v4  ;;  %v1715_v44 = vadd.f32 %v1714_v42, %v3525_v5  ;;  %v1203_v45 = vpop.f32.mrb[159].mxu0  ;;  %v1716_v46 = vpop.f32.mrb[159].mxu1 }
 0x236   : > { %3181 = vst [vmem:[%s3549_s11 + $0x130] sm:$0xff] %v3097_v38   ;;  %v1877_v47 = vmax.f32 %v1198_v34, %v1200_v39  ;;  %v1973_v48 = vmax.f32 %v1711_v35, %v1713_v40  ;;  %v1204_v49 = vadd.f32 %v1203_v45, %v3527_v6  ;;  %v1717_v50 = vadd.f32 %v1716_v46, %v3529_v7 }
 0x238   : > { %v2069_v51 = vmax.f32 %v1877_v47, %v1973_v48  ;;  %v1878_v52 = vmax.f32 %v1202_v43, %v1204_v49  ;;  %v1974_v53 = vmax.f32 %v1715_v44, %v1717_v50 }
 0x23a   : > { %v2070_v54 = vmax.f32 %v1878_v52, %v1974_v53  ;;  %v1207_v55 = vpop.f32.mrb[160].mxu0  ;;  %v1720_v56 = vpop.f32.mrb[160].mxu1 }
 0x23b   : > { %v1208_v57 = vadd.f32 %v1207_v55, %v3523_v4  ;;  %v1721_v58 = vadd.f32 %v1720_v56, %v3525_v5  ;;  %v1209_v59 = vpop.f32.mrb[161].mxu0  ;;  %v1722_v60 = vpop.f32.mrb[161].mxu1 }
 0x23c   : > { %v3102_v61 = vpack.c.bf16 %v2070_v54, %v2069_v51  ;;  %v1210_v62 = vadd.f32 %v1209_v59, %v3527_v6  ;;  %v1723_v63 = vadd.f32 %v1722_v60, %v3529_v7  ;;  %v1211_v0 = vpop.f32.mrb[162].mxu0  ;;  %v1724_v1 = vpop.f32.mrb[162].mxu1 }
 0x23d   : > { %v1212_v3 = vadd.f32 %v1211_v0, %v3523_v4  ;;  %v1725_v8 = vadd.f32 %v1724_v1, %v3525_v5  ;;  %v1213_v9 = vpop.f32.mrb[163].mxu0  ;;  %v1726_v10 = vpop.f32.mrb[163].mxu1 }
 0x23e   : > { %3182 = vst [vmem:[%s3549_s11 + $0x138] sm:$0xff] %v3102_v61   ;;  %v1879_v11 = vmax.f32 %v1208_v57, %v1210_v62  ;;  %v1975_v12 = vmax.f32 %v1721_v58, %v1723_v63  ;;  %v1214_v13 = vadd.f32 %v1213_v9, %v3527_v6  ;;  %v1727_v14 = vadd.f32 %v1726_v10, %v3529_v7 }
 0x240   : > { %v2071_v15 = vmax.f32 %v1879_v11, %v1975_v12  ;;  %v1880_v16 = vmax.f32 %v1212_v3, %v1214_v13  ;;  %v1976_v17 = vmax.f32 %v1725_v8, %v1727_v14 }
 0x242   : > { %v2072_v18 = vmax.f32 %v1880_v16, %v1976_v17  ;;  %v1217_v19 = vpop.f32.mrb[164].mxu0  ;;  %v1730_v20 = vpop.f32.mrb[164].mxu1 }
 0x243   : > { %v1218_v21 = vadd.f32 %v1217_v19, %v3523_v4  ;;  %v1731_v22 = vadd.f32 %v1730_v20, %v3525_v5  ;;  %v1219_v23 = vpop.f32.mrb[165].mxu0  ;;  %v1732_v24 = vpop.f32.mrb[165].mxu1 }
 0x244   : > { %v3107_v25 = vpack.c.bf16 %v2072_v18, %v2071_v15  ;;  %v1220_v26 = vadd.f32 %v1219_v23, %v3527_v6  ;;  %v1733_v2 = vadd.f32 %v1732_v24, %v3529_v7  ;;  %v1221_v27 = vpop.f32.mrb[166].mxu0  ;;  %v1734_v28 = vpop.f32.mrb[166].mxu1 }
 0x245   : > { %v1222_v29 = vadd.f32 %v1221_v27, %v3523_v4  ;;  %v1735_v30 = vadd.f32 %v1734_v28, %v3525_v5  ;;  %v1223_v31 = vpop.f32.mrb[167].mxu0  ;;  %v1736_v32 = vpop.f32.mrb[167].mxu1 }
 0x246   : > { %3183 = vst [vmem:[%s3549_s11 + $0x140] sm:$0xff] %v3107_v25   ;;  %v1881_v33 = vmax.f32 %v1218_v21, %v1220_v26  ;;  %v1977_v34 = vmax.f32 %v1731_v22, %v1733_v2  ;;  %v1224_v35 = vadd.f32 %v1223_v31, %v3527_v6  ;;  %v1737_v36 = vadd.f32 %v1736_v32, %v3529_v7 }
 0x248   : > { %v2073_v37 = vmax.f32 %v1881_v33, %v1977_v34  ;;  %v1882_v38 = vmax.f32 %v1222_v29, %v1224_v35  ;;  %v1978_v39 = vmax.f32 %v1735_v30, %v1737_v36 }
 0x24a   : > { %v2074_v40 = vmax.f32 %v1882_v38, %v1978_v39  ;;  %v1227_v41 = vpop.f32.mrb[168].mxu0  ;;  %v1740_v42 = vpop.f32.mrb[168].mxu1 }
 0x24b   : > { %v1228_v43 = vadd.f32 %v1227_v41, %v3523_v4  ;;  %v1741_v44 = vadd.f32 %v1740_v42, %v3525_v5  ;;  %v1229_v45 = vpop.f32.mrb[169].mxu0  ;;  %v1742_v46 = vpop.f32.mrb[169].mxu1 }
 0x24c   : > { %v3112_v47 = vpack.c.bf16 %v2074_v40, %v2073_v37  ;;  %v1230_v48 = vadd.f32 %v1229_v45, %v3527_v6  ;;  %v1743_v49 = vadd.f32 %v1742_v46, %v3529_v7  ;;  %v1231_v50 = vpop.f32.mrb[170].mxu0  ;;  %v1744_v51 = vpop.f32.mrb[170].mxu1 }
 0x24d   : > { %v1232_v52 = vadd.f32 %v1231_v50, %v3523_v4  ;;  %v1745_v53 = vadd.f32 %v1744_v51, %v3525_v5  ;;  %v1233_v54 = vpop.f32.mrb[171].mxu0  ;;  %v1746_v55 = vpop.f32.mrb[171].mxu1 }
 0x24e   : > { %3184 = vst [vmem:[%s3549_s11 + $0x148] sm:$0xff] %v3112_v47   ;;  %v1883_v56 = vmax.f32 %v1228_v43, %v1230_v48  ;;  %v1979_v57 = vmax.f32 %v1741_v44, %v1743_v49  ;;  %v1234_v58 = vadd.f32 %v1233_v54, %v3527_v6  ;;  %v1747_v59 = vadd.f32 %v1746_v55, %v3529_v7 }
 0x250   : > { %v2075_v60 = vmax.f32 %v1883_v56, %v1979_v57  ;;  %v1884_v61 = vmax.f32 %v1232_v52, %v1234_v58  ;;  %v1980_v62 = vmax.f32 %v1745_v53, %v1747_v59 }
 0x252   : > { %v2076_v63 = vmax.f32 %v1884_v61, %v1980_v62  ;;  %v1237_v0 = vpop.f32.mrb[172].mxu0  ;;  %v1750_v1 = vpop.f32.mrb[172].mxu1 }
 0x253   : > { %v1238_v3 = vadd.f32 %v1237_v0, %v3523_v4  ;;  %v1751_v8 = vadd.f32 %v1750_v1, %v3525_v5  ;;  %v1239_v9 = vpop.f32.mrb[173].mxu0  ;;  %v1752_v10 = vpop.f32.mrb[173].mxu1 }
 0x254   : > { %v3117_v11 = vpack.c.bf16 %v2076_v63, %v2075_v60  ;;  %v1240_v12 = vadd.f32 %v1239_v9, %v3527_v6  ;;  %v1753_v13 = vadd.f32 %v1752_v10, %v3529_v7  ;;  %v1241_v14 = vpop.f32.mrb[174].mxu0  ;;  %v1754_v15 = vpop.f32.mrb[174].mxu1 }
 0x255   : > { %v1242_v16 = vadd.f32 %v1241_v14, %v3523_v4  ;;  %v1755_v17 = vadd.f32 %v1754_v15, %v3525_v5  ;;  %v1243_v18 = vpop.f32.mrb[175].mxu0  ;;  %v1756_v19 = vpop.f32.mrb[175].mxu1 }
 0x256   : > { %3185 = vst [vmem:[%s3549_s11 + $0x150] sm:$0xff] %v3117_v11   ;;  %v1885_v20 = vmax.f32 %v1238_v3, %v1240_v12  ;;  %v1981_v21 = vmax.f32 %v1751_v8, %v1753_v13  ;;  %v1244_v22 = vadd.f32 %v1243_v18, %v3527_v6  ;;  %v1757_v23 = vadd.f32 %v1756_v19, %v3529_v7 }
 0x258   : > { %v2077_v24 = vmax.f32 %v1885_v20, %v1981_v21  ;;  %v1886_v25 = vmax.f32 %v1242_v16, %v1244_v22  ;;  %v1982_v26 = vmax.f32 %v1755_v17, %v1757_v23 }
 0x25a   : > { %v2078_v2 = vmax.f32 %v1886_v25, %v1982_v26  ;;  %v1247_v27 = vpop.f32.mrb[176].mxu0  ;;  %v1760_v28 = vpop.f32.mrb[176].mxu1 }
 0x25b   : > { %v1248_v29 = vadd.f32 %v1247_v27, %v3523_v4  ;;  %v1761_v30 = vadd.f32 %v1760_v28, %v3525_v5  ;;  %v1249_v31 = vpop.f32.mrb[177].mxu0  ;;  %v1762_v32 = vpop.f32.mrb[177].mxu1 }
 0x25c   : > { %v3122_v33 = vpack.c.bf16 %v2078_v2, %v2077_v24  ;;  %v1250_v34 = vadd.f32 %v1249_v31, %v3527_v6  ;;  %v1763_v35 = vadd.f32 %v1762_v32, %v3529_v7  ;;  %v1251_v36 = vpop.f32.mrb[178].mxu0  ;;  %v1764_v37 = vpop.f32.mrb[178].mxu1 }
 0x25d   : > { %v1252_v38 = vadd.f32 %v1251_v36, %v3523_v4  ;;  %v1765_v39 = vadd.f32 %v1764_v37, %v3525_v5  ;;  %v1253_v40 = vpop.f32.mrb[179].mxu0  ;;  %v1766_v41 = vpop.f32.mrb[179].mxu1 }
 0x25e   : > { %3186 = vst [vmem:[%s3549_s11 + $0x158] sm:$0xff] %v3122_v33   ;;  %v1887_v42 = vmax.f32 %v1248_v29, %v1250_v34  ;;  %v1983_v43 = vmax.f32 %v1761_v30, %v1763_v35  ;;  %v1254_v44 = vadd.f32 %v1253_v40, %v3527_v6  ;;  %v1767_v45 = vadd.f32 %v1766_v41, %v3529_v7 }
 0x260   : > { %v2079_v46 = vmax.f32 %v1887_v42, %v1983_v43  ;;  %v1888_v47 = vmax.f32 %v1252_v38, %v1254_v44  ;;  %v1984_v48 = vmax.f32 %v1765_v39, %v1767_v45 }
 0x262   : > { %v2080_v49 = vmax.f32 %v1888_v47, %v1984_v48  ;;  %v1257_v50 = vpop.f32.mrb[180].mxu0  ;;  %v1770_v51 = vpop.f32.mrb[180].mxu1 }
 0x263   : > { %v1258_v52 = vadd.f32 %v1257_v50, %v3523_v4  ;;  %v1771_v53 = vadd.f32 %v1770_v51, %v3525_v5  ;;  %v1259_v54 = vpop.f32.mrb[181].mxu0  ;;  %v1772_v55 = vpop.f32.mrb[181].mxu1 }
 0x264   : > { %v3127_v56 = vpack.c.bf16 %v2080_v49, %v2079_v46  ;;  %v1260_v57 = vadd.f32 %v1259_v54, %v3527_v6  ;;  %v1773_v58 = vadd.f32 %v1772_v55, %v3529_v7  ;;  %v1261_v59 = vpop.f32.mrb[182].mxu0  ;;  %v1774_v60 = vpop.f32.mrb[182].mxu1 }
 0x265   : > { %v1262_v61 = vadd.f32 %v1261_v59, %v3523_v4  ;;  %v1775_v62 = vadd.f32 %v1774_v60, %v3525_v5  ;;  %v1263_v63 = vpop.f32.mrb[183].mxu0  ;;  %v1776_v0 = vpop.f32.mrb[183].mxu1 }
 0x266   : > { %3187 = vst [vmem:[%s3549_s11 + $0x160] sm:$0xff] %v3127_v56   ;;  %v1889_v1 = vmax.f32 %v1258_v52, %v1260_v57  ;;  %v1985_v3 = vmax.f32 %v1771_v53, %v1773_v58  ;;  %v1264_v8 = vadd.f32 %v1263_v63, %v3527_v6  ;;  %v1777_v9 = vadd.f32 %v1776_v0, %v3529_v7 }
 0x268   : > { %v2081_v10 = vmax.f32 %v1889_v1, %v1985_v3  ;;  %v1890_v11 = vmax.f32 %v1262_v61, %v1264_v8  ;;  %v1986_v12 = vmax.f32 %v1775_v62, %v1777_v9 }
 0x26a   : > { %v2082_v13 = vmax.f32 %v1890_v11, %v1986_v12  ;;  %v1267_v14 = vpop.f32.mrb[184].mxu0  ;;  %v1780_v15 = vpop.f32.mrb[184].mxu1 }
 0x26b   : > { %v1268_v16 = vadd.f32 %v1267_v14, %v3523_v4  ;;  %v1781_v17 = vadd.f32 %v1780_v15, %v3525_v5  ;;  %v1269_v18 = vpop.f32.mrb[185].mxu0  ;;  %v1782_v19 = vpop.f32.mrb[185].mxu1 }
 0x26c   : > { %v3132_v20 = vpack.c.bf16 %v2082_v13, %v2081_v10  ;;  %v1270_v21 = vadd.f32 %v1269_v18, %v3527_v6  ;;  %v1783_v22 = vadd.f32 %v1782_v19, %v3529_v7  ;;  %v1271_v23 = vpop.f32.mrb[186].mxu0  ;;  %v1784_v24 = vpop.f32.mrb[186].mxu1 }
 0x26d   : > { %v1272_v25 = vadd.f32 %v1271_v23, %v3523_v4  ;;  %v1785_v26 = vadd.f32 %v1784_v24, %v3525_v5  ;;  %v1273_v2 = vpop.f32.mrb[187].mxu0  ;;  %v1786_v27 = vpop.f32.mrb[187].mxu1 }
 0x26e   : > { %3188 = vst [vmem:[%s3549_s11 + $0x168] sm:$0xff] %v3132_v20   ;;  %v1891_v28 = vmax.f32 %v1268_v16, %v1270_v21  ;;  %v1987_v29 = vmax.f32 %v1781_v17, %v1783_v22  ;;  %v1274_v30 = vadd.f32 %v1273_v2, %v3527_v6  ;;  %v1787_v31 = vadd.f32 %v1786_v27, %v3529_v7 }
 0x270   : > { %v2083_v32 = vmax.f32 %v1891_v28, %v1987_v29  ;;  %v1892_v33 = vmax.f32 %v1272_v25, %v1274_v30  ;;  %v1988_v34 = vmax.f32 %v1785_v26, %v1787_v31 }
 0x272   : > { %v2084_v35 = vmax.f32 %v1892_v33, %v1988_v34  ;;  %v1277_v36 = vpop.f32.mrb[188].mxu0  ;;  %v1790_v37 = vpop.f32.mrb[188].mxu1 }
 0x273   : > { %v1278_v38 = vadd.f32 %v1277_v36, %v3523_v4  ;;  %v1791_v39 = vadd.f32 %v1790_v37, %v3525_v5  ;;  %v1279_v40 = vpop.f32.mrb[189].mxu0  ;;  %v1792_v41 = vpop.f32.mrb[189].mxu1 }
 0x274   : > { %v3137_v42 = vpack.c.bf16 %v2084_v35, %v2083_v32  ;;  %v1280_v43 = vadd.f32 %v1279_v40, %v3527_v6  ;;  %v1793_v44 = vadd.f32 %v1792_v41, %v3529_v7  ;;  %v1281_v45 = vpop.f32.mrb[190].mxu0  ;;  %v1794_v46 = vpop.f32.mrb[190].mxu1 }
 0x275   : > { %v1282_v47 = vadd.f32 %v1281_v45, %v3523_v4  ;;  %v1795_v48 = vadd.f32 %v1794_v46, %v3525_v5  ;;  %v1283_v49 = vpop.f32.mrb[191].mxu0  ;;  %v1796_v50 = vpop.f32.mrb[191].mxu1 }
 0x276   : > { %3189 = vst [vmem:[%s3549_s11 + $0x170] sm:$0xff] %v3137_v42   ;;  %v1893_v51 = vmax.f32 %v1278_v38, %v1280_v43  ;;  %v1989_v52 = vmax.f32 %v1791_v39, %v1793_v44  ;;  %v1284_v53 = vadd.f32 %v1283_v49, %v3527_v6  ;;  %v1797_v54 = vadd.f32 %v1796_v50, %v3529_v7 }
 0x278   : > { %v2085_v55 = vmax.f32 %v1893_v51, %v1989_v52  ;;  %v1894_v56 = vmax.f32 %v1282_v47, %v1284_v53  ;;  %v1990_v57 = vmax.f32 %v1795_v48, %v1797_v54 }
 0x27a   : > { %v2086_v58 = vmax.f32 %v1894_v56, %v1990_v57 }
 0x27c   : > { %v3142_v59 = vpack.c.bf16 %v2086_v58, %v2085_v55 }
 0x27e   : > { %3190 = vst [vmem:[%s3549_s11 + $0x178] sm:$0xff] %v3142_v59  }
 0x27f PF: > { %s13_s12 = sadd.s32 1, %s3302_s12  }
 0x280   : > { %p10_p4 = scmp.ge.s32.totalorder %s13_s12, 4  }
 0x282   :  { %12 = sbr.rel (!%p10_p4) target bundleno = 1 (0x1), region = 62 }

// kernel: forward.4
= control target key start
LH: loop header
LB: loop body
LE: loop exit
PB: predicated region body
PF: predicated region fallthrough
CT: control target
= control target key end

     0   :  { %s2352_s12 = smov 0   ;;  %s2649_s0 = inlined_call_operand.vmem [shape: bf16[1280,144], index: 0, kind: input, shape index: {}]   ;;  %s2650_s1 = inlined_call_operand.vmem [shape: bf16[144,128], index: 1, kind: input, shape index: {}]   ;;  %s2651_s2 = inlined_call_operand.vmem [shape: f32[1,128], index: 2, kind: input, shape index: {}]   ;;  %s2652_s3 = inlined_call_operand.vmem [shape: bf16[1280,128], index: 3, kind: output, shape index: {}]  }
   0x1 LB: > { %s1627_s13 = sadd.s32 4294967295, %s2329_s12   ;;  %p1631_p0 = scmp.ge.s32.totalorder %s2329_s12, 1  ;;  %s2329_s12 = sphi %s2352_s12, %s13_s12  }
   0x2   : > { %p139_p1 = scmp.lt.s32.totalorder %s2329_s12, 3 }
   0x4   : > { %p140_p2 = pnand %p1631_p0, %p139_p1 }
   0x5   : > { %v2194_v0 = vld [vmem:[%s2650_s1] sm:$0xff] (!%p140_p2)   ;;  %v2331_v1 = vmov (!%p140_p2), 0   ;;  %s164_s16 = smul.u32 (!%p140_p2), 80, %s1627_s13  ;;  %v2195_v2 = vld [vmem:[%s2650_s1 + $0x8] sm:$0xff] (!%p140_p2)   ;;  %v2196_v3 = vld [vmem:[%s2650_s1 + $0x10] sm:$0xff] (!%p140_p2)   ;;  %vm697_vm0 = vcmask (!%p140_p2), 130048  }
   0x6   : > { %143 = sbr.rel (%p140_p2) target bundleno = 413 (0x19d), region = 32  ;;  %818 = vmatprep.subr.bf16.mxu0 (!%p140_p2), %v2331_v1  ;;  %2167 = vmatprep.subr.bf16.mxu1 (!%p140_p2), %v2331_v1  ;;  %v2197_v4 = vld [vmem:[%s2650_s1 + $0x18] sm:$0xff] (!%p140_p2)   ;;  %v2198_v7 = vld [vmem:[%s2650_s1 + $0x20] sm:$0xff] (!%p140_p2)   ;;  %v2199_v8 = vld [vmem:[%s2650_s1 + $0x28] sm:$0xff] (!%p140_p2)  }
   0x7   : > { %819 = vmatpush1.bf16.msra.mxu0 (!%p140_p2), %v2194_v0  ;;  %2176 = vmatpush1.bf16.msra.mxu1 (!%p140_p2), %v2194_v0  ;;  %p165_p3 = scmp.lt.s32.totalorder (!%p140_p2), %s164_s16, 159  ;;  %v2200_v9 = vld [vmem:[%s2650_s1 + $0x30] sm:$0xff] (!%p140_p2)   ;;  %v2201_v10 = vld [vmem:[%s2650_s1 + $0x38] sm:$0xff] (!%p140_p2)   ;;  %v2202_v11 = vld [vmem:[%s2650_s1 + $0x40] sm:$0xff] (!%p140_p2)  }
   0x8   : > { %820 = vmatprep.subr.bf16.mxu0 (!%p140_p2), %v2331_v1  ;;  %2168 = vmatprep.subr.bf16.mxu1 (!%p140_p2), %v2331_v1 }
   0xb   : > { %821 = vmatpush1.bf16.msra.mxu0 (!%p140_p2), %v2195_v2  ;;  %2177 = vmatpush1.bf16.msra.mxu1 (!%p140_p2), %v2195_v2 }
   0xc   : > { %822 = vmatprep.subr.bf16.mxu0 (!%p140_p2), %v2331_v1  ;;  %2169 = vmatprep.subr.bf16.mxu1 (!%p140_p2), %v2331_v1 }
   0xd   : > { %s2654_s16 = smov (!%p165_p3, %s164_s16), 159 }
   0xe   : > { %s1847_s21 = sshll.u32 %s2654_s16, 3  ;;  %s1634_s13 = sshll.u32 %s2654_s16, 2 }
   0xf   : > { %s2375_s24 = scalar_lea.vmem %s2649_s0, %s1847_s21  ;;  %823 = vmatpush1.bf16.msra.mxu0 %v2196_v3  ;;  %2178 = vmatpush1.bf16.msra.mxu1 %v2196_v3  ;;  %s2528_s17 = scalar_lea.vmem %s2652_s3, %s1634_s13 }
  0x10   : > { %v2205_v5 = vld [vmem:[%s2375_s24 + $0x4] ss:$8 sps:$4 sm:$0xff]   ;;  %824 = vmatprep.subr.bf16.mxu0 %v2331_v1  ;;  %2170 = vmatprep.subr.bf16.mxu1 %v2331_v1  ;;  %v2203_v12 = vld [vmem:[%s2375_s24] ss:$8 sps:$4 sm:$0xff]   ;;  %v2209_v14 = vld [vmem:[%s2375_s24 + $0x14] ss:$8 sps:$4 sm:$0xff]  }
  0x11   : > { %v2208_v6 = vld [vmem:[%s2375_s24 + $0x144] ss:$8 sps:$4 sm:$0xff]   ;;  %1725 = vmatprep.mubr.msk.bf16.mxu0 %vm697_vm0, %v2205_v5  ;;  %v2206_v13 = vld [vmem:[%s2375_s24 + $0x140] ss:$8 sps:$4 sm:$0xff]   ;;  %v2211_v15 = vld [vmem:[%s2375_s24 + $0x154] ss:$8 sps:$4 sm:$0xff]  }
  0x12   : > { %1745 = vmatprep.mubr.msk.bf16.mxu1 %vm697_vm0, %v2208_v6  ;;  %v2213_v16 = vld [vmem:[%s2375_s24 + $0x10] ss:$8 sps:$4 sm:$0xff]   ;;  %v2215_v18 = vld [vmem:[%s2375_s24 + $0x24] ss:$8 sps:$4 sm:$0xff]   ;;  %v2219_v20 = vld [vmem:[%s2375_s24 + $0x20] ss:$8 sps:$4 sm:$0xff]  }
  0x13   : > { %825 = vmatpush1.bf16.msra.mxu0 %v2197_v4  ;;  %2179 = vmatpush1.bf16.msra.mxu1 %v2197_v4  ;;  %v2214_v17 = vld [vmem:[%s2375_s24 + $0x150] ss:$8 sps:$4 sm:$0xff]   ;;  %v2217_v19 = vld [vmem:[%s2375_s24 + $0x164] ss:$8 sps:$4 sm:$0xff]   ;;  %v2220_v21 = vld [vmem:[%s2375_s24 + $0x160] ss:$8 sps:$4 sm:$0xff]  }
  0x14   : > { %826 = vmatprep.subr.bf16.mxu0 %v2331_v1  ;;  %2171 = vmatprep.subr.bf16.mxu1 %v2331_v1  ;;  %v2221_v22 = vld [vmem:[%s2375_s24 + $0x34] ss:$8 sps:$4 sm:$0xff]   ;;  %v2225_v24 = vld [vmem:[%s2375_s24 + $0x30] ss:$8 sps:$4 sm:$0xff]   ;;  %v2227_v26 = vld [vmem:[%s2375_s24 + $0x44] ss:$8 sps:$4 sm:$0xff]  }
  0x15   : > { %v2223_v23 = vld [vmem:[%s2375_s24 + $0x174] ss:$8 sps:$4 sm:$0xff]   ;;  %v2226_v25 = vld [vmem:[%s2375_s24 + $0x170] ss:$8 sps:$4 sm:$0xff]   ;;  %v2229_v27 = vld [vmem:[%s2375_s24 + $0x184] ss:$8 sps:$4 sm:$0xff]  }
  0x16   : > { %v2231_v28 = vld [vmem:[%s2375_s24 + $0x40] ss:$8 sps:$4 sm:$0xff]   ;;  %v2233_v30 = vld [vmem:[%s2375_s24 + $0x54] ss:$8 sps:$4 sm:$0xff]   ;;  %v2237_v32 = vld [vmem:[%s2375_s24 + $0x50] ss:$8 sps:$4 sm:$0xff]  }
  0x17   : > { %827 = vmatpush1.bf16.msra.mxu0 %v2198_v7  ;;  %2180 = vmatpush1.bf16.msra.mxu1 %v2198_v7  ;;  %v2232_v29 = vld [vmem:[%s2375_s24 + $0x180] ss:$8 sps:$4 sm:$0xff]   ;;  %v2235_v31 = vld [vmem:[%s2375_s24 + $0x194] ss:$8 sps:$4 sm:$0xff]   ;;  %v2238_v33 = vld [vmem:[%s2375_s24 + $0x190] ss:$8 sps:$4 sm:$0xff]  }
  0x18   : > { %828 = vmatprep.subr.bf16.mxu0 %v2331_v1  ;;  %2172 = vmatprep.subr.bf16.mxu1 %v2331_v1  ;;  %v2239_v34 = vld [vmem:[%s2375_s24 + $0x64] ss:$8 sps:$4 sm:$0xff]   ;;  %v2243_v36 = vld [vmem:[%s2375_s24 + $0x60] ss:$8 sps:$4 sm:$0xff]   ;;  %v2245_v38 = vld [vmem:[%s2375_s24 + $0x74] ss:$8 sps:$4 sm:$0xff]  }
  0x19   : > { %v2241_v35 = vld [vmem:[%s2375_s24 + $0x1a4] ss:$8 sps:$4 sm:$0xff]   ;;  %v2244_v37 = vld [vmem:[%s2375_s24 + $0x1a0] ss:$8 sps:$4 sm:$0xff]   ;;  %v2247_v39 = vld [vmem:[%s2375_s24 + $0x1b4] ss:$8 sps:$4 sm:$0xff]  }
  0x1a   : > { %v2249_v40 = vld [vmem:[%s2375_s24 + $0x70] ss:$8 sps:$4 sm:$0xff]   ;;  %v2251_v42 = vld [vmem:[%s2375_s24 + $0x84] ss:$8 sps:$4 sm:$0xff]   ;;  %v2255_v44 = vld [vmem:[%s2375_s24 + $0x80] ss:$8 sps:$4 sm:$0xff]  }
  0x1b   : > { %829 = vmatpush1.bf16.msra.mxu0 %v2199_v8  ;;  %2181 = vmatpush1.bf16.msra.mxu1 %v2199_v8  ;;  %v2250_v41 = vld [vmem:[%s2375_s24 + $0x1b0] ss:$8 sps:$4 sm:$0xff]   ;;  %v2253_v43 = vld [vmem:[%s2375_s24 + $0x1c4] ss:$8 sps:$4 sm:$0xff]   ;;  %v2256_v45 = vld [vmem:[%s2375_s24 + $0x1c0] ss:$8 sps:$4 sm:$0xff]  }
  0x1c   : > { %830 = vmatprep.subr.bf16.mxu0 %v2331_v1  ;;  %2173 = vmatprep.subr.bf16.mxu1 %v2331_v1  ;;  %v2257_v46 = vld [vmem:[%s2375_s24 + $0x94] ss:$8 sps:$4 sm:$0xff]   ;;  %v2261_v48 = vld [vmem:[%s2375_s24 + $0x90] ss:$8 sps:$4 sm:$0xff]   ;;  %v2263_v50 = vld [vmem:[%s2375_s24 + $0xa4] ss:$8 sps:$4 sm:$0xff]  }
  0x1d   : > { %v2259_v47 = vld [vmem:[%s2375_s24 + $0x1d4] ss:$8 sps:$4 sm:$0xff]   ;;  %v2262_v49 = vld [vmem:[%s2375_s24 + $0x1d0] ss:$8 sps:$4 sm:$0xff]   ;;  %v2265_v51 = vld [vmem:[%s2375_s24 + $0x1e4] ss:$8 sps:$4 sm:$0xff]  }
  0x1e   : > { %v2267_v52 = vld [vmem:[%s2375_s24 + $0xa0] ss:$8 sps:$4 sm:$0xff]   ;;  %v2269_v54 = vld [vmem:[%s2375_s24 + $0xb4] ss:$8 sps:$4 sm:$0xff]   ;;  %v2273_v56 = vld [vmem:[%s2375_s24 + $0xb0] ss:$8 sps:$4 sm:$0xff]  }
  0x1f   : > { %831 = vmatpush1.bf16.msra.mxu0 %v2200_v9  ;;  %2182 = vmatpush1.bf16.msra.mxu1 %v2200_v9  ;;  %v2268_v53 = vld [vmem:[%s2375_s24 + $0x1e0] ss:$8 sps:$4 sm:$0xff]   ;;  %v2271_v55 = vld [vmem:[%s2375_s24 + $0x1f4] ss:$8 sps:$4 sm:$0xff]   ;;  %v2274_v57 = vld [vmem:[%s2375_s24 + $0x1f0] ss:$8 sps:$4 sm:$0xff]  }
  0x20   : > { %832 = vmatprep.subr.bf16.mxu0 %v2331_v1  ;;  %2174 = vmatprep.subr.bf16.mxu1 %v2331_v1  ;;  %v2275_v58 = vld [vmem:[%s2375_s24 + $0xc4] ss:$8 sps:$4 sm:$0xff]   ;;  %v2279_v60 = vld [vmem:[%s2375_s24 + $0xc0] ss:$8 sps:$4 sm:$0xff]   ;;  %v2281_v62 = vld [vmem:[%s2375_s24 + $0xd4] ss:$8 sps:$4 sm:$0xff]  }
  0x21   : > { %v2277_v59 = vld [vmem:[%s2375_s24 + $0x204] ss:$8 sps:$4 sm:$0xff]   ;;  %v2280_v61 = vld [vmem:[%s2375_s24 + $0x200] ss:$8 sps:$4 sm:$0xff]   ;;  %v2283_v63 = vld [vmem:[%s2375_s24 + $0x214] ss:$8 sps:$4 sm:$0xff]  }
  0x22   : > { %v2285_v0 = vld [vmem:[%s2375_s24 + $0xd0] ss:$8 sps:$4 sm:$0xff]   ;;  %v2287_v2 = vld [vmem:[%s2375_s24 + $0xe4] ss:$8 sps:$4 sm:$0xff]   ;;  %v2291_v4 = vld [vmem:[%s2375_s24 + $0xe0] ss:$8 sps:$4 sm:$0xff]  }
  0x23   : > { %833 = vmatpush1.bf16.msra.mxu0 %v2201_v10  ;;  %2183 = vmatpush1.bf16.msra.mxu1 %v2201_v10  ;;  %v2289_v3 = vld [vmem:[%s2375_s24 + $0x224] ss:$8 sps:$4 sm:$0xff]   ;;  %v2292_v5 = vld [vmem:[%s2375_s24 + $0x220] ss:$8 sps:$4 sm:$0xff]   ;;  %v2293_v6 = vld [vmem:[%s2375_s24 + $0xf4] ss:$8 sps:$4 sm:$0xff]  }
  0x24   : > { %834 = vmatprep.subr.bf16.mxu0 %v2331_v1  ;;  %2175 = vmatprep.subr.bf16.mxu1 %v2331_v1  ;;  %v2286_v1 = vld [vmem:[%s2375_s24 + $0x210] ss:$8 sps:$4 sm:$0xff]   ;;  %v2295_v7 = vld [vmem:[%s2375_s24 + $0x234] ss:$8 sps:$4 sm:$0xff]   ;;  %v2299_v10 = vld [vmem:[%s2375_s24 + $0x104] ss:$8 sps:$4 sm:$0xff]  }
  0x25   : > { %v2297_v8 = vld [vmem:[%s2375_s24 + $0xf0] ss:$8 sps:$4 sm:$0xff]  }
  0x26   : > { %v2298_v9 = vld [vmem:[%s2375_s24 + $0x230] ss:$8 sps:$4 sm:$0xff]  }
  0x27   : > { %835 = vmatpush1.bf16.msra.mxu0 %v2202_v11  ;;  %2184 = vmatpush1.bf16.msra.mxu1 %v2202_v11  ;;  %v2301_v11 = vld [vmem:[%s2375_s24 + $0x244] ss:$8 sps:$4 sm:$0xff]  }
  0x2a   : > { %851 = vmatmul.mubr.bf16.vlgmr.msra.gmra.mrb[0].mxu0 %v2203_v12  ;;  %1011 = vmatmul.mubr.bf16.vlgmr.msra.gmra.mrb[0].mxu1 %v2206_v13  ;;  %v2303_v12 = vld [vmem:[%s2375_s24 + $0x100] ss:$8 sps:$4 sm:$0xff]  }
  0x2b   : > { %1726 = vmatprep.mubr.msk.bf16.mxu0 %vm697_vm0, %v2209_v14  ;;  %1746 = vmatprep.mubr.msk.bf16.mxu1 %vm697_vm0, %v2211_v15  ;;  %v2304_v13 = vld [vmem:[%s2375_s24 + $0x240] ss:$8 sps:$4 sm:$0xff]   ;;  %v2305_v14 = vld [vmem:[%s2375_s24 + $0x114] ss:$8 sps:$4 sm:$0xff]  }
  0x2c   : > { %v2307_v15 = vld [vmem:[%s2375_s24 + $0x254] ss:$8 sps:$4 sm:$0xff]  }
  0x32   : > { %859 = vmatmul.mubr.bf16.gmra.mrb[4].mxu0 %v2213_v16  ;;  %1019 = vmatmul.mubr.bf16.gmra.mrb[4].mxu1 %v2214_v17  ;;  %v2309_v16 = vld [vmem:[%s2375_s24 + $0x110] ss:$8 sps:$4 sm:$0xff]  }
  0x33   : > { %1727 = vmatprep.mubr.msk.bf16.mxu0 %vm697_vm0, %v2215_v18  ;;  %1747 = vmatprep.mubr.msk.bf16.mxu1 %vm697_vm0, %v2217_v19  ;;  %v2310_v17 = vld [vmem:[%s2375_s24 + $0x250] ss:$8 sps:$4 sm:$0xff]   ;;  %v2311_v18 = vld [vmem:[%s2375_s24 + $0x124] ss:$8 sps:$4 sm:$0xff]  }
  0x34   : > { %v2313_v19 = vld [vmem:[%s2375_s24 + $0x264] ss:$8 sps:$4 sm:$0xff]  }
  0x3a   : > { %867 = vmatmul.mubr.bf16.gmra.mrb[8].mxu0 %v2219_v20  ;;  %1027 = vmatmul.mubr.bf16.gmra.mrb[8].mxu1 %v2220_v21  ;;  %v2315_v20 = vld [vmem:[%s2375_s24 + $0x120] ss:$8 sps:$4 sm:$0xff]  }
  0x3b   : > { %1728 = vmatprep.mubr.msk.bf16.mxu0 %vm697_vm0, %v2221_v22  ;;  %1748 = vmatprep.mubr.msk.bf16.mxu1 %vm697_vm0, %v2223_v23  ;;  %v2316_v21 = vld [vmem:[%s2375_s24 + $0x260] ss:$8 sps:$4 sm:$0xff]   ;;  %v2317_v22 = vld [vmem:[%s2375_s24 + $0x134] ss:$8 sps:$4 sm:$0xff]  }
  0x3c   : > { %v2319_v23 = vld [vmem:[%s2375_s24 + $0x274] ss:$8 sps:$4 sm:$0xff]  }
  0x42   : > { %875 = vmatmul.mubr.bf16.gmra.mrb[12].mxu0 %v2225_v24  ;;  %1035 = vmatmul.mubr.bf16.gmra.mrb[12].mxu1 %v2226_v25  ;;  %v2321_v24 = vld [vmem:[%s2375_s24 + $0x130] ss:$8 sps:$4 sm:$0xff]  }
  0x43   : > { %1729 = vmatprep.mubr.msk.bf16.mxu0 %vm697_vm0, %v2227_v26  ;;  %1749 = vmatprep.mubr.msk.bf16.mxu1 %vm697_vm0, %v2229_v27  ;;  %v2322_v25 = vld [vmem:[%s2375_s24 + $0x270] ss:$8 sps:$4 sm:$0xff]   ;;  %v2518_v26 = vld [vmem:[%s2651_s2] ss:$0 sm:$0xff] }
  0x4a   : > { %883 = vmatmul.mubr.bf16.gmra.mrb[16].mxu0 %v2231_v28  ;;  %1043 = vmatmul.mubr.bf16.gmra.mrb[16].mxu1 %v2232_v29 }
  0x4b   : > { %1730 = vmatprep.mubr.msk.bf16.mxu0 %vm697_vm0, %v2233_v30  ;;  %1750 = vmatprep.mubr.msk.bf16.mxu1 %vm697_vm0, %v2235_v31 }
  0x52   : > { %891 = vmatmul.mubr.bf16.gmra.mrb[20].mxu0 %v2237_v32  ;;  %1051 = vmatmul.mubr.bf16.gmra.mrb[20].mxu1 %v2238_v33 }
  0x53   : > { %1731 = vmatprep.mubr.msk.bf16.mxu0 %vm697_vm0, %v2239_v34  ;;  %1751 = vmatprep.mubr.msk.bf16.mxu1 %vm697_vm0, %v2241_v35 }
  0x5a   : > { %899 = vmatmul.mubr.bf16.gmra.mrb[24].mxu0 %v2243_v36  ;;  %1059 = vmatmul.mubr.bf16.gmra.mrb[24].mxu1 %v2244_v37 }
  0x5b   : > { %1732 = vmatprep.mubr.msk.bf16.mxu0 %vm697_vm0, %v2245_v38  ;;  %1752 = vmatprep.mubr.msk.bf16.mxu1 %vm697_vm0, %v2247_v39 }
  0x62   : > { %907 = vmatmul.mubr.bf16.gmra.mrb[28].mxu0 %v2249_v40  ;;  %1067 = vmatmul.mubr.bf16.gmra.mrb[28].mxu1 %v2250_v41 }
  0x63   : > { %1733 = vmatprep.mubr.msk.bf16.mxu0 %vm697_vm0, %v2251_v42  ;;  %1753 = vmatprep.mubr.msk.bf16.mxu1 %vm697_vm0, %v2253_v43 }
  0x6a   : > { %915 = vmatmul.mubr.bf16.gmra.mrb[32].mxu0 %v2255_v44  ;;  %1075 = vmatmul.mubr.bf16.gmra.mrb[32].mxu1 %v2256_v45 }
  0x6b   : > { %1734 = vmatprep.mubr.msk.bf16.mxu0 %vm697_vm0, %v2257_v46  ;;  %1754 = vmatprep.mubr.msk.bf16.mxu1 %vm697_vm0, %v2259_v47 }
  0x72   : > { %923 = vmatmul.mubr.bf16.gmra.mrb[36].mxu0 %v2261_v48  ;;  %1083 = vmatmul.mubr.bf16.gmra.mrb[36].mxu1 %v2262_v49 }
  0x73   : > { %1735 = vmatprep.mubr.msk.bf16.mxu0 %vm697_vm0, %v2263_v50  ;;  %1755 = vmatprep.mubr.msk.bf16.mxu1 %vm697_vm0, %v2265_v51 }
  0x7a   : > { %931 = vmatmul.mubr.bf16.gmra.mrb[40].mxu0 %v2267_v52  ;;  %1091 = vmatmul.mubr.bf16.gmra.mrb[40].mxu1 %v2268_v53 }
  0x7b   : > { %1736 = vmatprep.mubr.msk.bf16.mxu0 %vm697_vm0, %v2269_v54  ;;  %1756 = vmatprep.mubr.msk.bf16.mxu1 %vm697_vm0, %v2271_v55 }
  0x82   : > { %939 = vmatmul.mubr.bf16.gmra.mrb[44].mxu0 %v2273_v56  ;;  %1099 = vmatmul.mubr.bf16.gmra.mrb[44].mxu1 %v2274_v57 }
  0x83   : > { %1737 = vmatprep.mubr.msk.bf16.mxu0 %vm697_vm0, %v2275_v58  ;;  %1757 = vmatprep.mubr.msk.bf16.mxu1 %vm697_vm0, %v2277_v59 }
  0x8a   : > { %947 = vmatmul.mubr.bf16.gmra.mrb[48].mxu0 %v2279_v60  ;;  %1107 = vmatmul.mubr.bf16.gmra.mrb[48].mxu1 %v2280_v61 }
  0x8b   : > { %1738 = vmatprep.mubr.msk.bf16.mxu0 %vm697_vm0, %v2281_v62  ;;  %1758 = vmatprep.mubr.msk.bf16.mxu1 %vm697_vm0, %v2283_v63 }
  0x92   : > { %955 = vmatmul.mubr.bf16.gmra.mrb[52].mxu0 %v2285_v0  ;;  %1115 = vmatmul.mubr.bf16.gmra.mrb[52].mxu1 %v2286_v1 }
  0x93   : > { %1739 = vmatprep.mubr.msk.bf16.mxu0 %vm697_vm0, %v2287_v2  ;;  %1759 = vmatprep.mubr.msk.bf16.mxu1 %vm697_vm0, %v2289_v3 }
  0x9a   : > { %963 = vmatmul.mubr.bf16.gmra.mrb[56].mxu0 %v2291_v4  ;;  %1123 = vmatmul.mubr.bf16.gmra.mrb[56].mxu1 %v2292_v5 }
  0x9b   : > { %1740 = vmatprep.mubr.msk.bf16.mxu0 %vm697_vm0, %v2293_v6  ;;  %1760 = vmatprep.mubr.msk.bf16.mxu1 %vm697_vm0, %v2295_v7 }
  0xa2   : > { %971 = vmatmul.mubr.bf16.gmra.mrb[60].mxu0 %v2297_v8  ;;  %1131 = vmatmul.mubr.bf16.gmra.mrb[60].mxu1 %v2298_v9 }
  0xa3   : > { %1741 = vmatprep.mubr.msk.bf16.mxu0 %vm697_vm0, %v2299_v10  ;;  %1761 = vmatprep.mubr.msk.bf16.mxu1 %vm697_vm0, %v2301_v11 }
  0xaa   : > { %979 = vmatmul.mubr.bf16.gmra.mrb[64].mxu0 %v2303_v12  ;;  %1139 = vmatmul.mubr.bf16.gmra.mrb[64].mxu1 %v2304_v13 }
  0xab   : > { %1742 = vmatprep.mubr.msk.bf16.mxu0 %vm697_vm0, %v2305_v14  ;;  %1762 = vmatprep.mubr.msk.bf16.mxu1 %vm697_vm0, %v2307_v15 }
  0xb2   : > { %987 = vmatmul.mubr.bf16.gmra.mrb[68].mxu0 %v2309_v16  ;;  %1147 = vmatmul.mubr.bf16.gmra.mrb[68].mxu1 %v2310_v17 }
  0xb3   : > { %1743 = vmatprep.mubr.msk.bf16.mxu0 %vm697_vm0, %v2311_v18  ;;  %1763 = vmatprep.mubr.msk.bf16.mxu1 %vm697_vm0, %v2313_v19 }
  0xba   : > { %995 = vmatmul.mubr.bf16.gmra.mrb[72].mxu0 %v2315_v20  ;;  %1155 = vmatmul.mubr.bf16.gmra.mrb[72].mxu1 %v2316_v21 }
  0xbb   : > { %1744 = vmatprep.mubr.msk.bf16.mxu0 %vm697_vm0, %v2317_v22  ;;  %1764 = vmatprep.mubr.msk.bf16.mxu1 %vm697_vm0, %v2319_v23 }
  0xc2   : > { %1003 = vmatmul.mubr.bf16.gmra.mrb[76].mxu0 %v2321_v24  ;;  %1163 = vmatmul.mubr.bf16.gmra.mrb[76].mxu1 %v2322_v25 }
  0xfd   : > { %v852_v27 = vpop.f32.mrb[0].mxu0  ;;  %v1012_v28 = vpop.f32.mrb[0].mxu1 }
  0xfe   : > { %v854_v29 = vpop.f32.mrb[1].mxu0  ;;  %v1014_v30 = vpop.f32.mrb[1].mxu1  ;;  %v853_v33 = vadd.f32 %v2518_v26, %v852_v27  ;;  %v1013_v34 = vadd.f32 %v2518_v26, %v1012_v28 }
  0xff   : > { %v855_v31 = vpop.f32.mrb[2].mxu0  ;;  %v1015_v32 = vpop.f32.mrb[2].mxu1 }
 0x100   : > { %v856_v35 = vadd.f32 %v2518_v26, %v855_v31  ;;  %v1016_v36 = vadd.f32 %v2518_v26, %v1015_v32  ;;  %v857_v37 = vpop.f32.mrb[3].mxu0  ;;  %v1017_v38 = vpop.f32.mrb[3].mxu1 }
 0x102   : > { %v1931_v39 = vpack.c.bf16 %v856_v35, %v853_v33  ;;  %v2031_v40 = vpack.c.bf16 %v1016_v36, %v1013_v34 }
 0x104   : > { %1932 = vst [vmem:[%s2528_s17] sm:$0xff] %v1931_v39   ;;  %2147 = vst [vmem:[%s2528_s17 + $0xa0] sm:$0xff] %v2031_v40  }
 0x105   : > { %v860_v41 = vpop.f32.mrb[4].mxu0  ;;  %v1020_v42 = vpop.f32.mrb[4].mxu1 }
 0x106   : > { %v862_v43 = vpop.f32.mrb[5].mxu0  ;;  %v1022_v44 = vpop.f32.mrb[5].mxu1  ;;  %v861_v47 = vadd.f32 %v2518_v26, %v860_v41  ;;  %v1021_v48 = vadd.f32 %v2518_v26, %v1020_v42 }
 0x107   : > { %v863_v45 = vpop.f32.mrb[6].mxu0  ;;  %v1023_v46 = vpop.f32.mrb[6].mxu1 }
 0x108   : > { %v864_v49 = vadd.f32 %v2518_v26, %v863_v45  ;;  %v1024_v50 = vadd.f32 %v2518_v26, %v1023_v46  ;;  %v865_v51 = vpop.f32.mrb[7].mxu0  ;;  %v1025_v52 = vpop.f32.mrb[7].mxu1 }
 0x10a   : > { %v1936_v53 = vpack.c.bf16 %v864_v49, %v861_v47  ;;  %v2036_v54 = vpack.c.bf16 %v1024_v50, %v1021_v48 }
 0x10c   : > { %2128 = vst [vmem:[%s2528_s17 + $0x8] sm:$0xff] %v1936_v53   ;;  %2148 = vst [vmem:[%s2528_s17 + $0xa8] sm:$0xff] %v2036_v54  }
 0x10d   : > { %v868_v55 = vpop.f32.mrb[8].mxu0  ;;  %v1028_v56 = vpop.f32.mrb[8].mxu1 }
 0x10e   : > { %v870_v57 = vpop.f32.mrb[9].mxu0  ;;  %v1030_v58 = vpop.f32.mrb[9].mxu1  ;;  %v869_v61 = vadd.f32 %v2518_v26, %v868_v55  ;;  %v1029_v62 = vadd.f32 %v2518_v26, %v1028_v56 }
 0x10f   : > { %v871_v59 = vpop.f32.mrb[10].mxu0  ;;  %v1031_v60 = vpop.f32.mrb[10].mxu1 }
 0x110   : > { %v872_v63 = vadd.f32 %v2518_v26, %v871_v59  ;;  %v1032_v0 = vadd.f32 %v2518_v26, %v1031_v60  ;;  %v873_v1 = vpop.f32.mrb[11].mxu0  ;;  %v1033_v2 = vpop.f32.mrb[11].mxu1 }
 0x112   : > { %v1941_v3 = vpack.c.bf16 %v872_v63, %v869_v61  ;;  %v2041_v4 = vpack.c.bf16 %v1032_v0, %v1029_v62 }
 0x114   : > { %2129 = vst [vmem:[%s2528_s17 + $0x10] sm:$0xff] %v1941_v3   ;;  %2149 = vst [vmem:[%s2528_s17 + $0xb0] sm:$0xff] %v2041_v4  }
 0x115   : > { %v876_v5 = vpop.f32.mrb[12].mxu0  ;;  %v1036_v6 = vpop.f32.mrb[12].mxu1 }
 0x116   : > { %v878_v7 = vpop.f32.mrb[13].mxu0  ;;  %v1038_v8 = vpop.f32.mrb[13].mxu1  ;;  %v877_v11 = vadd.f32 %v2518_v26, %v876_v5  ;;  %v1037_v12 = vadd.f32 %v2518_v26, %v1036_v6 }
 0x117   : > { %v879_v9 = vpop.f32.mrb[14].mxu0  ;;  %v1039_v10 = vpop.f32.mrb[14].mxu1 }
 0x118   : > { %v880_v13 = vadd.f32 %v2518_v26, %v879_v9  ;;  %v1040_v14 = vadd.f32 %v2518_v26, %v1039_v10  ;;  %v881_v15 = vpop.f32.mrb[15].mxu0  ;;  %v1041_v16 = vpop.f32.mrb[15].mxu1 }
 0x11a   : > { %v1946_v17 = vpack.c.bf16 %v880_v13, %v877_v11  ;;  %v2046_v18 = vpack.c.bf16 %v1040_v14, %v1037_v12 }
 0x11c   : > { %2130 = vst [vmem:[%s2528_s17 + $0x18] sm:$0xff] %v1946_v17   ;;  %2150 = vst [vmem:[%s2528_s17 + $0xb8] sm:$0xff] %v2046_v18  }
 0x11d   : > { %v884_v19 = vpop.f32.mrb[16].mxu0  ;;  %v1044_v20 = vpop.f32.mrb[16].mxu1 }
 0x11e   : > { %v886_v21 = vpop.f32.mrb[17].mxu0  ;;  %v1046_v22 = vpop.f32.mrb[17].mxu1  ;;  %v885_v25 = vadd.f32 %v2518_v26, %v884_v19  ;;  %v1045_v27 = vadd.f32 %v2518_v26, %v1044_v20 }
 0x11f   : > { %v887_v23 = vpop.f32.mrb[18].mxu0  ;;  %v1047_v24 = vpop.f32.mrb[18].mxu1 }
 0x120   : > { %v888_v28 = vadd.f32 %v2518_v26, %v887_v23  ;;  %v1048_v29 = vadd.f32 %v2518_v26, %v1047_v24  ;;  %v889_v30 = vpop.f32.mrb[19].mxu0  ;;  %v1049_v31 = vpop.f32.mrb[19].mxu1 }
 0x122   : > { %v1951_v32 = vpack.c.bf16 %v888_v28, %v885_v25  ;;  %v2051_v33 = vpack.c.bf16 %v1048_v29, %v1045_v27 }
 0x124   : > { %2131 = vst [vmem:[%s2528_s17 + $0x20] sm:$0xff] %v1951_v32   ;;  %2151 = vst [vmem:[%s2528_s17 + $0xc0] sm:$0xff] %v2051_v33  }
 0x125   : > { %v892_v34 = vpop.f32.mrb[20].mxu0  ;;  %v1052_v35 = vpop.f32.mrb[20].mxu1 }
 0x126   : > { %v894_v36 = vpop.f32.mrb[21].mxu0  ;;  %v1054_v37 = vpop.f32.mrb[21].mxu1  ;;  %v893_v40 = vadd.f32 %v2518_v26, %v892_v34  ;;  %v1053_v41 = vadd.f32 %v2518_v26, %v1052_v35 }
 0x127   : > { %v895_v38 = vpop.f32.mrb[22].mxu0  ;;  %v1055_v39 = vpop.f32.mrb[22].mxu1 }
 0x128   : > { %v896_v42 = vadd.f32 %v2518_v26, %v895_v38  ;;  %v1056_v43 = vadd.f32 %v2518_v26, %v1055_v39  ;;  %v897_v44 = vpop.f32.mrb[23].mxu0  ;;  %v1057_v45 = vpop.f32.mrb[23].mxu1 }
 0x12a   : > { %v1956_v46 = vpack.c.bf16 %v896_v42, %v893_v40  ;;  %v2056_v47 = vpack.c.bf16 %v1056_v43, %v1053_v41 }
 0x12c   : > { %2132 = vst [vmem:[%s2528_s17 + $0x28] sm:$0xff] %v1956_v46   ;;  %2152 = vst [vmem:[%s2528_s17 + $0xc8] sm:$0xff] %v2056_v47  }
 0x12d   : > { %v900_v48 = vpop.f32.mrb[24].mxu0  ;;  %v1060_v49 = vpop.f32.mrb[24].mxu1 }
 0x12e   : > { %v902_v50 = vpop.f32.mrb[25].mxu0  ;;  %v1062_v51 = vpop.f32.mrb[25].mxu1  ;;  %v901_v54 = vadd.f32 %v2518_v26, %v900_v48  ;;  %v1061_v55 = vadd.f32 %v2518_v26, %v1060_v49 }
 0x12f   : > { %v903_v52 = vpop.f32.mrb[26].mxu0  ;;  %v1063_v53 = vpop.f32.mrb[26].mxu1 }
 0x130   : > { %v904_v56 = vadd.f32 %v2518_v26, %v903_v52  ;;  %v1064_v57 = vadd.f32 %v2518_v26, %v1063_v53  ;;  %v905_v58 = vpop.f32.mrb[27].mxu0  ;;  %v1065_v59 = vpop.f32.mrb[27].mxu1 }
 0x132   : > { %v1961_v60 = vpack.c.bf16 %v904_v56, %v901_v54  ;;  %v2061_v61 = vpack.c.bf16 %v1064_v57, %v1061_v55 }
 0x134   : > { %2133 = vst [vmem:[%s2528_s17 + $0x30] sm:$0xff] %v1961_v60   ;;  %2153 = vst [vmem:[%s2528_s17 + $0xd0] sm:$0xff] %v2061_v61  }
 0x135   : > { %v908_v62 = vpop.f32.mrb[28].mxu0  ;;  %v1068_v63 = vpop.f32.mrb[28].mxu1 }
 0x136   : > { %v910_v0 = vpop.f32.mrb[29].mxu0  ;;  %v1070_v1 = vpop.f32.mrb[29].mxu1  ;;  %v909_v4 = vadd.f32 %v2518_v26, %v908_v62  ;;  %v1069_v5 = vadd.f32 %v2518_v26, %v1068_v63 }
 0x137   : > { %v911_v2 = vpop.f32.mrb[30].mxu0  ;;  %v1071_v3 = vpop.f32.mrb[30].mxu1 }
 0x138   : > { %v912_v6 = vadd.f32 %v2518_v26, %v911_v2  ;;  %v1072_v7 = vadd.f32 %v2518_v26, %v1071_v3  ;;  %v913_v8 = vpop.f32.mrb[31].mxu0  ;;  %v1073_v9 = vpop.f32.mrb[31].mxu1 }
 0x13a   : > { %v1966_v10 = vpack.c.bf16 %v912_v6, %v909_v4  ;;  %v2066_v11 = vpack.c.bf16 %v1072_v7, %v1069_v5 }
 0x13c   : > { %2134 = vst [vmem:[%s2528_s17 + $0x38] sm:$0xff] %v1966_v10   ;;  %2154 = vst [vmem:[%s2528_s17 + $0xd8] sm:$0xff] %v2066_v11  }
 0x13d   : > { %v916_v12 = vpop.f32.mrb[32].mxu0  ;;  %v1076_v13 = vpop.f32.mrb[32].mxu1 }
 0x13e   : > { %v918_v14 = vpop.f32.mrb[33].mxu0  ;;  %v1078_v15 = vpop.f32.mrb[33].mxu1  ;;  %v917_v18 = vadd.f32 %v2518_v26, %v916_v12  ;;  %v1077_v19 = vadd.f32 %v2518_v26, %v1076_v13 }
 0x13f   : > { %v919_v16 = vpop.f32.mrb[34].mxu0  ;;  %v1079_v17 = vpop.f32.mrb[34].mxu1 }
 0x140   : > { %v920_v20 = vadd.f32 %v2518_v26, %v919_v16  ;;  %v1080_v21 = vadd.f32 %v2518_v26, %v1079_v17  ;;  %v921_v22 = vpop.f32.mrb[35].mxu0  ;;  %v1081_v23 = vpop.f32.mrb[35].mxu1 }
 0x142   : > { %v1971_v24 = vpack.c.bf16 %v920_v20, %v917_v18  ;;  %v2071_v25 = vpack.c.bf16 %v1080_v21, %v1077_v19 }
 0x144   : > { %2135 = vst [vmem:[%s2528_s17 + $0x40] sm:$0xff] %v1971_v24   ;;  %2155 = vst [vmem:[%s2528_s17 + $0xe0] sm:$0xff] %v2071_v25  }
 0x145   : > { %v924_v27 = vpop.f32.mrb[36].mxu0  ;;  %v1084_v28 = vpop.f32.mrb[36].mxu1 }
 0x146   : > { %v926_v29 = vpop.f32.mrb[37].mxu0  ;;  %v1086_v30 = vpop.f32.mrb[37].mxu1  ;;  %v925_v33 = vadd.f32 %v2518_v26, %v924_v27  ;;  %v1085_v34 = vadd.f32 %v2518_v26, %v1084_v28 }
 0x147   : > { %v927_v31 = vpop.f32.mrb[38].mxu0  ;;  %v1087_v32 = vpop.f32.mrb[38].mxu1 }
 0x148   : > { %v928_v35 = vadd.f32 %v2518_v26, %v927_v31  ;;  %v1088_v36 = vadd.f32 %v2518_v26, %v1087_v32  ;;  %v929_v37 = vpop.f32.mrb[39].mxu0  ;;  %v1089_v38 = vpop.f32.mrb[39].mxu1 }
 0x14a   : > { %v1976_v39 = vpack.c.bf16 %v928_v35, %v925_v33  ;;  %v2076_v40 = vpack.c.bf16 %v1088_v36, %v1085_v34 }
 0x14c   : > { %2136 = vst [vmem:[%s2528_s17 + $0x48] sm:$0xff] %v1976_v39   ;;  %2156 = vst [vmem:[%s2528_s17 + $0xe8] sm:$0xff] %v2076_v40  }
 0x14d   : > { %v932_v41 = vpop.f32.mrb[40].mxu0  ;;  %v1092_v42 = vpop.f32.mrb[40].mxu1 }
 0x14e   : > { %v934_v43 = vpop.f32.mrb[41].mxu0  ;;  %v1094_v44 = vpop.f32.mrb[41].mxu1  ;;  %v933_v47 = vadd.f32 %v2518_v26, %v932_v41  ;;  %v1093_v48 = vadd.f32 %v2518_v26, %v1092_v42 }
 0x14f   : > { %v935_v45 = vpop.f32.mrb[42].mxu0  ;;  %v1095_v46 = vpop.f32.mrb[42].mxu1 }
 0x150   : > { %v936_v49 = vadd.f32 %v2518_v26, %v935_v45  ;;  %v1096_v50 = vadd.f32 %v2518_v26, %v1095_v46  ;;  %v937_v51 = vpop.f32.mrb[43].mxu0  ;;  %v1097_v52 = vpop.f32.mrb[43].mxu1 }
 0x152   : > { %v1981_v53 = vpack.c.bf16 %v936_v49, %v933_v47  ;;  %v2081_v54 = vpack.c.bf16 %v1096_v50, %v1093_v48 }
 0x154   : > { %2137 = vst [vmem:[%s2528_s17 + $0x50] sm:$0xff] %v1981_v53   ;;  %2157 = vst [vmem:[%s2528_s17 + $0xf0] sm:$0xff] %v2081_v54  }
 0x155   : > { %v940_v55 = vpop.f32.mrb[44].mxu0  ;;  %v1100_v56 = vpop.f32.mrb[44].mxu1 }
 0x156   : > { %v942_v57 = vpop.f32.mrb[45].mxu0  ;;  %v1102_v58 = vpop.f32.mrb[45].mxu1  ;;  %v941_v61 = vadd.f32 %v2518_v26, %v940_v55  ;;  %v1101_v62 = vadd.f32 %v2518_v26, %v1100_v56 }
 0x157   : > { %v943_v59 = vpop.f32.mrb[46].mxu0  ;;  %v1103_v60 = vpop.f32.mrb[46].mxu1 }
 0x158   : > { %v944_v63 = vadd.f32 %v2518_v26, %v943_v59  ;;  %v1104_v0 = vadd.f32 %v2518_v26, %v1103_v60  ;;  %v945_v1 = vpop.f32.mrb[47].mxu0  ;;  %v1105_v2 = vpop.f32.mrb[47].mxu1 }
 0x15a   : > { %v1986_v3 = vpack.c.bf16 %v944_v63, %v941_v61  ;;  %v2086_v4 = vpack.c.bf16 %v1104_v0, %v1101_v62 }
 0x15c   : > { %2138 = vst [vmem:[%s2528_s17 + $0x58] sm:$0xff] %v1986_v3   ;;  %2158 = vst [vmem:[%s2528_s17 + $0xf8] sm:$0xff] %v2086_v4  }
 0x15d   : > { %v948_v5 = vpop.f32.mrb[48].mxu0  ;;  %v1108_v6 = vpop.f32.mrb[48].mxu1 }
 0x15e   : > { %v950_v7 = vpop.f32.mrb[49].mxu0  ;;  %v1110_v8 = vpop.f32.mrb[49].mxu1  ;;  %v949_v11 = vadd.f32 %v2518_v26, %v948_v5  ;;  %v1109_v12 = vadd.f32 %v2518_v26, %v1108_v6 }
 0x15f   : > { %v951_v9 = vpop.f32.mrb[50].mxu0  ;;  %v1111_v10 = vpop.f32.mrb[50].mxu1 }
 0x160   : > { %v952_v13 = vadd.f32 %v2518_v26, %v951_v9  ;;  %v1112_v14 = vadd.f32 %v2518_v26, %v1111_v10  ;;  %v953_v15 = vpop.f32.mrb[51].mxu0  ;;  %v1113_v16 = vpop.f32.mrb[51].mxu1 }
 0x162   : > { %v1991_v17 = vpack.c.bf16 %v952_v13, %v949_v11  ;;  %v2091_v18 = vpack.c.bf16 %v1112_v14, %v1109_v12 }
 0x164   : > { %2139 = vst [vmem:[%s2528_s17 + $0x60] sm:$0xff] %v1991_v17   ;;  %2159 = vst [vmem:[%s2528_s17 + $0x100] sm:$0xff] %v2091_v18  }
 0x165   : > { %v956_v19 = vpop.f32.mrb[52].mxu0  ;;  %v1116_v20 = vpop.f32.mrb[52].mxu1 }
 0x166   : > { %v958_v21 = vpop.f32.mrb[53].mxu0  ;;  %v1118_v22 = vpop.f32.mrb[53].mxu1  ;;  %v957_v25 = vadd.f32 %v2518_v26, %v956_v19  ;;  %v1117_v27 = vadd.f32 %v2518_v26, %v1116_v20 }
 0x167   : > { %v959_v23 = vpop.f32.mrb[54].mxu0  ;;  %v1119_v24 = vpop.f32.mrb[54].mxu1 }
 0x168   : > { %v960_v28 = vadd.f32 %v2518_v26, %v959_v23  ;;  %v1120_v29 = vadd.f32 %v2518_v26, %v1119_v24  ;;  %v961_v30 = vpop.f32.mrb[55].mxu0  ;;  %v1121_v31 = vpop.f32.mrb[55].mxu1 }
 0x16a   : > { %v1996_v32 = vpack.c.bf16 %v960_v28, %v957_v25  ;;  %v2096_v33 = vpack.c.bf16 %v1120_v29, %v1117_v27 }
 0x16c   : > { %2140 = vst [vmem:[%s2528_s17 + $0x68] sm:$0xff] %v1996_v32   ;;  %2160 = vst [vmem:[%s2528_s17 + $0x108] sm:$0xff] %v2096_v33  }
 0x16d   : > { %v964_v34 = vpop.f32.mrb[56].mxu0  ;;  %v1124_v35 = vpop.f32.mrb[56].mxu1 }
 0x16e   : > { %v966_v36 = vpop.f32.mrb[57].mxu0  ;;  %v1126_v37 = vpop.f32.mrb[57].mxu1  ;;  %v965_v40 = vadd.f32 %v2518_v26, %v964_v34  ;;  %v1125_v41 = vadd.f32 %v2518_v26, %v1124_v35 }
 0x16f   : > { %v967_v38 = vpop.f32.mrb[58].mxu0  ;;  %v1127_v39 = vpop.f32.mrb[58].mxu1 }
 0x170   : > { %v968_v42 = vadd.f32 %v2518_v26, %v967_v38  ;;  %v1128_v43 = vadd.f32 %v2518_v26, %v1127_v39  ;;  %v969_v44 = vpop.f32.mrb[59].mxu0  ;;  %v1129_v45 = vpop.f32.mrb[59].mxu1 }
 0x172   : > { %v2001_v46 = vpack.c.bf16 %v968_v42, %v965_v40  ;;  %v2101_v47 = vpack.c.bf16 %v1128_v43, %v1125_v41 }
 0x174   : > { %2141 = vst [vmem:[%s2528_s17 + $0x70] sm:$0xff] %v2001_v46   ;;  %2161 = vst [vmem:[%s2528_s17 + $0x110] sm:$0xff] %v2101_v47  }
 0x175   : > { %v972_v48 = vpop.f32.mrb[60].mxu0  ;;  %v1132_v49 = vpop.f32.mrb[60].mxu1 }
 0x176   : > { %v974_v50 = vpop.f32.mrb[61].mxu0  ;;  %v1134_v51 = vpop.f32.mrb[61].mxu1  ;;  %v973_v54 = vadd.f32 %v2518_v26, %v972_v48  ;;  %v1133_v55 = vadd.f32 %v2518_v26, %v1132_v49 }
 0x177   : > { %v975_v52 = vpop.f32.mrb[62].mxu0  ;;  %v1135_v53 = vpop.f32.mrb[62].mxu1 }
 0x178   : > { %v976_v56 = vadd.f32 %v2518_v26, %v975_v52  ;;  %v1136_v57 = vadd.f32 %v2518_v26, %v1135_v53  ;;  %v977_v58 = vpop.f32.mrb[63].mxu0  ;;  %v1137_v59 = vpop.f32.mrb[63].mxu1 }
 0x17a   : > { %v2006_v60 = vpack.c.bf16 %v976_v56, %v973_v54  ;;  %v2106_v61 = vpack.c.bf16 %v1136_v57, %v1133_v55 }
 0x17c   : > { %2142 = vst [vmem:[%s2528_s17 + $0x78] sm:$0xff] %v2006_v60   ;;  %2162 = vst [vmem:[%s2528_s17 + $0x118] sm:$0xff] %v2106_v61  }
 0x17d   : > { %v980_v62 = vpop.f32.mrb[64].mxu0  ;;  %v1140_v63 = vpop.f32.mrb[64].mxu1 }
 0x17e   : > { %v982_v0 = vpop.f32.mrb[65].mxu0  ;;  %v1142_v1 = vpop.f32.mrb[65].mxu1  ;;  %v981_v4 = vadd.f32 %v2518_v26, %v980_v62  ;;  %v1141_v5 = vadd.f32 %v2518_v26, %v1140_v63 }
 0x17f   : > { %v983_v2 = vpop.f32.mrb[66].mxu0  ;;  %v1143_v3 = vpop.f32.mrb[66].mxu1 }
 0x180   : > { %v984_v6 = vadd.f32 %v2518_v26, %v983_v2  ;;  %v1144_v7 = vadd.f32 %v2518_v26, %v1143_v3  ;;  %v985_v8 = vpop.f32.mrb[67].mxu0  ;;  %v1145_v9 = vpop.f32.mrb[67].mxu1 }
 0x182   : > { %v2011_v10 = vpack.c.bf16 %v984_v6, %v981_v4  ;;  %v2111_v11 = vpack.c.bf16 %v1144_v7, %v1141_v5 }
 0x184   : > { %2143 = vst [vmem:[%s2528_s17 + $0x80] sm:$0xff] %v2011_v10   ;;  %2163 = vst [vmem:[%s2528_s17 + $0x120] sm:$0xff] %v2111_v11  }
 0x185   : > { %v988_v12 = vpop.f32.mrb[68].mxu0  ;;  %v1148_v13 = vpop.f32.mrb[68].mxu1 }
 0x186   : > { %v990_v14 = vpop.f32.mrb[69].mxu0  ;;  %v1150_v15 = vpop.f32.mrb[69].mxu1  ;;  %v989_v18 = vadd.f32 %v2518_v26, %v988_v12  ;;  %v1149_v19 = vadd.f32 %v2518_v26, %v1148_v13 }
 0x187   : > { %v991_v16 = vpop.f32.mrb[70].mxu0  ;;  %v1151_v17 = vpop.f32.mrb[70].mxu1 }
 0x188   : > { %v992_v20 = vadd.f32 %v2518_v26, %v991_v16  ;;  %v1152_v21 = vadd.f32 %v2518_v26, %v1151_v17  ;;  %v993_v22 = vpop.f32.mrb[71].mxu0  ;;  %v1153_v23 = vpop.f32.mrb[71].mxu1 }
 0x18a   : > { %v2016_v24 = vpack.c.bf16 %v992_v20, %v989_v18  ;;  %v2116_v25 = vpack.c.bf16 %v1152_v21, %v1149_v19 }
 0x18c   : > { %2144 = vst [vmem:[%s2528_s17 + $0x88] sm:$0xff] %v2016_v24   ;;  %2164 = vst [vmem:[%s2528_s17 + $0x128] sm:$0xff] %v2116_v25  }
 0x18d   : > { %v996_v27 = vpop.f32.mrb[72].mxu0  ;;  %v1156_v28 = vpop.f32.mrb[72].mxu1 }
 0x18e   : > { %v998_v29 = vpop.f32.mrb[73].mxu0  ;;  %v1158_v30 = vpop.f32.mrb[73].mxu1  ;;  %v997_v33 = vadd.f32 %v2518_v26, %v996_v27  ;;  %v1157_v34 = vadd.f32 %v2518_v26, %v1156_v28 }
 0x18f   : > { %v999_v31 = vpop.f32.mrb[74].mxu0  ;;  %v1159_v32 = vpop.f32.mrb[74].mxu1 }
 0x190   : > { %v1000_v35 = vadd.f32 %v2518_v26, %v999_v31  ;;  %v1160_v36 = vadd.f32 %v2518_v26, %v1159_v32  ;;  %v1001_v37 = vpop.f32.mrb[75].mxu0  ;;  %v1161_v38 = vpop.f32.mrb[75].mxu1 }
 0x192   : > { %v2021_v39 = vpack.c.bf16 %v1000_v35, %v997_v33  ;;  %v2121_v40 = vpack.c.bf16 %v1160_v36, %v1157_v34 }
 0x194   : > { %2145 = vst [vmem:[%s2528_s17 + $0x90] sm:$0xff] %v2021_v39   ;;  %2165 = vst [vmem:[%s2528_s17 + $0x130] sm:$0xff] %v2121_v40  }
 0x195   : > { %v1004_v41 = vpop.f32.mrb[76].mxu0  ;;  %v1164_v42 = vpop.f32.mrb[76].mxu1 }
 0x196   : > { %v1006_v43 = vpop.f32.mrb[77].mxu0  ;;  %v1166_v44 = vpop.f32.mrb[77].mxu1  ;;  %v1005_v47 = vadd.f32 %v2518_v26, %v1004_v41  ;;  %v1165_v48 = vadd.f32 %v2518_v26, %v1164_v42 }
 0x197   : > { %v1007_v45 = vpop.f32.mrb[78].mxu0  ;;  %v1167_v46 = vpop.f32.mrb[78].mxu1 }
 0x198   : > { %v1008_v49 = vadd.f32 %v2518_v26, %v1007_v45  ;;  %v1168_v50 = vadd.f32 %v2518_v26, %v1167_v46  ;;  %v1009_v51 = vpop.f32.mrb[79].mxu0  ;;  %v1169_v52 = vpop.f32.mrb[79].mxu1 }
 0x19a   : > { %v2026_v53 = vpack.c.bf16 %v1008_v49, %v1005_v47  ;;  %v2126_v54 = vpack.c.bf16 %v1168_v50, %v1165_v48 }
 0x19c   : > { %2146 = vst [vmem:[%s2528_s17 + $0x98] sm:$0xff] %v2026_v53   ;;  %2166 = vst [vmem:[%s2528_s17 + $0x138] sm:$0xff] %v2126_v54  }
 0x19d PF: > { %s13_s12 = sadd.s32 1, %s2329_s12  }
 0x19e   : > { %p10_p4 = scmp.ge.s32.totalorder %s13_s12, 4  }
 0x1a0   :  { %12 = sbr.rel (!%p10_p4) target bundleno = 1 (0x1), region = 62 }

// kernel: forward.5
= control target key start
LH: loop header
LB: loop body
LE: loop exit
PB: predicated region body
PF: predicated region fallthrough
CT: control target
= control target key end

     0   :  { %s14552_s24 = smov 0   ;;  %s14554_s25 = smov 0   ;;  %s16606_s0 = inlined_call_operand.vmem [shape: bf16[16,20480], index: 0, kind: input, shape index: {}]   ;;  %s16607_s1 = inlined_call_operand.vmem [shape: bf16[20480,256], index: 1, kind: input, shape index: {}]   ;;  %s16608_s2 = inlined_call_operand.vmem [shape: f32[1,256], index: 2, kind: input, shape index: {}]   ;;  %s16609_s3 = inlined_call_operand.vmem [shape: bf16[256,256], index: 3, kind: input, shape index: {}]   ;;  %s16610_s4 = inlined_call_operand.vmem [shape: f32[1,256], index: 4, kind: input, shape index: {}]   ;;  %s16611_s5 = inlined_call_operand.vmem [shape: bf16[256,128], index: 5, kind: input, shape index: {}]   ;;  %s16612_s6 = inlined_call_operand.vmem [shape: f32[1,128], index: 6, kind: input, shape index: {}]   ;;  %s16613_s7 = inlined_call_operand.vmem [shape: f32[16,128], index: 7, kind: output, shape index: {}]  }
   0x1   :  { %s14556_s26 = smov 0  }
   0x2 LB: > { %s14568_s27 = sadd.s32 4294967295, %s14509_s26   ;;  %s14571_s28 = sadd.s32 1, %s14509_s26   ;;  %s14509_s26 = sphi %s14556_s26, %s16616_s26   ;;  %s14505_s25 = sphi %s14554_s25, %s16615_s25   ;;  %s14501_s24 = sphi %s14552_s24, %s16614_s24  }
   0x3   : > { %s21_s29 = ssub.s32 %s14509_s26, %s14571_s28  ;;  %s24_s30 = sadd.s32 1, %s14505_s25 }
   0x4   : > { %p22_p0 = scmp.eq.s32.totalorder %s21_s29, 0  ;;  %p31_p1 = scmp.ne.s32.totalorder %s14505_s25, %s14501_s24 }
   0x5   : > { %p32_p2 = scmp.eq.s32.totalorder %s14509_s26, 0  ;;  %p10878_p4 = scmp.ge.s32.totalorder %s14509_s26, 2 }
   0x6   : > { %s14580_s8 = scalar_select %p22_p0, %s14505_s25, %s24_s30  }
   0x7   : > { %p33_p3 = por %p32_p2, %p31_p1  ;;  %224 = sbr.rel (%p10878_p4) target bundleno = 59 (0x3b), region = 36 }
   0xe   : > { %227 = sbr.rel (!%p33_p3) target bundleno = 59 (0x3b), region = 40  ;;  %s229_s9 = sand.u32 (%p33_p3), 1, %s14505_s25  }
   0xf   : > { %s12296_s10 = smul.u32 (%p33_p3), 320, %s14509_s26 }
  0x10   : > { %s12476_s11 = smul.u32 (%p33_p3), 640, %s229_s9 }
  0x11   : > { %s14588_s14 = scalar_lea.vmem (%p33_p3), %s16606_s0, %s12296_s10 }
  0x12   : > { %v247_v0 = vld [vmem:[%s14588_s14] sm:$0xff] (%p33_p3)  ;;  %v249_v1 = vld [vmem:[%s14588_s14 + $0x8] sm:$0xff] (%p33_p3)  ;;  %v251_v2 = vld [vmem:[%s14588_s14 + $0x10] sm:$0xff] (%p33_p3)  ;;  %s14593_s15 = scalar_lea.vmem (%p33_p3), [#allocation3], %s12476_s11 }
  0x13   : > { %248 = vst [vmem:[%s14593_s15] sm:$0xff] (%p33_p3), %v247_v0  ;;  %250 = vst [vmem:[%s14593_s15 + $0x8] sm:$0xff] (%p33_p3), %v249_v1  ;;  %v253_v3 = vld [vmem:[%s14588_s14 + $0x18] sm:$0xff] (%p33_p3)  ;;  %v255_v4 = vld [vmem:[%s14588_s14 + $0x20] sm:$0xff] (%p33_p3) }
  0x14   : > { %252 = vst [vmem:[%s14593_s15 + $0x10] sm:$0xff] (%p33_p3), %v251_v2  ;;  %v257_v5 = vld [vmem:[%s14588_s14 + $0x28] sm:$0xff] (%p33_p3)  ;;  %254 = vst [vmem:[%s14593_s15 + $0x18] sm:$0xff] (%p33_p3), %v253_v3  ;;  %v259_v6 = vld [vmem:[%s14588_s14 + $0x30] sm:$0xff] (%p33_p3) }
  0x15   : > { %256 = vst [vmem:[%s14593_s15 + $0x20] sm:$0xff] %v255_v4  ;;  %258 = vst [vmem:[%s14593_s15 + $0x28] sm:$0xff] %v257_v5  ;;  %v261_v7 = vld [vmem:[%s14588_s14 + $0x38] sm:$0xff]  ;;  %v263_v8 = vld [vmem:[%s14588_s14 + $0x40] sm:$0xff] }
  0x16   : > { %260 = vst [vmem:[%s14593_s15 + $0x30] sm:$0xff] %v259_v6  ;;  %262 = vst [vmem:[%s14593_s15 + $0x38] sm:$0xff] %v261_v7  ;;  %v265_v9 = vld [vmem:[%s14588_s14 + $0x48] sm:$0xff]  ;;  %v267_v10 = vld [vmem:[%s14588_s14 + $0x50] sm:$0xff] }
  0x17   : > { %264 = vst [vmem:[%s14593_s15 + $0x40] sm:$0xff] %v263_v8  ;;  %v269_v11 = vld [vmem:[%s14588_s14 + $0x58] sm:$0xff]  ;;  %266 = vst [vmem:[%s14593_s15 + $0x48] sm:$0xff] %v265_v9  ;;  %v271_v12 = vld [vmem:[%s14588_s14 + $0x60] sm:$0xff] }
  0x18   : > { %268 = vst [vmem:[%s14593_s15 + $0x50] sm:$0xff] %v267_v10  ;;  %270 = vst [vmem:[%s14593_s15 + $0x58] sm:$0xff] %v269_v11  ;;  %v273_v13 = vld [vmem:[%s14588_s14 + $0x68] sm:$0xff]  ;;  %v275_v14 = vld [vmem:[%s14588_s14 + $0x70] sm:$0xff] }
  0x19   : > { %272 = vst [vmem:[%s14593_s15 + $0x60] sm:$0xff] %v271_v12  ;;  %274 = vst [vmem:[%s14593_s15 + $0x68] sm:$0xff] %v273_v13  ;;  %v277_v15 = vld [vmem:[%s14588_s14 + $0x78] sm:$0xff]  ;;  %v279_v16 = vld [vmem:[%s14588_s14 + $0x80] sm:$0xff] }
  0x1a   : > { %276 = vst [vmem:[%s14593_s15 + $0x70] sm:$0xff] %v275_v14  ;;  %v281_v17 = vld [vmem:[%s14588_s14 + $0x88] sm:$0xff]  ;;  %278 = vst [vmem:[%s14593_s15 + $0x78] sm:$0xff] %v277_v15  ;;  %v283_v18 = vld [vmem:[%s14588_s14 + $0x90] sm:$0xff] }
  0x1b   : > { %280 = vst [vmem:[%s14593_s15 + $0x80] sm:$0xff] %v279_v16  ;;  %282 = vst [vmem:[%s14593_s15 + $0x88] sm:$0xff] %v281_v17  ;;  %v285_v19 = vld [vmem:[%s14588_s14 + $0x98] sm:$0xff]  ;;  %v287_v20 = vld [vmem:[%s14588_s14 + $0xa0] sm:$0xff] }
  0x1c   : > { %284 = vst [vmem:[%s14593_s15 + $0x90] sm:$0xff] %v283_v18  ;;  %286 = vst [vmem:[%s14593_s15 + $0x98] sm:$0xff] %v285_v19  ;;  %v289_v21 = vld [vmem:[%s14588_s14 + $0xa8] sm:$0xff]  ;;  %v291_v22 = vld [vmem:[%s14588_s14 + $0xb0] sm:$0xff] }
  0x1d   : > { %288 = vst [vmem:[%s14593_s15 + $0xa0] sm:$0xff] %v287_v20  ;;  %v293_v23 = vld [vmem:[%s14588_s14 + $0xb8] sm:$0xff]  ;;  %290 = vst [vmem:[%s14593_s15 + $0xa8] sm:$0xff] %v289_v21  ;;  %v295_v24 = vld [vmem:[%s14588_s14 + $0xc0] sm:$0xff] }
  0x1e   : > { %292 = vst [vmem:[%s14593_s15 + $0xb0] sm:$0xff] %v291_v22  ;;  %294 = vst [vmem:[%s14593_s15 + $0xb8] sm:$0xff] %v293_v23  ;;  %v297_v25 = vld [vmem:[%s14588_s14 + $0xc8] sm:$0xff]  ;;  %v299_v26 = vld [vmem:[%s14588_s14 + $0xd0] sm:$0xff] }
  0x1f   : > { %296 = vst [vmem:[%s14593_s15 + $0xc0] sm:$0xff] %v295_v24  ;;  %298 = vst [vmem:[%s14593_s15 + $0xc8] sm:$0xff] %v297_v25  ;;  %v301_v27 = vld [vmem:[%s14588_s14 + $0xd8] sm:$0xff]  ;;  %v303_v28 = vld [vmem:[%s14588_s14 + $0xe0] sm:$0xff] }
  0x20   : > { %300 = vst [vmem:[%s14593_s15 + $0xd0] sm:$0xff] %v299_v26  ;;  %v305_v29 = vld [vmem:[%s14588_s14 + $0xe8] sm:$0xff]  ;;  %302 = vst [vmem:[%s14593_s15 + $0xd8] sm:$0xff] %v301_v27  ;;  %v307_v30 = vld [vmem:[%s14588_s14 + $0xf0] sm:$0xff] }
  0x21   : > { %304 = vst [vmem:[%s14593_s15 + $0xe0] sm:$0xff] %v303_v28  ;;  %306 = vst [vmem:[%s14593_s15 + $0xe8] sm:$0xff] %v305_v29  ;;  %v309_v31 = vld [vmem:[%s14588_s14 + $0xf8] sm:$0xff]  ;;  %v311_v32 = vld [vmem:[%s14588_s14 + $0x100] sm:$0xff] }
  0x22   : > { %308 = vst [vmem:[%s14593_s15 + $0xf0] sm:$0xff] %v307_v30  ;;  %310 = vst [vmem:[%s14593_s15 + $0xf8] sm:$0xff] %v309_v31  ;;  %v313_v33 = vld [vmem:[%s14588_s14 + $0x108] sm:$0xff]  ;;  %v315_v34 = vld [vmem:[%s14588_s14 + $0x110] sm:$0xff] }
  0x23   : > { %312 = vst [vmem:[%s14593_s15 + $0x100] sm:$0xff] %v311_v32  ;;  %v317_v35 = vld [vmem:[%s14588_s14 + $0x118] sm:$0xff]  ;;  %314 = vst [vmem:[%s14593_s15 + $0x108] sm:$0xff] %v313_v33  ;;  %v319_v36 = vld [vmem:[%s14588_s14 + $0x120] sm:$0xff] }
  0x24   : > { %316 = vst [vmem:[%s14593_s15 + $0x110] sm:$0xff] %v315_v34  ;;  %318 = vst [vmem:[%s14593_s15 + $0x118] sm:$0xff] %v317_v35  ;;  %v321_v37 = vld [vmem:[%s14588_s14 + $0x128] sm:$0xff]  ;;  %v323_v38 = vld [vmem:[%s14588_s14 + $0x130] sm:$0xff] }
  0x25   : > { %320 = vst [vmem:[%s14593_s15 + $0x120] sm:$0xff] %v319_v36  ;;  %322 = vst [vmem:[%s14593_s15 + $0x128] sm:$0xff] %v321_v37  ;;  %v325_v39 = vld [vmem:[%s14588_s14 + $0x138] sm:$0xff]  ;;  %v327_v40 = vld [vmem:[%s14588_s14 + $0x280] sm:$0xff] }
  0x26   : > { %324 = vst [vmem:[%s14593_s15 + $0x130] sm:$0xff] %v323_v38  ;;  %v329_v41 = vld [vmem:[%s14588_s14 + $0x288] sm:$0xff]  ;;  %326 = vst [vmem:[%s14593_s15 + $0x138] sm:$0xff] %v325_v39  ;;  %v331_v42 = vld [vmem:[%s14588_s14 + $0x290] sm:$0xff] }
  0x27   : > { %328 = vst [vmem:[%s14593_s15 + $0x140] sm:$0xff] %v327_v40  ;;  %330 = vst [vmem:[%s14593_s15 + $0x148] sm:$0xff] %v329_v41  ;;  %v333_v43 = vld [vmem:[%s14588_s14 + $0x298] sm:$0xff]  ;;  %v335_v44 = vld [vmem:[%s14588_s14 + $0x2a0] sm:$0xff] }
  0x28   : > { %332 = vst [vmem:[%s14593_s15 + $0x150] sm:$0xff] %v331_v42  ;;  %334 = vst [vmem:[%s14593_s15 + $0x158] sm:$0xff] %v333_v43  ;;  %v337_v45 = vld [vmem:[%s14588_s14 + $0x2a8] sm:$0xff]  ;;  %v339_v46 = vld [vmem:[%s14588_s14 + $0x2b0] sm:$0xff] }
  0x29   : > { %336 = vst [vmem:[%s14593_s15 + $0x160] sm:$0xff] %v335_v44  ;;  %v341_v47 = vld [vmem:[%s14588_s14 + $0x2b8] sm:$0xff]  ;;  %338 = vst [vmem:[%s14593_s15 + $0x168] sm:$0xff] %v337_v45  ;;  %v343_v48 = vld [vmem:[%s14588_s14 + $0x2c0] sm:$0xff] }
  0x2a   : > { %340 = vst [vmem:[%s14593_s15 + $0x170] sm:$0xff] %v339_v46  ;;  %342 = vst [vmem:[%s14593_s15 + $0x178] sm:$0xff] %v341_v47  ;;  %v345_v49 = vld [vmem:[%s14588_s14 + $0x2c8] sm:$0xff]  ;;  %v347_v50 = vld [vmem:[%s14588_s14 + $0x2d0] sm:$0xff] }
  0x2b   : > { %344 = vst [vmem:[%s14593_s15 + $0x180] sm:$0xff] %v343_v48  ;;  %346 = vst [vmem:[%s14593_s15 + $0x188] sm:$0xff] %v345_v49  ;;  %v349_v51 = vld [vmem:[%s14588_s14 + $0x2d8] sm:$0xff]  ;;  %v351_v52 = vld [vmem:[%s14588_s14 + $0x2e0] sm:$0xff] }
  0x2c   : > { %348 = vst [vmem:[%s14593_s15 + $0x190] sm:$0xff] %v347_v50  ;;  %v353_v53 = vld [vmem:[%s14588_s14 + $0x2e8] sm:$0xff]  ;;  %350 = vst [vmem:[%s14593_s15 + $0x198] sm:$0xff] %v349_v51  ;;  %v355_v54 = vld [vmem:[%s14588_s14 + $0x2f0] sm:$0xff] }
  0x2d   : > { %352 = vst [vmem:[%s14593_s15 + $0x1a0] sm:$0xff] %v351_v52  ;;  %354 = vst [vmem:[%s14593_s15 + $0x1a8] sm:$0xff] %v353_v53  ;;  %v357_v55 = vld [vmem:[%s14588_s14 + $0x2f8] sm:$0xff]  ;;  %v359_v56 = vld [vmem:[%s14588_s14 + $0x300] sm:$0xff] }
  0x2e   : > { %356 = vst [vmem:[%s14593_s15 + $0x1b0] sm:$0xff] %v355_v54  ;;  %358 = vst [vmem:[%s14593_s15 + $0x1b8] sm:$0xff] %v357_v55  ;;  %v361_v57 = vld [vmem:[%s14588_s14 + $0x308] sm:$0xff]  ;;  %v363_v58 = vld [vmem:[%s14588_s14 + $0x310] sm:$0xff] }
  0x2f   : > { %360 = vst [vmem:[%s14593_s15 + $0x1c0] sm:$0xff] %v359_v56  ;;  %v365_v59 = vld [vmem:[%s14588_s14 + $0x318] sm:$0xff]  ;;  %362 = vst [vmem:[%s14593_s15 + $0x1c8] sm:$0xff] %v361_v57  ;;  %v367_v60 = vld [vmem:[%s14588_s14 + $0x320] sm:$0xff] }
  0x30   : > { %364 = vst [vmem:[%s14593_s15 + $0x1d0] sm:$0xff] %v363_v58  ;;  %366 = vst [vmem:[%s14593_s15 + $0x1d8] sm:$0xff] %v365_v59  ;;  %v369_v61 = vld [vmem:[%s14588_s14 + $0x328] sm:$0xff]  ;;  %v371_v62 = vld [vmem:[%s14588_s14 + $0x330] sm:$0xff] }
  0x31   : > { %368 = vst [vmem:[%s14593_s15 + $0x1e0] sm:$0xff] %v367_v60  ;;  %370 = vst [vmem:[%s14593_s15 + $0x1e8] sm:$0xff] %v369_v61  ;;  %v373_v63 = vld [vmem:[%s14588_s14 + $0x338] sm:$0xff]  ;;  %v375_v0 = vld [vmem:[%s14588_s14 + $0x340] sm:$0xff] }
  0x32   : > { %372 = vst [vmem:[%s14593_s15 + $0x1f0] sm:$0xff] %v371_v62  ;;  %v377_v1 = vld [vmem:[%s14588_s14 + $0x348] sm:$0xff]  ;;  %374 = vst [vmem:[%s14593_s15 + $0x1f8] sm:$0xff] %v373_v63  ;;  %v379_v2 = vld [vmem:[%s14588_s14 + $0x350] sm:$0xff] }
  0x33   : > { %376 = vst [vmem:[%s14593_s15 + $0x200] sm:$0xff] %v375_v0  ;;  %378 = vst [vmem:[%s14593_s15 + $0x208] sm:$0xff] %v377_v1  ;;  %v381_v3 = vld [vmem:[%s14588_s14 + $0x358] sm:$0xff]  ;;  %v383_v4 = vld [vmem:[%s14588_s14 + $0x360] sm:$0xff] }
  0x34   : > { %380 = vst [vmem:[%s14593_s15 + $0x210] sm:$0xff] %v379_v2  ;;  %382 = vst [vmem:[%s14593_s15 + $0x218] sm:$0xff] %v381_v3  ;;  %v385_v5 = vld [vmem:[%s14588_s14 + $0x368] sm:$0xff]  ;;  %v387_v6 = vld [vmem:[%s14588_s14 + $0x370] sm:$0xff] }
  0x35   : > { %384 = vst [vmem:[%s14593_s15 + $0x220] sm:$0xff] %v383_v4  ;;  %v389_v7 = vld [vmem:[%s14588_s14 + $0x378] sm:$0xff]  ;;  %386 = vst [vmem:[%s14593_s15 + $0x228] sm:$0xff] %v385_v5  ;;  %v391_v8 = vld [vmem:[%s14588_s14 + $0x380] sm:$0xff] }
  0x36   : > { %388 = vst [vmem:[%s14593_s15 + $0x230] sm:$0xff] %v387_v6  ;;  %390 = vst [vmem:[%s14593_s15 + $0x238] sm:$0xff] %v389_v7  ;;  %v393_v9 = vld [vmem:[%s14588_s14 + $0x388] sm:$0xff]  ;;  %v395_v10 = vld [vmem:[%s14588_s14 + $0x390] sm:$0xff] }
  0x37   : > { %392 = vst [vmem:[%s14593_s15 + $0x240] sm:$0xff] %v391_v8  ;;  %394 = vst [vmem:[%s14593_s15 + $0x248] sm:$0xff] %v393_v9  ;;  %v397_v11 = vld [vmem:[%s14588_s14 + $0x398] sm:$0xff]  ;;  %v399_v12 = vld [vmem:[%s14588_s14 + $0x3a0] sm:$0xff] }
  0x38   : > { %396 = vst [vmem:[%s14593_s15 + $0x250] sm:$0xff] %v395_v10  ;;  %v401_v13 = vld [vmem:[%s14588_s14 + $0x3a8] sm:$0xff]  ;;  %398 = vst [vmem:[%s14593_s15 + $0x258] sm:$0xff] %v397_v11  ;;  %v403_v14 = vld [vmem:[%s14588_s14 + $0x3b0] sm:$0xff] }
  0x39   : > { %400 = vst [vmem:[%s14593_s15 + $0x260] sm:$0xff] %v399_v12  ;;  %402 = vst [vmem:[%s14593_s15 + $0x268] sm:$0xff] %v401_v13  ;;  %v405_v15 = vld [vmem:[%s14588_s14 + $0x3b8] sm:$0xff] }
  0x3a   : > { %404 = vst [vmem:[%s14593_s15 + $0x270] sm:$0xff] %v403_v14  ;;  %406 = vst [vmem:[%s14593_s15 + $0x278] sm:$0xff] %v405_v15 }
  0x3b PF: > { %p10880_p5 = scmp.ge.s32.totalorder %s14509_s26, 1  ;;  %p421_p6 = scmp.lt.s32.totalorder %s14509_s26, 3 }
  0x3d   : > { %p422_p7 = pnand %p10880_p5, %p421_p6 }
  0x3e   : > { %s428_s16 = sand.u32 (!%p422_p7), 1, %s14501_s24   ;;  %s461_s17 = smul.u32 (!%p422_p7), 1280, %s14568_s27 }
  0x3f   : > { %425 = sbr.rel (%p422_p7) target bundleno = 2036 (0x7f4), region = 67  ;;  %p10883_p9 = scmp.ne.s32.totalorder (!%p422_p7), %s14568_s27, 0 }
  0x40   : > { %s12477_s18 = smul.u32 (!%p422_p7), 640, %s428_s16  ;;  %p462_p8 = scmp.lt.s32.totalorder (!%p422_p7), %s461_s17, 2559 }
  0x42   : > { %s14761_s23 = scalar_lea.vmem (!%p422_p7), [#allocation3], %s12477_s18 }
  0x46   : > { %s16618_s17 = smov (!%p462_p8, %s461_s17), 2559  ;;  %472 = sbr.rel (%p10883_p9) target bundleno = 77 (0x4d), region = 75 }
  0x47   : > { %s12297_s19 = sshll.u32 %s16618_s17, 3  ;;  %v14511_v16 = vmov (!%p10883_p9), 0.0  }
  0x48   : > { %s14759_s22 = scalar_lea.vmem %s16607_s1, %s12297_s19  ;;  %473 = vst [vmem:[#allocation2] sm:$0xff] (!%p10883_p9), %v14511_v16  ;;  %474 = vst [vmem:[#allocation2 + $0x8] sm:$0xff] (!%p10883_p9), %v14511_v16 }
  0x49   : > { %475 = vst [vmem:[#allocation2 + $0x10] sm:$0xff] (!%p10883_p9), %v14511_v16  ;;  %476 = vst [vmem:[#allocation2 + $0x18] sm:$0xff] (!%p10883_p9), %v14511_v16 }
  0x4d PF: > { %v12503_v17 = vld [vmem:[%s14759_s22 + $0x4] ss:$8 sps:$4 sm:$0xff]   ;;  %v12507_v19 = vld [vmem:[%s14759_s22] ss:$8 sps:$4 sm:$0xff]   ;;  %v12509_v21 = vld [vmem:[%s14759_s22 + $0x14] ss:$8 sps:$4 sm:$0xff]  }
  0x4e   : > { %v12505_v18 = vld [vmem:[%s14759_s22 + $0x1404] ss:$8 sps:$4 sm:$0xff]   ;;  %8641 = vmatprep.subr.bf16.mxu1 %v12503_v17  ;;  %v12508_v20 = vld [vmem:[%s14759_s22 + $0x1400] ss:$8 sps:$4 sm:$0xff]   ;;  %v12511_v22 = vld [vmem:[%s14759_s22 + $0x1414] ss:$8 sps:$4 sm:$0xff]  }
  0x4f   : > { %9501 = vmatprep.subr.bf16.mxu0 %v12505_v18  ;;  %8642 = vmatpush1.bf16.msra.mxu1 %v12507_v19  ;;  %v12513_v23 = vld [vmem:[%s14759_s22 + $0x10] ss:$8 sps:$4 sm:$0xff]   ;;  %v12515_v25 = vld [vmem:[%s14759_s22 + $0x24] ss:$8 sps:$4 sm:$0xff]   ;;  %v12519_v27 = vld [vmem:[%s14759_s22 + $0x20] ss:$8 sps:$4 sm:$0xff]  }
  0x50   : > { %9502 = vmatpush1.bf16.msra.mxu0 %v12508_v20  ;;  %8643 = vmatprep.subr.bf16.mxu1 %v12509_v21  ;;  %v12514_v24 = vld [vmem:[%s14759_s22 + $0x1410] ss:$8 sps:$4 sm:$0xff]   ;;  %v12517_v26 = vld [vmem:[%s14759_s22 + $0x1424] ss:$8 sps:$4 sm:$0xff]   ;;  %v12520_v28 = vld [vmem:[%s14759_s22 + $0x1420] ss:$8 sps:$4 sm:$0xff]  }
  0x51   : > { %9503 = vmatprep.subr.bf16.mxu0 %v12511_v22  ;;  %v12521_v29 = vld [vmem:[%s14759_s22 + $0x34] ss:$8 sps:$4 sm:$0xff]   ;;  %v12525_v31 = vld [vmem:[%s14759_s22 + $0x30] ss:$8 sps:$4 sm:$0xff]   ;;  %v12527_v33 = vld [vmem:[%s14759_s22 + $0x44] ss:$8 sps:$4 sm:$0xff]  }
  0x52   : > { %v12523_v30 = vld [vmem:[%s14759_s22 + $0x1434] ss:$8 sps:$4 sm:$0xff]   ;;  %v12526_v32 = vld [vmem:[%s14759_s22 + $0x1430] ss:$8 sps:$4 sm:$0xff]   ;;  %v12529_v34 = vld [vmem:[%s14759_s22 + $0x1444] ss:$8 sps:$4 sm:$0xff]  }
  0x53   : > { %8644 = vmatpush1.bf16.msra.mxu1 %v12513_v23  ;;  %v12531_v35 = vld [vmem:[%s14759_s22 + $0x40] ss:$8 sps:$4 sm:$0xff]   ;;  %v12533_v37 = vld [vmem:[%s14759_s22 + $0x54] ss:$8 sps:$4 sm:$0xff]   ;;  %v12537_v39 = vld [vmem:[%s14759_s22 + $0x50] ss:$8 sps:$4 sm:$0xff]  }
  0x54   : > { %9504 = vmatpush1.bf16.msra.mxu0 %v12514_v24  ;;  %8645 = vmatprep.subr.bf16.mxu1 %v12515_v25  ;;  %v12532_v36 = vld [vmem:[%s14759_s22 + $0x1440] ss:$8 sps:$4 sm:$0xff]   ;;  %v12535_v38 = vld [vmem:[%s14759_s22 + $0x1454] ss:$8 sps:$4 sm:$0xff]   ;;  %v12538_v40 = vld [vmem:[%s14759_s22 + $0x1450] ss:$8 sps:$4 sm:$0xff]  }
  0x55   : > { %9505 = vmatprep.subr.bf16.mxu0 %v12517_v26  ;;  %v12539_v41 = vld [vmem:[%s14759_s22 + $0x64] ss:$8 sps:$4 sm:$0xff]   ;;  %v12543_v43 = vld [vmem:[%s14759_s22 + $0x60] ss:$8 sps:$4 sm:$0xff]   ;;  %v12545_v45 = vld [vmem:[%s14759_s22 + $0x74] ss:$8 sps:$4 sm:$0xff]  }
  0x56   : > { %v12541_v42 = vld [vmem:[%s14759_s22 + $0x1464] ss:$8 sps:$4 sm:$0xff]   ;;  %v12544_v44 = vld [vmem:[%s14759_s22 + $0x1460] ss:$8 sps:$4 sm:$0xff]   ;;  %v12547_v46 = vld [vmem:[%s14759_s22 + $0x1474] ss:$8 sps:$4 sm:$0xff]  }
  0x57   : > { %8646 = vmatpush1.bf16.msra.mxu1 %v12519_v27  ;;  %v12549_v47 = vld [vmem:[%s14759_s22 + $0x70] ss:$8 sps:$4 sm:$0xff]   ;;  %v12551_v49 = vld [vmem:[%s14759_s22 + $0x84] ss:$8 sps:$4 sm:$0xff]   ;;  %v12555_v51 = vld [vmem:[%s14759_s22 + $0x80] ss:$8 sps:$4 sm:$0xff]  }
  0x58   : > { %9506 = vmatpush1.bf16.msra.mxu0 %v12520_v28  ;;  %8647 = vmatprep.subr.bf16.mxu1 %v12521_v29  ;;  %v12550_v48 = vld [vmem:[%s14759_s22 + $0x1470] ss:$8 sps:$4 sm:$0xff]   ;;  %v12553_v50 = vld [vmem:[%s14759_s22 + $0x1484] ss:$8 sps:$4 sm:$0xff]   ;;  %v12556_v52 = vld [vmem:[%s14759_s22 + $0x1480] ss:$8 sps:$4 sm:$0xff]  }
  0x59   : > { %9507 = vmatprep.subr.bf16.mxu0 %v12523_v30  ;;  %v12557_v53 = vld [vmem:[%s14759_s22 + $0x94] ss:$8 sps:$4 sm:$0xff]   ;;  %v12561_v55 = vld [vmem:[%s14759_s22 + $0x90] ss:$8 sps:$4 sm:$0xff]   ;;  %v12563_v57 = vld [vmem:[%s14759_s22 + $0xa4] ss:$8 sps:$4 sm:$0xff]  }
  0x5a   : > { %v12559_v54 = vld [vmem:[%s14759_s22 + $0x1494] ss:$8 sps:$4 sm:$0xff]   ;;  %v12562_v56 = vld [vmem:[%s14759_s22 + $0x1490] ss:$8 sps:$4 sm:$0xff]   ;;  %v12565_v58 = vld [vmem:[%s14759_s22 + $0x14a4] ss:$8 sps:$4 sm:$0xff]  }
  0x5b   : > { %8648 = vmatpush1.bf16.msra.mxu1 %v12525_v31  ;;  %v12567_v59 = vld [vmem:[%s14759_s22 + $0xa0] ss:$8 sps:$4 sm:$0xff]   ;;  %v12569_v61 = vld [vmem:[%s14759_s22 + $0xb4] ss:$8 sps:$4 sm:$0xff]   ;;  %v12573_v63 = vld [vmem:[%s14759_s22 + $0xb0] ss:$8 sps:$4 sm:$0xff]  }
  0x5c   : > { %9508 = vmatpush1.bf16.msra.mxu0 %v12526_v32  ;;  %8649 = vmatprep.subr.bf16.mxu1 %v12527_v33  ;;  %v12568_v60 = vld [vmem:[%s14759_s22 + $0x14a0] ss:$8 sps:$4 sm:$0xff]   ;;  %v12571_v62 = vld [vmem:[%s14759_s22 + $0x14b4] ss:$8 sps:$4 sm:$0xff]   ;;  %v12574_v0 = vld [vmem:[%s14759_s22 + $0x14b0] ss:$8 sps:$4 sm:$0xff]  }
  0x5d   : > { %9509 = vmatprep.subr.bf16.mxu0 %v12529_v34  ;;  %v481_v1 = vld [vmem:[%s14761_s23] sm:$0xff]  ;;  %v12581_v11 = vld [vmem:[%s14759_s22 + $0xd4] ss:$8 sps:$4 sm:$0xff]   ;;  %v12585_v13 = vld [vmem:[%s14759_s22 + $0xd0] ss:$8 sps:$4 sm:$0xff]   ;;  %p12244_p10 = scmp.ne.s32.totalorder %s14568_s27, 1 }
  0x5e   : > { %v521_v2 = vld [vmem:[%s14761_s23 + $0x140] sm:$0xff]  ;;  %v12583_v12 = vld [vmem:[%s14759_s22 + $0x14d4] ss:$8 sps:$4 sm:$0xff]   ;;  %v12586_v14 = vld [vmem:[%s14759_s22 + $0x14d0] ss:$8 sps:$4 sm:$0xff]  }
  0x5f   : > { %8650 = vmatpush1.bf16.msra.mxu1 %v12531_v35  ;;  %v12575_v3 = vld [vmem:[%s14759_s22 + $0xc4] ss:$8 sps:$4 sm:$0xff]   ;;  %v10885_v5 = vcombine.high %v481_v1, %v521_v2  ;;  %v12579_v9 = vld [vmem:[%s14759_s22 + $0xc0] ss:$8 sps:$4 sm:$0xff]   ;;  %v12593_v19 = vld [vmem:[%s14759_s22 + $0xf4] ss:$8 sps:$4 sm:$0xff]   ;;  %v10884_v25 = vcombine.low %v481_v1, %v521_v2 }
  0x60   : > { %9510 = vmatpush1.bf16.msra.mxu0 %v12532_v36  ;;  %8651 = vmatprep.subr.bf16.mxu1 %v12533_v37  ;;  %v12577_v4 = vld [vmem:[%s14759_s22 + $0x14c4] ss:$8 sps:$4 sm:$0xff]   ;;  %v12580_v10 = vld [vmem:[%s14759_s22 + $0x14c0] ss:$8 sps:$4 sm:$0xff]   ;;  %v12595_v20 = vld [vmem:[%s14759_s22 + $0x14f4] ss:$8 sps:$4 sm:$0xff]  }
  0x61   : > { %9511 = vmatprep.subr.bf16.mxu0 %v12535_v38  ;;  %v501_v6 = vld [vmem:[%s14761_s23 + $0xa0] sm:$0xff]  ;;  %8673 = vmatprep.mubr.bf16.mxu1 %v10885_v5  ;;  %v12597_v21 = vld [vmem:[%s14759_s22 + $0xf0] ss:$8 sps:$4 sm:$0xff]   ;;  %v12607_v29 = vld [vmem:[%s14759_s22 + $0x114] ss:$8 sps:$4 sm:$0xff]  }
  0x62   : > { %v541_v7 = vld [vmem:[%s14761_s23 + $0x1e0] sm:$0xff]  ;;  %v12598_v22 = vld [vmem:[%s14759_s22 + $0x14f0] ss:$8 sps:$4 sm:$0xff]   ;;  %v12610_v30 = vld [vmem:[%s14759_s22 + $0x1514] ss:$8 sps:$4 sm:$0xff]  }
  0x63   : > { %8652 = vmatpush1.bf16.msra.mxu1 %v12537_v39  ;;  %v10925_v8 = vcombine.high %v501_v6, %v541_v7  ;;  %v12587_v15 = vld [vmem:[%s14759_s22 + $0xe4] ss:$8 sps:$4 sm:$0xff]   ;;  %v12591_v17 = vld [vmem:[%s14759_s22 + $0xe0] ss:$8 sps:$4 sm:$0xff]   ;;  %v10924_v27 = vcombine.low %v501_v6, %v541_v7  ;;  %v12605_v31 = vld [vmem:[%s14759_s22 + $0x110] ss:$8 sps:$4 sm:$0xff]  }
  0x64   : > { %9512 = vmatpush1.bf16.msra.mxu0 %v12538_v40  ;;  %8653 = vmatprep.subr.bf16.mxu1 %v12539_v41  ;;  %v12589_v16 = vld [vmem:[%s14759_s22 + $0x14e4] ss:$8 sps:$4 sm:$0xff]   ;;  %v12592_v18 = vld [vmem:[%s14759_s22 + $0x14e0] ss:$8 sps:$4 sm:$0xff]   ;;  %v12608_v32 = vld [vmem:[%s14759_s22 + $0x1510] ss:$8 sps:$4 sm:$0xff]  }
  0x65   : > { %9513 = vmatprep.subr.bf16.mxu0 %v12541_v42  ;;  %9533 = vmatprep.mubr.bf16.mxu0 %v10925_v8  ;;  %v12601_v23 = vld [vmem:[%s14759_s22 + $0x104] ss:$8 sps:$4 sm:$0xff]   ;;  %v12599_v26 = vld [vmem:[%s14759_s22 + $0x100] ss:$8 sps:$4 sm:$0xff]   ;;  %v12619_v37 = vld [vmem:[%s14759_s22 + $0x134] ss:$8 sps:$4 sm:$0xff]  }
  0x66   : > { %v12604_v24 = vld [vmem:[%s14759_s22 + $0x1504] ss:$8 sps:$4 sm:$0xff]   ;;  %v12602_v28 = vld [vmem:[%s14759_s22 + $0x1500] ss:$8 sps:$4 sm:$0xff]   ;;  %v12622_v38 = vld [vmem:[%s14759_s22 + $0x1534] ss:$8 sps:$4 sm:$0xff]  }
  0x67   : > { %8654 = vmatpush1.bf16.msra.mxu1 %v12543_v43  ;;  %v12613_v33 = vld [vmem:[%s14759_s22 + $0x124] ss:$8 sps:$4 sm:$0xff]   ;;  %v12611_v35 = vld [vmem:[%s14759_s22 + $0x120] ss:$8 sps:$4 sm:$0xff]   ;;  %v12617_v39 = vld [vmem:[%s14759_s22 + $0x130] ss:$8 sps:$4 sm:$0xff]  }
  0x68   : > { %9514 = vmatpush1.bf16.msra.mxu0 %v12544_v44  ;;  %8655 = vmatprep.subr.bf16.mxu1 %v12545_v45  ;;  %v12616_v34 = vld [vmem:[%s14759_s22 + $0x1524] ss:$8 sps:$4 sm:$0xff]   ;;  %v12614_v36 = vld [vmem:[%s14759_s22 + $0x1520] ss:$8 sps:$4 sm:$0xff]   ;;  %v12620_v40 = vld [vmem:[%s14759_s22 + $0x1530] ss:$8 sps:$4 sm:$0xff]  }
  0x69   : > { %9515 = vmatprep.subr.bf16.mxu0 %v12547_v46  ;;  %v12625_v41 = vld [vmem:[%s14759_s22 + $0x144] ss:$8 sps:$4 sm:$0xff]   ;;  %v12623_v43 = vld [vmem:[%s14759_s22 + $0x140] ss:$8 sps:$4 sm:$0xff]   ;;  %v12631_v45 = vld [vmem:[%s14759_s22 + $0x154] ss:$8 sps:$4 sm:$0xff]  }
  0x6a   : > { %v12628_v42 = vld [vmem:[%s14759_s22 + $0x1544] ss:$8 sps:$4 sm:$0xff]   ;;  %v12626_v44 = vld [vmem:[%s14759_s22 + $0x1540] ss:$8 sps:$4 sm:$0xff]   ;;  %v12634_v46 = vld [vmem:[%s14759_s22 + $0x1554] ss:$8 sps:$4 sm:$0xff]  }
  0x6b   : > { %8656 = vmatpush1.bf16.msra.mxu1 %v12549_v47  ;;  %v12629_v47 = vld [vmem:[%s14759_s22 + $0x150] ss:$8 sps:$4 sm:$0xff]   ;;  %v12647_v1 = vld [vmem:[%s14759_s22 + $0x180] ss:$8 sps:$4 sm:$0xff]   ;;  %v12661_v7 = vld [vmem:[%s14759_s22 + $0x1a4] ss:$8 sps:$4 sm:$0xff]  }
  0x6c   : > { %9516 = vmatpush1.bf16.msra.mxu0 %v12550_v48  ;;  %8657 = vmatprep.subr.bf16.mxu1 %v12551_v49  ;;  %v12632_v48 = vld [vmem:[%s14759_s22 + $0x1550] ss:$8 sps:$4 sm:$0xff]   ;;  %v12637_v49 = vld [vmem:[%s14759_s22 + $0x164] ss:$8 sps:$4 sm:$0xff]   ;;  %v12650_v2 = vld [vmem:[%s14759_s22 + $0x1580] ss:$8 sps:$4 sm:$0xff]  }
  0x6d   : > { %9517 = vmatprep.subr.bf16.mxu0 %v12553_v50  ;;  %v12640_v50 = vld [vmem:[%s14759_s22 + $0x1564] ss:$8 sps:$4 sm:$0xff]   ;;  %v12653_v5 = vld [vmem:[%s14759_s22 + $0x190] ss:$8 sps:$4 sm:$0xff]  }
  0x6e   : > { %v12656_v6 = vld [vmem:[%s14759_s22 + $0x1590] ss:$8 sps:$4 sm:$0xff]   ;;  %v12664_v8 = vld [vmem:[%s14759_s22 + $0x15a4] ss:$8 sps:$4 sm:$0xff]  }
  0x6f   : > { %8658 = vmatpush1.bf16.msra.mxu1 %v12555_v51  ;;  %v12635_v51 = vld [vmem:[%s14759_s22 + $0x160] ss:$8 sps:$4 sm:$0xff]  }
  0x70   : > { %9518 = vmatpush1.bf16.msra.mxu0 %v12556_v52  ;;  %8659 = vmatprep.subr.bf16.mxu1 %v12557_v53  ;;  %v12638_v52 = vld [vmem:[%s14759_s22 + $0x1560] ss:$8 sps:$4 sm:$0xff]  }
  0x71   : > { %9519 = vmatprep.subr.bf16.mxu0 %v12559_v54  ;;  %v14861_v53 = vld [vmem:[%s14761_s23 + $0x8] sm:$0xff] }
  0x72   : > { %v14864_v54 = vld [vmem:[%s14761_s23 + $0x148] sm:$0xff] }
  0x73   : > { %8660 = vmatpush1.bf16.msra.mxu1 %v12561_v55  ;;  %v12643_v55 = vld [vmem:[%s14759_s22 + $0x174] ss:$8 sps:$4 sm:$0xff]  }
  0x74   : > { %9520 = vmatpush1.bf16.msra.mxu0 %v12562_v56  ;;  %8661 = vmatprep.subr.bf16.mxu1 %v12563_v57  ;;  %v12646_v56 = vld [vmem:[%s14759_s22 + $0x1574] ss:$8 sps:$4 sm:$0xff]   ;;  %v10887_v57 = vcombine.high %v14861_v53, %v14864_v54 }
  0x75   : > { %9521 = vmatprep.subr.bf16.mxu0 %v12565_v58  ;;  %v14871_v58 = vld [vmem:[%s14761_s23 + $0xa8] sm:$0xff] }
  0x77   : > { %8662 = vmatpush1.bf16.msra.mxu1 %v12567_v59  ;;  %v14874_v59 = vld [vmem:[%s14761_s23 + $0x1e8] sm:$0xff] }
  0x78   : > { %9522 = vmatpush1.bf16.msra.mxu0 %v12568_v60  ;;  %8663 = vmatprep.subr.bf16.mxu1 %v12569_v61  ;;  %v10927_v60 = vcombine.high %v14871_v58, %v14874_v59  ;;  %v12641_v61 = vld [vmem:[%s14759_s22 + $0x170] ss:$8 sps:$4 sm:$0xff]  }
  0x79   : > { %9523 = vmatprep.subr.bf16.mxu0 %v12571_v62  ;;  %v12644_v62 = vld [vmem:[%s14759_s22 + $0x1570] ss:$8 sps:$4 sm:$0xff]  }
  0x7b   : > { %8664 = vmatpush1.bf16.msra.mxu1 %v12573_v63  ;;  %v12649_v63 = vld [vmem:[%s14759_s22 + $0x184] ss:$8 sps:$4 sm:$0xff]  }
  0x7c   : > { %9524 = vmatpush1.bf16.msra.mxu0 %v12574_v0  ;;  %8665 = vmatprep.subr.bf16.mxu1 %v12575_v3  ;;  %v12652_v0 = vld [vmem:[%s14759_s22 + $0x1584] ss:$8 sps:$4 sm:$0xff]   ;;  %v12655_v3 = vld [vmem:[%s14759_s22 + $0x194] ss:$8 sps:$4 sm:$0xff]  }
  0x7d   : > { %9525 = vmatprep.subr.bf16.mxu0 %v12577_v4  ;;  %v12658_v4 = vld [vmem:[%s14759_s22 + $0x1594] ss:$8 sps:$4 sm:$0xff]  }
  0x7f   : > { %8666 = vmatpush1.bf16.msra.mxu1 %v12579_v9  ;;  %v12659_v9 = vld [vmem:[%s14759_s22 + $0x1a0] ss:$8 sps:$4 sm:$0xff]  }
  0x80   : > { %9526 = vmatpush1.bf16.msra.mxu0 %v12580_v10  ;;  %8667 = vmatprep.subr.bf16.mxu1 %v12581_v11  ;;  %v12662_v10 = vld [vmem:[%s14759_s22 + $0x15a0] ss:$8 sps:$4 sm:$0xff]   ;;  %v12667_v11 = vld [vmem:[%s14759_s22 + $0x1b4] ss:$8 sps:$4 sm:$0xff]  }
  0x81   : > { %9527 = vmatprep.subr.bf16.mxu0 %v12583_v12  ;;  %v12670_v12 = vld [vmem:[%s14759_s22 + $0x15b4] ss:$8 sps:$4 sm:$0xff]  }
  0x83   : > { %8668 = vmatpush1.bf16.msra.mxu1 %v12585_v13  ;;  %v12665_v13 = vld [vmem:[%s14759_s22 + $0x1b0] ss:$8 sps:$4 sm:$0xff]  }
  0x84   : > { %9528 = vmatpush1.bf16.msra.mxu0 %v12586_v14  ;;  %8669 = vmatprep.subr.bf16.mxu1 %v12587_v15  ;;  %v12668_v14 = vld [vmem:[%s14759_s22 + $0x15b0] ss:$8 sps:$4 sm:$0xff]   ;;  %v12673_v15 = vld [vmem:[%s14759_s22 + $0x1c4] ss:$8 sps:$4 sm:$0xff]  }
  0x85   : > { %9529 = vmatprep.subr.bf16.mxu0 %v12589_v16  ;;  %v12676_v16 = vld [vmem:[%s14759_s22 + $0x15c4] ss:$8 sps:$4 sm:$0xff]  }
  0x87   : > { %8670 = vmatpush1.bf16.msra.mxu1 %v12591_v17  ;;  %v12671_v17 = vld [vmem:[%s14759_s22 + $0x1c0] ss:$8 sps:$4 sm:$0xff]  }
  0x88   : > { %9530 = vmatpush1.bf16.msra.mxu0 %v12592_v18  ;;  %8671 = vmatprep.subr.bf16.mxu1 %v12593_v19  ;;  %v12674_v18 = vld [vmem:[%s14759_s22 + $0x15c0] ss:$8 sps:$4 sm:$0xff]   ;;  %v12679_v19 = vld [vmem:[%s14759_s22 + $0x1d4] ss:$8 sps:$4 sm:$0xff]  }
  0x89   : > { %9531 = vmatprep.subr.bf16.mxu0 %v12595_v20  ;;  %v12682_v20 = vld [vmem:[%s14759_s22 + $0x15d4] ss:$8 sps:$4 sm:$0xff]  }
  0x8b   : > { %8672 = vmatpush1.bf16.msra.mxu1 %v12597_v21  ;;  %v12677_v21 = vld [vmem:[%s14759_s22 + $0x1d0] ss:$8 sps:$4 sm:$0xff]  }
  0x8c   : > { %9532 = vmatpush1.bf16.msra.mxu0 %v12598_v22  ;;  %8684 = vmatprep.subr.bf16.mxu1 %v12601_v23  ;;  %v12680_v22 = vld [vmem:[%s14759_s22 + $0x15d0] ss:$8 sps:$4 sm:$0xff]   ;;  %v12685_v23 = vld [vmem:[%s14759_s22 + $0x1e4] ss:$8 sps:$4 sm:$0xff]  }
  0x8d   : > { %9544 = vmatprep.subr.bf16.mxu0 %v12604_v24  ;;  %v12688_v24 = vld [vmem:[%s14759_s22 + $0x15e4] ss:$8 sps:$4 sm:$0xff]  }
  0x8e   : > { %8674 = vmatmul.mubr.bf16.vlgmr.msra.gmra.mrb[0].mxu1 %v10884_v25  ;;  %v12683_v25 = vld [vmem:[%s14759_s22 + $0x1e0] ss:$8 sps:$4 sm:$0xff]  }
  0x8f   : > { %9534 = vmatmul.mubr.bf16.vlgmr.msra.gmra.mrb[0].mxu0 %v10924_v27  ;;  %8685 = vmatpush1.bf16.msra.mxu1 %v12599_v26  ;;  %v12686_v26 = vld [vmem:[%s14759_s22 + $0x15e0] ss:$8 sps:$4 sm:$0xff]   ;;  %v12691_v27 = vld [vmem:[%s14759_s22 + $0x1f4] ss:$8 sps:$4 sm:$0xff]  }
  0x90   : > { %9545 = vmatpush1.bf16.msra.mxu0 %v12602_v28  ;;  %8686 = vmatprep.subr.bf16.mxu1 %v12607_v29  ;;  %v12694_v28 = vld [vmem:[%s14759_s22 + $0x15f4] ss:$8 sps:$4 sm:$0xff]   ;;  %v12689_v29 = vld [vmem:[%s14759_s22 + $0x1f0] ss:$8 sps:$4 sm:$0xff]  }
  0x91   : > { %9546 = vmatprep.subr.bf16.mxu0 %v12610_v30  ;;  %8716 = vmatprep.mubr.bf16.mxu1 %v10887_v57  ;;  %v12692_v30 = vld [vmem:[%s14759_s22 + $0x15f0] ss:$8 sps:$4 sm:$0xff]   ;;  %v12719_v57 = vld [vmem:[%s14759_s22 + $0x240] ss:$8 sps:$4 sm:$0xff]  }
  0x92   : > { %9576 = vmatprep.mubr.bf16.mxu0 %v10927_v60  ;;  %v12730_v60 = vld [vmem:[%s14759_s22 + $0x1654] ss:$8 sps:$4 sm:$0xff]  }
  0x93   : > { %8687 = vmatpush1.bf16.msra.mxu1 %v12605_v31  ;;  %v12697_v31 = vld [vmem:[%s14759_s22 + $0x204] ss:$8 sps:$4 sm:$0xff]  }
  0x94   : > { %9547 = vmatpush1.bf16.msra.mxu0 %v12608_v32  ;;  %8688 = vmatprep.subr.bf16.mxu1 %v12613_v33  ;;  %v12700_v32 = vld [vmem:[%s14759_s22 + $0x1604] ss:$8 sps:$4 sm:$0xff]   ;;  %v10886_v33 = vcombine.low %v14861_v53, %v14864_v54  ;;  %v12713_v53 = vld [vmem:[%s14759_s22 + $0x230] ss:$8 sps:$4 sm:$0xff]  }
  0x95   : > { %9548 = vmatprep.subr.bf16.mxu0 %v12616_v34  ;;  %v12695_v34 = vld [vmem:[%s14759_s22 + $0x200] ss:$8 sps:$4 sm:$0xff]   ;;  %v12716_v54 = vld [vmem:[%s14759_s22 + $0x1630] ss:$8 sps:$4 sm:$0xff]  }
  0x97   : > { %8689 = vmatpush1.bf16.msra.mxu1 %v12611_v35  ;;  %v10926_v35 = vcombine.low %v14871_v58, %v14874_v59  ;;  %v12722_v58 = vld [vmem:[%s14759_s22 + $0x1640] ss:$8 sps:$4 sm:$0xff]   ;;  %v12727_v59 = vld [vmem:[%s14759_s22 + $0x254] ss:$8 sps:$4 sm:$0xff]  }
  0x98   : > { %9549 = vmatpush1.bf16.msra.mxu0 %v12614_v36  ;;  %8690 = vmatprep.subr.bf16.mxu1 %v12619_v37  ;;  %v12698_v36 = vld [vmem:[%s14759_s22 + $0x1600] ss:$8 sps:$4 sm:$0xff]   ;;  %v12703_v37 = vld [vmem:[%s14759_s22 + $0x214] ss:$8 sps:$4 sm:$0xff]  }
  0x99   : > { %9550 = vmatprep.subr.bf16.mxu0 %v12622_v38  ;;  %v12706_v38 = vld [vmem:[%s14759_s22 + $0x1614] ss:$8 sps:$4 sm:$0xff]  }
  0x9b   : > { %8691 = vmatpush1.bf16.msra.mxu1 %v12617_v39  ;;  %v12701_v39 = vld [vmem:[%s14759_s22 + $0x210] ss:$8 sps:$4 sm:$0xff]  }
  0x9c   : > { %9551 = vmatpush1.bf16.msra.mxu0 %v12620_v40  ;;  %8692 = vmatprep.subr.bf16.mxu1 %v12625_v41  ;;  %v12704_v40 = vld [vmem:[%s14759_s22 + $0x1610] ss:$8 sps:$4 sm:$0xff]  }
  0x9d   : > { %9552 = vmatprep.subr.bf16.mxu0 %v12628_v42  ;;  %v14925_v41 = vld [vmem:[%s14761_s23 + $0x10] sm:$0xff] }
  0x9e   : > { %v14928_v42 = vld [vmem:[%s14761_s23 + $0x150] sm:$0xff] }
  0x9f   : > { %8693 = vmatpush1.bf16.msra.mxu1 %v12623_v43  ;;  %v12709_v43 = vld [vmem:[%s14759_s22 + $0x224] ss:$8 sps:$4 sm:$0xff]  }
  0xa0   : > { %9553 = vmatpush1.bf16.msra.mxu0 %v12626_v44  ;;  %8694 = vmatprep.subr.bf16.mxu1 %v12631_v45  ;;  %v12712_v44 = vld [vmem:[%s14759_s22 + $0x1624] ss:$8 sps:$4 sm:$0xff]   ;;  %v10889_v45 = vcombine.high %v14925_v41, %v14928_v42 }
  0xa1   : > { %9554 = vmatprep.subr.bf16.mxu0 %v12634_v46  ;;  %v14935_v46 = vld [vmem:[%s14761_s23 + $0xb0] sm:$0xff] }
  0xa3   : > { %8695 = vmatpush1.bf16.msra.mxu1 %v12629_v47  ;;  %v14938_v47 = vld [vmem:[%s14761_s23 + $0x1f0] sm:$0xff] }
  0xa4   : > { %9555 = vmatpush1.bf16.msra.mxu0 %v12632_v48  ;;  %8696 = vmatprep.subr.bf16.mxu1 %v12637_v49  ;;  %v10929_v48 = vcombine.high %v14935_v46, %v14938_v47  ;;  %v12707_v49 = vld [vmem:[%s14759_s22 + $0x220] ss:$8 sps:$4 sm:$0xff]  }
  0xa5   : > { %9556 = vmatprep.subr.bf16.mxu0 %v12640_v50  ;;  %v12710_v50 = vld [vmem:[%s14759_s22 + $0x1620] ss:$8 sps:$4 sm:$0xff]  }
  0xa7   : > { %8697 = vmatpush1.bf16.msra.mxu1 %v12635_v51  ;;  %v12715_v51 = vld [vmem:[%s14759_s22 + $0x234] ss:$8 sps:$4 sm:$0xff]  }
  0xa8   : > { %9557 = vmatpush1.bf16.msra.mxu0 %v12638_v52  ;;  %8698 = vmatprep.subr.bf16.mxu1 %v12643_v55  ;;  %v12718_v52 = vld [vmem:[%s14759_s22 + $0x1634] ss:$8 sps:$4 sm:$0xff]   ;;  %v12721_v55 = vld [vmem:[%s14759_s22 + $0x244] ss:$8 sps:$4 sm:$0xff]  }
  0xa9   : > { %9558 = vmatprep.subr.bf16.mxu0 %v12646_v56  ;;  %v12724_v56 = vld [vmem:[%s14759_s22 + $0x1644] ss:$8 sps:$4 sm:$0xff]  }
  0xab   : > { %8699 = vmatpush1.bf16.msra.mxu1 %v12641_v61  ;;  %v12725_v61 = vld [vmem:[%s14759_s22 + $0x250] ss:$8 sps:$4 sm:$0xff]  }
  0xac   : > { %9559 = vmatpush1.bf16.msra.mxu0 %v12644_v62  ;;  %8700 = vmatprep.subr.bf16.mxu1 %v12649_v63  ;;  %v12728_v62 = vld [vmem:[%s14759_s22 + $0x1650] ss:$8 sps:$4 sm:$0xff]   ;;  %v12733_v63 = vld [vmem:[%s14759_s22 + $0x264] ss:$8 sps:$4 sm:$0xff]  }
  0xad   : > { %9560 = vmatprep.subr.bf16.mxu0 %v12652_v0  ;;  %v12736_v0 = vld [vmem:[%s14759_s22 + $0x1664] ss:$8 sps:$4 sm:$0xff]  }
  0xaf   : > { %8701 = vmatpush1.bf16.msra.mxu1 %v12647_v1  ;;  %v12731_v1 = vld [vmem:[%s14759_s22 + $0x260] ss:$8 sps:$4 sm:$0xff]  }
  0xb0   : > { %9561 = vmatpush1.bf16.msra.mxu0 %v12650_v2  ;;  %8702 = vmatprep.subr.bf16.mxu1 %v12655_v3  ;;  %v12734_v2 = vld [vmem:[%s14759_s22 + $0x1660] ss:$8 sps:$4 sm:$0xff]   ;;  %v12739_v3 = vld [vmem:[%s14759_s22 + $0x274] ss:$8 sps:$4 sm:$0xff]  }
  0xb1   : > { %9562 = vmatprep.subr.bf16.mxu0 %v12658_v4  ;;  %v12742_v4 = vld [vmem:[%s14759_s22 + $0x1674] ss:$8 sps:$4 sm:$0xff]  }
  0xb3   : > { %8703 = vmatpush1.bf16.msra.mxu1 %v12653_v5  ;;  %v12737_v5 = vld [vmem:[%s14759_s22 + $0x270] ss:$8 sps:$4 sm:$0xff]  }
  0xb4   : > { %9563 = vmatpush1.bf16.msra.mxu0 %v12656_v6  ;;  %8704 = vmatprep.subr.bf16.mxu1 %v12661_v7  ;;  %v12740_v6 = vld [vmem:[%s14759_s22 + $0x1670] ss:$8 sps:$4 sm:$0xff]   ;;  %v12745_v7 = vld [vmem:[%s14759_s22 + $0x284] ss:$8 sps:$4 sm:$0xff]  }
  0xb5   : > { %9564 = vmatprep.subr.bf16.mxu0 %v12664_v8  ;;  %v12748_v8 = vld [vmem:[%s14759_s22 + $0x1684] ss:$8 sps:$4 sm:$0xff]  }
  0xb7   : > { %8705 = vmatpush1.bf16.msra.mxu1 %v12659_v9  ;;  %v12743_v9 = vld [vmem:[%s14759_s22 + $0x280] ss:$8 sps:$4 sm:$0xff]  }
  0xb8   : > { %9565 = vmatpush1.bf16.msra.mxu0 %v12662_v10  ;;  %8706 = vmatprep.subr.bf16.mxu1 %v12667_v11  ;;  %v12746_v10 = vld [vmem:[%s14759_s22 + $0x1680] ss:$8 sps:$4 sm:$0xff]   ;;  %v12751_v11 = vld [vmem:[%s14759_s22 + $0x294] ss:$8 sps:$4 sm:$0xff]  }
  0xb9   : > { %9566 = vmatprep.subr.bf16.mxu0 %v12670_v12  ;;  %v12754_v12 = vld [vmem:[%s14759_s22 + $0x1694] ss:$8 sps:$4 sm:$0xff]  }
  0xbb   : > { %8707 = vmatpush1.bf16.msra.mxu1 %v12665_v13  ;;  %v12749_v13 = vld [vmem:[%s14759_s22 + $0x290] ss:$8 sps:$4 sm:$0xff]  }
  0xbc   : > { %9567 = vmatpush1.bf16.msra.mxu0 %v12668_v14  ;;  %8708 = vmatprep.subr.bf16.mxu1 %v12673_v15  ;;  %v12752_v14 = vld [vmem:[%s14759_s22 + $0x1690] ss:$8 sps:$4 sm:$0xff]   ;;  %v12757_v15 = vld [vmem:[%s14759_s22 + $0x2a4] ss:$8 sps:$4 sm:$0xff]  }
  0xbd   : > { %9568 = vmatprep.subr.bf16.mxu0 %v12676_v16  ;;  %v12760_v16 = vld [vmem:[%s14759_s22 + $0x16a4] ss:$8 sps:$4 sm:$0xff]  }
  0xbf   : > { %8709 = vmatpush1.bf16.msra.mxu1 %v12671_v17  ;;  %v12755_v17 = vld [vmem:[%s14759_s22 + $0x2a0] ss:$8 sps:$4 sm:$0xff]  }
  0xc0   : > { %9569 = vmatpush1.bf16.msra.mxu0 %v12674_v18  ;;  %8710 = vmatprep.subr.bf16.mxu1 %v12679_v19  ;;  %v12758_v18 = vld [vmem:[%s14759_s22 + $0x16a0] ss:$8 sps:$4 sm:$0xff]   ;;  %v12763_v19 = vld [vmem:[%s14759_s22 + $0x2b4] ss:$8 sps:$4 sm:$0xff]  }
  0xc1   : > { %9570 = vmatprep.subr.bf16.mxu0 %v12682_v20  ;;  %v12766_v20 = vld [vmem:[%s14759_s22 + $0x16b4] ss:$8 sps:$4 sm:$0xff]  }
  0xc3   : > { %8711 = vmatpush1.bf16.msra.mxu1 %v12677_v21  ;;  %v12761_v21 = vld [vmem:[%s14759_s22 + $0x2b0] ss:$8 sps:$4 sm:$0xff]  }
  0xc4   : > { %9571 = vmatpush1.bf16.msra.mxu0 %v12680_v22  ;;  %8712 = vmatprep.subr.bf16.mxu1 %v12685_v23  ;;  %v12764_v22 = vld [vmem:[%s14759_s22 + $0x16b0] ss:$8 sps:$4 sm:$0xff]   ;;  %v12769_v23 = vld [vmem:[%s14759_s22 + $0x2c4] ss:$8 sps:$4 sm:$0xff]  }
  0xc5   : > { %9572 = vmatprep.subr.bf16.mxu0 %v12688_v24  ;;  %v12772_v24 = vld [vmem:[%s14759_s22 + $0x16c4] ss:$8 sps:$4 sm:$0xff]  }
  0xc7   : > { %8713 = vmatpush1.bf16.msra.mxu1 %v12683_v25  ;;  %v12767_v25 = vld [vmem:[%s14759_s22 + $0x2c0] ss:$8 sps:$4 sm:$0xff]  }
  0xc8   : > { %9573 = vmatpush1.bf16.msra.mxu0 %v12686_v26  ;;  %8714 = vmatprep.subr.bf16.mxu1 %v12691_v27  ;;  %v12770_v26 = vld [vmem:[%s14759_s22 + $0x16c0] ss:$8 sps:$4 sm:$0xff]   ;;  %v12775_v27 = vld [vmem:[%s14759_s22 + $0x2d4] ss:$8 sps:$4 sm:$0xff]  }
  0xc9   : > { %9574 = vmatprep.subr.bf16.mxu0 %v12694_v28  ;;  %v12778_v28 = vld [vmem:[%s14759_s22 + $0x16d4] ss:$8 sps:$4 sm:$0xff]  }
  0xcb   : > { %8715 = vmatpush1.bf16.msra.mxu1 %v12689_v29  ;;  %v12773_v29 = vld [vmem:[%s14759_s22 + $0x2d0] ss:$8 sps:$4 sm:$0xff]  }
  0xcc   : > { %9575 = vmatpush1.bf16.msra.mxu0 %v12692_v30  ;;  %8727 = vmatprep.subr.bf16.mxu1 %v12697_v31  ;;  %v12776_v30 = vld [vmem:[%s14759_s22 + $0x16d0] ss:$8 sps:$4 sm:$0xff]   ;;  %v12781_v31 = vld [vmem:[%s14759_s22 + $0x2e4] ss:$8 sps:$4 sm:$0xff]  }
  0xcd   : > { %9587 = vmatprep.subr.bf16.mxu0 %v12700_v32  ;;  %v12784_v32 = vld [vmem:[%s14759_s22 + $0x16e4] ss:$8 sps:$4 sm:$0xff]  }
  0xce   : > { %8717 = vmatmul.mubr.bf16.vlgmr.msra.gmra.mrb[0].mxu1 %v10886_v33  ;;  %v12779_v33 = vld [vmem:[%s14759_s22 + $0x2e0] ss:$8 sps:$4 sm:$0xff]  }
  0xcf   : > { %9577 = vmatmul.mubr.bf16.vlgmr.msra.gmra.mrb[0].mxu0 %v10926_v35  ;;  %8728 = vmatpush1.bf16.msra.mxu1 %v12695_v34  ;;  %v12782_v34 = vld [vmem:[%s14759_s22 + $0x16e0] ss:$8 sps:$4 sm:$0xff]   ;;  %v12787_v35 = vld [vmem:[%s14759_s22 + $0x2f4] ss:$8 sps:$4 sm:$0xff]  }
  0xd0   : > { %9588 = vmatpush1.bf16.msra.mxu0 %v12698_v36  ;;  %8729 = vmatprep.subr.bf16.mxu1 %v12703_v37  ;;  %v12790_v36 = vld [vmem:[%s14759_s22 + $0x16f4] ss:$8 sps:$4 sm:$0xff]   ;;  %v12785_v37 = vld [vmem:[%s14759_s22 + $0x2f0] ss:$8 sps:$4 sm:$0xff]  }
  0xd1   : > { %9589 = vmatprep.subr.bf16.mxu0 %v12706_v38  ;;  %8759 = vmatprep.mubr.bf16.mxu1 %v10889_v45  ;;  %v12788_v38 = vld [vmem:[%s14759_s22 + $0x16f0] ss:$8 sps:$4 sm:$0xff]  }
  0xd2   : > { %9619 = vmatprep.mubr.bf16.mxu0 %v10929_v48  ;;  %v15001_v45 = vld [vmem:[%s14761_s23 + $0x18] sm:$0xff] }
  0xd3   : > { %8730 = vmatpush1.bf16.msra.mxu1 %v12701_v39  ;;  %v12793_v39 = vld [vmem:[%s14759_s22 + $0x304] ss:$8 sps:$4 sm:$0xff]   ;;  %v15004_v48 = vld [vmem:[%s14761_s23 + $0x158] sm:$0xff] }
  0xd4   : > { %9590 = vmatpush1.bf16.msra.mxu0 %v12704_v40  ;;  %8731 = vmatprep.subr.bf16.mxu1 %v12709_v43  ;;  %v12796_v40 = vld [vmem:[%s14759_s22 + $0x1704] ss:$8 sps:$4 sm:$0xff]   ;;  %v12791_v43 = vld [vmem:[%s14759_s22 + $0x300] ss:$8 sps:$4 sm:$0xff]  }
  0xd5   : > { %9591 = vmatprep.subr.bf16.mxu0 %v12712_v44  ;;  %v12794_v44 = vld [vmem:[%s14759_s22 + $0x1700] ss:$8 sps:$4 sm:$0xff]  }
  0xd7   : > { %8732 = vmatpush1.bf16.msra.mxu1 %v12707_v49  ;;  %v10888_v49 = vcombine.low %v14925_v41, %v14928_v42  ;;  %v10891_v41 = vcombine.high %v15001_v45, %v15004_v48 }
  0xd8   : > { %9592 = vmatpush1.bf16.msra.mxu0 %v12710_v50  ;;  %8733 = vmatprep.subr.bf16.mxu1 %v12715_v51  ;;  %v10928_v50 = vcombine.low %v14935_v46, %v14938_v47  ;;  %v15011_v51 = vld [vmem:[%s14761_s23 + $0xb8] sm:$0xff] }
  0xd9   : > { %9593 = vmatprep.subr.bf16.mxu0 %v12718_v52  ;;  %v15014_v52 = vld [vmem:[%s14761_s23 + $0x1f8] sm:$0xff] }
  0xda   : > { %v10931_v42 = vcombine.high %v15011_v51, %v15014_v52  ;;  %v12797_v46 = vld [vmem:[%s14759_s22 + $0x310] ss:$8 sps:$4 sm:$0xff]  }
  0xdb   : > { %8734 = vmatpush1.bf16.msra.mxu1 %v12713_v53  ;;  %v12799_v53 = vld [vmem:[%s14759_s22 + $0x314] ss:$8 sps:$4 sm:$0xff]   ;;  %v12800_v47 = vld [vmem:[%s14759_s22 + $0x1710] ss:$8 sps:$4 sm:$0xff]  }
  0xdc   : > { %9594 = vmatpush1.bf16.msra.mxu0 %v12716_v54  ;;  %8735 = vmatprep.subr.bf16.mxu1 %v12721_v55  ;;  %v12802_v54 = vld [vmem:[%s14759_s22 + $0x1714] ss:$8 sps:$4 sm:$0xff]   ;;  %v12805_v55 = vld [vmem:[%s14759_s22 + $0x324] ss:$8 sps:$4 sm:$0xff]  }
  0xdd   : > { %9595 = vmatprep.subr.bf16.mxu0 %v12724_v56  ;;  %v12808_v56 = vld [vmem:[%s14759_s22 + $0x1724] ss:$8 sps:$4 sm:$0xff]  }
  0xdf   : > { %8736 = vmatpush1.bf16.msra.mxu1 %v12719_v57  ;;  %v12803_v57 = vld [vmem:[%s14759_s22 + $0x320] ss:$8 sps:$4 sm:$0xff]  }
  0xe0   : > { %9596 = vmatpush1.bf16.msra.mxu0 %v12722_v58  ;;  %8737 = vmatprep.subr.bf16.mxu1 %v12727_v59  ;;  %v12806_v58 = vld [vmem:[%s14759_s22 + $0x1720] ss:$8 sps:$4 sm:$0xff]   ;;  %v12811_v59 = vld [vmem:[%s14759_s22 + $0x334] ss:$8 sps:$4 sm:$0xff]  }
  0xe1   : > { %9597 = vmatprep.subr.bf16.mxu0 %v12730_v60  ;;  %v12814_v60 = vld [vmem:[%s14759_s22 + $0x1734] ss:$8 sps:$4 sm:$0xff]  }
  0xe3   : > { %8738 = vmatpush1.bf16.msra.mxu1 %v12725_v61  ;;  %v12809_v61 = vld [vmem:[%s14759_s22 + $0x330] ss:$8 sps:$4 sm:$0xff]  }
  0xe4   : > { %9598 = vmatpush1.bf16.msra.mxu0 %v12728_v62  ;;  %8739 = vmatprep.subr.bf16.mxu1 %v12733_v63  ;;  %v12812_v62 = vld [vmem:[%s14759_s22 + $0x1730] ss:$8 sps:$4 sm:$0xff]   ;;  %v12817_v63 = vld [vmem:[%s14759_s22 + $0x344] ss:$8 sps:$4 sm:$0xff]  }
  0xe5   : > { %9599 = vmatprep.subr.bf16.mxu0 %v12736_v0  ;;  %v12820_v0 = vld [vmem:[%s14759_s22 + $0x1744] ss:$8 sps:$4 sm:$0xff]  }
  0xe7   : > { %8740 = vmatpush1.bf16.msra.mxu1 %v12731_v1  ;;  %v12815_v1 = vld [vmem:[%s14759_s22 + $0x340] ss:$8 sps:$4 sm:$0xff]  }
  0xe8   : > { %9600 = vmatpush1.bf16.msra.mxu0 %v12734_v2  ;;  %8741 = vmatprep.subr.bf16.mxu1 %v12739_v3  ;;  %v12818_v2 = vld [vmem:[%s14759_s22 + $0x1740] ss:$8 sps:$4 sm:$0xff]   ;;  %v12823_v3 = vld [vmem:[%s14759_s22 + $0x354] ss:$8 sps:$4 sm:$0xff]  }
  0xe9   : > { %9601 = vmatprep.subr.bf16.mxu0 %v12742_v4  ;;  %v12826_v4 = vld [vmem:[%s14759_s22 + $0x1754] ss:$8 sps:$4 sm:$0xff]  }
  0xeb   : > { %8742 = vmatpush1.bf16.msra.mxu1 %v12737_v5  ;;  %v12821_v5 = vld [vmem:[%s14759_s22 + $0x350] ss:$8 sps:$4 sm:$0xff]  }
  0xec   : > { %9602 = vmatpush1.bf16.msra.mxu0 %v12740_v6  ;;  %8743 = vmatprep.subr.bf16.mxu1 %v12745_v7  ;;  %v12824_v6 = vld [vmem:[%s14759_s22 + $0x1750] ss:$8 sps:$4 sm:$0xff]   ;;  %v12829_v7 = vld [vmem:[%s14759_s22 + $0x364] ss:$8 sps:$4 sm:$0xff]  }
  0xed   : > { %9603 = vmatprep.subr.bf16.mxu0 %v12748_v8  ;;  %v12832_v8 = vld [vmem:[%s14759_s22 + $0x1764] ss:$8 sps:$4 sm:$0xff]  }
  0xef   : > { %8744 = vmatpush1.bf16.msra.mxu1 %v12743_v9  ;;  %v12827_v9 = vld [vmem:[%s14759_s22 + $0x360] ss:$8 sps:$4 sm:$0xff]  }
  0xf0   : > { %9604 = vmatpush1.bf16.msra.mxu0 %v12746_v10  ;;  %8745 = vmatprep.subr.bf16.mxu1 %v12751_v11  ;;  %v12830_v10 = vld [vmem:[%s14759_s22 + $0x1760] ss:$8 sps:$4 sm:$0xff]   ;;  %v12835_v11 = vld [vmem:[%s14759_s22 + $0x374] ss:$8 sps:$4 sm:$0xff]  }
  0xf1   : > { %9605 = vmatprep.subr.bf16.mxu0 %v12754_v12  ;;  %v12838_v12 = vld [vmem:[%s14759_s22 + $0x1774] ss:$8 sps:$4 sm:$0xff]  }
  0xf3   : > { %8746 = vmatpush1.bf16.msra.mxu1 %v12749_v13  ;;  %v12833_v13 = vld [vmem:[%s14759_s22 + $0x370] ss:$8 sps:$4 sm:$0xff]  }
  0xf4   : > { %9606 = vmatpush1.bf16.msra.mxu0 %v12752_v14  ;;  %8747 = vmatprep.subr.bf16.mxu1 %v12757_v15  ;;  %v12836_v14 = vld [vmem:[%s14759_s22 + $0x1770] ss:$8 sps:$4 sm:$0xff]   ;;  %v12841_v15 = vld [vmem:[%s14759_s22 + $0x384] ss:$8 sps:$4 sm:$0xff]  }
  0xf5   : > { %9607 = vmatprep.subr.bf16.mxu0 %v12760_v16  ;;  %v12844_v16 = vld [vmem:[%s14759_s22 + $0x1784] ss:$8 sps:$4 sm:$0xff]  }
  0xf7   : > { %8748 = vmatpush1.bf16.msra.mxu1 %v12755_v17  ;;  %v12839_v17 = vld [vmem:[%s14759_s22 + $0x380] ss:$8 sps:$4 sm:$0xff]  }
  0xf8   : > { %9608 = vmatpush1.bf16.msra.mxu0 %v12758_v18  ;;  %8749 = vmatprep.subr.bf16.mxu1 %v12763_v19  ;;  %v12842_v18 = vld [vmem:[%s14759_s22 + $0x1780] ss:$8 sps:$4 sm:$0xff]   ;;  %v12847_v19 = vld [vmem:[%s14759_s22 + $0x394] ss:$8 sps:$4 sm:$0xff]  }
  0xf9   : > { %9609 = vmatprep.subr.bf16.mxu0 %v12766_v20  ;;  %v12850_v20 = vld [vmem:[%s14759_s22 + $0x1794] ss:$8 sps:$4 sm:$0xff]  }
  0xfb   : > { %8750 = vmatpush1.bf16.msra.mxu1 %v12761_v21  ;;  %v12845_v21 = vld [vmem:[%s14759_s22 + $0x390] ss:$8 sps:$4 sm:$0xff]  }
  0xfc   : > { %9610 = vmatpush1.bf16.msra.mxu0 %v12764_v22  ;;  %8751 = vmatprep.subr.bf16.mxu1 %v12769_v23  ;;  %v12848_v22 = vld [vmem:[%s14759_s22 + $0x1790] ss:$8 sps:$4 sm:$0xff]   ;;  %v12853_v23 = vld [vmem:[%s14759_s22 + $0x3a4] ss:$8 sps:$4 sm:$0xff]  }
  0xfd   : > { %9611 = vmatprep.subr.bf16.mxu0 %v12772_v24  ;;  %v12856_v24 = vld [vmem:[%s14759_s22 + $0x17a4] ss:$8 sps:$4 sm:$0xff]  }
  0xff   : > { %8752 = vmatpush1.bf16.msra.mxu1 %v12767_v25  ;;  %v12851_v25 = vld [vmem:[%s14759_s22 + $0x3a0] ss:$8 sps:$4 sm:$0xff]  }
 0x100   : > { %9612 = vmatpush1.bf16.msra.mxu0 %v12770_v26  ;;  %8753 = vmatprep.subr.bf16.mxu1 %v12775_v27  ;;  %v12854_v26 = vld [vmem:[%s14759_s22 + $0x17a0] ss:$8 sps:$4 sm:$0xff]   ;;  %v12859_v27 = vld [vmem:[%s14759_s22 + $0x3b4] ss:$8 sps:$4 sm:$0xff]  }
 0x101   : > { %9613 = vmatprep.subr.bf16.mxu0 %v12778_v28  ;;  %v12862_v28 = vld [vmem:[%s14759_s22 + $0x17b4] ss:$8 sps:$4 sm:$0xff]  }
 0x103   : > { %8754 = vmatpush1.bf16.msra.mxu1 %v12773_v29  ;;  %v12857_v29 = vld [vmem:[%s14759_s22 + $0x3b0] ss:$8 sps:$4 sm:$0xff]  }
 0x104   : > { %9614 = vmatpush1.bf16.msra.mxu0 %v12776_v30  ;;  %8755 = vmatprep.subr.bf16.mxu1 %v12781_v31  ;;  %v12860_v30 = vld [vmem:[%s14759_s22 + $0x17b0] ss:$8 sps:$4 sm:$0xff]   ;;  %v12865_v31 = vld [vmem:[%s14759_s22 + $0x3c4] ss:$8 sps:$4 sm:$0xff]  }
 0x105   : > { %9615 = vmatprep.subr.bf16.mxu0 %v12784_v32  ;;  %v12868_v32 = vld [vmem:[%s14759_s22 + $0x17c4] ss:$8 sps:$4 sm:$0xff]  }
 0x107   : > { %8756 = vmatpush1.bf16.msra.mxu1 %v12779_v33  ;;  %v12863_v33 = vld [vmem:[%s14759_s22 + $0x3c0] ss:$8 sps:$4 sm:$0xff]  }
 0x108   : > { %9616 = vmatpush1.bf16.msra.mxu0 %v12782_v34  ;;  %8757 = vmatprep.subr.bf16.mxu1 %v12787_v35  ;;  %v12866_v34 = vld [vmem:[%s14759_s22 + $0x17c0] ss:$8 sps:$4 sm:$0xff]   ;;  %v12871_v35 = vld [vmem:[%s14759_s22 + $0x3d4] ss:$8 sps:$4 sm:$0xff]  }
 0x109   : > { %9617 = vmatprep.subr.bf16.mxu0 %v12790_v36  ;;  %v12874_v36 = vld [vmem:[%s14759_s22 + $0x17d4] ss:$8 sps:$4 sm:$0xff]  }
 0x10b   : > { %8758 = vmatpush1.bf16.msra.mxu1 %v12785_v37  ;;  %v12869_v37 = vld [vmem:[%s14759_s22 + $0x3d0] ss:$8 sps:$4 sm:$0xff]  }
 0x10c   : > { %9618 = vmatpush1.bf16.msra.mxu0 %v12788_v38  ;;  %8770 = vmatprep.subr.bf16.mxu1 %v12793_v39  ;;  %v12872_v38 = vld [vmem:[%s14759_s22 + $0x17d0] ss:$8 sps:$4 sm:$0xff]   ;;  %v12877_v39 = vld [vmem:[%s14759_s22 + $0x3e4] ss:$8 sps:$4 sm:$0xff]  }
 0x10d   : > { %9630 = vmatprep.subr.bf16.mxu0 %v12796_v40  ;;  %v12880_v40 = vld [vmem:[%s14759_s22 + $0x17e4] ss:$8 sps:$4 sm:$0xff]  }
 0x10e   : > { %8760 = vmatmul.mubr.bf16.vlgmr.msra.gmra.mrb[0].mxu1 %v10888_v49  ;;  %v12883_v49 = vld [vmem:[%s14759_s22 + $0x3f4] ss:$8 sps:$4 sm:$0xff]  }
 0x10f   : > { %9620 = vmatmul.mubr.bf16.vlgmr.msra.gmra.mrb[0].mxu0 %v10928_v50  ;;  %8771 = vmatpush1.bf16.msra.mxu1 %v12791_v43  ;;  %v12875_v43 = vld [vmem:[%s14759_s22 + $0x3e0] ss:$8 sps:$4 sm:$0xff]   ;;  %v12886_v50 = vld [vmem:[%s14759_s22 + $0x17f4] ss:$8 sps:$4 sm:$0xff]  }
 0x110   : > { %9631 = vmatpush1.bf16.msra.mxu0 %v12794_v44  ;;  %8772 = vmatprep.subr.bf16.mxu1 %v12799_v53  ;;  %v12878_v44 = vld [vmem:[%s14759_s22 + $0x17e0] ss:$8 sps:$4 sm:$0xff]   ;;  %v12881_v53 = vld [vmem:[%s14759_s22 + $0x3f0] ss:$8 sps:$4 sm:$0xff]  }
 0x111   : > { %9632 = vmatprep.subr.bf16.mxu0 %v12802_v54  ;;  %8802 = vmatprep.mubr.bf16.mxu1 %v10891_v41  ;;  %v12884_v54 = vld [vmem:[%s14759_s22 + $0x17f0] ss:$8 sps:$4 sm:$0xff]   ;;  %v12889_v41 = vld [vmem:[%s14759_s22 + $0x404] ss:$8 sps:$4 sm:$0xff]  }
 0x112   : > { %9662 = vmatprep.mubr.bf16.mxu0 %v10931_v42  ;;  %v12892_v42 = vld [vmem:[%s14759_s22 + $0x1804] ss:$8 sps:$4 sm:$0xff]  }
 0x113   : > { %8773 = vmatpush1.bf16.msra.mxu1 %v12797_v46  ;;  %v12887_v46 = vld [vmem:[%s14759_s22 + $0x400] ss:$8 sps:$4 sm:$0xff]  }
 0x114   : > { %9633 = vmatpush1.bf16.msra.mxu0 %v12800_v47  ;;  %8774 = vmatprep.subr.bf16.mxu1 %v12805_v55  ;;  %v12890_v47 = vld [vmem:[%s14759_s22 + $0x1800] ss:$8 sps:$4 sm:$0xff]  }
 0x115   : > { %9634 = vmatprep.subr.bf16.mxu0 %v12808_v56  ;;  %v15085_v55 = vld [vmem:[%s14761_s23 + $0x20] sm:$0xff] }
 0x116   : > { %v15088_v56 = vld [vmem:[%s14761_s23 + $0x160] sm:$0xff] }
 0x117   : > { %8775 = vmatpush1.bf16.msra.mxu1 %v12803_v57  ;;  %v10890_v57 = vcombine.low %v15001_v45, %v15004_v48  ;;  %v12893_v48 = vld [vmem:[%s14759_s22 + $0x410] ss:$8 sps:$4 sm:$0xff]  }
 0x118   : > { %9635 = vmatpush1.bf16.msra.mxu0 %v12806_v58  ;;  %8776 = vmatprep.subr.bf16.mxu1 %v12811_v59  ;;  %v10930_v58 = vcombine.low %v15011_v51, %v15014_v52  ;;  %v15095_v59 = vld [vmem:[%s14761_s23 + $0xc0] sm:$0xff]  ;;  %v12896_v51 = vld [vmem:[%s14759_s22 + $0x1810] ss:$8 sps:$4 sm:$0xff]  }
 0x119   : > { %9636 = vmatprep.subr.bf16.mxu0 %v12814_v60  ;;  %v15098_v60 = vld [vmem:[%s14761_s23 + $0x200] sm:$0xff] }
 0x11a   : > { %v10933_v45 = vcombine.high %v15095_v59, %v15098_v60  ;;  %v12901_v52 = vld [vmem:[%s14759_s22 + $0x424] ss:$8 sps:$4 sm:$0xff]  }
 0x11b   : > { %8777 = vmatpush1.bf16.msra.mxu1 %v12809_v61  ;;  %v12895_v61 = vld [vmem:[%s14759_s22 + $0x414] ss:$8 sps:$4 sm:$0xff]  }
 0x11c   : > { %9637 = vmatpush1.bf16.msra.mxu0 %v12812_v62  ;;  %8778 = vmatprep.subr.bf16.mxu1 %v12817_v63  ;;  %v12898_v62 = vld [vmem:[%s14759_s22 + $0x1814] ss:$8 sps:$4 sm:$0xff]   ;;  %v10893_v63 = vcombine.high %v15085_v55, %v15088_v56 }
 0x11d   : > { %9638 = vmatprep.subr.bf16.mxu0 %v12820_v0  ;;  %v12904_v0 = vld [vmem:[%s14759_s22 + $0x1824] ss:$8 sps:$4 sm:$0xff]  }
 0x11f   : > { %8779 = vmatpush1.bf16.msra.mxu1 %v12815_v1  ;;  %v12899_v1 = vld [vmem:[%s14759_s22 + $0x420] ss:$8 sps:$4 sm:$0xff]  }
 0x120   : > { %9639 = vmatpush1.bf16.msra.mxu0 %v12818_v2  ;;  %8780 = vmatprep.subr.bf16.mxu1 %v12823_v3  ;;  %v12902_v2 = vld [vmem:[%s14759_s22 + $0x1820] ss:$8 sps:$4 sm:$0xff]   ;;  %v12907_v3 = vld [vmem:[%s14759_s22 + $0x434] ss:$8 sps:$4 sm:$0xff]  }
 0x121   : > { %9640 = vmatprep.subr.bf16.mxu0 %v12826_v4  ;;  %v12910_v4 = vld [vmem:[%s14759_s22 + $0x1834] ss:$8 sps:$4 sm:$0xff]  }
 0x123   : > { %8781 = vmatpush1.bf16.msra.mxu1 %v12821_v5  ;;  %v12905_v5 = vld [vmem:[%s14759_s22 + $0x430] ss:$8 sps:$4 sm:$0xff]  }
 0x124   : > { %9641 = vmatpush1.bf16.msra.mxu0 %v12824_v6  ;;  %8782 = vmatprep.subr.bf16.mxu1 %v12829_v7  ;;  %v12908_v6 = vld [vmem:[%s14759_s22 + $0x1830] ss:$8 sps:$4 sm:$0xff]   ;;  %v12913_v7 = vld [vmem:[%s14759_s22 + $0x444] ss:$8 sps:$4 sm:$0xff]  }
 0x125   : > { %9642 = vmatprep.subr.bf16.mxu0 %v12832_v8  ;;  %v12916_v8 = vld [vmem:[%s14759_s22 + $0x1844] ss:$8 sps:$4 sm:$0xff]  }
 0x127   : > { %8783 = vmatpush1.bf16.msra.mxu1 %v12827_v9  ;;  %v12911_v9 = vld [vmem:[%s14759_s22 + $0x440] ss:$8 sps:$4 sm:$0xff]  }
 0x128   : > { %9643 = vmatpush1.bf16.msra.mxu0 %v12830_v10  ;;  %8784 = vmatprep.subr.bf16.mxu1 %v12835_v11  ;;  %v12914_v10 = vld [vmem:[%s14759_s22 + $0x1840] ss:$8 sps:$4 sm:$0xff]   ;;  %v12919_v11 = vld [vmem:[%s14759_s22 + $0x454] ss:$8 sps:$4 sm:$0xff]  }
 0x129   : > { %9644 = vmatprep.subr.bf16.mxu0 %v12838_v12  ;;  %v12922_v12 = vld [vmem:[%s14759_s22 + $0x1854] ss:$8 sps:$4 sm:$0xff]  }
 0x12b   : > { %8785 = vmatpush1.bf16.msra.mxu1 %v12833_v13  ;;  %v12917_v13 = vld [vmem:[%s14759_s22 + $0x450] ss:$8 sps:$4 sm:$0xff]  }
 0x12c   : > { %9645 = vmatpush1.bf16.msra.mxu0 %v12836_v14  ;;  %8786 = vmatprep.subr.bf16.mxu1 %v12841_v15  ;;  %v12920_v14 = vld [vmem:[%s14759_s22 + $0x1850] ss:$8 sps:$4 sm:$0xff]   ;;  %v12925_v15 = vld [vmem:[%s14759_s22 + $0x464] ss:$8 sps:$4 sm:$0xff]  }
 0x12d   : > { %9646 = vmatprep.subr.bf16.mxu0 %v12844_v16  ;;  %v12928_v16 = vld [vmem:[%s14759_s22 + $0x1864] ss:$8 sps:$4 sm:$0xff]  }
 0x12f   : > { %8787 = vmatpush1.bf16.msra.mxu1 %v12839_v17  ;;  %v12923_v17 = vld [vmem:[%s14759_s22 + $0x460] ss:$8 sps:$4 sm:$0xff]  }
 0x130   : > { %9647 = vmatpush1.bf16.msra.mxu0 %v12842_v18  ;;  %8788 = vmatprep.subr.bf16.mxu1 %v12847_v19  ;;  %v12926_v18 = vld [vmem:[%s14759_s22 + $0x1860] ss:$8 sps:$4 sm:$0xff]   ;;  %v12931_v19 = vld [vmem:[%s14759_s22 + $0x474] ss:$8 sps:$4 sm:$0xff]  }
 0x131   : > { %9648 = vmatprep.subr.bf16.mxu0 %v12850_v20  ;;  %v12934_v20 = vld [vmem:[%s14759_s22 + $0x1874] ss:$8 sps:$4 sm:$0xff]  }
 0x133   : > { %8789 = vmatpush1.bf16.msra.mxu1 %v12845_v21  ;;  %v12929_v21 = vld [vmem:[%s14759_s22 + $0x470] ss:$8 sps:$4 sm:$0xff]  }
 0x134   : > { %9649 = vmatpush1.bf16.msra.mxu0 %v12848_v22  ;;  %8790 = vmatprep.subr.bf16.mxu1 %v12853_v23  ;;  %v12932_v22 = vld [vmem:[%s14759_s22 + $0x1870] ss:$8 sps:$4 sm:$0xff]   ;;  %v12937_v23 = vld [vmem:[%s14759_s22 + $0x484] ss:$8 sps:$4 sm:$0xff]  }
 0x135   : > { %9650 = vmatprep.subr.bf16.mxu0 %v12856_v24  ;;  %v12940_v24 = vld [vmem:[%s14759_s22 + $0x1884] ss:$8 sps:$4 sm:$0xff]  }
 0x137   : > { %8791 = vmatpush1.bf16.msra.mxu1 %v12851_v25  ;;  %v12935_v25 = vld [vmem:[%s14759_s22 + $0x480] ss:$8 sps:$4 sm:$0xff]  }
 0x138   : > { %9651 = vmatpush1.bf16.msra.mxu0 %v12854_v26  ;;  %8792 = vmatprep.subr.bf16.mxu1 %v12859_v27  ;;  %v12938_v26 = vld [vmem:[%s14759_s22 + $0x1880] ss:$8 sps:$4 sm:$0xff]   ;;  %v12943_v27 = vld [vmem:[%s14759_s22 + $0x494] ss:$8 sps:$4 sm:$0xff]  }
 0x139   : > { %9652 = vmatprep.subr.bf16.mxu0 %v12862_v28  ;;  %v12946_v28 = vld [vmem:[%s14759_s22 + $0x1894] ss:$8 sps:$4 sm:$0xff]  }
 0x13b   : > { %8793 = vmatpush1.bf16.msra.mxu1 %v12857_v29  ;;  %v12941_v29 = vld [vmem:[%s14759_s22 + $0x490] ss:$8 sps:$4 sm:$0xff]  }
 0x13c   : > { %9653 = vmatpush1.bf16.msra.mxu0 %v12860_v30  ;;  %8794 = vmatprep.subr.bf16.mxu1 %v12865_v31  ;;  %v12944_v30 = vld [vmem:[%s14759_s22 + $0x1890] ss:$8 sps:$4 sm:$0xff]   ;;  %v12949_v31 = vld [vmem:[%s14759_s22 + $0x4a4] ss:$8 sps:$4 sm:$0xff]  }
 0x13d   : > { %9654 = vmatprep.subr.bf16.mxu0 %v12868_v32  ;;  %v12952_v32 = vld [vmem:[%s14759_s22 + $0x18a4] ss:$8 sps:$4 sm:$0xff]  }
 0x13f   : > { %8795 = vmatpush1.bf16.msra.mxu1 %v12863_v33  ;;  %v12947_v33 = vld [vmem:[%s14759_s22 + $0x4a0] ss:$8 sps:$4 sm:$0xff]  }
 0x140   : > { %9655 = vmatpush1.bf16.msra.mxu0 %v12866_v34  ;;  %8796 = vmatprep.subr.bf16.mxu1 %v12871_v35  ;;  %v12950_v34 = vld [vmem:[%s14759_s22 + $0x18a0] ss:$8 sps:$4 sm:$0xff]   ;;  %v12955_v35 = vld [vmem:[%s14759_s22 + $0x4b4] ss:$8 sps:$4 sm:$0xff]  }
 0x141   : > { %9656 = vmatprep.subr.bf16.mxu0 %v12874_v36  ;;  %v12958_v36 = vld [vmem:[%s14759_s22 + $0x18b4] ss:$8 sps:$4 sm:$0xff]  }
 0x143   : > { %8797 = vmatpush1.bf16.msra.mxu1 %v12869_v37  ;;  %v12953_v37 = vld [vmem:[%s14759_s22 + $0x4b0] ss:$8 sps:$4 sm:$0xff]  }
 0x144   : > { %9657 = vmatpush1.bf16.msra.mxu0 %v12872_v38  ;;  %8798 = vmatprep.subr.bf16.mxu1 %v12877_v39  ;;  %v12956_v38 = vld [vmem:[%s14759_s22 + $0x18b0] ss:$8 sps:$4 sm:$0xff]   ;;  %v12961_v39 = vld [vmem:[%s14759_s22 + $0x4c4] ss:$8 sps:$4 sm:$0xff]  }
 0x145   : > { %9658 = vmatprep.subr.bf16.mxu0 %v12880_v40  ;;  %v12964_v40 = vld [vmem:[%s14759_s22 + $0x18c4] ss:$8 sps:$4 sm:$0xff]  }
 0x147   : > { %8799 = vmatpush1.bf16.msra.mxu1 %v12875_v43  ;;  %v12959_v43 = vld [vmem:[%s14759_s22 + $0x4c0] ss:$8 sps:$4 sm:$0xff]  }
 0x148   : > { %9659 = vmatpush1.bf16.msra.mxu0 %v12878_v44  ;;  %8800 = vmatprep.subr.bf16.mxu1 %v12883_v49  ;;  %v12962_v44 = vld [vmem:[%s14759_s22 + $0x18c0] ss:$8 sps:$4 sm:$0xff]   ;;  %v12967_v49 = vld [vmem:[%s14759_s22 + $0x4d4] ss:$8 sps:$4 sm:$0xff]  }
 0x149   : > { %9660 = vmatprep.subr.bf16.mxu0 %v12886_v50  ;;  %v12970_v50 = vld [vmem:[%s14759_s22 + $0x18d4] ss:$8 sps:$4 sm:$0xff]  }
 0x14b   : > { %8801 = vmatpush1.bf16.msra.mxu1 %v12881_v53  ;;  %v12965_v53 = vld [vmem:[%s14759_s22 + $0x4d0] ss:$8 sps:$4 sm:$0xff]  }
 0x14c   : > { %9661 = vmatpush1.bf16.msra.mxu0 %v12884_v54  ;;  %8813 = vmatprep.subr.bf16.mxu1 %v12889_v41  ;;  %v12968_v54 = vld [vmem:[%s14759_s22 + $0x18d0] ss:$8 sps:$4 sm:$0xff]   ;;  %v12973_v41 = vld [vmem:[%s14759_s22 + $0x4e4] ss:$8 sps:$4 sm:$0xff]  }
 0x14d   : > { %9673 = vmatprep.subr.bf16.mxu0 %v12892_v42  ;;  %v12976_v42 = vld [vmem:[%s14759_s22 + $0x18e4] ss:$8 sps:$4 sm:$0xff]  }
 0x14e   : > { %8803 = vmatmul.mubr.bf16.vlgmr.msra.gmra.mrb[0].mxu1 %v10890_v57  ;;  %v12979_v57 = vld [vmem:[%s14759_s22 + $0x4f4] ss:$8 sps:$4 sm:$0xff]  }
 0x14f   : > { %9663 = vmatmul.mubr.bf16.vlgmr.msra.gmra.mrb[0].mxu0 %v10930_v58  ;;  %8814 = vmatpush1.bf16.msra.mxu1 %v12887_v46  ;;  %v12971_v46 = vld [vmem:[%s14759_s22 + $0x4e0] ss:$8 sps:$4 sm:$0xff]   ;;  %v12982_v58 = vld [vmem:[%s14759_s22 + $0x18f4] ss:$8 sps:$4 sm:$0xff]  }
 0x150   : > { %9674 = vmatpush1.bf16.msra.mxu0 %v12890_v47  ;;  %8815 = vmatprep.subr.bf16.mxu1 %v12895_v61  ;;  %v12974_v47 = vld [vmem:[%s14759_s22 + $0x18e0] ss:$8 sps:$4 sm:$0xff]   ;;  %v12977_v61 = vld [vmem:[%s14759_s22 + $0x4f0] ss:$8 sps:$4 sm:$0xff]  }
 0x151   : > { %9675 = vmatprep.subr.bf16.mxu0 %v12898_v62  ;;  %8845 = vmatprep.mubr.bf16.mxu1 %v10893_v63  ;;  %v12980_v62 = vld [vmem:[%s14759_s22 + $0x18f0] ss:$8 sps:$4 sm:$0xff]   ;;  %v12985_v63 = vld [vmem:[%s14759_s22 + $0x504] ss:$8 sps:$4 sm:$0xff]  }
 0x152   : > { %9705 = vmatprep.mubr.bf16.mxu0 %v10933_v45  ;;  %v12988_v45 = vld [vmem:[%s14759_s22 + $0x1904] ss:$8 sps:$4 sm:$0xff]  }
 0x153   : > { %8816 = vmatpush1.bf16.msra.mxu1 %v12893_v48  ;;  %v15167_v48 = vld [vmem:[%s14761_s23 + $0x28] sm:$0xff] }
 0x154   : > { %9676 = vmatpush1.bf16.msra.mxu0 %v12896_v51  ;;  %8817 = vmatprep.subr.bf16.mxu1 %v12901_v52  ;;  %v15170_v51 = vld [vmem:[%s14761_s23 + $0x168] sm:$0xff] }
 0x155   : > { %9677 = vmatprep.subr.bf16.mxu0 %v12904_v0  ;;  %v15173_v52 = vld [vmem:[%s14761_s23 + $0xc8] sm:$0xff] }
 0x156   : > { %v15176_v0 = vld [vmem:[%s14761_s23 + $0x208] sm:$0xff] }
 0x157   : > { %8818 = vmatpush1.bf16.msra.mxu1 %v12899_v1  ;;  %v10892_v1 = vcombine.low %v15085_v55, %v15088_v56  ;;  %v10935_v55 = vcombine.high %v15173_v52, %v15176_v0  ;;  %v12989_v56 = vld [vmem:[%s14759_s22 + $0x510] ss:$8 sps:$4 sm:$0xff]  }
 0x158   : > { %9678 = vmatpush1.bf16.msra.mxu0 %v12902_v2  ;;  %8819 = vmatprep.subr.bf16.mxu1 %v12907_v3  ;;  %v10932_v2 = vcombine.low %v15095_v59, %v15098_v60  ;;  %v12983_v3 = vld [vmem:[%s14759_s22 + $0x500] ss:$8 sps:$4 sm:$0xff]   ;;  %v12992_v59 = vld [vmem:[%s14759_s22 + $0x1910] ss:$8 sps:$4 sm:$0xff]   ;;  %v12997_v60 = vld [vmem:[%s14759_s22 + $0x524] ss:$8 sps:$4 sm:$0xff]  }
 0x159   : > { %9679 = vmatprep.subr.bf16.mxu0 %v12910_v4  ;;  %v12986_v4 = vld [vmem:[%s14759_s22 + $0x1900] ss:$8 sps:$4 sm:$0xff]  }
 0x15b   : > { %8820 = vmatpush1.bf16.msra.mxu1 %v12905_v5  ;;  %v12991_v5 = vld [vmem:[%s14759_s22 + $0x514] ss:$8 sps:$4 sm:$0xff]  }
 0x15c   : > { %9680 = vmatpush1.bf16.msra.mxu0 %v12908_v6  ;;  %8821 = vmatprep.subr.bf16.mxu1 %v12913_v7  ;;  %v12994_v6 = vld [vmem:[%s14759_s22 + $0x1914] ss:$8 sps:$4 sm:$0xff]   ;;  %v10895_v7 = vcombine.high %v15167_v48, %v15170_v51 }
 0x15d   : > { %9681 = vmatprep.subr.bf16.mxu0 %v12916_v8  ;;  %v13000_v8 = vld [vmem:[%s14759_s22 + $0x1924] ss:$8 sps:$4 sm:$0xff]  }
 0x15f   : > { %8822 = vmatpush1.bf16.msra.mxu1 %v12911_v9  ;;  %v12995_v9 = vld [vmem:[%s14759_s22 + $0x520] ss:$8 sps:$4 sm:$0xff]  }
 0x160   : > { %9682 = vmatpush1.bf16.msra.mxu0 %v12914_v10  ;;  %8823 = vmatprep.subr.bf16.mxu1 %v12919_v11  ;;  %v12998_v10 = vld [vmem:[%s14759_s22 + $0x1920] ss:$8 sps:$4 sm:$0xff]   ;;  %v13003_v11 = vld [vmem:[%s14759_s22 + $0x534] ss:$8 sps:$4 sm:$0xff]  }
 0x161   : > { %9683 = vmatprep.subr.bf16.mxu0 %v12922_v12  ;;  %v13006_v12 = vld [vmem:[%s14759_s22 + $0x1934] ss:$8 sps:$4 sm:$0xff]  }
 0x163   : > { %8824 = vmatpush1.bf16.msra.mxu1 %v12917_v13  ;;  %v13001_v13 = vld [vmem:[%s14759_s22 + $0x530] ss:$8 sps:$4 sm:$0xff]  }
 0x164   : > { %9684 = vmatpush1.bf16.msra.mxu0 %v12920_v14  ;;  %8825 = vmatprep.subr.bf16.mxu1 %v12925_v15  ;;  %v13004_v14 = vld [vmem:[%s14759_s22 + $0x1930] ss:$8 sps:$4 sm:$0xff]   ;;  %v13009_v15 = vld [vmem:[%s14759_s22 + $0x544] ss:$8 sps:$4 sm:$0xff]  }
 0x165   : > { %9685 = vmatprep.subr.bf16.mxu0 %v12928_v16  ;;  %v13012_v16 = vld [vmem:[%s14759_s22 + $0x1944] ss:$8 sps:$4 sm:$0xff]  }
 0x167   : > { %8826 = vmatpush1.bf16.msra.mxu1 %v12923_v17  ;;  %v13007_v17 = vld [vmem:[%s14759_s22 + $0x540] ss:$8 sps:$4 sm:$0xff]  }
 0x168   : > { %9686 = vmatpush1.bf16.msra.mxu0 %v12926_v18  ;;  %8827 = vmatprep.subr.bf16.mxu1 %v12931_v19  ;;  %v13010_v18 = vld [vmem:[%s14759_s22 + $0x1940] ss:$8 sps:$4 sm:$0xff]   ;;  %v13015_v19 = vld [vmem:[%s14759_s22 + $0x554] ss:$8 sps:$4 sm:$0xff]  }
 0x169   : > { %9687 = vmatprep.subr.bf16.mxu0 %v12934_v20  ;;  %v13018_v20 = vld [vmem:[%s14759_s22 + $0x1954] ss:$8 sps:$4 sm:$0xff]  }
 0x16b   : > { %8828 = vmatpush1.bf16.msra.mxu1 %v12929_v21  ;;  %v13013_v21 = vld [vmem:[%s14759_s22 + $0x550] ss:$8 sps:$4 sm:$0xff]  }
 0x16c   : > { %9688 = vmatpush1.bf16.msra.mxu0 %v12932_v22  ;;  %8829 = vmatprep.subr.bf16.mxu1 %v12937_v23  ;;  %v13016_v22 = vld [vmem:[%s14759_s22 + $0x1950] ss:$8 sps:$4 sm:$0xff]   ;;  %v13021_v23 = vld [vmem:[%s14759_s22 + $0x564] ss:$8 sps:$4 sm:$0xff]  }
 0x16d   : > { %9689 = vmatprep.subr.bf16.mxu0 %v12940_v24  ;;  %v13024_v24 = vld [vmem:[%s14759_s22 + $0x1964] ss:$8 sps:$4 sm:$0xff]  }
 0x16f   : > { %8830 = vmatpush1.bf16.msra.mxu1 %v12935_v25  ;;  %v13019_v25 = vld [vmem:[%s14759_s22 + $0x560] ss:$8 sps:$4 sm:$0xff]  }
 0x170   : > { %9690 = vmatpush1.bf16.msra.mxu0 %v12938_v26  ;;  %8831 = vmatprep.subr.bf16.mxu1 %v12943_v27  ;;  %v13022_v26 = vld [vmem:[%s14759_s22 + $0x1960] ss:$8 sps:$4 sm:$0xff]   ;;  %v13027_v27 = vld [vmem:[%s14759_s22 + $0x574] ss:$8 sps:$4 sm:$0xff]  }
 0x171   : > { %9691 = vmatprep.subr.bf16.mxu0 %v12946_v28  ;;  %v13030_v28 = vld [vmem:[%s14759_s22 + $0x1974] ss:$8 sps:$4 sm:$0xff]  }
 0x173   : > { %8832 = vmatpush1.bf16.msra.mxu1 %v12941_v29  ;;  %v13025_v29 = vld [vmem:[%s14759_s22 + $0x570] ss:$8 sps:$4 sm:$0xff]  }
 0x174   : > { %9692 = vmatpush1.bf16.msra.mxu0 %v12944_v30  ;;  %8833 = vmatprep.subr.bf16.mxu1 %v12949_v31  ;;  %v13028_v30 = vld [vmem:[%s14759_s22 + $0x1970] ss:$8 sps:$4 sm:$0xff]   ;;  %v13033_v31 = vld [vmem:[%s14759_s22 + $0x584] ss:$8 sps:$4 sm:$0xff]  }
 0x175   : > { %9693 = vmatprep.subr.bf16.mxu0 %v12952_v32  ;;  %v13036_v32 = vld [vmem:[%s14759_s22 + $0x1984] ss:$8 sps:$4 sm:$0xff]  }
 0x177   : > { %8834 = vmatpush1.bf16.msra.mxu1 %v12947_v33  ;;  %v13031_v33 = vld [vmem:[%s14759_s22 + $0x580] ss:$8 sps:$4 sm:$0xff]  }
 0x178   : > { %9694 = vmatpush1.bf16.msra.mxu0 %v12950_v34  ;;  %8835 = vmatprep.subr.bf16.mxu1 %v12955_v35  ;;  %v13034_v34 = vld [vmem:[%s14759_s22 + $0x1980] ss:$8 sps:$4 sm:$0xff]   ;;  %v13039_v35 = vld [vmem:[%s14759_s22 + $0x594] ss:$8 sps:$4 sm:$0xff]  }
 0x179   : > { %9695 = vmatprep.subr.bf16.mxu0 %v12958_v36  ;;  %v13042_v36 = vld [vmem:[%s14759_s22 + $0x1994] ss:$8 sps:$4 sm:$0xff]  }
 0x17b   : > { %8836 = vmatpush1.bf16.msra.mxu1 %v12953_v37  ;;  %v13037_v37 = vld [vmem:[%s14759_s22 + $0x590] ss:$8 sps:$4 sm:$0xff]  }
 0x17c   : > { %9696 = vmatpush1.bf16.msra.mxu0 %v12956_v38  ;;  %8837 = vmatprep.subr.bf16.mxu1 %v12961_v39  ;;  %v13040_v38 = vld [vmem:[%s14759_s22 + $0x1990] ss:$8 sps:$4 sm:$0xff]   ;;  %v13045_v39 = vld [vmem:[%s14759_s22 + $0x5a4] ss:$8 sps:$4 sm:$0xff]  }
 0x17d   : > { %9697 = vmatprep.subr.bf16.mxu0 %v12964_v40  ;;  %v13048_v40 = vld [vmem:[%s14759_s22 + $0x19a4] ss:$8 sps:$4 sm:$0xff]  }
 0x17f   : > { %8838 = vmatpush1.bf16.msra.mxu1 %v12959_v43  ;;  %v13043_v43 = vld [vmem:[%s14759_s22 + $0x5a0] ss:$8 sps:$4 sm:$0xff]  }
 0x180   : > { %9698 = vmatpush1.bf16.msra.mxu0 %v12962_v44  ;;  %8839 = vmatprep.subr.bf16.mxu1 %v12967_v49  ;;  %v13046_v44 = vld [vmem:[%s14759_s22 + $0x19a0] ss:$8 sps:$4 sm:$0xff]   ;;  %v13051_v49 = vld [vmem:[%s14759_s22 + $0x5b4] ss:$8 sps:$4 sm:$0xff]  }
 0x181   : > { %9699 = vmatprep.subr.bf16.mxu0 %v12970_v50  ;;  %v13054_v50 = vld [vmem:[%s14759_s22 + $0x19b4] ss:$8 sps:$4 sm:$0xff]  }
 0x183   : > { %8840 = vmatpush1.bf16.msra.mxu1 %v12965_v53  ;;  %v13049_v53 = vld [vmem:[%s14759_s22 + $0x5b0] ss:$8 sps:$4 sm:$0xff]  }
 0x184   : > { %9700 = vmatpush1.bf16.msra.mxu0 %v12968_v54  ;;  %8841 = vmatprep.subr.bf16.mxu1 %v12973_v41  ;;  %v13052_v54 = vld [vmem:[%s14759_s22 + $0x19b0] ss:$8 sps:$4 sm:$0xff]   ;;  %v13057_v41 = vld [vmem:[%s14759_s22 + $0x5c4] ss:$8 sps:$4 sm:$0xff]  }
 0x185   : > { %9701 = vmatprep.subr.bf16.mxu0 %v12976_v42  ;;  %v13060_v42 = vld [vmem:[%s14759_s22 + $0x19c4] ss:$8 sps:$4 sm:$0xff]  }
 0x187   : > { %8842 = vmatpush1.bf16.msra.mxu1 %v12971_v46  ;;  %v13055_v46 = vld [vmem:[%s14759_s22 + $0x5c0] ss:$8 sps:$4 sm:$0xff]  }
 0x188   : > { %9702 = vmatpush1.bf16.msra.mxu0 %v12974_v47  ;;  %8843 = vmatprep.subr.bf16.mxu1 %v12979_v57  ;;  %v13058_v47 = vld [vmem:[%s14759_s22 + $0x19c0] ss:$8 sps:$4 sm:$0xff]   ;;  %v13063_v57 = vld [vmem:[%s14759_s22 + $0x5d4] ss:$8 sps:$4 sm:$0xff]  }
 0x189   : > { %9703 = vmatprep.subr.bf16.mxu0 %v12982_v58  ;;  %v13066_v58 = vld [vmem:[%s14759_s22 + $0x19d4] ss:$8 sps:$4 sm:$0xff]  }
 0x18b   : > { %8844 = vmatpush1.bf16.msra.mxu1 %v12977_v61  ;;  %v13061_v61 = vld [vmem:[%s14759_s22 + $0x5d0] ss:$8 sps:$4 sm:$0xff]  }
 0x18c   : > { %9704 = vmatpush1.bf16.msra.mxu0 %v12980_v62  ;;  %8856 = vmatprep.subr.bf16.mxu1 %v12985_v63  ;;  %v13064_v62 = vld [vmem:[%s14759_s22 + $0x19d0] ss:$8 sps:$4 sm:$0xff]   ;;  %v13069_v63 = vld [vmem:[%s14759_s22 + $0x5e4] ss:$8 sps:$4 sm:$0xff]  }
 0x18d   : > { %9716 = vmatprep.subr.bf16.mxu0 %v12988_v45  ;;  %v13072_v45 = vld [vmem:[%s14759_s22 + $0x19e4] ss:$8 sps:$4 sm:$0xff]  }
 0x18e   : > { %8846 = vmatmul.mubr.bf16.vlgmr.msra.gmra.mrb[0].mxu1 %v10892_v1  ;;  %v13067_v1 = vld [vmem:[%s14759_s22 + $0x5e0] ss:$8 sps:$4 sm:$0xff]  }
 0x18f   : > { %9706 = vmatmul.mubr.bf16.vlgmr.msra.gmra.mrb[0].mxu0 %v10932_v2  ;;  %8857 = vmatpush1.bf16.msra.mxu1 %v12983_v3  ;;  %v13070_v2 = vld [vmem:[%s14759_s22 + $0x19e0] ss:$8 sps:$4 sm:$0xff]   ;;  %v13075_v3 = vld [vmem:[%s14759_s22 + $0x5f4] ss:$8 sps:$4 sm:$0xff]  }
 0x190   : > { %9717 = vmatpush1.bf16.msra.mxu0 %v12986_v4  ;;  %8858 = vmatprep.subr.bf16.mxu1 %v12991_v5  ;;  %v13078_v4 = vld [vmem:[%s14759_s22 + $0x19f4] ss:$8 sps:$4 sm:$0xff]   ;;  %v13073_v5 = vld [vmem:[%s14759_s22 + $0x5f0] ss:$8 sps:$4 sm:$0xff]  }
 0x191   : > { %9718 = vmatprep.subr.bf16.mxu0 %v12994_v6  ;;  %8888 = vmatprep.mubr.bf16.mxu1 %v10895_v7  ;;  %v13076_v6 = vld [vmem:[%s14759_s22 + $0x19f0] ss:$8 sps:$4 sm:$0xff]   ;;  %v13081_v7 = vld [vmem:[%s14759_s22 + $0x604] ss:$8 sps:$4 sm:$0xff]  }
 0x192   : > { %9748 = vmatprep.mubr.bf16.mxu0 %v10935_v55  ;;  %v13084_v55 = vld [vmem:[%s14759_s22 + $0x1a04] ss:$8 sps:$4 sm:$0xff]  }
 0x193   : > { %8859 = vmatpush1.bf16.msra.mxu1 %v12989_v56  ;;  %v15251_v56 = vld [vmem:[%s14761_s23 + $0x30] sm:$0xff] }
 0x194   : > { %9719 = vmatpush1.bf16.msra.mxu0 %v12992_v59  ;;  %8860 = vmatprep.subr.bf16.mxu1 %v12997_v60  ;;  %v15254_v59 = vld [vmem:[%s14761_s23 + $0x170] sm:$0xff] }
 0x195   : > { %9720 = vmatprep.subr.bf16.mxu0 %v13000_v8  ;;  %v15257_v60 = vld [vmem:[%s14761_s23 + $0xd0] sm:$0xff] }
 0x196   : > { %v15260_v8 = vld [vmem:[%s14761_s23 + $0x210] sm:$0xff] }
 0x197   : > { %8861 = vmatpush1.bf16.msra.mxu1 %v12995_v9  ;;  %v10894_v9 = vcombine.low %v15167_v48, %v15170_v51  ;;  %v10937_v48 = vcombine.high %v15257_v60, %v15260_v8  ;;  %v13085_v51 = vld [vmem:[%s14759_s22 + $0x610] ss:$8 sps:$4 sm:$0xff]  }
 0x198   : > { %9721 = vmatpush1.bf16.msra.mxu0 %v12998_v10  ;;  %8862 = vmatprep.subr.bf16.mxu1 %v13003_v11  ;;  %v10934_v10 = vcombine.low %v15173_v52, %v15176_v0  ;;  %v13079_v11 = vld [vmem:[%s14759_s22 + $0x600] ss:$8 sps:$4 sm:$0xff]   ;;  %v13088_v52 = vld [vmem:[%s14759_s22 + $0x1a10] ss:$8 sps:$4 sm:$0xff]   ;;  %v13093_v0 = vld [vmem:[%s14759_s22 + $0x624] ss:$8 sps:$4 sm:$0xff]  }
 0x199   : > { %9722 = vmatprep.subr.bf16.mxu0 %v13006_v12  ;;  %v13082_v12 = vld [vmem:[%s14759_s22 + $0x1a00] ss:$8 sps:$4 sm:$0xff]  }
 0x19b   : > { %8863 = vmatpush1.bf16.msra.mxu1 %v13001_v13  ;;  %v13087_v13 = vld [vmem:[%s14759_s22 + $0x614] ss:$8 sps:$4 sm:$0xff]  }
 0x19c   : > { %9723 = vmatpush1.bf16.msra.mxu0 %v13004_v14  ;;  %8864 = vmatprep.subr.bf16.mxu1 %v13009_v15  ;;  %v13090_v14 = vld [vmem:[%s14759_s22 + $0x1a14] ss:$8 sps:$4 sm:$0xff]   ;;  %v10897_v15 = vcombine.high %v15251_v56, %v15254_v59 }
 0x19d   : > { %9724 = vmatprep.subr.bf16.mxu0 %v13012_v16  ;;  %v13096_v16 = vld [vmem:[%s14759_s22 + $0x1a24] ss:$8 sps:$4 sm:$0xff]  }
 0x19f   : > { %8865 = vmatpush1.bf16.msra.mxu1 %v13007_v17  ;;  %v13091_v17 = vld [vmem:[%s14759_s22 + $0x620] ss:$8 sps:$4 sm:$0xff]  }
 0x1a0   : > { %9725 = vmatpush1.bf16.msra.mxu0 %v13010_v18  ;;  %8866 = vmatprep.subr.bf16.mxu1 %v13015_v19  ;;  %v13094_v18 = vld [vmem:[%s14759_s22 + $0x1a20] ss:$8 sps:$4 sm:$0xff]   ;;  %v13099_v19 = vld [vmem:[%s14759_s22 + $0x634] ss:$8 sps:$4 sm:$0xff]  }
 0x1a1   : > { %9726 = vmatprep.subr.bf16.mxu0 %v13018_v20  ;;  %v13102_v20 = vld [vmem:[%s14759_s22 + $0x1a34] ss:$8 sps:$4 sm:$0xff]  }
 0x1a3   : > { %8867 = vmatpush1.bf16.msra.mxu1 %v13013_v21  ;;  %v13097_v21 = vld [vmem:[%s14759_s22 + $0x630] ss:$8 sps:$4 sm:$0xff]  }
 0x1a4   : > { %9727 = vmatpush1.bf16.msra.mxu0 %v13016_v22  ;;  %8868 = vmatprep.subr.bf16.mxu1 %v13021_v23  ;;  %v13100_v22 = vld [vmem:[%s14759_s22 + $0x1a30] ss:$8 sps:$4 sm:$0xff]   ;;  %v13105_v23 = vld [vmem:[%s14759_s22 + $0x644] ss:$8 sps:$4 sm:$0xff]  }
 0x1a5   : > { %9728 = vmatprep.subr.bf16.mxu0 %v13024_v24  ;;  %v13108_v24 = vld [vmem:[%s14759_s22 + $0x1a44] ss:$8 sps:$4 sm:$0xff]  }
 0x1a7   : > { %8869 = vmatpush1.bf16.msra.mxu1 %v13019_v25  ;;  %v13103_v25 = vld [vmem:[%s14759_s22 + $0x640] ss:$8 sps:$4 sm:$0xff]  }
 0x1a8   : > { %9729 = vmatpush1.bf16.msra.mxu0 %v13022_v26  ;;  %8870 = vmatprep.subr.bf16.mxu1 %v13027_v27  ;;  %v13106_v26 = vld [vmem:[%s14759_s22 + $0x1a40] ss:$8 sps:$4 sm:$0xff]   ;;  %v13111_v27 = vld [vmem:[%s14759_s22 + $0x654] ss:$8 sps:$4 sm:$0xff]  }
 0x1a9   : > { %9730 = vmatprep.subr.bf16.mxu0 %v13030_v28  ;;  %v13114_v28 = vld [vmem:[%s14759_s22 + $0x1a54] ss:$8 sps:$4 sm:$0xff]  }
 0x1ab   : > { %8871 = vmatpush1.bf16.msra.mxu1 %v13025_v29  ;;  %v13109_v29 = vld [vmem:[%s14759_s22 + $0x650] ss:$8 sps:$4 sm:$0xff]  }
 0x1ac   : > { %9731 = vmatpush1.bf16.msra.mxu0 %v13028_v30  ;;  %8872 = vmatprep.subr.bf16.mxu1 %v13033_v31  ;;  %v13112_v30 = vld [vmem:[%s14759_s22 + $0x1a50] ss:$8 sps:$4 sm:$0xff]   ;;  %v13117_v31 = vld [vmem:[%s14759_s22 + $0x664] ss:$8 sps:$4 sm:$0xff]  }
 0x1ad   : > { %9732 = vmatprep.subr.bf16.mxu0 %v13036_v32  ;;  %v13120_v32 = vld [vmem:[%s14759_s22 + $0x1a64] ss:$8 sps:$4 sm:$0xff]  }
 0x1af   : > { %8873 = vmatpush1.bf16.msra.mxu1 %v13031_v33  ;;  %v13115_v33 = vld [vmem:[%s14759_s22 + $0x660] ss:$8 sps:$4 sm:$0xff]  }
 0x1b0   : > { %9733 = vmatpush1.bf16.msra.mxu0 %v13034_v34  ;;  %8874 = vmatprep.subr.bf16.mxu1 %v13039_v35  ;;  %v13118_v34 = vld [vmem:[%s14759_s22 + $0x1a60] ss:$8 sps:$4 sm:$0xff]   ;;  %v13123_v35 = vld [vmem:[%s14759_s22 + $0x674] ss:$8 sps:$4 sm:$0xff]  }
 0x1b1   : > { %9734 = vmatprep.subr.bf16.mxu0 %v13042_v36  ;;  %v13126_v36 = vld [vmem:[%s14759_s22 + $0x1a74] ss:$8 sps:$4 sm:$0xff]  }
 0x1b3   : > { %8875 = vmatpush1.bf16.msra.mxu1 %v13037_v37  ;;  %v13121_v37 = vld [vmem:[%s14759_s22 + $0x670] ss:$8 sps:$4 sm:$0xff]  }
 0x1b4   : > { %9735 = vmatpush1.bf16.msra.mxu0 %v13040_v38  ;;  %8876 = vmatprep.subr.bf16.mxu1 %v13045_v39  ;;  %v13124_v38 = vld [vmem:[%s14759_s22 + $0x1a70] ss:$8 sps:$4 sm:$0xff]   ;;  %v13129_v39 = vld [vmem:[%s14759_s22 + $0x684] ss:$8 sps:$4 sm:$0xff]  }
 0x1b5   : > { %9736 = vmatprep.subr.bf16.mxu0 %v13048_v40  ;;  %v13132_v40 = vld [vmem:[%s14759_s22 + $0x1a84] ss:$8 sps:$4 sm:$0xff]  }
 0x1b7   : > { %8877 = vmatpush1.bf16.msra.mxu1 %v13043_v43  ;;  %v13127_v43 = vld [vmem:[%s14759_s22 + $0x680] ss:$8 sps:$4 sm:$0xff]  }
 0x1b8   : > { %9737 = vmatpush1.bf16.msra.mxu0 %v13046_v44  ;;  %8878 = vmatprep.subr.bf16.mxu1 %v13051_v49  ;;  %v13130_v44 = vld [vmem:[%s14759_s22 + $0x1a80] ss:$8 sps:$4 sm:$0xff]   ;;  %v13135_v49 = vld [vmem:[%s14759_s22 + $0x694] ss:$8 sps:$4 sm:$0xff]  }
 0x1b9   : > { %9738 = vmatprep.subr.bf16.mxu0 %v13054_v50  ;;  %v13138_v50 = vld [vmem:[%s14759_s22 + $0x1a94] ss:$8 sps:$4 sm:$0xff]  }
 0x1bb   : > { %8879 = vmatpush1.bf16.msra.mxu1 %v13049_v53  ;;  %v13133_v53 = vld [vmem:[%s14759_s22 + $0x690] ss:$8 sps:$4 sm:$0xff]  }
 0x1bc   : > { %9739 = vmatpush1.bf16.msra.mxu0 %v13052_v54  ;;  %8880 = vmatprep.subr.bf16.mxu1 %v13057_v41  ;;  %v13136_v54 = vld [vmem:[%s14759_s22 + $0x1a90] ss:$8 sps:$4 sm:$0xff]   ;;  %v13141_v41 = vld [vmem:[%s14759_s22 + $0x6a4] ss:$8 sps:$4 sm:$0xff]  }
 0x1bd   : > { %9740 = vmatprep.subr.bf16.mxu0 %v13060_v42  ;;  %v13144_v42 = vld [vmem:[%s14759_s22 + $0x1aa4] ss:$8 sps:$4 sm:$0xff]  }
 0x1bf   : > { %8881 = vmatpush1.bf16.msra.mxu1 %v13055_v46  ;;  %v13139_v46 = vld [vmem:[%s14759_s22 + $0x6a0] ss:$8 sps:$4 sm:$0xff]  }
 0x1c0   : > { %9741 = vmatpush1.bf16.msra.mxu0 %v13058_v47  ;;  %8882 = vmatprep.subr.bf16.mxu1 %v13063_v57  ;;  %v13142_v47 = vld [vmem:[%s14759_s22 + $0x1aa0] ss:$8 sps:$4 sm:$0xff]   ;;  %v13147_v57 = vld [vmem:[%s14759_s22 + $0x6b4] ss:$8 sps:$4 sm:$0xff]  }
 0x1c1   : > { %9742 = vmatprep.subr.bf16.mxu0 %v13066_v58  ;;  %v13150_v58 = vld [vmem:[%s14759_s22 + $0x1ab4] ss:$8 sps:$4 sm:$0xff]  }
 0x1c3   : > { %8883 = vmatpush1.bf16.msra.mxu1 %v13061_v61  ;;  %v13145_v61 = vld [vmem:[%s14759_s22 + $0x6b0] ss:$8 sps:$4 sm:$0xff]  }
 0x1c4   : > { %9743 = vmatpush1.bf16.msra.mxu0 %v13064_v62  ;;  %8884 = vmatprep.subr.bf16.mxu1 %v13069_v63  ;;  %v13148_v62 = vld [vmem:[%s14759_s22 + $0x1ab0] ss:$8 sps:$4 sm:$0xff]   ;;  %v13153_v63 = vld [vmem:[%s14759_s22 + $0x6c4] ss:$8 sps:$4 sm:$0xff]  }
 0x1c5   : > { %9744 = vmatprep.subr.bf16.mxu0 %v13072_v45  ;;  %v13156_v45 = vld [vmem:[%s14759_s22 + $0x1ac4] ss:$8 sps:$4 sm:$0xff]  }
 0x1c7   : > { %8885 = vmatpush1.bf16.msra.mxu1 %v13067_v1  ;;  %v13151_v1 = vld [vmem:[%s14759_s22 + $0x6c0] ss:$8 sps:$4 sm:$0xff]  }
 0x1c8   : > { %9745 = vmatpush1.bf16.msra.mxu0 %v13070_v2  ;;  %8886 = vmatprep.subr.bf16.mxu1 %v13075_v3  ;;  %v13154_v2 = vld [vmem:[%s14759_s22 + $0x1ac0] ss:$8 sps:$4 sm:$0xff]   ;;  %v13159_v3 = vld [vmem:[%s14759_s22 + $0x6d4] ss:$8 sps:$4 sm:$0xff]  }
 0x1c9   : > { %9746 = vmatprep.subr.bf16.mxu0 %v13078_v4  ;;  %v13162_v4 = vld [vmem:[%s14759_s22 + $0x1ad4] ss:$8 sps:$4 sm:$0xff]  }
 0x1cb   : > { %8887 = vmatpush1.bf16.msra.mxu1 %v13073_v5  ;;  %v13157_v5 = vld [vmem:[%s14759_s22 + $0x6d0] ss:$8 sps:$4 sm:$0xff]  }
 0x1cc   : > { %9747 = vmatpush1.bf16.msra.mxu0 %v13076_v6  ;;  %8899 = vmatprep.subr.bf16.mxu1 %v13081_v7  ;;  %v13160_v6 = vld [vmem:[%s14759_s22 + $0x1ad0] ss:$8 sps:$4 sm:$0xff]   ;;  %v13165_v7 = vld [vmem:[%s14759_s22 + $0x6e4] ss:$8 sps:$4 sm:$0xff]  }
 0x1cd   : > { %9759 = vmatprep.subr.bf16.mxu0 %v13084_v55  ;;  %v13168_v55 = vld [vmem:[%s14759_s22 + $0x1ae4] ss:$8 sps:$4 sm:$0xff]  }
 0x1ce   : > { %8889 = vmatmul.mubr.bf16.vlgmr.msra.gmra.mrb[0].mxu1 %v10894_v9  ;;  %v13163_v9 = vld [vmem:[%s14759_s22 + $0x6e0] ss:$8 sps:$4 sm:$0xff]  }
 0x1cf   : > { %9749 = vmatmul.mubr.bf16.vlgmr.msra.gmra.mrb[0].mxu0 %v10934_v10  ;;  %8900 = vmatpush1.bf16.msra.mxu1 %v13079_v11  ;;  %v13166_v10 = vld [vmem:[%s14759_s22 + $0x1ae0] ss:$8 sps:$4 sm:$0xff]   ;;  %v13171_v11 = vld [vmem:[%s14759_s22 + $0x6f4] ss:$8 sps:$4 sm:$0xff]  }
 0x1d0   : > { %9760 = vmatpush1.bf16.msra.mxu0 %v13082_v12  ;;  %8901 = vmatprep.subr.bf16.mxu1 %v13087_v13  ;;  %v13174_v12 = vld [vmem:[%s14759_s22 + $0x1af4] ss:$8 sps:$4 sm:$0xff]   ;;  %v13169_v13 = vld [vmem:[%s14759_s22 + $0x6f0] ss:$8 sps:$4 sm:$0xff]  }
 0x1d1   : > { %9761 = vmatprep.subr.bf16.mxu0 %v13090_v14  ;;  %8931 = vmatprep.mubr.bf16.mxu1 %v10897_v15  ;;  %v13172_v14 = vld [vmem:[%s14759_s22 + $0x1af0] ss:$8 sps:$4 sm:$0xff]   ;;  %v13177_v15 = vld [vmem:[%s14759_s22 + $0x704] ss:$8 sps:$4 sm:$0xff]  }
 0x1d2   : > { %9791 = vmatprep.mubr.bf16.mxu0 %v10937_v48  ;;  %v13180_v48 = vld [vmem:[%s14759_s22 + $0x1b04] ss:$8 sps:$4 sm:$0xff]  }
 0x1d3   : > { %8902 = vmatpush1.bf16.msra.mxu1 %v13085_v51  ;;  %v15335_v51 = vld [vmem:[%s14761_s23 + $0x38] sm:$0xff] }
 0x1d4   : > { %9762 = vmatpush1.bf16.msra.mxu0 %v13088_v52  ;;  %8903 = vmatprep.subr.bf16.mxu1 %v13093_v0  ;;  %v15338_v52 = vld [vmem:[%s14761_s23 + $0x178] sm:$0xff] }
 0x1d5   : > { %9763 = vmatprep.subr.bf16.mxu0 %v13096_v16  ;;  %v15341_v0 = vld [vmem:[%s14761_s23 + $0xd8] sm:$0xff] }
 0x1d6   : > { %v15344_v16 = vld [vmem:[%s14761_s23 + $0x218] sm:$0xff] }
 0x1d7   : > { %8904 = vmatpush1.bf16.msra.mxu1 %v13091_v17  ;;  %v10896_v17 = vcombine.low %v15251_v56, %v15254_v59  ;;  %v10939_v56 = vcombine.high %v15341_v0, %v15344_v16  ;;  %v13181_v59 = vld [vmem:[%s14759_s22 + $0x710] ss:$8 sps:$4 sm:$0xff]  }
 0x1d8   : > { %9764 = vmatpush1.bf16.msra.mxu0 %v13094_v18  ;;  %8905 = vmatprep.subr.bf16.mxu1 %v13099_v19  ;;  %v10936_v18 = vcombine.low %v15257_v60, %v15260_v8  ;;  %v13175_v19 = vld [vmem:[%s14759_s22 + $0x700] ss:$8 sps:$4 sm:$0xff]   ;;  %v13184_v60 = vld [vmem:[%s14759_s22 + $0x1b10] ss:$8 sps:$4 sm:$0xff]   ;;  %v13189_v8 = vld [vmem:[%s14759_s22 + $0x724] ss:$8 sps:$4 sm:$0xff]  }
 0x1d9   : > { %9765 = vmatprep.subr.bf16.mxu0 %v13102_v20  ;;  %v13178_v20 = vld [vmem:[%s14759_s22 + $0x1b00] ss:$8 sps:$4 sm:$0xff]  }
 0x1db   : > { %8906 = vmatpush1.bf16.msra.mxu1 %v13097_v21  ;;  %v13183_v21 = vld [vmem:[%s14759_s22 + $0x714] ss:$8 sps:$4 sm:$0xff]  }
 0x1dc   : > { %9766 = vmatpush1.bf16.msra.mxu0 %v13100_v22  ;;  %8907 = vmatprep.subr.bf16.mxu1 %v13105_v23  ;;  %v13186_v22 = vld [vmem:[%s14759_s22 + $0x1b14] ss:$8 sps:$4 sm:$0xff]   ;;  %v10899_v23 = vcombine.high %v15335_v51, %v15338_v52 }
 0x1dd   : > { %9767 = vmatprep.subr.bf16.mxu0 %v13108_v24  ;;  %v13192_v24 = vld [vmem:[%s14759_s22 + $0x1b24] ss:$8 sps:$4 sm:$0xff]  }
 0x1df   : > { %8908 = vmatpush1.bf16.msra.mxu1 %v13103_v25  ;;  %v13187_v25 = vld [vmem:[%s14759_s22 + $0x720] ss:$8 sps:$4 sm:$0xff]  }
 0x1e0   : > { %9768 = vmatpush1.bf16.msra.mxu0 %v13106_v26  ;;  %8909 = vmatprep.subr.bf16.mxu1 %v13111_v27  ;;  %v13190_v26 = vld [vmem:[%s14759_s22 + $0x1b20] ss:$8 sps:$4 sm:$0xff]   ;;  %v13195_v27 = vld [vmem:[%s14759_s22 + $0x734] ss:$8 sps:$4 sm:$0xff]  }
 0x1e1   : > { %9769 = vmatprep.subr.bf16.mxu0 %v13114_v28  ;;  %v13198_v28 = vld [vmem:[%s14759_s22 + $0x1b34] ss:$8 sps:$4 sm:$0xff]  }
 0x1e3   : > { %8910 = vmatpush1.bf16.msra.mxu1 %v13109_v29  ;;  %v13193_v29 = vld [vmem:[%s14759_s22 + $0x730] ss:$8 sps:$4 sm:$0xff]  }
 0x1e4   : > { %9770 = vmatpush1.bf16.msra.mxu0 %v13112_v30  ;;  %8911 = vmatprep.subr.bf16.mxu1 %v13117_v31  ;;  %v13196_v30 = vld [vmem:[%s14759_s22 + $0x1b30] ss:$8 sps:$4 sm:$0xff]   ;;  %v13201_v31 = vld [vmem:[%s14759_s22 + $0x744] ss:$8 sps:$4 sm:$0xff]  }
 0x1e5   : > { %9771 = vmatprep.subr.bf16.mxu0 %v13120_v32  ;;  %v13204_v32 = vld [vmem:[%s14759_s22 + $0x1b44] ss:$8 sps:$4 sm:$0xff]  }
 0x1e7   : > { %8912 = vmatpush1.bf16.msra.mxu1 %v13115_v33  ;;  %v13199_v33 = vld [vmem:[%s14759_s22 + $0x740] ss:$8 sps:$4 sm:$0xff]  }
 0x1e8   : > { %9772 = vmatpush1.bf16.msra.mxu0 %v13118_v34  ;;  %8913 = vmatprep.subr.bf16.mxu1 %v13123_v35  ;;  %v13202_v34 = vld [vmem:[%s14759_s22 + $0x1b40] ss:$8 sps:$4 sm:$0xff]   ;;  %v13207_v35 = vld [vmem:[%s14759_s22 + $0x754] ss:$8 sps:$4 sm:$0xff]  }
 0x1e9   : > { %9773 = vmatprep.subr.bf16.mxu0 %v13126_v36  ;;  %v13210_v36 = vld [vmem:[%s14759_s22 + $0x1b54] ss:$8 sps:$4 sm:$0xff]  }
 0x1eb   : > { %8914 = vmatpush1.bf16.msra.mxu1 %v13121_v37  ;;  %v13205_v37 = vld [vmem:[%s14759_s22 + $0x750] ss:$8 sps:$4 sm:$0xff]  }
 0x1ec   : > { %9774 = vmatpush1.bf16.msra.mxu0 %v13124_v38  ;;  %8915 = vmatprep.subr.bf16.mxu1 %v13129_v39  ;;  %v13208_v38 = vld [vmem:[%s14759_s22 + $0x1b50] ss:$8 sps:$4 sm:$0xff]   ;;  %v13213_v39 = vld [vmem:[%s14759_s22 + $0x764] ss:$8 sps:$4 sm:$0xff]  }
 0x1ed   : > { %9775 = vmatprep.subr.bf16.mxu0 %v13132_v40  ;;  %v13216_v40 = vld [vmem:[%s14759_s22 + $0x1b64] ss:$8 sps:$4 sm:$0xff]  }
 0x1ef   : > { %8916 = vmatpush1.bf16.msra.mxu1 %v13127_v43  ;;  %v13211_v43 = vld [vmem:[%s14759_s22 + $0x760] ss:$8 sps:$4 sm:$0xff]  }
 0x1f0   : > { %9776 = vmatpush1.bf16.msra.mxu0 %v13130_v44  ;;  %8917 = vmatprep.subr.bf16.mxu1 %v13135_v49  ;;  %v13214_v44 = vld [vmem:[%s14759_s22 + $0x1b60] ss:$8 sps:$4 sm:$0xff]   ;;  %v13219_v49 = vld [vmem:[%s14759_s22 + $0x774] ss:$8 sps:$4 sm:$0xff]  }
 0x1f1   : > { %9777 = vmatprep.subr.bf16.mxu0 %v13138_v50  ;;  %v13222_v50 = vld [vmem:[%s14759_s22 + $0x1b74] ss:$8 sps:$4 sm:$0xff]  }
 0x1f3   : > { %8918 = vmatpush1.bf16.msra.mxu1 %v13133_v53  ;;  %v13217_v53 = vld [vmem:[%s14759_s22 + $0x770] ss:$8 sps:$4 sm:$0xff]  }
 0x1f4   : > { %9778 = vmatpush1.bf16.msra.mxu0 %v13136_v54  ;;  %8919 = vmatprep.subr.bf16.mxu1 %v13141_v41  ;;  %v13220_v54 = vld [vmem:[%s14759_s22 + $0x1b70] ss:$8 sps:$4 sm:$0xff]   ;;  %v13225_v41 = vld [vmem:[%s14759_s22 + $0x784] ss:$8 sps:$4 sm:$0xff]  }
 0x1f5   : > { %9779 = vmatprep.subr.bf16.mxu0 %v13144_v42  ;;  %v13228_v42 = vld [vmem:[%s14759_s22 + $0x1b84] ss:$8 sps:$4 sm:$0xff]  }
 0x1f7   : > { %8920 = vmatpush1.bf16.msra.mxu1 %v13139_v46  ;;  %v13223_v46 = vld [vmem:[%s14759_s22 + $0x780] ss:$8 sps:$4 sm:$0xff]  }
 0x1f8   : > { %9780 = vmatpush1.bf16.msra.mxu0 %v13142_v47  ;;  %8921 = vmatprep.subr.bf16.mxu1 %v13147_v57  ;;  %v13226_v47 = vld [vmem:[%s14759_s22 + $0x1b80] ss:$8 sps:$4 sm:$0xff]   ;;  %v13231_v57 = vld [vmem:[%s14759_s22 + $0x794] ss:$8 sps:$4 sm:$0xff]  }
 0x1f9   : > { %9781 = vmatprep.subr.bf16.mxu0 %v13150_v58  ;;  %v13234_v58 = vld [vmem:[%s14759_s22 + $0x1b94] ss:$8 sps:$4 sm:$0xff]  }
 0x1fb   : > { %8922 = vmatpush1.bf16.msra.mxu1 %v13145_v61  ;;  %v13229_v61 = vld [vmem:[%s14759_s22 + $0x790] ss:$8 sps:$4 sm:$0xff]  }
 0x1fc   : > { %9782 = vmatpush1.bf16.msra.mxu0 %v13148_v62  ;;  %8923 = vmatprep.subr.bf16.mxu1 %v13153_v63  ;;  %v13232_v62 = vld [vmem:[%s14759_s22 + $0x1b90] ss:$8 sps:$4 sm:$0xff]   ;;  %v13237_v63 = vld [vmem:[%s14759_s22 + $0x7a4] ss:$8 sps:$4 sm:$0xff]  }
 0x1fd   : > { %9783 = vmatprep.subr.bf16.mxu0 %v13156_v45  ;;  %v13240_v45 = vld [vmem:[%s14759_s22 + $0x1ba4] ss:$8 sps:$4 sm:$0xff]  }
 0x1ff   : > { %8924 = vmatpush1.bf16.msra.mxu1 %v13151_v1  ;;  %v13235_v1 = vld [vmem:[%s14759_s22 + $0x7a0] ss:$8 sps:$4 sm:$0xff]  }
 0x200   : > { %9784 = vmatpush1.bf16.msra.mxu0 %v13154_v2  ;;  %8925 = vmatprep.subr.bf16.mxu1 %v13159_v3  ;;  %v13238_v2 = vld [vmem:[%s14759_s22 + $0x1ba0] ss:$8 sps:$4 sm:$0xff]   ;;  %v13243_v3 = vld [vmem:[%s14759_s22 + $0x7b4] ss:$8 sps:$4 sm:$0xff]  }
 0x201   : > { %9785 = vmatprep.subr.bf16.mxu0 %v13162_v4  ;;  %v13246_v4 = vld [vmem:[%s14759_s22 + $0x1bb4] ss:$8 sps:$4 sm:$0xff]  }
 0x203   : > { %8926 = vmatpush1.bf16.msra.mxu1 %v13157_v5  ;;  %v13241_v5 = vld [vmem:[%s14759_s22 + $0x7b0] ss:$8 sps:$4 sm:$0xff]  }
 0x204   : > { %9786 = vmatpush1.bf16.msra.mxu0 %v13160_v6  ;;  %8927 = vmatprep.subr.bf16.mxu1 %v13165_v7  ;;  %v13244_v6 = vld [vmem:[%s14759_s22 + $0x1bb0] ss:$8 sps:$4 sm:$0xff]   ;;  %v13249_v7 = vld [vmem:[%s14759_s22 + $0x7c4] ss:$8 sps:$4 sm:$0xff]  }
 0x205   : > { %9787 = vmatprep.subr.bf16.mxu0 %v13168_v55  ;;  %v13252_v55 = vld [vmem:[%s14759_s22 + $0x1bc4] ss:$8 sps:$4 sm:$0xff]  }
 0x207   : > { %8928 = vmatpush1.bf16.msra.mxu1 %v13163_v9  ;;  %v13247_v9 = vld [vmem:[%s14759_s22 + $0x7c0] ss:$8 sps:$4 sm:$0xff]  }
 0x208   : > { %9788 = vmatpush1.bf16.msra.mxu0 %v13166_v10  ;;  %8929 = vmatprep.subr.bf16.mxu1 %v13171_v11  ;;  %v13250_v10 = vld [vmem:[%s14759_s22 + $0x1bc0] ss:$8 sps:$4 sm:$0xff]   ;;  %v13255_v11 = vld [vmem:[%s14759_s22 + $0x7d4] ss:$8 sps:$4 sm:$0xff]  }
 0x209   : > { %9789 = vmatprep.subr.bf16.mxu0 %v13174_v12  ;;  %v13258_v12 = vld [vmem:[%s14759_s22 + $0x1bd4] ss:$8 sps:$4 sm:$0xff]  }
 0x20b   : > { %8930 = vmatpush1.bf16.msra.mxu1 %v13169_v13  ;;  %v13253_v13 = vld [vmem:[%s14759_s22 + $0x7d0] ss:$8 sps:$4 sm:$0xff]  }
 0x20c   : > { %9790 = vmatpush1.bf16.msra.mxu0 %v13172_v14  ;;  %8942 = vmatprep.subr.bf16.mxu1 %v13177_v15  ;;  %v13256_v14 = vld [vmem:[%s14759_s22 + $0x1bd0] ss:$8 sps:$4 sm:$0xff]   ;;  %v13261_v15 = vld [vmem:[%s14759_s22 + $0x7e4] ss:$8 sps:$4 sm:$0xff]  }
 0x20d   : > { %9802 = vmatprep.subr.bf16.mxu0 %v13180_v48  ;;  %v13264_v48 = vld [vmem:[%s14759_s22 + $0x1be4] ss:$8 sps:$4 sm:$0xff]  }
 0x20e   : > { %8932 = vmatmul.mubr.bf16.vlgmr.msra.gmra.mrb[0].mxu1 %v10896_v17  ;;  %v13259_v17 = vld [vmem:[%s14759_s22 + $0x7e0] ss:$8 sps:$4 sm:$0xff]  }
 0x20f   : > { %9792 = vmatmul.mubr.bf16.vlgmr.msra.gmra.mrb[0].mxu0 %v10936_v18  ;;  %8943 = vmatpush1.bf16.msra.mxu1 %v13175_v19  ;;  %v13262_v18 = vld [vmem:[%s14759_s22 + $0x1be0] ss:$8 sps:$4 sm:$0xff]   ;;  %v13267_v19 = vld [vmem:[%s14759_s22 + $0x7f4] ss:$8 sps:$4 sm:$0xff]  }
 0x210   : > { %9803 = vmatpush1.bf16.msra.mxu0 %v13178_v20  ;;  %8944 = vmatprep.subr.bf16.mxu1 %v13183_v21  ;;  %v13270_v20 = vld [vmem:[%s14759_s22 + $0x1bf4] ss:$8 sps:$4 sm:$0xff]   ;;  %v13265_v21 = vld [vmem:[%s14759_s22 + $0x7f0] ss:$8 sps:$4 sm:$0xff]  }
 0x211   : > { %9804 = vmatprep.subr.bf16.mxu0 %v13186_v22  ;;  %8974 = vmatprep.mubr.bf16.mxu1 %v10899_v23  ;;  %v13268_v22 = vld [vmem:[%s14759_s22 + $0x1bf0] ss:$8 sps:$4 sm:$0xff]   ;;  %v13273_v23 = vld [vmem:[%s14759_s22 + $0x804] ss:$8 sps:$4 sm:$0xff]  }
 0x212   : > { %9834 = vmatprep.mubr.bf16.mxu0 %v10939_v56  ;;  %v13276_v56 = vld [vmem:[%s14759_s22 + $0x1c04] ss:$8 sps:$4 sm:$0xff]  }
 0x213   : > { %8945 = vmatpush1.bf16.msra.mxu1 %v13181_v59  ;;  %v15419_v59 = vld [vmem:[%s14761_s23 + $0x40] sm:$0xff] }
 0x214   : > { %9805 = vmatpush1.bf16.msra.mxu0 %v13184_v60  ;;  %8946 = vmatprep.subr.bf16.mxu1 %v13189_v8  ;;  %v15422_v60 = vld [vmem:[%s14761_s23 + $0x180] sm:$0xff] }
 0x215   : > { %9806 = vmatprep.subr.bf16.mxu0 %v13192_v24  ;;  %v15425_v8 = vld [vmem:[%s14761_s23 + $0xe0] sm:$0xff] }
 0x216   : > { %v15428_v24 = vld [vmem:[%s14761_s23 + $0x220] sm:$0xff] }
 0x217   : > { %8947 = vmatpush1.bf16.msra.mxu1 %v13187_v25  ;;  %v10898_v25 = vcombine.low %v15335_v51, %v15338_v52  ;;  %v10941_v51 = vcombine.high %v15425_v8, %v15428_v24  ;;  %v13277_v52 = vld [vmem:[%s14759_s22 + $0x810] ss:$8 sps:$4 sm:$0xff]  }
 0x218   : > { %9807 = vmatpush1.bf16.msra.mxu0 %v13190_v26  ;;  %8948 = vmatprep.subr.bf16.mxu1 %v13195_v27  ;;  %v10938_v26 = vcombine.low %v15341_v0, %v15344_v16  ;;  %v13271_v27 = vld [vmem:[%s14759_s22 + $0x800] ss:$8 sps:$4 sm:$0xff]   ;;  %v13280_v0 = vld [vmem:[%s14759_s22 + $0x1c10] ss:$8 sps:$4 sm:$0xff]   ;;  %v13285_v16 = vld [vmem:[%s14759_s22 + $0x824] ss:$8 sps:$4 sm:$0xff]  }
 0x219   : > { %9808 = vmatprep.subr.bf16.mxu0 %v13198_v28  ;;  %v13274_v28 = vld [vmem:[%s14759_s22 + $0x1c00] ss:$8 sps:$4 sm:$0xff]  }
 0x21b   : > { %8949 = vmatpush1.bf16.msra.mxu1 %v13193_v29  ;;  %v13279_v29 = vld [vmem:[%s14759_s22 + $0x814] ss:$8 sps:$4 sm:$0xff]  }
 0x21c   : > { %9809 = vmatpush1.bf16.msra.mxu0 %v13196_v30  ;;  %8950 = vmatprep.subr.bf16.mxu1 %v13201_v31  ;;  %v13282_v30 = vld [vmem:[%s14759_s22 + $0x1c14] ss:$8 sps:$4 sm:$0xff]   ;;  %v10901_v31 = vcombine.high %v15419_v59, %v15422_v60 }
 0x21d   : > { %9810 = vmatprep.subr.bf16.mxu0 %v13204_v32  ;;  %v13288_v32 = vld [vmem:[%s14759_s22 + $0x1c24] ss:$8 sps:$4 sm:$0xff]  }
 0x21f   : > { %8951 = vmatpush1.bf16.msra.mxu1 %v13199_v33  ;;  %v13283_v33 = vld [vmem:[%s14759_s22 + $0x820] ss:$8 sps:$4 sm:$0xff]  }
 0x220   : > { %9811 = vmatpush1.bf16.msra.mxu0 %v13202_v34  ;;  %8952 = vmatprep.subr.bf16.mxu1 %v13207_v35  ;;  %v13286_v34 = vld [vmem:[%s14759_s22 + $0x1c20] ss:$8 sps:$4 sm:$0xff]   ;;  %v13291_v35 = vld [vmem:[%s14759_s22 + $0x834] ss:$8 sps:$4 sm:$0xff]  }
 0x221   : > { %9812 = vmatprep.subr.bf16.mxu0 %v13210_v36  ;;  %v13294_v36 = vld [vmem:[%s14759_s22 + $0x1c34] ss:$8 sps:$4 sm:$0xff]  }
 0x223   : > { %8953 = vmatpush1.bf16.msra.mxu1 %v13205_v37  ;;  %v13289_v37 = vld [vmem:[%s14759_s22 + $0x830] ss:$8 sps:$4 sm:$0xff]  }
 0x224   : > { %9813 = vmatpush1.bf16.msra.mxu0 %v13208_v38  ;;  %8954 = vmatprep.subr.bf16.mxu1 %v13213_v39  ;;  %v13292_v38 = vld [vmem:[%s14759_s22 + $0x1c30] ss:$8 sps:$4 sm:$0xff]   ;;  %v13297_v39 = vld [vmem:[%s14759_s22 + $0x844] ss:$8 sps:$4 sm:$0xff]  }
 0x225   : > { %9814 = vmatprep.subr.bf16.mxu0 %v13216_v40  ;;  %v13300_v40 = vld [vmem:[%s14759_s22 + $0x1c44] ss:$8 sps:$4 sm:$0xff]  }
 0x227   : > { %8955 = vmatpush1.bf16.msra.mxu1 %v13211_v43  ;;  %v13295_v43 = vld [vmem:[%s14759_s22 + $0x840] ss:$8 sps:$4 sm:$0xff]  }
 0x228   : > { %9815 = vmatpush1.bf16.msra.mxu0 %v13214_v44  ;;  %8956 = vmatprep.subr.bf16.mxu1 %v13219_v49  ;;  %v13298_v44 = vld [vmem:[%s14759_s22 + $0x1c40] ss:$8 sps:$4 sm:$0xff]   ;;  %v13303_v49 = vld [vmem:[%s14759_s22 + $0x854] ss:$8 sps:$4 sm:$0xff]  }
 0x229   : > { %9816 = vmatprep.subr.bf16.mxu0 %v13222_v50  ;;  %v13306_v50 = vld [vmem:[%s14759_s22 + $0x1c54] ss:$8 sps:$4 sm:$0xff]  }
 0x22b   : > { %8957 = vmatpush1.bf16.msra.mxu1 %v13217_v53  ;;  %v13301_v53 = vld [vmem:[%s14759_s22 + $0x850] ss:$8 sps:$4 sm:$0xff]  }
 0x22c   : > { %9817 = vmatpush1.bf16.msra.mxu0 %v13220_v54  ;;  %8958 = vmatprep.subr.bf16.mxu1 %v13225_v41  ;;  %v13304_v54 = vld [vmem:[%s14759_s22 + $0x1c50] ss:$8 sps:$4 sm:$0xff]   ;;  %v13309_v41 = vld [vmem:[%s14759_s22 + $0x864] ss:$8 sps:$4 sm:$0xff]  }
 0x22d   : > { %9818 = vmatprep.subr.bf16.mxu0 %v13228_v42  ;;  %v13312_v42 = vld [vmem:[%s14759_s22 + $0x1c64] ss:$8 sps:$4 sm:$0xff]  }
 0x22f   : > { %8959 = vmatpush1.bf16.msra.mxu1 %v13223_v46  ;;  %v13307_v46 = vld [vmem:[%s14759_s22 + $0x860] ss:$8 sps:$4 sm:$0xff]  }
 0x230   : > { %9819 = vmatpush1.bf16.msra.mxu0 %v13226_v47  ;;  %8960 = vmatprep.subr.bf16.mxu1 %v13231_v57  ;;  %v13310_v47 = vld [vmem:[%s14759_s22 + $0x1c60] ss:$8 sps:$4 sm:$0xff]   ;;  %v13315_v57 = vld [vmem:[%s14759_s22 + $0x874] ss:$8 sps:$4 sm:$0xff]  }
 0x231   : > { %9820 = vmatprep.subr.bf16.mxu0 %v13234_v58  ;;  %v13318_v58 = vld [vmem:[%s14759_s22 + $0x1c74] ss:$8 sps:$4 sm:$0xff]  }
 0x233   : > { %8961 = vmatpush1.bf16.msra.mxu1 %v13229_v61  ;;  %v13313_v61 = vld [vmem:[%s14759_s22 + $0x870] ss:$8 sps:$4 sm:$0xff]  }
 0x234   : > { %9821 = vmatpush1.bf16.msra.mxu0 %v13232_v62  ;;  %8962 = vmatprep.subr.bf16.mxu1 %v13237_v63  ;;  %v13316_v62 = vld [vmem:[%s14759_s22 + $0x1c70] ss:$8 sps:$4 sm:$0xff]   ;;  %v13321_v63 = vld [vmem:[%s14759_s22 + $0x884] ss:$8 sps:$4 sm:$0xff]  }
 0x235   : > { %9822 = vmatprep.subr.bf16.mxu0 %v13240_v45  ;;  %v13324_v45 = vld [vmem:[%s14759_s22 + $0x1c84] ss:$8 sps:$4 sm:$0xff]  }
 0x237   : > { %8963 = vmatpush1.bf16.msra.mxu1 %v13235_v1  ;;  %v13319_v1 = vld [vmem:[%s14759_s22 + $0x880] ss:$8 sps:$4 sm:$0xff]  }
 0x238   : > { %9823 = vmatpush1.bf16.msra.mxu0 %v13238_v2  ;;  %8964 = vmatprep.subr.bf16.mxu1 %v13243_v3  ;;  %v13322_v2 = vld [vmem:[%s14759_s22 + $0x1c80] ss:$8 sps:$4 sm:$0xff]   ;;  %v13327_v3 = vld [vmem:[%s14759_s22 + $0x894] ss:$8 sps:$4 sm:$0xff]  }
 0x239   : > { %9824 = vmatprep.subr.bf16.mxu0 %v13246_v4  ;;  %v13330_v4 = vld [vmem:[%s14759_s22 + $0x1c94] ss:$8 sps:$4 sm:$0xff]  }
 0x23b   : > { %8965 = vmatpush1.bf16.msra.mxu1 %v13241_v5  ;;  %v13325_v5 = vld [vmem:[%s14759_s22 + $0x890] ss:$8 sps:$4 sm:$0xff]  }
 0x23c   : > { %9825 = vmatpush1.bf16.msra.mxu0 %v13244_v6  ;;  %8966 = vmatprep.subr.bf16.mxu1 %v13249_v7  ;;  %v13328_v6 = vld [vmem:[%s14759_s22 + $0x1c90] ss:$8 sps:$4 sm:$0xff]   ;;  %v13333_v7 = vld [vmem:[%s14759_s22 + $0x8a4] ss:$8 sps:$4 sm:$0xff]  }
 0x23d   : > { %9826 = vmatprep.subr.bf16.mxu0 %v13252_v55  ;;  %v13336_v55 = vld [vmem:[%s14759_s22 + $0x1ca4] ss:$8 sps:$4 sm:$0xff]  }
 0x23f   : > { %8967 = vmatpush1.bf16.msra.mxu1 %v13247_v9  ;;  %v13331_v9 = vld [vmem:[%s14759_s22 + $0x8a0] ss:$8 sps:$4 sm:$0xff]  }
 0x240   : > { %9827 = vmatpush1.bf16.msra.mxu0 %v13250_v10  ;;  %8968 = vmatprep.subr.bf16.mxu1 %v13255_v11  ;;  %v13334_v10 = vld [vmem:[%s14759_s22 + $0x1ca0] ss:$8 sps:$4 sm:$0xff]   ;;  %v13339_v11 = vld [vmem:[%s14759_s22 + $0x8b4] ss:$8 sps:$4 sm:$0xff]  }
 0x241   : > { %9828 = vmatprep.subr.bf16.mxu0 %v13258_v12  ;;  %v13342_v12 = vld [vmem:[%s14759_s22 + $0x1cb4] ss:$8 sps:$4 sm:$0xff]  }
 0x243   : > { %8969 = vmatpush1.bf16.msra.mxu1 %v13253_v13  ;;  %v13337_v13 = vld [vmem:[%s14759_s22 + $0x8b0] ss:$8 sps:$4 sm:$0xff]  }
 0x244   : > { %9829 = vmatpush1.bf16.msra.mxu0 %v13256_v14  ;;  %8970 = vmatprep.subr.bf16.mxu1 %v13261_v15  ;;  %v13340_v14 = vld [vmem:[%s14759_s22 + $0x1cb0] ss:$8 sps:$4 sm:$0xff]   ;;  %v13345_v15 = vld [vmem:[%s14759_s22 + $0x8c4] ss:$8 sps:$4 sm:$0xff]  }
 0x245   : > { %9830 = vmatprep.subr.bf16.mxu0 %v13264_v48  ;;  %v13348_v48 = vld [vmem:[%s14759_s22 + $0x1cc4] ss:$8 sps:$4 sm:$0xff]  }
 0x247   : > { %8971 = vmatpush1.bf16.msra.mxu1 %v13259_v17  ;;  %v13343_v17 = vld [vmem:[%s14759_s22 + $0x8c0] ss:$8 sps:$4 sm:$0xff]  }
 0x248   : > { %9831 = vmatpush1.bf16.msra.mxu0 %v13262_v18  ;;  %8972 = vmatprep.subr.bf16.mxu1 %v13267_v19  ;;  %v13346_v18 = vld [vmem:[%s14759_s22 + $0x1cc0] ss:$8 sps:$4 sm:$0xff]   ;;  %v13351_v19 = vld [vmem:[%s14759_s22 + $0x8d4] ss:$8 sps:$4 sm:$0xff]  }
 0x249   : > { %9832 = vmatprep.subr.bf16.mxu0 %v13270_v20  ;;  %v13354_v20 = vld [vmem:[%s14759_s22 + $0x1cd4] ss:$8 sps:$4 sm:$0xff]  }
 0x24b   : > { %8973 = vmatpush1.bf16.msra.mxu1 %v13265_v21  ;;  %v13349_v21 = vld [vmem:[%s14759_s22 + $0x8d0] ss:$8 sps:$4 sm:$0xff]  }
 0x24c   : > { %9833 = vmatpush1.bf16.msra.mxu0 %v13268_v22  ;;  %8985 = vmatprep.subr.bf16.mxu1 %v13273_v23  ;;  %v13352_v22 = vld [vmem:[%s14759_s22 + $0x1cd0] ss:$8 sps:$4 sm:$0xff]   ;;  %v13357_v23 = vld [vmem:[%s14759_s22 + $0x8e4] ss:$8 sps:$4 sm:$0xff]  }
 0x24d   : > { %9845 = vmatprep.subr.bf16.mxu0 %v13276_v56  ;;  %v13360_v56 = vld [vmem:[%s14759_s22 + $0x1ce4] ss:$8 sps:$4 sm:$0xff]  }
 0x24e   : > { %8975 = vmatmul.mubr.bf16.vlgmr.msra.gmra.mrb[0].mxu1 %v10898_v25  ;;  %v13355_v25 = vld [vmem:[%s14759_s22 + $0x8e0] ss:$8 sps:$4 sm:$0xff]  }
 0x24f   : > { %9835 = vmatmul.mubr.bf16.vlgmr.msra.gmra.mrb[0].mxu0 %v10938_v26  ;;  %8986 = vmatpush1.bf16.msra.mxu1 %v13271_v27  ;;  %v13358_v26 = vld [vmem:[%s14759_s22 + $0x1ce0] ss:$8 sps:$4 sm:$0xff]   ;;  %v13363_v27 = vld [vmem:[%s14759_s22 + $0x8f4] ss:$8 sps:$4 sm:$0xff]  }
 0x250   : > { %9846 = vmatpush1.bf16.msra.mxu0 %v13274_v28  ;;  %8987 = vmatprep.subr.bf16.mxu1 %v13279_v29  ;;  %v13366_v28 = vld [vmem:[%s14759_s22 + $0x1cf4] ss:$8 sps:$4 sm:$0xff]   ;;  %v13361_v29 = vld [vmem:[%s14759_s22 + $0x8f0] ss:$8 sps:$4 sm:$0xff]  }
 0x251   : > { %9847 = vmatprep.subr.bf16.mxu0 %v13282_v30  ;;  %9017 = vmatprep.mubr.bf16.mxu1 %v10901_v31  ;;  %v13364_v30 = vld [vmem:[%s14759_s22 + $0x1cf0] ss:$8 sps:$4 sm:$0xff]   ;;  %v13369_v31 = vld [vmem:[%s14759_s22 + $0x904] ss:$8 sps:$4 sm:$0xff]  }
 0x252   : > { %9877 = vmatprep.mubr.bf16.mxu0 %v10941_v51  ;;  %v13372_v51 = vld [vmem:[%s14759_s22 + $0x1d04] ss:$8 sps:$4 sm:$0xff]  }
 0x253   : > { %8988 = vmatpush1.bf16.msra.mxu1 %v13277_v52  ;;  %v15503_v52 = vld [vmem:[%s14761_s23 + $0x48] sm:$0xff] }
 0x254   : > { %9848 = vmatpush1.bf16.msra.mxu0 %v13280_v0  ;;  %8989 = vmatprep.subr.bf16.mxu1 %v13285_v16  ;;  %v15506_v0 = vld [vmem:[%s14761_s23 + $0x188] sm:$0xff] }
 0x255   : > { %9849 = vmatprep.subr.bf16.mxu0 %v13288_v32  ;;  %v15509_v16 = vld [vmem:[%s14761_s23 + $0xe8] sm:$0xff] }
 0x256   : > { %v15512_v32 = vld [vmem:[%s14761_s23 + $0x228] sm:$0xff] }
 0x257   : > { %8990 = vmatpush1.bf16.msra.mxu1 %v13283_v33  ;;  %v10900_v33 = vcombine.low %v15419_v59, %v15422_v60  ;;  %v10943_v59 = vcombine.high %v15509_v16, %v15512_v32  ;;  %v13373_v60 = vld [vmem:[%s14759_s22 + $0x910] ss:$8 sps:$4 sm:$0xff]  }
 0x258   : > { %9850 = vmatpush1.bf16.msra.mxu0 %v13286_v34  ;;  %8991 = vmatprep.subr.bf16.mxu1 %v13291_v35  ;;  %v10940_v34 = vcombine.low %v15425_v8, %v15428_v24  ;;  %v13367_v35 = vld [vmem:[%s14759_s22 + $0x900] ss:$8 sps:$4 sm:$0xff]   ;;  %v13376_v8 = vld [vmem:[%s14759_s22 + $0x1d10] ss:$8 sps:$4 sm:$0xff]   ;;  %v13381_v24 = vld [vmem:[%s14759_s22 + $0x924] ss:$8 sps:$4 sm:$0xff]  }
 0x259   : > { %9851 = vmatprep.subr.bf16.mxu0 %v13294_v36  ;;  %v13370_v36 = vld [vmem:[%s14759_s22 + $0x1d00] ss:$8 sps:$4 sm:$0xff]  }
 0x25b   : > { %8992 = vmatpush1.bf16.msra.mxu1 %v13289_v37  ;;  %v13375_v37 = vld [vmem:[%s14759_s22 + $0x914] ss:$8 sps:$4 sm:$0xff]  }
 0x25c   : > { %9852 = vmatpush1.bf16.msra.mxu0 %v13292_v38  ;;  %8993 = vmatprep.subr.bf16.mxu1 %v13297_v39  ;;  %v13378_v38 = vld [vmem:[%s14759_s22 + $0x1d14] ss:$8 sps:$4 sm:$0xff]   ;;  %v10903_v39 = vcombine.high %v15503_v52, %v15506_v0 }
 0x25d   : > { %9853 = vmatprep.subr.bf16.mxu0 %v13300_v40  ;;  %v13384_v40 = vld [vmem:[%s14759_s22 + $0x1d24] ss:$8 sps:$4 sm:$0xff]  }
 0x25f   : > { %8994 = vmatpush1.bf16.msra.mxu1 %v13295_v43  ;;  %v13379_v43 = vld [vmem:[%s14759_s22 + $0x920] ss:$8 sps:$4 sm:$0xff]  }
 0x260   : > { %9854 = vmatpush1.bf16.msra.mxu0 %v13298_v44  ;;  %8995 = vmatprep.subr.bf16.mxu1 %v13303_v49  ;;  %v13382_v44 = vld [vmem:[%s14759_s22 + $0x1d20] ss:$8 sps:$4 sm:$0xff]   ;;  %v13387_v49 = vld [vmem:[%s14759_s22 + $0x934] ss:$8 sps:$4 sm:$0xff]  }
 0x261   : > { %9855 = vmatprep.subr.bf16.mxu0 %v13306_v50  ;;  %v13390_v50 = vld [vmem:[%s14759_s22 + $0x1d34] ss:$8 sps:$4 sm:$0xff]  }
 0x263   : > { %8996 = vmatpush1.bf16.msra.mxu1 %v13301_v53  ;;  %v13385_v53 = vld [vmem:[%s14759_s22 + $0x930] ss:$8 sps:$4 sm:$0xff]  }
 0x264   : > { %9856 = vmatpush1.bf16.msra.mxu0 %v13304_v54  ;;  %8997 = vmatprep.subr.bf16.mxu1 %v13309_v41  ;;  %v13388_v54 = vld [vmem:[%s14759_s22 + $0x1d30] ss:$8 sps:$4 sm:$0xff]   ;;  %v13393_v41 = vld [vmem:[%s14759_s22 + $0x944] ss:$8 sps:$4 sm:$0xff]  }
 0x265   : > { %9857 = vmatprep.subr.bf16.mxu0 %v13312_v42  ;;  %v13396_v42 = vld [vmem:[%s14759_s22 + $0x1d44] ss:$8 sps:$4 sm:$0xff]  }
 0x267   : > { %8998 = vmatpush1.bf16.msra.mxu1 %v13307_v46  ;;  %v13391_v46 = vld [vmem:[%s14759_s22 + $0x940] ss:$8 sps:$4 sm:$0xff]  }
 0x268   : > { %9858 = vmatpush1.bf16.msra.mxu0 %v13310_v47  ;;  %8999 = vmatprep.subr.bf16.mxu1 %v13315_v57  ;;  %v13394_v47 = vld [vmem:[%s14759_s22 + $0x1d40] ss:$8 sps:$4 sm:$0xff]   ;;  %v13399_v57 = vld [vmem:[%s14759_s22 + $0x954] ss:$8 sps:$4 sm:$0xff]  }
 0x269   : > { %9859 = vmatprep.subr.bf16.mxu0 %v13318_v58  ;;  %v13402_v58 = vld [vmem:[%s14759_s22 + $0x1d54] ss:$8 sps:$4 sm:$0xff]  }
 0x26b   : > { %9000 = vmatpush1.bf16.msra.mxu1 %v13313_v61  ;;  %v13397_v61 = vld [vmem:[%s14759_s22 + $0x950] ss:$8 sps:$4 sm:$0xff]  }
 0x26c   : > { %9860 = vmatpush1.bf16.msra.mxu0 %v13316_v62  ;;  %9001 = vmatprep.subr.bf16.mxu1 %v13321_v63  ;;  %v13400_v62 = vld [vmem:[%s14759_s22 + $0x1d50] ss:$8 sps:$4 sm:$0xff]   ;;  %v13405_v63 = vld [vmem:[%s14759_s22 + $0x964] ss:$8 sps:$4 sm:$0xff]  }
 0x26d   : > { %9861 = vmatprep.subr.bf16.mxu0 %v13324_v45  ;;  %v13408_v45 = vld [vmem:[%s14759_s22 + $0x1d64] ss:$8 sps:$4 sm:$0xff]  }
 0x26f   : > { %9002 = vmatpush1.bf16.msra.mxu1 %v13319_v1  ;;  %v13403_v1 = vld [vmem:[%s14759_s22 + $0x960] ss:$8 sps:$4 sm:$0xff]  }
 0x270   : > { %9862 = vmatpush1.bf16.msra.mxu0 %v13322_v2  ;;  %9003 = vmatprep.subr.bf16.mxu1 %v13327_v3  ;;  %v13406_v2 = vld [vmem:[%s14759_s22 + $0x1d60] ss:$8 sps:$4 sm:$0xff]   ;;  %v13411_v3 = vld [vmem:[%s14759_s22 + $0x974] ss:$8 sps:$4 sm:$0xff]  }
 0x271   : > { %9863 = vmatprep.subr.bf16.mxu0 %v13330_v4  ;;  %v13414_v4 = vld [vmem:[%s14759_s22 + $0x1d74] ss:$8 sps:$4 sm:$0xff]  }
 0x273   : > { %9004 = vmatpush1.bf16.msra.mxu1 %v13325_v5  ;;  %v13409_v5 = vld [vmem:[%s14759_s22 + $0x970] ss:$8 sps:$4 sm:$0xff]  }
 0x274   : > { %9864 = vmatpush1.bf16.msra.mxu0 %v13328_v6  ;;  %9005 = vmatprep.subr.bf16.mxu1 %v13333_v7  ;;  %v13412_v6 = vld [vmem:[%s14759_s22 + $0x1d70] ss:$8 sps:$4 sm:$0xff]   ;;  %v13417_v7 = vld [vmem:[%s14759_s22 + $0x984] ss:$8 sps:$4 sm:$0xff]  }
 0x275   : > { %9865 = vmatprep.subr.bf16.mxu0 %v13336_v55  ;;  %v13420_v55 = vld [vmem:[%s14759_s22 + $0x1d84] ss:$8 sps:$4 sm:$0xff]  }
 0x277   : > { %9006 = vmatpush1.bf16.msra.mxu1 %v13331_v9  ;;  %v13415_v9 = vld [vmem:[%s14759_s22 + $0x980] ss:$8 sps:$4 sm:$0xff]  }
 0x278   : > { %9866 = vmatpush1.bf16.msra.mxu0 %v13334_v10  ;;  %9007 = vmatprep.subr.bf16.mxu1 %v13339_v11  ;;  %v13418_v10 = vld [vmem:[%s14759_s22 + $0x1d80] ss:$8 sps:$4 sm:$0xff]   ;;  %v13423_v11 = vld [vmem:[%s14759_s22 + $0x994] ss:$8 sps:$4 sm:$0xff]  }
 0x279   : > { %9867 = vmatprep.subr.bf16.mxu0 %v13342_v12  ;;  %v13426_v12 = vld [vmem:[%s14759_s22 + $0x1d94] ss:$8 sps:$4 sm:$0xff]  }
 0x27b   : > { %9008 = vmatpush1.bf16.msra.mxu1 %v13337_v13  ;;  %v13421_v13 = vld [vmem:[%s14759_s22 + $0x990] ss:$8 sps:$4 sm:$0xff]  }
 0x27c   : > { %9868 = vmatpush1.bf16.msra.mxu0 %v13340_v14  ;;  %9009 = vmatprep.subr.bf16.mxu1 %v13345_v15  ;;  %v13424_v14 = vld [vmem:[%s14759_s22 + $0x1d90] ss:$8 sps:$4 sm:$0xff]   ;;  %v13429_v15 = vld [vmem:[%s14759_s22 + $0x9a4] ss:$8 sps:$4 sm:$0xff]  }
 0x27d   : > { %9869 = vmatprep.subr.bf16.mxu0 %v13348_v48  ;;  %v13432_v48 = vld [vmem:[%s14759_s22 + $0x1da4] ss:$8 sps:$4 sm:$0xff]  }
 0x27f   : > { %9010 = vmatpush1.bf16.msra.mxu1 %v13343_v17  ;;  %v13427_v17 = vld [vmem:[%s14759_s22 + $0x9a0] ss:$8 sps:$4 sm:$0xff]  }
 0x280   : > { %9870 = vmatpush1.bf16.msra.mxu0 %v13346_v18  ;;  %9011 = vmatprep.subr.bf16.mxu1 %v13351_v19  ;;  %v13430_v18 = vld [vmem:[%s14759_s22 + $0x1da0] ss:$8 sps:$4 sm:$0xff]   ;;  %v13435_v19 = vld [vmem:[%s14759_s22 + $0x9b4] ss:$8 sps:$4 sm:$0xff]  }
 0x281   : > { %9871 = vmatprep.subr.bf16.mxu0 %v13354_v20  ;;  %v13438_v20 = vld [vmem:[%s14759_s22 + $0x1db4] ss:$8 sps:$4 sm:$0xff]  }
 0x283   : > { %9012 = vmatpush1.bf16.msra.mxu1 %v13349_v21  ;;  %v13433_v21 = vld [vmem:[%s14759_s22 + $0x9b0] ss:$8 sps:$4 sm:$0xff]  }
 0x284   : > { %9872 = vmatpush1.bf16.msra.mxu0 %v13352_v22  ;;  %9013 = vmatprep.subr.bf16.mxu1 %v13357_v23  ;;  %v13436_v22 = vld [vmem:[%s14759_s22 + $0x1db0] ss:$8 sps:$4 sm:$0xff]   ;;  %v13441_v23 = vld [vmem:[%s14759_s22 + $0x9c4] ss:$8 sps:$4 sm:$0xff]  }
 0x285   : > { %9873 = vmatprep.subr.bf16.mxu0 %v13360_v56  ;;  %v13444_v56 = vld [vmem:[%s14759_s22 + $0x1dc4] ss:$8 sps:$4 sm:$0xff]  }
 0x287   : > { %9014 = vmatpush1.bf16.msra.mxu1 %v13355_v25  ;;  %v13439_v25 = vld [vmem:[%s14759_s22 + $0x9c0] ss:$8 sps:$4 sm:$0xff]  }
 0x288   : > { %9874 = vmatpush1.bf16.msra.mxu0 %v13358_v26  ;;  %9015 = vmatprep.subr.bf16.mxu1 %v13363_v27  ;;  %v13442_v26 = vld [vmem:[%s14759_s22 + $0x1dc0] ss:$8 sps:$4 sm:$0xff]   ;;  %v13447_v27 = vld [vmem:[%s14759_s22 + $0x9d4] ss:$8 sps:$4 sm:$0xff]  }
 0x289   : > { %9875 = vmatprep.subr.bf16.mxu0 %v13366_v28  ;;  %v13450_v28 = vld [vmem:[%s14759_s22 + $0x1dd4] ss:$8 sps:$4 sm:$0xff]  }
 0x28b   : > { %9016 = vmatpush1.bf16.msra.mxu1 %v13361_v29  ;;  %v13445_v29 = vld [vmem:[%s14759_s22 + $0x9d0] ss:$8 sps:$4 sm:$0xff]  }
 0x28c   : > { %9876 = vmatpush1.bf16.msra.mxu0 %v13364_v30  ;;  %9028 = vmatprep.subr.bf16.mxu1 %v13369_v31  ;;  %v13448_v30 = vld [vmem:[%s14759_s22 + $0x1dd0] ss:$8 sps:$4 sm:$0xff]   ;;  %v13453_v31 = vld [vmem:[%s14759_s22 + $0x9e4] ss:$8 sps:$4 sm:$0xff]  }
 0x28d   : > { %9888 = vmatprep.subr.bf16.mxu0 %v13372_v51  ;;  %v13456_v51 = vld [vmem:[%s14759_s22 + $0x1de4] ss:$8 sps:$4 sm:$0xff]  }
 0x28e   : > { %9018 = vmatmul.mubr.bf16.vlgmr.msra.gmra.mrb[0].mxu1 %v10900_v33  ;;  %v13451_v33 = vld [vmem:[%s14759_s22 + $0x9e0] ss:$8 sps:$4 sm:$0xff]  }
 0x28f   : > { %9878 = vmatmul.mubr.bf16.vlgmr.msra.gmra.mrb[0].mxu0 %v10940_v34  ;;  %9029 = vmatpush1.bf16.msra.mxu1 %v13367_v35  ;;  %v13454_v34 = vld [vmem:[%s14759_s22 + $0x1de0] ss:$8 sps:$4 sm:$0xff]   ;;  %v13459_v35 = vld [vmem:[%s14759_s22 + $0x9f4] ss:$8 sps:$4 sm:$0xff]  }
 0x290   : > { %9889 = vmatpush1.bf16.msra.mxu0 %v13370_v36  ;;  %9030 = vmatprep.subr.bf16.mxu1 %v13375_v37  ;;  %v13462_v36 = vld [vmem:[%s14759_s22 + $0x1df4] ss:$8 sps:$4 sm:$0xff]   ;;  %v13457_v37 = vld [vmem:[%s14759_s22 + $0x9f0] ss:$8 sps:$4 sm:$0xff]  }
 0x291   : > { %9890 = vmatprep.subr.bf16.mxu0 %v13378_v38  ;;  %9060 = vmatprep.mubr.bf16.mxu1 %v10903_v39  ;;  %v13460_v38 = vld [vmem:[%s14759_s22 + $0x1df0] ss:$8 sps:$4 sm:$0xff]   ;;  %v13465_v39 = vld [vmem:[%s14759_s22 + $0xa04] ss:$8 sps:$4 sm:$0xff]  }
 0x292   : > { %9920 = vmatprep.mubr.bf16.mxu0 %v10943_v59  ;;  %v13468_v59 = vld [vmem:[%s14759_s22 + $0x1e04] ss:$8 sps:$4 sm:$0xff]  }
 0x293   : > { %9031 = vmatpush1.bf16.msra.mxu1 %v13373_v60  ;;  %v15587_v60 = vld [vmem:[%s14761_s23 + $0x50] sm:$0xff] }
 0x294   : > { %9891 = vmatpush1.bf16.msra.mxu0 %v13376_v8  ;;  %9032 = vmatprep.subr.bf16.mxu1 %v13381_v24  ;;  %v15590_v8 = vld [vmem:[%s14761_s23 + $0x190] sm:$0xff] }
 0x295   : > { %9892 = vmatprep.subr.bf16.mxu0 %v13384_v40  ;;  %v15593_v24 = vld [vmem:[%s14761_s23 + $0xf0] sm:$0xff] }
 0x296   : > { %v15596_v40 = vld [vmem:[%s14761_s23 + $0x230] sm:$0xff] }
 0x297   : > { %9033 = vmatpush1.bf16.msra.mxu1 %v13379_v43  ;;  %v10902_v43 = vcombine.low %v15503_v52, %v15506_v0  ;;  %v10945_v52 = vcombine.high %v15593_v24, %v15596_v40  ;;  %v13469_v0 = vld [vmem:[%s14759_s22 + $0xa10] ss:$8 sps:$4 sm:$0xff]  }
 0x298   : > { %9893 = vmatpush1.bf16.msra.mxu0 %v13382_v44  ;;  %9034 = vmatprep.subr.bf16.mxu1 %v13387_v49  ;;  %v10942_v44 = vcombine.low %v15509_v16, %v15512_v32  ;;  %v13463_v49 = vld [vmem:[%s14759_s22 + $0xa00] ss:$8 sps:$4 sm:$0xff]   ;;  %v13472_v16 = vld [vmem:[%s14759_s22 + $0x1e10] ss:$8 sps:$4 sm:$0xff]   ;;  %v13477_v32 = vld [vmem:[%s14759_s22 + $0xa24] ss:$8 sps:$4 sm:$0xff]  }
 0x299   : > { %9894 = vmatprep.subr.bf16.mxu0 %v13390_v50  ;;  %v13466_v50 = vld [vmem:[%s14759_s22 + $0x1e00] ss:$8 sps:$4 sm:$0xff]  }
 0x29b   : > { %9035 = vmatpush1.bf16.msra.mxu1 %v13385_v53  ;;  %v13471_v53 = vld [vmem:[%s14759_s22 + $0xa14] ss:$8 sps:$4 sm:$0xff]  }
 0x29c   : > { %9895 = vmatpush1.bf16.msra.mxu0 %v13388_v54  ;;  %9036 = vmatprep.subr.bf16.mxu1 %v13393_v41  ;;  %v13474_v54 = vld [vmem:[%s14759_s22 + $0x1e14] ss:$8 sps:$4 sm:$0xff]   ;;  %v10905_v41 = vcombine.high %v15587_v60, %v15590_v8 }
 0x29d   : > { %9896 = vmatprep.subr.bf16.mxu0 %v13396_v42  ;;  %v13480_v42 = vld [vmem:[%s14759_s22 + $0x1e24] ss:$8 sps:$4 sm:$0xff]  }
 0x29f   : > { %9037 = vmatpush1.bf16.msra.mxu1 %v13391_v46  ;;  %v13475_v46 = vld [vmem:[%s14759_s22 + $0xa20] ss:$8 sps:$4 sm:$0xff]  }
 0x2a0   : > { %9897 = vmatpush1.bf16.msra.mxu0 %v13394_v47  ;;  %9038 = vmatprep.subr.bf16.mxu1 %v13399_v57  ;;  %v13478_v47 = vld [vmem:[%s14759_s22 + $0x1e20] ss:$8 sps:$4 sm:$0xff]   ;;  %v13483_v57 = vld [vmem:[%s14759_s22 + $0xa34] ss:$8 sps:$4 sm:$0xff]  }
 0x2a1   : > { %9898 = vmatprep.subr.bf16.mxu0 %v13402_v58  ;;  %v13486_v58 = vld [vmem:[%s14759_s22 + $0x1e34] ss:$8 sps:$4 sm:$0xff]  }
 0x2a3   : > { %9039 = vmatpush1.bf16.msra.mxu1 %v13397_v61  ;;  %v13481_v61 = vld [vmem:[%s14759_s22 + $0xa30] ss:$8 sps:$4 sm:$0xff]  }
 0x2a4   : > { %9899 = vmatpush1.bf16.msra.mxu0 %v13400_v62  ;;  %9040 = vmatprep.subr.bf16.mxu1 %v13405_v63  ;;  %v13484_v62 = vld [vmem:[%s14759_s22 + $0x1e30] ss:$8 sps:$4 sm:$0xff]   ;;  %v13489_v63 = vld [vmem:[%s14759_s22 + $0xa44] ss:$8 sps:$4 sm:$0xff]  }
 0x2a5   : > { %9900 = vmatprep.subr.bf16.mxu0 %v13408_v45  ;;  %v13492_v45 = vld [vmem:[%s14759_s22 + $0x1e44] ss:$8 sps:$4 sm:$0xff]  }
 0x2a7   : > { %9041 = vmatpush1.bf16.msra.mxu1 %v13403_v1  ;;  %v13487_v1 = vld [vmem:[%s14759_s22 + $0xa40] ss:$8 sps:$4 sm:$0xff]  }
 0x2a8   : > { %9901 = vmatpush1.bf16.msra.mxu0 %v13406_v2  ;;  %9042 = vmatprep.subr.bf16.mxu1 %v13411_v3  ;;  %v13490_v2 = vld [vmem:[%s14759_s22 + $0x1e40] ss:$8 sps:$4 sm:$0xff]   ;;  %v13495_v3 = vld [vmem:[%s14759_s22 + $0xa54] ss:$8 sps:$4 sm:$0xff]  }
 0x2a9   : > { %9902 = vmatprep.subr.bf16.mxu0 %v13414_v4  ;;  %v13498_v4 = vld [vmem:[%s14759_s22 + $0x1e54] ss:$8 sps:$4 sm:$0xff]  }
 0x2ab   : > { %9043 = vmatpush1.bf16.msra.mxu1 %v13409_v5  ;;  %v13493_v5 = vld [vmem:[%s14759_s22 + $0xa50] ss:$8 sps:$4 sm:$0xff]  }
 0x2ac   : > { %9903 = vmatpush1.bf16.msra.mxu0 %v13412_v6  ;;  %9044 = vmatprep.subr.bf16.mxu1 %v13417_v7  ;;  %v13496_v6 = vld [vmem:[%s14759_s22 + $0x1e50] ss:$8 sps:$4 sm:$0xff]   ;;  %v13501_v7 = vld [vmem:[%s14759_s22 + $0xa64] ss:$8 sps:$4 sm:$0xff]  }
 0x2ad   : > { %9904 = vmatprep.subr.bf16.mxu0 %v13420_v55  ;;  %v13504_v55 = vld [vmem:[%s14759_s22 + $0x1e64] ss:$8 sps:$4 sm:$0xff]  }
 0x2af   : > { %9045 = vmatpush1.bf16.msra.mxu1 %v13415_v9  ;;  %v13499_v9 = vld [vmem:[%s14759_s22 + $0xa60] ss:$8 sps:$4 sm:$0xff]  }
 0x2b0   : > { %9905 = vmatpush1.bf16.msra.mxu0 %v13418_v10  ;;  %9046 = vmatprep.subr.bf16.mxu1 %v13423_v11  ;;  %v13502_v10 = vld [vmem:[%s14759_s22 + $0x1e60] ss:$8 sps:$4 sm:$0xff]   ;;  %v13507_v11 = vld [vmem:[%s14759_s22 + $0xa74] ss:$8 sps:$4 sm:$0xff]  }
 0x2b1   : > { %9906 = vmatprep.subr.bf16.mxu0 %v13426_v12  ;;  %v13510_v12 = vld [vmem:[%s14759_s22 + $0x1e74] ss:$8 sps:$4 sm:$0xff]  }
 0x2b3   : > { %9047 = vmatpush1.bf16.msra.mxu1 %v13421_v13  ;;  %v13505_v13 = vld [vmem:[%s14759_s22 + $0xa70] ss:$8 sps:$4 sm:$0xff]  }
 0x2b4   : > { %9907 = vmatpush1.bf16.msra.mxu0 %v13424_v14  ;;  %9048 = vmatprep.subr.bf16.mxu1 %v13429_v15  ;;  %v13508_v14 = vld [vmem:[%s14759_s22 + $0x1e70] ss:$8 sps:$4 sm:$0xff]   ;;  %v13513_v15 = vld [vmem:[%s14759_s22 + $0xa84] ss:$8 sps:$4 sm:$0xff]  }
 0x2b5   : > { %9908 = vmatprep.subr.bf16.mxu0 %v13432_v48  ;;  %v13516_v48 = vld [vmem:[%s14759_s22 + $0x1e84] ss:$8 sps:$4 sm:$0xff]  }
 0x2b7   : > { %9049 = vmatpush1.bf16.msra.mxu1 %v13427_v17  ;;  %v13511_v17 = vld [vmem:[%s14759_s22 + $0xa80] ss:$8 sps:$4 sm:$0xff]  }
 0x2b8   : > { %9909 = vmatpush1.bf16.msra.mxu0 %v13430_v18  ;;  %9050 = vmatprep.subr.bf16.mxu1 %v13435_v19  ;;  %v13514_v18 = vld [vmem:[%s14759_s22 + $0x1e80] ss:$8 sps:$4 sm:$0xff]   ;;  %v13519_v19 = vld [vmem:[%s14759_s22 + $0xa94] ss:$8 sps:$4 sm:$0xff]  }
 0x2b9   : > { %9910 = vmatprep.subr.bf16.mxu0 %v13438_v20  ;;  %v13522_v20 = vld [vmem:[%s14759_s22 + $0x1e94] ss:$8 sps:$4 sm:$0xff]  }
 0x2bb   : > { %9051 = vmatpush1.bf16.msra.mxu1 %v13433_v21  ;;  %v13517_v21 = vld [vmem:[%s14759_s22 + $0xa90] ss:$8 sps:$4 sm:$0xff]  }
 0x2bc   : > { %9911 = vmatpush1.bf16.msra.mxu0 %v13436_v22  ;;  %9052 = vmatprep.subr.bf16.mxu1 %v13441_v23  ;;  %v13520_v22 = vld [vmem:[%s14759_s22 + $0x1e90] ss:$8 sps:$4 sm:$0xff]   ;;  %v13525_v23 = vld [vmem:[%s14759_s22 + $0xaa4] ss:$8 sps:$4 sm:$0xff]  }
 0x2bd   : > { %9912 = vmatprep.subr.bf16.mxu0 %v13444_v56  ;;  %v13528_v56 = vld [vmem:[%s14759_s22 + $0x1ea4] ss:$8 sps:$4 sm:$0xff]  }
 0x2bf   : > { %9053 = vmatpush1.bf16.msra.mxu1 %v13439_v25  ;;  %v13523_v25 = vld [vmem:[%s14759_s22 + $0xaa0] ss:$8 sps:$4 sm:$0xff]  }
 0x2c0   : > { %9913 = vmatpush1.bf16.msra.mxu0 %v13442_v26  ;;  %9054 = vmatprep.subr.bf16.mxu1 %v13447_v27  ;;  %v13526_v26 = vld [vmem:[%s14759_s22 + $0x1ea0] ss:$8 sps:$4 sm:$0xff]   ;;  %v13531_v27 = vld [vmem:[%s14759_s22 + $0xab4] ss:$8 sps:$4 sm:$0xff]  }
 0x2c1   : > { %9914 = vmatprep.subr.bf16.mxu0 %v13450_v28  ;;  %v13534_v28 = vld [vmem:[%s14759_s22 + $0x1eb4] ss:$8 sps:$4 sm:$0xff]  }
 0x2c3   : > { %9055 = vmatpush1.bf16.msra.mxu1 %v13445_v29  ;;  %v13529_v29 = vld [vmem:[%s14759_s22 + $0xab0] ss:$8 sps:$4 sm:$0xff]  }
 0x2c4   : > { %9915 = vmatpush1.bf16.msra.mxu0 %v13448_v30  ;;  %9056 = vmatprep.subr.bf16.mxu1 %v13453_v31  ;;  %v13532_v30 = vld [vmem:[%s14759_s22 + $0x1eb0] ss:$8 sps:$4 sm:$0xff]   ;;  %v13537_v31 = vld [vmem:[%s14759_s22 + $0xac4] ss:$8 sps:$4 sm:$0xff]  }
 0x2c5   : > { %9916 = vmatprep.subr.bf16.mxu0 %v13456_v51  ;;  %v13540_v51 = vld [vmem:[%s14759_s22 + $0x1ec4] ss:$8 sps:$4 sm:$0xff]  }
 0x2c7   : > { %9057 = vmatpush1.bf16.msra.mxu1 %v13451_v33  ;;  %v13535_v33 = vld [vmem:[%s14759_s22 + $0xac0] ss:$8 sps:$4 sm:$0xff]  }
 0x2c8   : > { %9917 = vmatpush1.bf16.msra.mxu0 %v13454_v34  ;;  %9058 = vmatprep.subr.bf16.mxu1 %v13459_v35  ;;  %v13538_v34 = vld [vmem:[%s14759_s22 + $0x1ec0] ss:$8 sps:$4 sm:$0xff]   ;;  %v13543_v35 = vld [vmem:[%s14759_s22 + $0xad4] ss:$8 sps:$4 sm:$0xff]  }
 0x2c9   : > { %9918 = vmatprep.subr.bf16.mxu0 %v13462_v36  ;;  %v13546_v36 = vld [vmem:[%s14759_s22 + $0x1ed4] ss:$8 sps:$4 sm:$0xff]  }
 0x2cb   : > { %9059 = vmatpush1.bf16.msra.mxu1 %v13457_v37  ;;  %v13541_v37 = vld [vmem:[%s14759_s22 + $0xad0] ss:$8 sps:$4 sm:$0xff]  }
 0x2cc   : > { %9919 = vmatpush1.bf16.msra.mxu0 %v13460_v38  ;;  %9071 = vmatprep.subr.bf16.mxu1 %v13465_v39  ;;  %v13544_v38 = vld [vmem:[%s14759_s22 + $0x1ed0] ss:$8 sps:$4 sm:$0xff]   ;;  %v13549_v39 = vld [vmem:[%s14759_s22 + $0xae4] ss:$8 sps:$4 sm:$0xff]  }
 0x2cd   : > { %9931 = vmatprep.subr.bf16.mxu0 %v13468_v59  ;;  %v13552_v59 = vld [vmem:[%s14759_s22 + $0x1ee4] ss:$8 sps:$4 sm:$0xff]  }
 0x2ce   : > { %9061 = vmatmul.mubr.bf16.vlgmr.msra.gmra.mrb[0].mxu1 %v10902_v43  ;;  %v13547_v43 = vld [vmem:[%s14759_s22 + $0xae0] ss:$8 sps:$4 sm:$0xff]  }
 0x2cf   : > { %9921 = vmatmul.mubr.bf16.vlgmr.msra.gmra.mrb[0].mxu0 %v10942_v44  ;;  %9072 = vmatpush1.bf16.msra.mxu1 %v13463_v49  ;;  %v13550_v44 = vld [vmem:[%s14759_s22 + $0x1ee0] ss:$8 sps:$4 sm:$0xff]   ;;  %v13555_v49 = vld [vmem:[%s14759_s22 + $0xaf4] ss:$8 sps:$4 sm:$0xff]  }
 0x2d0   : > { %9932 = vmatpush1.bf16.msra.mxu0 %v13466_v50  ;;  %9073 = vmatprep.subr.bf16.mxu1 %v13471_v53  ;;  %v13558_v50 = vld [vmem:[%s14759_s22 + $0x1ef4] ss:$8 sps:$4 sm:$0xff]   ;;  %v13553_v53 = vld [vmem:[%s14759_s22 + $0xaf0] ss:$8 sps:$4 sm:$0xff]  }
 0x2d1   : > { %9933 = vmatprep.subr.bf16.mxu0 %v13474_v54  ;;  %9103 = vmatprep.mubr.bf16.mxu1 %v10905_v41  ;;  %v13556_v54 = vld [vmem:[%s14759_s22 + $0x1ef0] ss:$8 sps:$4 sm:$0xff]   ;;  %v13561_v41 = vld [vmem:[%s14759_s22 + $0xb04] ss:$8 sps:$4 sm:$0xff]  }
 0x2d2   : > { %9963 = vmatprep.mubr.bf16.mxu0 %v10945_v52  ;;  %v13564_v52 = vld [vmem:[%s14759_s22 + $0x1f04] ss:$8 sps:$4 sm:$0xff]  }
 0x2d3   : > { %9074 = vmatpush1.bf16.msra.mxu1 %v13469_v0  ;;  %v15671_v0 = vld [vmem:[%s14761_s23 + $0x58] sm:$0xff] }
 0x2d4   : > { %9934 = vmatpush1.bf16.msra.mxu0 %v13472_v16  ;;  %9075 = vmatprep.subr.bf16.mxu1 %v13477_v32  ;;  %v15674_v16 = vld [vmem:[%s14761_s23 + $0x198] sm:$0xff] }
 0x2d5   : > { %9935 = vmatprep.subr.bf16.mxu0 %v13480_v42  ;;  %v15677_v32 = vld [vmem:[%s14761_s23 + $0xf8] sm:$0xff] }
 0x2d6   : > { %v15680_v42 = vld [vmem:[%s14761_s23 + $0x238] sm:$0xff] }
 0x2d7   : > { %9076 = vmatpush1.bf16.msra.mxu1 %v13475_v46  ;;  %v10904_v46 = vcombine.low %v15587_v60, %v15590_v8  ;;  %v10947_v60 = vcombine.high %v15677_v32, %v15680_v42  ;;  %v13565_v8 = vld [vmem:[%s14759_s22 + $0xb10] ss:$8 sps:$4 sm:$0xff]  }
 0x2d8   : > { %9936 = vmatpush1.bf16.msra.mxu0 %v13478_v47  ;;  %9077 = vmatprep.subr.bf16.mxu1 %v13483_v57  ;;  %v10944_v47 = vcombine.low %v15593_v24, %v15596_v40  ;;  %v13559_v57 = vld [vmem:[%s14759_s22 + $0xb00] ss:$8 sps:$4 sm:$0xff]   ;;  %v13568_v24 = vld [vmem:[%s14759_s22 + $0x1f10] ss:$8 sps:$4 sm:$0xff]   ;;  %v13573_v40 = vld [vmem:[%s14759_s22 + $0xb24] ss:$8 sps:$4 sm:$0xff]  }
 0x2d9   : > { %9937 = vmatprep.subr.bf16.mxu0 %v13486_v58  ;;  %v13562_v58 = vld [vmem:[%s14759_s22 + $0x1f00] ss:$8 sps:$4 sm:$0xff]  }
 0x2db   : > { %9078 = vmatpush1.bf16.msra.mxu1 %v13481_v61  ;;  %v13567_v61 = vld [vmem:[%s14759_s22 + $0xb14] ss:$8 sps:$4 sm:$0xff]  }
 0x2dc   : > { %9938 = vmatpush1.bf16.msra.mxu0 %v13484_v62  ;;  %9079 = vmatprep.subr.bf16.mxu1 %v13489_v63  ;;  %v13570_v62 = vld [vmem:[%s14759_s22 + $0x1f14] ss:$8 sps:$4 sm:$0xff]   ;;  %v10907_v63 = vcombine.high %v15671_v0, %v15674_v16 }
 0x2dd   : > { %9939 = vmatprep.subr.bf16.mxu0 %v13492_v45  ;;  %v13576_v45 = vld [vmem:[%s14759_s22 + $0x1f24] ss:$8 sps:$4 sm:$0xff]  }
 0x2df   : > { %9080 = vmatpush1.bf16.msra.mxu1 %v13487_v1  ;;  %v13571_v1 = vld [vmem:[%s14759_s22 + $0xb20] ss:$8 sps:$4 sm:$0xff]  }
 0x2e0   : > { %9940 = vmatpush1.bf16.msra.mxu0 %v13490_v2  ;;  %9081 = vmatprep.subr.bf16.mxu1 %v13495_v3  ;;  %v13574_v2 = vld [vmem:[%s14759_s22 + $0x1f20] ss:$8 sps:$4 sm:$0xff]   ;;  %v13579_v3 = vld [vmem:[%s14759_s22 + $0xb34] ss:$8 sps:$4 sm:$0xff]  }
 0x2e1   : > { %9941 = vmatprep.subr.bf16.mxu0 %v13498_v4  ;;  %v13582_v4 = vld [vmem:[%s14759_s22 + $0x1f34] ss:$8 sps:$4 sm:$0xff]  }
 0x2e3   : > { %9082 = vmatpush1.bf16.msra.mxu1 %v13493_v5  ;;  %v13577_v5 = vld [vmem:[%s14759_s22 + $0xb30] ss:$8 sps:$4 sm:$0xff]  }
 0x2e4   : > { %9942 = vmatpush1.bf16.msra.mxu0 %v13496_v6  ;;  %9083 = vmatprep.subr.bf16.mxu1 %v13501_v7  ;;  %v13580_v6 = vld [vmem:[%s14759_s22 + $0x1f30] ss:$8 sps:$4 sm:$0xff]   ;;  %v13585_v7 = vld [vmem:[%s14759_s22 + $0xb44] ss:$8 sps:$4 sm:$0xff]  }
 0x2e5   : > { %9943 = vmatprep.subr.bf16.mxu0 %v13504_v55  ;;  %v13588_v55 = vld [vmem:[%s14759_s22 + $0x1f44] ss:$8 sps:$4 sm:$0xff]  }
 0x2e7   : > { %9084 = vmatpush1.bf16.msra.mxu1 %v13499_v9  ;;  %v13583_v9 = vld [vmem:[%s14759_s22 + $0xb40] ss:$8 sps:$4 sm:$0xff]  }
 0x2e8   : > { %9944 = vmatpush1.bf16.msra.mxu0 %v13502_v10  ;;  %9085 = vmatprep.subr.bf16.mxu1 %v13507_v11  ;;  %v13586_v10 = vld [vmem:[%s14759_s22 + $0x1f40] ss:$8 sps:$4 sm:$0xff]   ;;  %v13591_v11 = vld [vmem:[%s14759_s22 + $0xb54] ss:$8 sps:$4 sm:$0xff]  }
 0x2e9   : > { %9945 = vmatprep.subr.bf16.mxu0 %v13510_v12  ;;  %v13594_v12 = vld [vmem:[%s14759_s22 + $0x1f54] ss:$8 sps:$4 sm:$0xff]  }
 0x2eb   : > { %9086 = vmatpush1.bf16.msra.mxu1 %v13505_v13  ;;  %v13589_v13 = vld [vmem:[%s14759_s22 + $0xb50] ss:$8 sps:$4 sm:$0xff]  }
 0x2ec   : > { %9946 = vmatpush1.bf16.msra.mxu0 %v13508_v14  ;;  %9087 = vmatprep.subr.bf16.mxu1 %v13513_v15  ;;  %v13592_v14 = vld [vmem:[%s14759_s22 + $0x1f50] ss:$8 sps:$4 sm:$0xff]   ;;  %v13597_v15 = vld [vmem:[%s14759_s22 + $0xb64] ss:$8 sps:$4 sm:$0xff]  }
 0x2ed   : > { %9947 = vmatprep.subr.bf16.mxu0 %v13516_v48  ;;  %v13600_v48 = vld [vmem:[%s14759_s22 + $0x1f64] ss:$8 sps:$4 sm:$0xff]  }
 0x2ef   : > { %9088 = vmatpush1.bf16.msra.mxu1 %v13511_v17  ;;  %v13595_v17 = vld [vmem:[%s14759_s22 + $0xb60] ss:$8 sps:$4 sm:$0xff]  }
 0x2f0   : > { %9948 = vmatpush1.bf16.msra.mxu0 %v13514_v18  ;;  %9089 = vmatprep.subr.bf16.mxu1 %v13519_v19  ;;  %v13598_v18 = vld [vmem:[%s14759_s22 + $0x1f60] ss:$8 sps:$4 sm:$0xff]   ;;  %v13603_v19 = vld [vmem:[%s14759_s22 + $0xb74] ss:$8 sps:$4 sm:$0xff]  }
 0x2f1   : > { %9949 = vmatprep.subr.bf16.mxu0 %v13522_v20  ;;  %v13606_v20 = vld [vmem:[%s14759_s22 + $0x1f74] ss:$8 sps:$4 sm:$0xff]  }
 0x2f3   : > { %9090 = vmatpush1.bf16.msra.mxu1 %v13517_v21  ;;  %v13601_v21 = vld [vmem:[%s14759_s22 + $0xb70] ss:$8 sps:$4 sm:$0xff]  }
 0x2f4   : > { %9950 = vmatpush1.bf16.msra.mxu0 %v13520_v22  ;;  %9091 = vmatprep.subr.bf16.mxu1 %v13525_v23  ;;  %v13604_v22 = vld [vmem:[%s14759_s22 + $0x1f70] ss:$8 sps:$4 sm:$0xff]   ;;  %v13609_v23 = vld [vmem:[%s14759_s22 + $0xb84] ss:$8 sps:$4 sm:$0xff]  }
 0x2f5   : > { %9951 = vmatprep.subr.bf16.mxu0 %v13528_v56  ;;  %v13612_v56 = vld [vmem:[%s14759_s22 + $0x1f84] ss:$8 sps:$4 sm:$0xff]  }
 0x2f7   : > { %9092 = vmatpush1.bf16.msra.mxu1 %v13523_v25  ;;  %v13607_v25 = vld [vmem:[%s14759_s22 + $0xb80] ss:$8 sps:$4 sm:$0xff]  }
 0x2f8   : > { %9952 = vmatpush1.bf16.msra.mxu0 %v13526_v26  ;;  %9093 = vmatprep.subr.bf16.mxu1 %v13531_v27  ;;  %v13610_v26 = vld [vmem:[%s14759_s22 + $0x1f80] ss:$8 sps:$4 sm:$0xff]   ;;  %v13615_v27 = vld [vmem:[%s14759_s22 + $0xb94] ss:$8 sps:$4 sm:$0xff]  }
 0x2f9   : > { %9953 = vmatprep.subr.bf16.mxu0 %v13534_v28  ;;  %v13618_v28 = vld [vmem:[%s14759_s22 + $0x1f94] ss:$8 sps:$4 sm:$0xff]  }
 0x2fb   : > { %9094 = vmatpush1.bf16.msra.mxu1 %v13529_v29  ;;  %v13613_v29 = vld [vmem:[%s14759_s22 + $0xb90] ss:$8 sps:$4 sm:$0xff]  }
 0x2fc   : > { %9954 = vmatpush1.bf16.msra.mxu0 %v13532_v30  ;;  %9095 = vmatprep.subr.bf16.mxu1 %v13537_v31  ;;  %v13616_v30 = vld [vmem:[%s14759_s22 + $0x1f90] ss:$8 sps:$4 sm:$0xff]   ;;  %v13621_v31 = vld [vmem:[%s14759_s22 + $0xba4] ss:$8 sps:$4 sm:$0xff]  }
 0x2fd   : > { %9955 = vmatprep.subr.bf16.mxu0 %v13540_v51  ;;  %v13624_v51 = vld [vmem:[%s14759_s22 + $0x1fa4] ss:$8 sps:$4 sm:$0xff]  }
 0x2ff   : > { %9096 = vmatpush1.bf16.msra.mxu1 %v13535_v33  ;;  %v13619_v33 = vld [vmem:[%s14759_s22 + $0xba0] ss:$8 sps:$4 sm:$0xff]  }
 0x300   : > { %9956 = vmatpush1.bf16.msra.mxu0 %v13538_v34  ;;  %9097 = vmatprep.subr.bf16.mxu1 %v13543_v35  ;;  %v13622_v34 = vld [vmem:[%s14759_s22 + $0x1fa0] ss:$8 sps:$4 sm:$0xff]   ;;  %v13627_v35 = vld [vmem:[%s14759_s22 + $0xbb4] ss:$8 sps:$4 sm:$0xff]  }
 0x301   : > { %9957 = vmatprep.subr.bf16.mxu0 %v13546_v36  ;;  %v13630_v36 = vld [vmem:[%s14759_s22 + $0x1fb4] ss:$8 sps:$4 sm:$0xff]  }
 0x303   : > { %9098 = vmatpush1.bf16.msra.mxu1 %v13541_v37  ;;  %v13625_v37 = vld [vmem:[%s14759_s22 + $0xbb0] ss:$8 sps:$4 sm:$0xff]  }
 0x304   : > { %9958 = vmatpush1.bf16.msra.mxu0 %v13544_v38  ;;  %9099 = vmatprep.subr.bf16.mxu1 %v13549_v39  ;;  %v13628_v38 = vld [vmem:[%s14759_s22 + $0x1fb0] ss:$8 sps:$4 sm:$0xff]   ;;  %v13633_v39 = vld [vmem:[%s14759_s22 + $0xbc4] ss:$8 sps:$4 sm:$0xff]  }
 0x305   : > { %9959 = vmatprep.subr.bf16.mxu0 %v13552_v59  ;;  %v13636_v59 = vld [vmem:[%s14759_s22 + $0x1fc4] ss:$8 sps:$4 sm:$0xff]  }
 0x307   : > { %9100 = vmatpush1.bf16.msra.mxu1 %v13547_v43  ;;  %v13631_v43 = vld [vmem:[%s14759_s22 + $0xbc0] ss:$8 sps:$4 sm:$0xff]  }
 0x308   : > { %9960 = vmatpush1.bf16.msra.mxu0 %v13550_v44  ;;  %9101 = vmatprep.subr.bf16.mxu1 %v13555_v49  ;;  %v13634_v44 = vld [vmem:[%s14759_s22 + $0x1fc0] ss:$8 sps:$4 sm:$0xff]   ;;  %v13639_v49 = vld [vmem:[%s14759_s22 + $0xbd4] ss:$8 sps:$4 sm:$0xff]  }
 0x309   : > { %9961 = vmatprep.subr.bf16.mxu0 %v13558_v50  ;;  %v13642_v50 = vld [vmem:[%s14759_s22 + $0x1fd4] ss:$8 sps:$4 sm:$0xff]  }
 0x30b   : > { %9102 = vmatpush1.bf16.msra.mxu1 %v13553_v53  ;;  %v13637_v53 = vld [vmem:[%s14759_s22 + $0xbd0] ss:$8 sps:$4 sm:$0xff]  }
 0x30c   : > { %9962 = vmatpush1.bf16.msra.mxu0 %v13556_v54  ;;  %9114 = vmatprep.subr.bf16.mxu1 %v13561_v41  ;;  %v13640_v54 = vld [vmem:[%s14759_s22 + $0x1fd0] ss:$8 sps:$4 sm:$0xff]   ;;  %v13645_v41 = vld [vmem:[%s14759_s22 + $0xbe4] ss:$8 sps:$4 sm:$0xff]  }
 0x30d   : > { %9974 = vmatprep.subr.bf16.mxu0 %v13564_v52  ;;  %v13648_v52 = vld [vmem:[%s14759_s22 + $0x1fe4] ss:$8 sps:$4 sm:$0xff]  }
 0x30e   : > { %9104 = vmatmul.mubr.bf16.vlgmr.msra.gmra.mrb[0].mxu1 %v10904_v46  ;;  %v13643_v46 = vld [vmem:[%s14759_s22 + $0xbe0] ss:$8 sps:$4 sm:$0xff]  }
 0x30f   : > { %9964 = vmatmul.mubr.bf16.vlgmr.msra.gmra.mrb[0].mxu0 %v10944_v47  ;;  %9115 = vmatpush1.bf16.msra.mxu1 %v13559_v57  ;;  %v13646_v47 = vld [vmem:[%s14759_s22 + $0x1fe0] ss:$8 sps:$4 sm:$0xff]   ;;  %v13651_v57 = vld [vmem:[%s14759_s22 + $0xbf4] ss:$8 sps:$4 sm:$0xff]  }
 0x310   : > { %9975 = vmatpush1.bf16.msra.mxu0 %v13562_v58  ;;  %9116 = vmatprep.subr.bf16.mxu1 %v13567_v61  ;;  %v13654_v58 = vld [vmem:[%s14759_s22 + $0x1ff4] ss:$8 sps:$4 sm:$0xff]   ;;  %v13649_v61 = vld [vmem:[%s14759_s22 + $0xbf0] ss:$8 sps:$4 sm:$0xff]  }
 0x311   : > { %9976 = vmatprep.subr.bf16.mxu0 %v13570_v62  ;;  %9146 = vmatprep.mubr.bf16.mxu1 %v10907_v63  ;;  %v13652_v62 = vld [vmem:[%s14759_s22 + $0x1ff0] ss:$8 sps:$4 sm:$0xff]   ;;  %v13657_v63 = vld [vmem:[%s14759_s22 + $0xc04] ss:$8 sps:$4 sm:$0xff]  }
 0x312   : > { %10006 = vmatprep.mubr.bf16.mxu0 %v10947_v60  ;;  %v13660_v60 = vld [vmem:[%s14759_s22 + $0x2004] ss:$8 sps:$4 sm:$0xff]  }
 0x313   : > { %9117 = vmatpush1.bf16.msra.mxu1 %v13565_v8  ;;  %v15755_v8 = vld [vmem:[%s14761_s23 + $0x60] sm:$0xff] }
 0x314   : > { %9977 = vmatpush1.bf16.msra.mxu0 %v13568_v24  ;;  %9118 = vmatprep.subr.bf16.mxu1 %v13573_v40  ;;  %v10906_v24 = vcombine.low %v15671_v0, %v15674_v16  ;;  %v10946_v40 = vcombine.low %v15677_v32, %v15680_v42  ;;  %v13663_v0 = vld [vmem:[%s14759_s22 + $0xc14] ss:$8 sps:$4 sm:$0xff]  }
 0x315   : > { %9978 = vmatprep.subr.bf16.mxu0 %v13576_v45  ;;  %v15762_v45 = vld [vmem:[%s14761_s23 + $0x1a0] sm:$0xff]  ;;  %v13666_v16 = vld [vmem:[%s14759_s22 + $0x2014] ss:$8 sps:$4 sm:$0xff]  }
 0x316   : > { %v10909_v32 = vcombine.high %v15755_v8, %v15762_v45 }
 0x317   : > { %9119 = vmatpush1.bf16.msra.mxu1 %v13571_v1  ;;  %v15765_v1 = vld [vmem:[%s14761_s23 + $0x100] sm:$0xff] }
 0x318   : > { %9979 = vmatpush1.bf16.msra.mxu0 %v13574_v2  ;;  %9120 = vmatprep.subr.bf16.mxu1 %v13579_v3  ;;  %v15768_v2 = vld [vmem:[%s14761_s23 + $0x240] sm:$0xff] }
 0x319   : > { %9980 = vmatprep.subr.bf16.mxu0 %v13582_v4  ;;  %v13655_v3 = vld [vmem:[%s14759_s22 + $0xc00] ss:$8 sps:$4 sm:$0xff]   ;;  %v10949_v42 = vcombine.high %v15765_v1, %v15768_v2 }
 0x31a   : > { %v13658_v4 = vld [vmem:[%s14759_s22 + $0x2000] ss:$8 sps:$4 sm:$0xff]  }
 0x31b   : > { %9121 = vmatpush1.bf16.msra.mxu1 %v13577_v5  ;;  %v13661_v5 = vld [vmem:[%s14759_s22 + $0xc10] ss:$8 sps:$4 sm:$0xff]  }
 0x31c   : > { %9981 = vmatpush1.bf16.msra.mxu0 %v13580_v6  ;;  %9122 = vmatprep.subr.bf16.mxu1 %v13585_v7  ;;  %v13664_v6 = vld [vmem:[%s14759_s22 + $0x2010] ss:$8 sps:$4 sm:$0xff]   ;;  %v13669_v7 = vld [vmem:[%s14759_s22 + $0xc24] ss:$8 sps:$4 sm:$0xff]  }
 0x31d   : > { %9982 = vmatprep.subr.bf16.mxu0 %v13588_v55  ;;  %v13672_v55 = vld [vmem:[%s14759_s22 + $0x2024] ss:$8 sps:$4 sm:$0xff]  }
 0x31f   : > { %9123 = vmatpush1.bf16.msra.mxu1 %v13583_v9  ;;  %v13667_v9 = vld [vmem:[%s14759_s22 + $0xc20] ss:$8 sps:$4 sm:$0xff]  }
 0x320   : > { %9983 = vmatpush1.bf16.msra.mxu0 %v13586_v10  ;;  %9124 = vmatprep.subr.bf16.mxu1 %v13591_v11  ;;  %v13670_v10 = vld [vmem:[%s14759_s22 + $0x2020] ss:$8 sps:$4 sm:$0xff]   ;;  %v13675_v11 = vld [vmem:[%s14759_s22 + $0xc34] ss:$8 sps:$4 sm:$0xff]  }
 0x321   : > { %9984 = vmatprep.subr.bf16.mxu0 %v13594_v12  ;;  %v13678_v12 = vld [vmem:[%s14759_s22 + $0x2034] ss:$8 sps:$4 sm:$0xff]  }
 0x323   : > { %9125 = vmatpush1.bf16.msra.mxu1 %v13589_v13  ;;  %v13673_v13 = vld [vmem:[%s14759_s22 + $0xc30] ss:$8 sps:$4 sm:$0xff]  }
 0x324   : > { %9985 = vmatpush1.bf16.msra.mxu0 %v13592_v14  ;;  %9126 = vmatprep.subr.bf16.mxu1 %v13597_v15  ;;  %v13676_v14 = vld [vmem:[%s14759_s22 + $0x2030] ss:$8 sps:$4 sm:$0xff]   ;;  %v13681_v15 = vld [vmem:[%s14759_s22 + $0xc44] ss:$8 sps:$4 sm:$0xff]  }
 0x325   : > { %9986 = vmatprep.subr.bf16.mxu0 %v13600_v48  ;;  %v13684_v48 = vld [vmem:[%s14759_s22 + $0x2044] ss:$8 sps:$4 sm:$0xff]  }
 0x327   : > { %9127 = vmatpush1.bf16.msra.mxu1 %v13595_v17  ;;  %v13679_v17 = vld [vmem:[%s14759_s22 + $0xc40] ss:$8 sps:$4 sm:$0xff]  }
 0x328   : > { %9987 = vmatpush1.bf16.msra.mxu0 %v13598_v18  ;;  %9128 = vmatprep.subr.bf16.mxu1 %v13603_v19  ;;  %v13682_v18 = vld [vmem:[%s14759_s22 + $0x2040] ss:$8 sps:$4 sm:$0xff]   ;;  %v13687_v19 = vld [vmem:[%s14759_s22 + $0xc54] ss:$8 sps:$4 sm:$0xff]  }
 0x329   : > { %9988 = vmatprep.subr.bf16.mxu0 %v13606_v20  ;;  %v13690_v20 = vld [vmem:[%s14759_s22 + $0x2054] ss:$8 sps:$4 sm:$0xff]  }
 0x32b   : > { %9129 = vmatpush1.bf16.msra.mxu1 %v13601_v21  ;;  %v13685_v21 = vld [vmem:[%s14759_s22 + $0xc50] ss:$8 sps:$4 sm:$0xff]  }
 0x32c   : > { %9989 = vmatpush1.bf16.msra.mxu0 %v13604_v22  ;;  %9130 = vmatprep.subr.bf16.mxu1 %v13609_v23  ;;  %v13688_v22 = vld [vmem:[%s14759_s22 + $0x2050] ss:$8 sps:$4 sm:$0xff]   ;;  %v13693_v23 = vld [vmem:[%s14759_s22 + $0xc64] ss:$8 sps:$4 sm:$0xff]  }
 0x32d   : > { %9990 = vmatprep.subr.bf16.mxu0 %v13612_v56  ;;  %v13696_v56 = vld [vmem:[%s14759_s22 + $0x2064] ss:$8 sps:$4 sm:$0xff]  }
 0x32f   : > { %9131 = vmatpush1.bf16.msra.mxu1 %v13607_v25  ;;  %v13691_v25 = vld [vmem:[%s14759_s22 + $0xc60] ss:$8 sps:$4 sm:$0xff]  }
 0x330   : > { %9991 = vmatpush1.bf16.msra.mxu0 %v13610_v26  ;;  %9132 = vmatprep.subr.bf16.mxu1 %v13615_v27  ;;  %v13694_v26 = vld [vmem:[%s14759_s22 + $0x2060] ss:$8 sps:$4 sm:$0xff]   ;;  %v13699_v27 = vld [vmem:[%s14759_s22 + $0xc74] ss:$8 sps:$4 sm:$0xff]  }
 0x331   : > { %9992 = vmatprep.subr.bf16.mxu0 %v13618_v28  ;;  %v13702_v28 = vld [vmem:[%s14759_s22 + $0x2074] ss:$8 sps:$4 sm:$0xff]  }
 0x333   : > { %9133 = vmatpush1.bf16.msra.mxu1 %v13613_v29  ;;  %v13697_v29 = vld [vmem:[%s14759_s22 + $0xc70] ss:$8 sps:$4 sm:$0xff]  }
 0x334   : > { %9993 = vmatpush1.bf16.msra.mxu0 %v13616_v30  ;;  %9134 = vmatprep.subr.bf16.mxu1 %v13621_v31  ;;  %v13700_v30 = vld [vmem:[%s14759_s22 + $0x2070] ss:$8 sps:$4 sm:$0xff]   ;;  %v13705_v31 = vld [vmem:[%s14759_s22 + $0xc84] ss:$8 sps:$4 sm:$0xff]  }
 0x335   : > { %9994 = vmatprep.subr.bf16.mxu0 %v13624_v51  ;;  %v13708_v51 = vld [vmem:[%s14759_s22 + $0x2084] ss:$8 sps:$4 sm:$0xff]  }
 0x337   : > { %9135 = vmatpush1.bf16.msra.mxu1 %v13619_v33  ;;  %v13703_v33 = vld [vmem:[%s14759_s22 + $0xc80] ss:$8 sps:$4 sm:$0xff]  }
 0x338   : > { %9995 = vmatpush1.bf16.msra.mxu0 %v13622_v34  ;;  %9136 = vmatprep.subr.bf16.mxu1 %v13627_v35  ;;  %v13706_v34 = vld [vmem:[%s14759_s22 + $0x2080] ss:$8 sps:$4 sm:$0xff]   ;;  %v13711_v35 = vld [vmem:[%s14759_s22 + $0xc94] ss:$8 sps:$4 sm:$0xff]  }
 0x339   : > { %9996 = vmatprep.subr.bf16.mxu0 %v13630_v36  ;;  %v13714_v36 = vld [vmem:[%s14759_s22 + $0x2094] ss:$8 sps:$4 sm:$0xff]  }
 0x33b   : > { %9137 = vmatpush1.bf16.msra.mxu1 %v13625_v37  ;;  %v13709_v37 = vld [vmem:[%s14759_s22 + $0xc90] ss:$8 sps:$4 sm:$0xff]  }
 0x33c   : > { %9997 = vmatpush1.bf16.msra.mxu0 %v13628_v38  ;;  %9138 = vmatprep.subr.bf16.mxu1 %v13633_v39  ;;  %v13712_v38 = vld [vmem:[%s14759_s22 + $0x2090] ss:$8 sps:$4 sm:$0xff]   ;;  %v13717_v39 = vld [vmem:[%s14759_s22 + $0xca4] ss:$8 sps:$4 sm:$0xff]  }
 0x33d   : > { %9998 = vmatprep.subr.bf16.mxu0 %v13636_v59  ;;  %v13720_v59 = vld [vmem:[%s14759_s22 + $0x20a4] ss:$8 sps:$4 sm:$0xff]  }
 0x33f   : > { %9139 = vmatpush1.bf16.msra.mxu1 %v13631_v43  ;;  %v13715_v43 = vld [vmem:[%s14759_s22 + $0xca0] ss:$8 sps:$4 sm:$0xff]  }
 0x340   : > { %9999 = vmatpush1.bf16.msra.mxu0 %v13634_v44  ;;  %9140 = vmatprep.subr.bf16.mxu1 %v13639_v49  ;;  %v13718_v44 = vld [vmem:[%s14759_s22 + $0x20a0] ss:$8 sps:$4 sm:$0xff]   ;;  %v13723_v49 = vld [vmem:[%s14759_s22 + $0xcb4] ss:$8 sps:$4 sm:$0xff]  }
 0x341   : > { %10000 = vmatprep.subr.bf16.mxu0 %v13642_v50  ;;  %v13726_v50 = vld [vmem:[%s14759_s22 + $0x20b4] ss:$8 sps:$4 sm:$0xff]  }
 0x343   : > { %9141 = vmatpush1.bf16.msra.mxu1 %v13637_v53  ;;  %v13721_v53 = vld [vmem:[%s14759_s22 + $0xcb0] ss:$8 sps:$4 sm:$0xff]  }
 0x344   : > { %10001 = vmatpush1.bf16.msra.mxu0 %v13640_v54  ;;  %9142 = vmatprep.subr.bf16.mxu1 %v13645_v41  ;;  %v13724_v54 = vld [vmem:[%s14759_s22 + $0x20b0] ss:$8 sps:$4 sm:$0xff]   ;;  %v13729_v41 = vld [vmem:[%s14759_s22 + $0xcc4] ss:$8 sps:$4 sm:$0xff]  }
 0x345   : > { %10002 = vmatprep.subr.bf16.mxu0 %v13648_v52  ;;  %v13732_v52 = vld [vmem:[%s14759_s22 + $0x20c4] ss:$8 sps:$4 sm:$0xff]  }
 0x347   : > { %9143 = vmatpush1.bf16.msra.mxu1 %v13643_v46  ;;  %v13727_v46 = vld [vmem:[%s14759_s22 + $0xcc0] ss:$8 sps:$4 sm:$0xff]  }
 0x348   : > { %10003 = vmatpush1.bf16.msra.mxu0 %v13646_v47  ;;  %9144 = vmatprep.subr.bf16.mxu1 %v13651_v57  ;;  %v13730_v47 = vld [vmem:[%s14759_s22 + $0x20c0] ss:$8 sps:$4 sm:$0xff]   ;;  %v13735_v57 = vld [vmem:[%s14759_s22 + $0xcd4] ss:$8 sps:$4 sm:$0xff]  }
 0x349   : > { %10004 = vmatprep.subr.bf16.mxu0 %v13654_v58  ;;  %v13738_v58 = vld [vmem:[%s14759_s22 + $0x20d4] ss:$8 sps:$4 sm:$0xff]  }
 0x34b   : > { %9145 = vmatpush1.bf16.msra.mxu1 %v13649_v61  ;;  %v13733_v61 = vld [vmem:[%s14759_s22 + $0xcd0] ss:$8 sps:$4 sm:$0xff]  }
 0x34c   : > { %10005 = vmatpush1.bf16.msra.mxu0 %v13652_v62  ;;  %9157 = vmatprep.subr.bf16.mxu1 %v13657_v63  ;;  %v13736_v62 = vld [vmem:[%s14759_s22 + $0x20d0] ss:$8 sps:$4 sm:$0xff]   ;;  %v13741_v63 = vld [vmem:[%s14759_s22 + $0xce4] ss:$8 sps:$4 sm:$0xff]  }
 0x34d   : > { %10017 = vmatprep.subr.bf16.mxu0 %v13660_v60  ;;  %v13744_v60 = vld [vmem:[%s14759_s22 + $0x20e4] ss:$8 sps:$4 sm:$0xff]  }
 0x34e   : > { %9147 = vmatmul.mubr.bf16.vlgmr.msra.gmra.mrb[0].mxu1 %v10906_v24  ;;  %v13739_v24 = vld [vmem:[%s14759_s22 + $0xce0] ss:$8 sps:$4 sm:$0xff]  }
 0x34f   : > { %10007 = vmatmul.mubr.bf16.vlgmr.msra.gmra.mrb[0].mxu0 %v10946_v40  ;;  %9158 = vmatpush1.bf16.msra.mxu1 %v13655_v3  ;;  %v13742_v40 = vld [vmem:[%s14759_s22 + $0x20e0] ss:$8 sps:$4 sm:$0xff]   ;;  %v13747_v3 = vld [vmem:[%s14759_s22 + $0xcf4] ss:$8 sps:$4 sm:$0xff]  }
 0x350   : > { %10018 = vmatpush1.bf16.msra.mxu0 %v13658_v4  ;;  %9159 = vmatprep.subr.bf16.mxu1 %v13663_v0  ;;  %v13750_v4 = vld [vmem:[%s14759_s22 + $0x20f4] ss:$8 sps:$4 sm:$0xff]   ;;  %v13745_v0 = vld [vmem:[%s14759_s22 + $0xcf0] ss:$8 sps:$4 sm:$0xff]  }
 0x351   : > { %10019 = vmatprep.subr.bf16.mxu0 %v13666_v16  ;;  %9189 = vmatprep.mubr.bf16.mxu1 %v10909_v32  ;;  %v13748_v16 = vld [vmem:[%s14759_s22 + $0x20f0] ss:$8 sps:$4 sm:$0xff]   ;;  %v13753_v32 = vld [vmem:[%s14759_s22 + $0xd04] ss:$8 sps:$4 sm:$0xff]  }
 0x352   : > { %10049 = vmatprep.mubr.bf16.mxu0 %v10949_v42  ;;  %v13756_v42 = vld [vmem:[%s14759_s22 + $0x2104] ss:$8 sps:$4 sm:$0xff]  }
 0x353   : > { %9160 = vmatpush1.bf16.msra.mxu1 %v13661_v5  ;;  %v15839_v5 = vld [vmem:[%s14761_s23 + $0x68] sm:$0xff] }
 0x354   : > { %10020 = vmatpush1.bf16.msra.mxu0 %v13664_v6  ;;  %9161 = vmatprep.subr.bf16.mxu1 %v13669_v7  ;;  %v10908_v6 = vcombine.low %v15755_v8, %v15762_v45  ;;  %v10948_v7 = vcombine.low %v15765_v1, %v15768_v2  ;;  %v13759_v8 = vld [vmem:[%s14759_s22 + $0xd14] ss:$8 sps:$4 sm:$0xff]  }
 0x355   : > { %10021 = vmatprep.subr.bf16.mxu0 %v13672_v55  ;;  %v15846_v55 = vld [vmem:[%s14761_s23 + $0x1a8] sm:$0xff]  ;;  %v13762_v45 = vld [vmem:[%s14759_s22 + $0x2114] ss:$8 sps:$4 sm:$0xff]  }
 0x356   : > { %v10911_v1 = vcombine.high %v15839_v5, %v15846_v55 }
 0x357   : > { %9162 = vmatpush1.bf16.msra.mxu1 %v13667_v9  ;;  %v15849_v9 = vld [vmem:[%s14761_s23 + $0x108] sm:$0xff] }
 0x358   : > { %10022 = vmatpush1.bf16.msra.mxu0 %v13670_v10  ;;  %9163 = vmatprep.subr.bf16.mxu1 %v13675_v11  ;;  %v15852_v10 = vld [vmem:[%s14761_s23 + $0x248] sm:$0xff] }
 0x359   : > { %10023 = vmatprep.subr.bf16.mxu0 %v13678_v12  ;;  %v13751_v11 = vld [vmem:[%s14759_s22 + $0xd00] ss:$8 sps:$4 sm:$0xff]   ;;  %v10951_v2 = vcombine.high %v15849_v9, %v15852_v10 }
 0x35a   : > { %v13754_v12 = vld [vmem:[%s14759_s22 + $0x2100] ss:$8 sps:$4 sm:$0xff]  }
 0x35b   : > { %9164 = vmatpush1.bf16.msra.mxu1 %v13673_v13  ;;  %v13757_v13 = vld [vmem:[%s14759_s22 + $0xd10] ss:$8 sps:$4 sm:$0xff]  }
 0x35c   : > { %10024 = vmatpush1.bf16.msra.mxu0 %v13676_v14  ;;  %9165 = vmatprep.subr.bf16.mxu1 %v13681_v15  ;;  %v13760_v14 = vld [vmem:[%s14759_s22 + $0x2110] ss:$8 sps:$4 sm:$0xff]   ;;  %v13765_v15 = vld [vmem:[%s14759_s22 + $0xd24] ss:$8 sps:$4 sm:$0xff]  }
 0x35d   : > { %10025 = vmatprep.subr.bf16.mxu0 %v13684_v48  ;;  %v13768_v48 = vld [vmem:[%s14759_s22 + $0x2124] ss:$8 sps:$4 sm:$0xff]  }
 0x35f   : > { %9166 = vmatpush1.bf16.msra.mxu1 %v13679_v17  ;;  %v13763_v17 = vld [vmem:[%s14759_s22 + $0xd20] ss:$8 sps:$4 sm:$0xff]  }
 0x360   : > { %10026 = vmatpush1.bf16.msra.mxu0 %v13682_v18  ;;  %9167 = vmatprep.subr.bf16.mxu1 %v13687_v19  ;;  %v13766_v18 = vld [vmem:[%s14759_s22 + $0x2120] ss:$8 sps:$4 sm:$0xff]   ;;  %v13771_v19 = vld [vmem:[%s14759_s22 + $0xd34] ss:$8 sps:$4 sm:$0xff]  }
 0x361   : > { %10027 = vmatprep.subr.bf16.mxu0 %v13690_v20  ;;  %v13774_v20 = vld [vmem:[%s14759_s22 + $0x2134] ss:$8 sps:$4 sm:$0xff]  }
 0x363   : > { %9168 = vmatpush1.bf16.msra.mxu1 %v13685_v21  ;;  %v13769_v21 = vld [vmem:[%s14759_s22 + $0xd30] ss:$8 sps:$4 sm:$0xff]  }
 0x364   : > { %10028 = vmatpush1.bf16.msra.mxu0 %v13688_v22  ;;  %9169 = vmatprep.subr.bf16.mxu1 %v13693_v23  ;;  %v13772_v22 = vld [vmem:[%s14759_s22 + $0x2130] ss:$8 sps:$4 sm:$0xff]   ;;  %v13777_v23 = vld [vmem:[%s14759_s22 + $0xd44] ss:$8 sps:$4 sm:$0xff]  }
 0x365   : > { %10029 = vmatprep.subr.bf16.mxu0 %v13696_v56  ;;  %v13780_v56 = vld [vmem:[%s14759_s22 + $0x2144] ss:$8 sps:$4 sm:$0xff]  }
 0x367   : > { %9170 = vmatpush1.bf16.msra.mxu1 %v13691_v25  ;;  %v13775_v25 = vld [vmem:[%s14759_s22 + $0xd40] ss:$8 sps:$4 sm:$0xff]  }
 0x368   : > { %10030 = vmatpush1.bf16.msra.mxu0 %v13694_v26  ;;  %9171 = vmatprep.subr.bf16.mxu1 %v13699_v27  ;;  %v13778_v26 = vld [vmem:[%s14759_s22 + $0x2140] ss:$8 sps:$4 sm:$0xff]   ;;  %v13783_v27 = vld [vmem:[%s14759_s22 + $0xd54] ss:$8 sps:$4 sm:$0xff]  }
 0x369   : > { %10031 = vmatprep.subr.bf16.mxu0 %v13702_v28  ;;  %v13786_v28 = vld [vmem:[%s14759_s22 + $0x2154] ss:$8 sps:$4 sm:$0xff]  }
 0x36b   : > { %9172 = vmatpush1.bf16.msra.mxu1 %v13697_v29  ;;  %v13781_v29 = vld [vmem:[%s14759_s22 + $0xd50] ss:$8 sps:$4 sm:$0xff]  }
 0x36c   : > { %10032 = vmatpush1.bf16.msra.mxu0 %v13700_v30  ;;  %9173 = vmatprep.subr.bf16.mxu1 %v13705_v31  ;;  %v13784_v30 = vld [vmem:[%s14759_s22 + $0x2150] ss:$8 sps:$4 sm:$0xff]   ;;  %v13789_v31 = vld [vmem:[%s14759_s22 + $0xd64] ss:$8 sps:$4 sm:$0xff]  }
 0x36d   : > { %10033 = vmatprep.subr.bf16.mxu0 %v13708_v51  ;;  %v13792_v51 = vld [vmem:[%s14759_s22 + $0x2164] ss:$8 sps:$4 sm:$0xff]  }
 0x36f   : > { %9174 = vmatpush1.bf16.msra.mxu1 %v13703_v33  ;;  %v13787_v33 = vld [vmem:[%s14759_s22 + $0xd60] ss:$8 sps:$4 sm:$0xff]  }
 0x370   : > { %10034 = vmatpush1.bf16.msra.mxu0 %v13706_v34  ;;  %9175 = vmatprep.subr.bf16.mxu1 %v13711_v35  ;;  %v13790_v34 = vld [vmem:[%s14759_s22 + $0x2160] ss:$8 sps:$4 sm:$0xff]   ;;  %v13795_v35 = vld [vmem:[%s14759_s22 + $0xd74] ss:$8 sps:$4 sm:$0xff]  }
 0x371   : > { %10035 = vmatprep.subr.bf16.mxu0 %v13714_v36  ;;  %v13798_v36 = vld [vmem:[%s14759_s22 + $0x2174] ss:$8 sps:$4 sm:$0xff]  }
 0x373   : > { %9176 = vmatpush1.bf16.msra.mxu1 %v13709_v37  ;;  %v13793_v37 = vld [vmem:[%s14759_s22 + $0xd70] ss:$8 sps:$4 sm:$0xff]  }
 0x374   : > { %10036 = vmatpush1.bf16.msra.mxu0 %v13712_v38  ;;  %9177 = vmatprep.subr.bf16.mxu1 %v13717_v39  ;;  %v13796_v38 = vld [vmem:[%s14759_s22 + $0x2170] ss:$8 sps:$4 sm:$0xff]   ;;  %v13801_v39 = vld [vmem:[%s14759_s22 + $0xd84] ss:$8 sps:$4 sm:$0xff]  }
 0x375   : > { %10037 = vmatprep.subr.bf16.mxu0 %v13720_v59  ;;  %v13804_v59 = vld [vmem:[%s14759_s22 + $0x2184] ss:$8 sps:$4 sm:$0xff]  }
 0x377   : > { %9178 = vmatpush1.bf16.msra.mxu1 %v13715_v43  ;;  %v13799_v43 = vld [vmem:[%s14759_s22 + $0xd80] ss:$8 sps:$4 sm:$0xff]  }
 0x378   : > { %10038 = vmatpush1.bf16.msra.mxu0 %v13718_v44  ;;  %9179 = vmatprep.subr.bf16.mxu1 %v13723_v49  ;;  %v13802_v44 = vld [vmem:[%s14759_s22 + $0x2180] ss:$8 sps:$4 sm:$0xff]   ;;  %v13807_v49 = vld [vmem:[%s14759_s22 + $0xd94] ss:$8 sps:$4 sm:$0xff]  }
 0x379   : > { %10039 = vmatprep.subr.bf16.mxu0 %v13726_v50  ;;  %v13810_v50 = vld [vmem:[%s14759_s22 + $0x2194] ss:$8 sps:$4 sm:$0xff]  }
 0x37b   : > { %9180 = vmatpush1.bf16.msra.mxu1 %v13721_v53  ;;  %v13805_v53 = vld [vmem:[%s14759_s22 + $0xd90] ss:$8 sps:$4 sm:$0xff]  }
 0x37c   : > { %10040 = vmatpush1.bf16.msra.mxu0 %v13724_v54  ;;  %9181 = vmatprep.subr.bf16.mxu1 %v13729_v41  ;;  %v13808_v54 = vld [vmem:[%s14759_s22 + $0x2190] ss:$8 sps:$4 sm:$0xff]   ;;  %v13813_v41 = vld [vmem:[%s14759_s22 + $0xda4] ss:$8 sps:$4 sm:$0xff]  }
 0x37d   : > { %10041 = vmatprep.subr.bf16.mxu0 %v13732_v52  ;;  %v13816_v52 = vld [vmem:[%s14759_s22 + $0x21a4] ss:$8 sps:$4 sm:$0xff]  }
 0x37f   : > { %9182 = vmatpush1.bf16.msra.mxu1 %v13727_v46  ;;  %v13811_v46 = vld [vmem:[%s14759_s22 + $0xda0] ss:$8 sps:$4 sm:$0xff]  }
 0x380   : > { %10042 = vmatpush1.bf16.msra.mxu0 %v13730_v47  ;;  %9183 = vmatprep.subr.bf16.mxu1 %v13735_v57  ;;  %v13814_v47 = vld [vmem:[%s14759_s22 + $0x21a0] ss:$8 sps:$4 sm:$0xff]   ;;  %v13819_v57 = vld [vmem:[%s14759_s22 + $0xdb4] ss:$8 sps:$4 sm:$0xff]  }
 0x381   : > { %10043 = vmatprep.subr.bf16.mxu0 %v13738_v58  ;;  %v13822_v58 = vld [vmem:[%s14759_s22 + $0x21b4] ss:$8 sps:$4 sm:$0xff]  }
 0x383   : > { %9184 = vmatpush1.bf16.msra.mxu1 %v13733_v61  ;;  %v13817_v61 = vld [vmem:[%s14759_s22 + $0xdb0] ss:$8 sps:$4 sm:$0xff]  }
 0x384   : > { %10044 = vmatpush1.bf16.msra.mxu0 %v13736_v62  ;;  %9185 = vmatprep.subr.bf16.mxu1 %v13741_v63  ;;  %v13820_v62 = vld [vmem:[%s14759_s22 + $0x21b0] ss:$8 sps:$4 sm:$0xff]   ;;  %v13825_v63 = vld [vmem:[%s14759_s22 + $0xdc4] ss:$8 sps:$4 sm:$0xff]  }
 0x385   : > { %10045 = vmatprep.subr.bf16.mxu0 %v13744_v60  ;;  %v13828_v60 = vld [vmem:[%s14759_s22 + $0x21c4] ss:$8 sps:$4 sm:$0xff]  }
 0x387   : > { %9186 = vmatpush1.bf16.msra.mxu1 %v13739_v24  ;;  %v13823_v24 = vld [vmem:[%s14759_s22 + $0xdc0] ss:$8 sps:$4 sm:$0xff]  }
 0x388   : > { %10046 = vmatpush1.bf16.msra.mxu0 %v13742_v40  ;;  %9187 = vmatprep.subr.bf16.mxu1 %v13747_v3  ;;  %v13826_v40 = vld [vmem:[%s14759_s22 + $0x21c0] ss:$8 sps:$4 sm:$0xff]   ;;  %v13831_v3 = vld [vmem:[%s14759_s22 + $0xdd4] ss:$8 sps:$4 sm:$0xff]  }
 0x389   : > { %10047 = vmatprep.subr.bf16.mxu0 %v13750_v4  ;;  %v13834_v4 = vld [vmem:[%s14759_s22 + $0x21d4] ss:$8 sps:$4 sm:$0xff]  }
 0x38b   : > { %9188 = vmatpush1.bf16.msra.mxu1 %v13745_v0  ;;  %v13829_v0 = vld [vmem:[%s14759_s22 + $0xdd0] ss:$8 sps:$4 sm:$0xff]  }
 0x38c   : > { %10048 = vmatpush1.bf16.msra.mxu0 %v13748_v16  ;;  %9200 = vmatprep.subr.bf16.mxu1 %v13753_v32  ;;  %v13832_v16 = vld [vmem:[%s14759_s22 + $0x21d0] ss:$8 sps:$4 sm:$0xff]   ;;  %v13837_v32 = vld [vmem:[%s14759_s22 + $0xde4] ss:$8 sps:$4 sm:$0xff]  }
 0x38d   : > { %10060 = vmatprep.subr.bf16.mxu0 %v13756_v42  ;;  %v13840_v42 = vld [vmem:[%s14759_s22 + $0x21e4] ss:$8 sps:$4 sm:$0xff]  }
 0x38e   : > { %9190 = vmatmul.mubr.bf16.vlgmr.msra.gmra.mrb[0].mxu1 %v10908_v6  ;;  %v13835_v6 = vld [vmem:[%s14759_s22 + $0xde0] ss:$8 sps:$4 sm:$0xff]  }
 0x38f   : > { %10050 = vmatmul.mubr.bf16.vlgmr.msra.gmra.mrb[0].mxu0 %v10948_v7  ;;  %9201 = vmatpush1.bf16.msra.mxu1 %v13751_v11  ;;  %v13838_v7 = vld [vmem:[%s14759_s22 + $0x21e0] ss:$8 sps:$4 sm:$0xff]   ;;  %v13843_v11 = vld [vmem:[%s14759_s22 + $0xdf4] ss:$8 sps:$4 sm:$0xff]  }
 0x390   : > { %10061 = vmatpush1.bf16.msra.mxu0 %v13754_v12  ;;  %9202 = vmatprep.subr.bf16.mxu1 %v13759_v8  ;;  %v13846_v12 = vld [vmem:[%s14759_s22 + $0x21f4] ss:$8 sps:$4 sm:$0xff]   ;;  %v13841_v8 = vld [vmem:[%s14759_s22 + $0xdf0] ss:$8 sps:$4 sm:$0xff]  }
 0x391   : > { %10062 = vmatprep.subr.bf16.mxu0 %v13762_v45  ;;  %9232 = vmatprep.mubr.bf16.mxu1 %v10911_v1  ;;  %v13844_v45 = vld [vmem:[%s14759_s22 + $0x21f0] ss:$8 sps:$4 sm:$0xff]   ;;  %v13849_v1 = vld [vmem:[%s14759_s22 + $0xe04] ss:$8 sps:$4 sm:$0xff]  }
 0x392   : > { %10092 = vmatprep.mubr.bf16.mxu0 %v10951_v2  ;;  %v13852_v2 = vld [vmem:[%s14759_s22 + $0x2204] ss:$8 sps:$4 sm:$0xff]  }
 0x393   : > { %9203 = vmatpush1.bf16.msra.mxu1 %v13757_v13  ;;  %v15923_v13 = vld [vmem:[%s14761_s23 + $0x70] sm:$0xff] }
 0x394   : > { %10063 = vmatpush1.bf16.msra.mxu0 %v13760_v14  ;;  %9204 = vmatprep.subr.bf16.mxu1 %v13765_v15  ;;  %v10910_v14 = vcombine.low %v15839_v5, %v15846_v55  ;;  %v10950_v15 = vcombine.low %v15849_v9, %v15852_v10  ;;  %v13855_v5 = vld [vmem:[%s14759_s22 + $0xe14] ss:$8 sps:$4 sm:$0xff]  }
 0x395   : > { %10064 = vmatprep.subr.bf16.mxu0 %v13768_v48  ;;  %v15930_v48 = vld [vmem:[%s14761_s23 + $0x1b0] sm:$0xff] }
 0x396   : > { %v13858_v55 = vld [vmem:[%s14759_s22 + $0x2214] ss:$8 sps:$4 sm:$0xff]   ;;  %v10913_v9 = vcombine.high %v15923_v13, %v15930_v48 }
 0x397   : > { %9205 = vmatpush1.bf16.msra.mxu1 %v13763_v17  ;;  %v15933_v17 = vld [vmem:[%s14761_s23 + $0x110] sm:$0xff] }
 0x398   : > { %10065 = vmatpush1.bf16.msra.mxu0 %v13766_v18  ;;  %9206 = vmatprep.subr.bf16.mxu1 %v13771_v19  ;;  %v15936_v18 = vld [vmem:[%s14761_s23 + $0x250] sm:$0xff]  ;;  %v13847_v19 = vld [vmem:[%s14759_s22 + $0xe00] ss:$8 sps:$4 sm:$0xff]  }
 0x399   : > { %10066 = vmatprep.subr.bf16.mxu0 %v13774_v20  ;;  %v13850_v20 = vld [vmem:[%s14759_s22 + $0x2200] ss:$8 sps:$4 sm:$0xff]   ;;  %v10953_v10 = vcombine.high %v15933_v17, %v15936_v18 }
 0x39b   : > { %9207 = vmatpush1.bf16.msra.mxu1 %v13769_v21  ;;  %v13853_v21 = vld [vmem:[%s14759_s22 + $0xe10] ss:$8 sps:$4 sm:$0xff]  }
 0x39c   : > { %10067 = vmatpush1.bf16.msra.mxu0 %v13772_v22  ;;  %9208 = vmatprep.subr.bf16.mxu1 %v13777_v23  ;;  %v13856_v22 = vld [vmem:[%s14759_s22 + $0x2210] ss:$8 sps:$4 sm:$0xff]   ;;  %v13861_v23 = vld [vmem:[%s14759_s22 + $0xe24] ss:$8 sps:$4 sm:$0xff]  }
 0x39d   : > { %10068 = vmatprep.subr.bf16.mxu0 %v13780_v56  ;;  %v13864_v56 = vld [vmem:[%s14759_s22 + $0x2224] ss:$8 sps:$4 sm:$0xff]  }
 0x39f   : > { %9209 = vmatpush1.bf16.msra.mxu1 %v13775_v25  ;;  %v13859_v25 = vld [vmem:[%s14759_s22 + $0xe20] ss:$8 sps:$4 sm:$0xff]  }
 0x3a0   : > { %10069 = vmatpush1.bf16.msra.mxu0 %v13778_v26  ;;  %9210 = vmatprep.subr.bf16.mxu1 %v13783_v27  ;;  %v13862_v26 = vld [vmem:[%s14759_s22 + $0x2220] ss:$8 sps:$4 sm:$0xff]   ;;  %v13867_v27 = vld [vmem:[%s14759_s22 + $0xe34] ss:$8 sps:$4 sm:$0xff]  }
 0x3a1   : > { %10070 = vmatprep.subr.bf16.mxu0 %v13786_v28  ;;  %v13870_v28 = vld [vmem:[%s14759_s22 + $0x2234] ss:$8 sps:$4 sm:$0xff]  }
 0x3a3   : > { %9211 = vmatpush1.bf16.msra.mxu1 %v13781_v29  ;;  %v13865_v29 = vld [vmem:[%s14759_s22 + $0xe30] ss:$8 sps:$4 sm:$0xff]  }
 0x3a4   : > { %10071 = vmatpush1.bf16.msra.mxu0 %v13784_v30  ;;  %9212 = vmatprep.subr.bf16.mxu1 %v13789_v31  ;;  %v13868_v30 = vld [vmem:[%s14759_s22 + $0x2230] ss:$8 sps:$4 sm:$0xff]   ;;  %v13873_v31 = vld [vmem:[%s14759_s22 + $0xe44] ss:$8 sps:$4 sm:$0xff]  }
 0x3a5   : > { %10072 = vmatprep.subr.bf16.mxu0 %v13792_v51  ;;  %v13876_v51 = vld [vmem:[%s14759_s22 + $0x2244] ss:$8 sps:$4 sm:$0xff]  }
 0x3a7   : > { %9213 = vmatpush1.bf16.msra.mxu1 %v13787_v33  ;;  %v13871_v33 = vld [vmem:[%s14759_s22 + $0xe40] ss:$8 sps:$4 sm:$0xff]  }
 0x3a8   : > { %10073 = vmatpush1.bf16.msra.mxu0 %v13790_v34  ;;  %9214 = vmatprep.subr.bf16.mxu1 %v13795_v35  ;;  %v13874_v34 = vld [vmem:[%s14759_s22 + $0x2240] ss:$8 sps:$4 sm:$0xff]   ;;  %v13879_v35 = vld [vmem:[%s14759_s22 + $0xe54] ss:$8 sps:$4 sm:$0xff]  }
 0x3a9   : > { %10074 = vmatprep.subr.bf16.mxu0 %v13798_v36  ;;  %v13882_v36 = vld [vmem:[%s14759_s22 + $0x2254] ss:$8 sps:$4 sm:$0xff]  }
 0x3ab   : > { %9215 = vmatpush1.bf16.msra.mxu1 %v13793_v37  ;;  %v13877_v37 = vld [vmem:[%s14759_s22 + $0xe50] ss:$8 sps:$4 sm:$0xff]  }
 0x3ac   : > { %10075 = vmatpush1.bf16.msra.mxu0 %v13796_v38  ;;  %9216 = vmatprep.subr.bf16.mxu1 %v13801_v39  ;;  %v13880_v38 = vld [vmem:[%s14759_s22 + $0x2250] ss:$8 sps:$4 sm:$0xff]   ;;  %v13885_v39 = vld [vmem:[%s14759_s22 + $0xe64] ss:$8 sps:$4 sm:$0xff]  }
 0x3ad   : > { %10076 = vmatprep.subr.bf16.mxu0 %v13804_v59  ;;  %v13888_v59 = vld [vmem:[%s14759_s22 + $0x2264] ss:$8 sps:$4 sm:$0xff]  }
 0x3af   : > { %9217 = vmatpush1.bf16.msra.mxu1 %v13799_v43  ;;  %v13883_v43 = vld [vmem:[%s14759_s22 + $0xe60] ss:$8 sps:$4 sm:$0xff]  }
 0x3b0   : > { %10077 = vmatpush1.bf16.msra.mxu0 %v13802_v44  ;;  %9218 = vmatprep.subr.bf16.mxu1 %v13807_v49  ;;  %v13886_v44 = vld [vmem:[%s14759_s22 + $0x2260] ss:$8 sps:$4 sm:$0xff]   ;;  %v13891_v49 = vld [vmem:[%s14759_s22 + $0xe74] ss:$8 sps:$4 sm:$0xff]  }
 0x3b1   : > { %10078 = vmatprep.subr.bf16.mxu0 %v13810_v50  ;;  %v13894_v50 = vld [vmem:[%s14759_s22 + $0x2274] ss:$8 sps:$4 sm:$0xff]  }
 0x3b3   : > { %9219 = vmatpush1.bf16.msra.mxu1 %v13805_v53  ;;  %v13889_v53 = vld [vmem:[%s14759_s22 + $0xe70] ss:$8 sps:$4 sm:$0xff]  }
 0x3b4   : > { %10079 = vmatpush1.bf16.msra.mxu0 %v13808_v54  ;;  %9220 = vmatprep.subr.bf16.mxu1 %v13813_v41  ;;  %v13892_v54 = vld [vmem:[%s14759_s22 + $0x2270] ss:$8 sps:$4 sm:$0xff]   ;;  %v13897_v41 = vld [vmem:[%s14759_s22 + $0xe84] ss:$8 sps:$4 sm:$0xff]  }
 0x3b5   : > { %10080 = vmatprep.subr.bf16.mxu0 %v13816_v52  ;;  %v13900_v52 = vld [vmem:[%s14759_s22 + $0x2284] ss:$8 sps:$4 sm:$0xff]  }
 0x3b7   : > { %9221 = vmatpush1.bf16.msra.mxu1 %v13811_v46  ;;  %v13895_v46 = vld [vmem:[%s14759_s22 + $0xe80] ss:$8 sps:$4 sm:$0xff]  }
 0x3b8   : > { %10081 = vmatpush1.bf16.msra.mxu0 %v13814_v47  ;;  %9222 = vmatprep.subr.bf16.mxu1 %v13819_v57  ;;  %v13898_v47 = vld [vmem:[%s14759_s22 + $0x2280] ss:$8 sps:$4 sm:$0xff]   ;;  %v13903_v57 = vld [vmem:[%s14759_s22 + $0xe94] ss:$8 sps:$4 sm:$0xff]  }
 0x3b9   : > { %10082 = vmatprep.subr.bf16.mxu0 %v13822_v58  ;;  %v13906_v58 = vld [vmem:[%s14759_s22 + $0x2294] ss:$8 sps:$4 sm:$0xff]  }
 0x3bb   : > { %9223 = vmatpush1.bf16.msra.mxu1 %v13817_v61  ;;  %v13901_v61 = vld [vmem:[%s14759_s22 + $0xe90] ss:$8 sps:$4 sm:$0xff]  }
 0x3bc   : > { %10083 = vmatpush1.bf16.msra.mxu0 %v13820_v62  ;;  %9224 = vmatprep.subr.bf16.mxu1 %v13825_v63  ;;  %v13904_v62 = vld [vmem:[%s14759_s22 + $0x2290] ss:$8 sps:$4 sm:$0xff]   ;;  %v13909_v63 = vld [vmem:[%s14759_s22 + $0xea4] ss:$8 sps:$4 sm:$0xff]  }
 0x3bd   : > { %10084 = vmatprep.subr.bf16.mxu0 %v13828_v60  ;;  %v13912_v60 = vld [vmem:[%s14759_s22 + $0x22a4] ss:$8 sps:$4 sm:$0xff]  }
 0x3bf   : > { %9225 = vmatpush1.bf16.msra.mxu1 %v13823_v24  ;;  %v13907_v24 = vld [vmem:[%s14759_s22 + $0xea0] ss:$8 sps:$4 sm:$0xff]  }
 0x3c0   : > { %10085 = vmatpush1.bf16.msra.mxu0 %v13826_v40  ;;  %9226 = vmatprep.subr.bf16.mxu1 %v13831_v3  ;;  %v13910_v40 = vld [vmem:[%s14759_s22 + $0x22a0] ss:$8 sps:$4 sm:$0xff]   ;;  %v13915_v3 = vld [vmem:[%s14759_s22 + $0xeb4] ss:$8 sps:$4 sm:$0xff]  }
 0x3c1   : > { %10086 = vmatprep.subr.bf16.mxu0 %v13834_v4  ;;  %v13918_v4 = vld [vmem:[%s14759_s22 + $0x22b4] ss:$8 sps:$4 sm:$0xff]  }
 0x3c3   : > { %9227 = vmatpush1.bf16.msra.mxu1 %v13829_v0  ;;  %v13913_v0 = vld [vmem:[%s14759_s22 + $0xeb0] ss:$8 sps:$4 sm:$0xff]  }
 0x3c4   : > { %10087 = vmatpush1.bf16.msra.mxu0 %v13832_v16  ;;  %9228 = vmatprep.subr.bf16.mxu1 %v13837_v32  ;;  %v13916_v16 = vld [vmem:[%s14759_s22 + $0x22b0] ss:$8 sps:$4 sm:$0xff]   ;;  %v13921_v32 = vld [vmem:[%s14759_s22 + $0xec4] ss:$8 sps:$4 sm:$0xff]  }
 0x3c5   : > { %10088 = vmatprep.subr.bf16.mxu0 %v13840_v42  ;;  %v13924_v42 = vld [vmem:[%s14759_s22 + $0x22c4] ss:$8 sps:$4 sm:$0xff]  }
 0x3c7   : > { %9229 = vmatpush1.bf16.msra.mxu1 %v13835_v6  ;;  %v13919_v6 = vld [vmem:[%s14759_s22 + $0xec0] ss:$8 sps:$4 sm:$0xff]  }
 0x3c8   : > { %10089 = vmatpush1.bf16.msra.mxu0 %v13838_v7  ;;  %9230 = vmatprep.subr.bf16.mxu1 %v13843_v11  ;;  %v13922_v7 = vld [vmem:[%s14759_s22 + $0x22c0] ss:$8 sps:$4 sm:$0xff]   ;;  %v13927_v11 = vld [vmem:[%s14759_s22 + $0xed4] ss:$8 sps:$4 sm:$0xff]  }
 0x3c9   : > { %10090 = vmatprep.subr.bf16.mxu0 %v13846_v12  ;;  %v13930_v12 = vld [vmem:[%s14759_s22 + $0x22d4] ss:$8 sps:$4 sm:$0xff]  }
 0x3cb   : > { %9231 = vmatpush1.bf16.msra.mxu1 %v13841_v8  ;;  %v13925_v8 = vld [vmem:[%s14759_s22 + $0xed0] ss:$8 sps:$4 sm:$0xff]  }
 0x3cc   : > { %10091 = vmatpush1.bf16.msra.mxu0 %v13844_v45  ;;  %9243 = vmatprep.subr.bf16.mxu1 %v13849_v1  ;;  %v13928_v45 = vld [vmem:[%s14759_s22 + $0x22d0] ss:$8 sps:$4 sm:$0xff]   ;;  %v13933_v1 = vld [vmem:[%s14759_s22 + $0xee4] ss:$8 sps:$4 sm:$0xff]  }
 0x3cd   : > { %10103 = vmatprep.subr.bf16.mxu0 %v13852_v2  ;;  %v13936_v2 = vld [vmem:[%s14759_s22 + $0x22e4] ss:$8 sps:$4 sm:$0xff]  }
 0x3ce   : > { %9233 = vmatmul.mubr.bf16.vlgmr.msra.gmra.mrb[0].mxu1 %v10910_v14  ;;  %v13931_v14 = vld [vmem:[%s14759_s22 + $0xee0] ss:$8 sps:$4 sm:$0xff]  }
 0x3cf   : > { %10093 = vmatmul.mubr.bf16.vlgmr.msra.gmra.mrb[0].mxu0 %v10950_v15  ;;  %9244 = vmatpush1.bf16.msra.mxu1 %v13847_v19  ;;  %v13934_v15 = vld [vmem:[%s14759_s22 + $0x22e0] ss:$8 sps:$4 sm:$0xff]   ;;  %v13939_v19 = vld [vmem:[%s14759_s22 + $0xef4] ss:$8 sps:$4 sm:$0xff]  }
 0x3d0   : > { %10104 = vmatpush1.bf16.msra.mxu0 %v13850_v20  ;;  %9245 = vmatprep.subr.bf16.mxu1 %v13855_v5  ;;  %v13942_v20 = vld [vmem:[%s14759_s22 + $0x22f4] ss:$8 sps:$4 sm:$0xff]   ;;  %v13937_v5 = vld [vmem:[%s14759_s22 + $0xef0] ss:$8 sps:$4 sm:$0xff]  }
 0x3d1   : > { %10105 = vmatprep.subr.bf16.mxu0 %v13858_v55  ;;  %9275 = vmatprep.mubr.bf16.mxu1 %v10913_v9  ;;  %v13940_v55 = vld [vmem:[%s14759_s22 + $0x22f0] ss:$8 sps:$4 sm:$0xff]   ;;  %v13945_v9 = vld [vmem:[%s14759_s22 + $0xf04] ss:$8 sps:$4 sm:$0xff]  }
 0x3d2   : > { %10135 = vmatprep.mubr.bf16.mxu0 %v10953_v10  ;;  %v13948_v10 = vld [vmem:[%s14759_s22 + $0x2304] ss:$8 sps:$4 sm:$0xff]  }
 0x3d3   : > { %9246 = vmatpush1.bf16.msra.mxu1 %v13853_v21  ;;  %v16007_v21 = vld [vmem:[%s14761_s23 + $0x78] sm:$0xff] }
 0x3d4   : > { %10106 = vmatpush1.bf16.msra.mxu0 %v13856_v22  ;;  %9247 = vmatprep.subr.bf16.mxu1 %v13861_v23  ;;  %v10912_v22 = vcombine.low %v15923_v13, %v15930_v48  ;;  %v10952_v23 = vcombine.low %v15933_v17, %v15936_v18  ;;  %v13951_v13 = vld [vmem:[%s14759_s22 + $0xf14] ss:$8 sps:$4 sm:$0xff]  }
 0x3d5   : > { %10107 = vmatprep.subr.bf16.mxu0 %v13864_v56  ;;  %v16014_v56 = vld [vmem:[%s14761_s23 + $0x1b8] sm:$0xff] }
 0x3d6   : > { %v13954_v48 = vld [vmem:[%s14759_s22 + $0x2314] ss:$8 sps:$4 sm:$0xff]   ;;  %v10915_v17 = vcombine.high %v16007_v21, %v16014_v56 }
 0x3d7   : > { %9248 = vmatpush1.bf16.msra.mxu1 %v13859_v25  ;;  %v16017_v25 = vld [vmem:[%s14761_s23 + $0x118] sm:$0xff] }
 0x3d8   : > { %10108 = vmatpush1.bf16.msra.mxu0 %v13862_v26  ;;  %9249 = vmatprep.subr.bf16.mxu1 %v13867_v27  ;;  %v16020_v26 = vld [vmem:[%s14761_s23 + $0x258] sm:$0xff]  ;;  %v13943_v27 = vld [vmem:[%s14759_s22 + $0xf00] ss:$8 sps:$4 sm:$0xff]  }
 0x3d9   : > { %10109 = vmatprep.subr.bf16.mxu0 %v13870_v28  ;;  %v13946_v28 = vld [vmem:[%s14759_s22 + $0x2300] ss:$8 sps:$4 sm:$0xff]   ;;  %v10955_v18 = vcombine.high %v16017_v25, %v16020_v26 }
 0x3db   : > { %9250 = vmatpush1.bf16.msra.mxu1 %v13865_v29  ;;  %v13949_v29 = vld [vmem:[%s14759_s22 + $0xf10] ss:$8 sps:$4 sm:$0xff]  }
 0x3dc   : > { %10110 = vmatpush1.bf16.msra.mxu0 %v13868_v30  ;;  %9251 = vmatprep.subr.bf16.mxu1 %v13873_v31  ;;  %v13952_v30 = vld [vmem:[%s14759_s22 + $0x2310] ss:$8 sps:$4 sm:$0xff]   ;;  %v13957_v31 = vld [vmem:[%s14759_s22 + $0xf24] ss:$8 sps:$4 sm:$0xff]  }
 0x3dd   : > { %10111 = vmatprep.subr.bf16.mxu0 %v13876_v51  ;;  %v13960_v51 = vld [vmem:[%s14759_s22 + $0x2324] ss:$8 sps:$4 sm:$0xff]  }
 0x3df   : > { %9252 = vmatpush1.bf16.msra.mxu1 %v13871_v33  ;;  %v13955_v33 = vld [vmem:[%s14759_s22 + $0xf20] ss:$8 sps:$4 sm:$0xff]  }
 0x3e0   : > { %10112 = vmatpush1.bf16.msra.mxu0 %v13874_v34  ;;  %9253 = vmatprep.subr.bf16.mxu1 %v13879_v35  ;;  %v13958_v34 = vld [vmem:[%s14759_s22 + $0x2320] ss:$8 sps:$4 sm:$0xff]   ;;  %v13963_v35 = vld [vmem:[%s14759_s22 + $0xf34] ss:$8 sps:$4 sm:$0xff]  }
 0x3e1   : > { %10113 = vmatprep.subr.bf16.mxu0 %v13882_v36  ;;  %v13966_v36 = vld [vmem:[%s14759_s22 + $0x2334] ss:$8 sps:$4 sm:$0xff]  }
 0x3e3   : > { %9254 = vmatpush1.bf16.msra.mxu1 %v13877_v37  ;;  %v13961_v37 = vld [vmem:[%s14759_s22 + $0xf30] ss:$8 sps:$4 sm:$0xff]  }
 0x3e4   : > { %10114 = vmatpush1.bf16.msra.mxu0 %v13880_v38  ;;  %9255 = vmatprep.subr.bf16.mxu1 %v13885_v39  ;;  %v13964_v38 = vld [vmem:[%s14759_s22 + $0x2330] ss:$8 sps:$4 sm:$0xff]   ;;  %v13969_v39 = vld [vmem:[%s14759_s22 + $0xf44] ss:$8 sps:$4 sm:$0xff]  }
 0x3e5   : > { %10115 = vmatprep.subr.bf16.mxu0 %v13888_v59  ;;  %v13972_v59 = vld [vmem:[%s14759_s22 + $0x2344] ss:$8 sps:$4 sm:$0xff]  }
 0x3e7   : > { %9256 = vmatpush1.bf16.msra.mxu1 %v13883_v43  ;;  %v13967_v43 = vld [vmem:[%s14759_s22 + $0xf40] ss:$8 sps:$4 sm:$0xff]  }
 0x3e8   : > { %10116 = vmatpush1.bf16.msra.mxu0 %v13886_v44  ;;  %9257 = vmatprep.subr.bf16.mxu1 %v13891_v49  ;;  %v13970_v44 = vld [vmem:[%s14759_s22 + $0x2340] ss:$8 sps:$4 sm:$0xff]   ;;  %v13975_v49 = vld [vmem:[%s14759_s22 + $0xf54] ss:$8 sps:$4 sm:$0xff]  }
 0x3e9   : > { %10117 = vmatprep.subr.bf16.mxu0 %v13894_v50  ;;  %v13978_v50 = vld [vmem:[%s14759_s22 + $0x2354] ss:$8 sps:$4 sm:$0xff]  }
 0x3eb   : > { %9258 = vmatpush1.bf16.msra.mxu1 %v13889_v53  ;;  %v13973_v53 = vld [vmem:[%s14759_s22 + $0xf50] ss:$8 sps:$4 sm:$0xff]  }
 0x3ec   : > { %10118 = vmatpush1.bf16.msra.mxu0 %v13892_v54  ;;  %9259 = vmatprep.subr.bf16.mxu1 %v13897_v41  ;;  %v13976_v54 = vld [vmem:[%s14759_s22 + $0x2350] ss:$8 sps:$4 sm:$0xff]   ;;  %v13981_v41 = vld [vmem:[%s14759_s22 + $0xf64] ss:$8 sps:$4 sm:$0xff]  }
 0x3ed   : > { %10119 = vmatprep.subr.bf16.mxu0 %v13900_v52  ;;  %v13984_v52 = vld [vmem:[%s14759_s22 + $0x2364] ss:$8 sps:$4 sm:$0xff]  }
 0x3ef   : > { %9260 = vmatpush1.bf16.msra.mxu1 %v13895_v46  ;;  %v13979_v46 = vld [vmem:[%s14759_s22 + $0xf60] ss:$8 sps:$4 sm:$0xff]  }
 0x3f0   : > { %10120 = vmatpush1.bf16.msra.mxu0 %v13898_v47  ;;  %9261 = vmatprep.subr.bf16.mxu1 %v13903_v57  ;;  %v13982_v47 = vld [vmem:[%s14759_s22 + $0x2360] ss:$8 sps:$4 sm:$0xff]   ;;  %v13987_v57 = vld [vmem:[%s14759_s22 + $0xf74] ss:$8 sps:$4 sm:$0xff]  }
 0x3f1   : > { %10121 = vmatprep.subr.bf16.mxu0 %v13906_v58  ;;  %v13990_v58 = vld [vmem:[%s14759_s22 + $0x2374] ss:$8 sps:$4 sm:$0xff]  }
 0x3f3   : > { %9262 = vmatpush1.bf16.msra.mxu1 %v13901_v61  ;;  %v13985_v61 = vld [vmem:[%s14759_s22 + $0xf70] ss:$8 sps:$4 sm:$0xff]  }
 0x3f4   : > { %10122 = vmatpush1.bf16.msra.mxu0 %v13904_v62  ;;  %9263 = vmatprep.subr.bf16.mxu1 %v13909_v63  ;;  %v13988_v62 = vld [vmem:[%s14759_s22 + $0x2370] ss:$8 sps:$4 sm:$0xff]   ;;  %v13993_v63 = vld [vmem:[%s14759_s22 + $0xf84] ss:$8 sps:$4 sm:$0xff]  }
 0x3f5   : > { %10123 = vmatprep.subr.bf16.mxu0 %v13912_v60  ;;  %v13996_v60 = vld [vmem:[%s14759_s22 + $0x2384] ss:$8 sps:$4 sm:$0xff]  }
 0x3f7   : > { %9264 = vmatpush1.bf16.msra.mxu1 %v13907_v24  ;;  %v13991_v24 = vld [vmem:[%s14759_s22 + $0xf80] ss:$8 sps:$4 sm:$0xff]  }
 0x3f8   : > { %10124 = vmatpush1.bf16.msra.mxu0 %v13910_v40  ;;  %9265 = vmatprep.subr.bf16.mxu1 %v13915_v3  ;;  %v13994_v40 = vld [vmem:[%s14759_s22 + $0x2380] ss:$8 sps:$4 sm:$0xff]   ;;  %v13999_v3 = vld [vmem:[%s14759_s22 + $0xf94] ss:$8 sps:$4 sm:$0xff]  }
 0x3f9   : > { %10125 = vmatprep.subr.bf16.mxu0 %v13918_v4  ;;  %v14002_v4 = vld [vmem:[%s14759_s22 + $0x2394] ss:$8 sps:$4 sm:$0xff]  }
 0x3fb   : > { %9266 = vmatpush1.bf16.msra.mxu1 %v13913_v0  ;;  %v13997_v0 = vld [vmem:[%s14759_s22 + $0xf90] ss:$8 sps:$4 sm:$0xff]  }
 0x3fc   : > { %10126 = vmatpush1.bf16.msra.mxu0 %v13916_v16  ;;  %9267 = vmatprep.subr.bf16.mxu1 %v13921_v32  ;;  %v14000_v16 = vld [vmem:[%s14759_s22 + $0x2390] ss:$8 sps:$4 sm:$0xff]   ;;  %v14005_v32 = vld [vmem:[%s14759_s22 + $0xfa4] ss:$8 sps:$4 sm:$0xff]  }
 0x3fd   : > { %10127 = vmatprep.subr.bf16.mxu0 %v13924_v42  ;;  %v14008_v42 = vld [vmem:[%s14759_s22 + $0x23a4] ss:$8 sps:$4 sm:$0xff]  }
 0x3ff   : > { %9268 = vmatpush1.bf16.msra.mxu1 %v13919_v6  ;;  %v14003_v6 = vld [vmem:[%s14759_s22 + $0xfa0] ss:$8 sps:$4 sm:$0xff]  }
 0x400   : > { %10128 = vmatpush1.bf16.msra.mxu0 %v13922_v7  ;;  %9269 = vmatprep.subr.bf16.mxu1 %v13927_v11  ;;  %v14006_v7 = vld [vmem:[%s14759_s22 + $0x23a0] ss:$8 sps:$4 sm:$0xff]   ;;  %v14011_v11 = vld [vmem:[%s14759_s22 + $0xfb4] ss:$8 sps:$4 sm:$0xff]  }
 0x401   : > { %10129 = vmatprep.subr.bf16.mxu0 %v13930_v12  ;;  %v14014_v12 = vld [vmem:[%s14759_s22 + $0x23b4] ss:$8 sps:$4 sm:$0xff]  }
 0x403   : > { %9270 = vmatpush1.bf16.msra.mxu1 %v13925_v8  ;;  %v14009_v8 = vld [vmem:[%s14759_s22 + $0xfb0] ss:$8 sps:$4 sm:$0xff]  }
 0x404   : > { %10130 = vmatpush1.bf16.msra.mxu0 %v13928_v45  ;;  %9271 = vmatprep.subr.bf16.mxu1 %v13933_v1  ;;  %v14012_v45 = vld [vmem:[%s14759_s22 + $0x23b0] ss:$8 sps:$4 sm:$0xff]   ;;  %v14017_v1 = vld [vmem:[%s14759_s22 + $0xfc4] ss:$8 sps:$4 sm:$0xff]  }
 0x405   : > { %10131 = vmatprep.subr.bf16.mxu0 %v13936_v2  ;;  %v14020_v2 = vld [vmem:[%s14759_s22 + $0x23c4] ss:$8 sps:$4 sm:$0xff]  }
 0x407   : > { %9272 = vmatpush1.bf16.msra.mxu1 %v13931_v14  ;;  %v14015_v14 = vld [vmem:[%s14759_s22 + $0xfc0] ss:$8 sps:$4 sm:$0xff]  }
 0x408   : > { %10132 = vmatpush1.bf16.msra.mxu0 %v13934_v15  ;;  %9273 = vmatprep.subr.bf16.mxu1 %v13939_v19  ;;  %v14018_v15 = vld [vmem:[%s14759_s22 + $0x23c0] ss:$8 sps:$4 sm:$0xff]   ;;  %v14023_v19 = vld [vmem:[%s14759_s22 + $0xfd4] ss:$8 sps:$4 sm:$0xff]  }
 0x409   : > { %10133 = vmatprep.subr.bf16.mxu0 %v13942_v20  ;;  %v14026_v20 = vld [vmem:[%s14759_s22 + $0x23d4] ss:$8 sps:$4 sm:$0xff]  }
 0x40b   : > { %9274 = vmatpush1.bf16.msra.mxu1 %v13937_v5  ;;  %v14021_v5 = vld [vmem:[%s14759_s22 + $0xfd0] ss:$8 sps:$4 sm:$0xff]  }
 0x40c   : > { %10134 = vmatpush1.bf16.msra.mxu0 %v13940_v55  ;;  %9286 = vmatprep.subr.bf16.mxu1 %v13945_v9  ;;  %v14024_v55 = vld [vmem:[%s14759_s22 + $0x23d0] ss:$8 sps:$4 sm:$0xff]   ;;  %v14029_v9 = vld [vmem:[%s14759_s22 + $0xfe4] ss:$8 sps:$4 sm:$0xff]  }
 0x40d   : > { %10146 = vmatprep.subr.bf16.mxu0 %v13948_v10  ;;  %v14032_v10 = vld [vmem:[%s14759_s22 + $0x23e4] ss:$8 sps:$4 sm:$0xff]  }
 0x40e   : > { %9276 = vmatmul.mubr.bf16.vlgmr.msra.gmra.mrb[0].mxu1 %v10912_v22  ;;  %v14027_v22 = vld [vmem:[%s14759_s22 + $0xfe0] ss:$8 sps:$4 sm:$0xff]  }
 0x40f   : > { %10136 = vmatmul.mubr.bf16.vlgmr.msra.gmra.mrb[0].mxu0 %v10952_v23  ;;  %9287 = vmatpush1.bf16.msra.mxu1 %v13943_v27  ;;  %v14030_v23 = vld [vmem:[%s14759_s22 + $0x23e0] ss:$8 sps:$4 sm:$0xff]   ;;  %v14035_v27 = vld [vmem:[%s14759_s22 + $0xff4] ss:$8 sps:$4 sm:$0xff]  }
 0x410   : > { %10147 = vmatpush1.bf16.msra.mxu0 %v13946_v28  ;;  %9288 = vmatprep.subr.bf16.mxu1 %v13951_v13  ;;  %v14038_v28 = vld [vmem:[%s14759_s22 + $0x23f4] ss:$8 sps:$4 sm:$0xff]   ;;  %v14033_v13 = vld [vmem:[%s14759_s22 + $0xff0] ss:$8 sps:$4 sm:$0xff]  }
 0x411   : > { %10148 = vmatprep.subr.bf16.mxu0 %v13954_v48  ;;  %9318 = vmatprep.mubr.bf16.mxu1 %v10915_v17  ;;  %v14036_v48 = vld [vmem:[%s14759_s22 + $0x23f0] ss:$8 sps:$4 sm:$0xff]   ;;  %v14041_v17 = vld [vmem:[%s14759_s22 + $0x1004] ss:$8 sps:$4 sm:$0xff]  }
 0x412   : > { %10178 = vmatprep.mubr.bf16.mxu0 %v10955_v18  ;;  %v14044_v18 = vld [vmem:[%s14759_s22 + $0x2404] ss:$8 sps:$4 sm:$0xff]  }
 0x413   : > { %9289 = vmatpush1.bf16.msra.mxu1 %v13949_v29  ;;  %v16091_v29 = vld [vmem:[%s14761_s23 + $0x80] sm:$0xff] }
 0x414   : > { %10149 = vmatpush1.bf16.msra.mxu0 %v13952_v30  ;;  %9290 = vmatprep.subr.bf16.mxu1 %v13957_v31  ;;  %v10914_v30 = vcombine.low %v16007_v21, %v16014_v56  ;;  %v10954_v31 = vcombine.low %v16017_v25, %v16020_v26  ;;  %v14047_v21 = vld [vmem:[%s14759_s22 + $0x1014] ss:$8 sps:$4 sm:$0xff]  }
 0x415   : > { %10150 = vmatprep.subr.bf16.mxu0 %v13960_v51  ;;  %v16098_v51 = vld [vmem:[%s14761_s23 + $0x1c0] sm:$0xff]  ;;  %v14050_v56 = vld [vmem:[%s14759_s22 + $0x2414] ss:$8 sps:$4 sm:$0xff]  }
 0x416   : > { %v10917_v25 = vcombine.high %v16091_v29, %v16098_v51 }
 0x417   : > { %9291 = vmatpush1.bf16.msra.mxu1 %v13955_v33  ;;  %v16101_v33 = vld [vmem:[%s14761_s23 + $0x120] sm:$0xff] }
 0x418   : > { %10151 = vmatpush1.bf16.msra.mxu0 %v13958_v34  ;;  %9292 = vmatprep.subr.bf16.mxu1 %v13963_v35  ;;  %v16104_v34 = vld [vmem:[%s14761_s23 + $0x260] sm:$0xff] }
 0x419   : > { %10152 = vmatprep.subr.bf16.mxu0 %v13966_v36  ;;  %v14039_v35 = vld [vmem:[%s14759_s22 + $0x1000] ss:$8 sps:$4 sm:$0xff]   ;;  %v10957_v26 = vcombine.high %v16101_v33, %v16104_v34 }
 0x41a   : > { %v14042_v36 = vld [vmem:[%s14759_s22 + $0x2400] ss:$8 sps:$4 sm:$0xff]  }
 0x41b   : > { %9293 = vmatpush1.bf16.msra.mxu1 %v13961_v37  ;;  %v14045_v37 = vld [vmem:[%s14759_s22 + $0x1010] ss:$8 sps:$4 sm:$0xff]  }
 0x41c   : > { %10153 = vmatpush1.bf16.msra.mxu0 %v13964_v38  ;;  %9294 = vmatprep.subr.bf16.mxu1 %v13969_v39  ;;  %v14048_v38 = vld [vmem:[%s14759_s22 + $0x2410] ss:$8 sps:$4 sm:$0xff]   ;;  %v14053_v39 = vld [vmem:[%s14759_s22 + $0x1024] ss:$8 sps:$4 sm:$0xff]  }
 0x41d   : > { %10154 = vmatprep.subr.bf16.mxu0 %v13972_v59  ;;  %v14056_v59 = vld [vmem:[%s14759_s22 + $0x2424] ss:$8 sps:$4 sm:$0xff]  }
 0x41f   : > { %9295 = vmatpush1.bf16.msra.mxu1 %v13967_v43  ;;  %v14051_v43 = vld [vmem:[%s14759_s22 + $0x1020] ss:$8 sps:$4 sm:$0xff]  }
 0x420   : > { %10155 = vmatpush1.bf16.msra.mxu0 %v13970_v44  ;;  %9296 = vmatprep.subr.bf16.mxu1 %v13975_v49  ;;  %v14054_v44 = vld [vmem:[%s14759_s22 + $0x2420] ss:$8 sps:$4 sm:$0xff]   ;;  %v14059_v49 = vld [vmem:[%s14759_s22 + $0x1034] ss:$8 sps:$4 sm:$0xff]  }
 0x421   : > { %10156 = vmatprep.subr.bf16.mxu0 %v13978_v50  ;;  %v14062_v50 = vld [vmem:[%s14759_s22 + $0x2434] ss:$8 sps:$4 sm:$0xff]  }
 0x423   : > { %9297 = vmatpush1.bf16.msra.mxu1 %v13973_v53  ;;  %v14057_v53 = vld [vmem:[%s14759_s22 + $0x1030] ss:$8 sps:$4 sm:$0xff]  }
 0x424   : > { %10157 = vmatpush1.bf16.msra.mxu0 %v13976_v54  ;;  %9298 = vmatprep.subr.bf16.mxu1 %v13981_v41  ;;  %v14060_v54 = vld [vmem:[%s14759_s22 + $0x2430] ss:$8 sps:$4 sm:$0xff]   ;;  %v14065_v41 = vld [vmem:[%s14759_s22 + $0x1044] ss:$8 sps:$4 sm:$0xff]  }
 0x425   : > { %10158 = vmatprep.subr.bf16.mxu0 %v13984_v52  ;;  %v14068_v52 = vld [vmem:[%s14759_s22 + $0x2444] ss:$8 sps:$4 sm:$0xff]  }
 0x427   : > { %9299 = vmatpush1.bf16.msra.mxu1 %v13979_v46  ;;  %v14063_v46 = vld [vmem:[%s14759_s22 + $0x1040] ss:$8 sps:$4 sm:$0xff]  }
 0x428   : > { %10159 = vmatpush1.bf16.msra.mxu0 %v13982_v47  ;;  %9300 = vmatprep.subr.bf16.mxu1 %v13987_v57  ;;  %v14066_v47 = vld [vmem:[%s14759_s22 + $0x2440] ss:$8 sps:$4 sm:$0xff]   ;;  %v14071_v57 = vld [vmem:[%s14759_s22 + $0x1054] ss:$8 sps:$4 sm:$0xff]  }
 0x429   : > { %10160 = vmatprep.subr.bf16.mxu0 %v13990_v58  ;;  %v14074_v58 = vld [vmem:[%s14759_s22 + $0x2454] ss:$8 sps:$4 sm:$0xff]  }
 0x42b   : > { %9301 = vmatpush1.bf16.msra.mxu1 %v13985_v61  ;;  %v14069_v61 = vld [vmem:[%s14759_s22 + $0x1050] ss:$8 sps:$4 sm:$0xff]  }
 0x42c   : > { %10161 = vmatpush1.bf16.msra.mxu0 %v13988_v62  ;;  %9302 = vmatprep.subr.bf16.mxu1 %v13993_v63  ;;  %v14072_v62 = vld [vmem:[%s14759_s22 + $0x2450] ss:$8 sps:$4 sm:$0xff]   ;;  %v14077_v63 = vld [vmem:[%s14759_s22 + $0x1064] ss:$8 sps:$4 sm:$0xff]  }
 0x42d   : > { %10162 = vmatprep.subr.bf16.mxu0 %v13996_v60  ;;  %v14080_v60 = vld [vmem:[%s14759_s22 + $0x2464] ss:$8 sps:$4 sm:$0xff]  }
 0x42f   : > { %9303 = vmatpush1.bf16.msra.mxu1 %v13991_v24  ;;  %v14075_v24 = vld [vmem:[%s14759_s22 + $0x1060] ss:$8 sps:$4 sm:$0xff]  }
 0x430   : > { %10163 = vmatpush1.bf16.msra.mxu0 %v13994_v40  ;;  %9304 = vmatprep.subr.bf16.mxu1 %v13999_v3  ;;  %v14078_v40 = vld [vmem:[%s14759_s22 + $0x2460] ss:$8 sps:$4 sm:$0xff]   ;;  %v14083_v3 = vld [vmem:[%s14759_s22 + $0x1074] ss:$8 sps:$4 sm:$0xff]  }
 0x431   : > { %10164 = vmatprep.subr.bf16.mxu0 %v14002_v4  ;;  %v14086_v4 = vld [vmem:[%s14759_s22 + $0x2474] ss:$8 sps:$4 sm:$0xff]  }
 0x433   : > { %9305 = vmatpush1.bf16.msra.mxu1 %v13997_v0  ;;  %v14081_v0 = vld [vmem:[%s14759_s22 + $0x1070] ss:$8 sps:$4 sm:$0xff]  }
 0x434   : > { %10165 = vmatpush1.bf16.msra.mxu0 %v14000_v16  ;;  %9306 = vmatprep.subr.bf16.mxu1 %v14005_v32  ;;  %v14084_v16 = vld [vmem:[%s14759_s22 + $0x2470] ss:$8 sps:$4 sm:$0xff]   ;;  %v14089_v32 = vld [vmem:[%s14759_s22 + $0x1084] ss:$8 sps:$4 sm:$0xff]  }
 0x435   : > { %10166 = vmatprep.subr.bf16.mxu0 %v14008_v42  ;;  %v14092_v42 = vld [vmem:[%s14759_s22 + $0x2484] ss:$8 sps:$4 sm:$0xff]  }
 0x437   : > { %9307 = vmatpush1.bf16.msra.mxu1 %v14003_v6  ;;  %v14087_v6 = vld [vmem:[%s14759_s22 + $0x1080] ss:$8 sps:$4 sm:$0xff]  }
 0x438   : > { %10167 = vmatpush1.bf16.msra.mxu0 %v14006_v7  ;;  %9308 = vmatprep.subr.bf16.mxu1 %v14011_v11  ;;  %v14090_v7 = vld [vmem:[%s14759_s22 + $0x2480] ss:$8 sps:$4 sm:$0xff]   ;;  %v14095_v11 = vld [vmem:[%s14759_s22 + $0x1094] ss:$8 sps:$4 sm:$0xff]  }
 0x439   : > { %10168 = vmatprep.subr.bf16.mxu0 %v14014_v12  ;;  %v14098_v12 = vld [vmem:[%s14759_s22 + $0x2494] ss:$8 sps:$4 sm:$0xff]  }
 0x43b   : > { %9309 = vmatpush1.bf16.msra.mxu1 %v14009_v8  ;;  %v14093_v8 = vld [vmem:[%s14759_s22 + $0x1090] ss:$8 sps:$4 sm:$0xff]  }
 0x43c   : > { %10169 = vmatpush1.bf16.msra.mxu0 %v14012_v45  ;;  %9310 = vmatprep.subr.bf16.mxu1 %v14017_v1  ;;  %v14096_v45 = vld [vmem:[%s14759_s22 + $0x2490] ss:$8 sps:$4 sm:$0xff]   ;;  %v14101_v1 = vld [vmem:[%s14759_s22 + $0x10a4] ss:$8 sps:$4 sm:$0xff]  }
 0x43d   : > { %10170 = vmatprep.subr.bf16.mxu0 %v14020_v2  ;;  %v14104_v2 = vld [vmem:[%s14759_s22 + $0x24a4] ss:$8 sps:$4 sm:$0xff]  }
 0x43f   : > { %9311 = vmatpush1.bf16.msra.mxu1 %v14015_v14  ;;  %v14099_v14 = vld [vmem:[%s14759_s22 + $0x10a0] ss:$8 sps:$4 sm:$0xff]  }
 0x440   : > { %10171 = vmatpush1.bf16.msra.mxu0 %v14018_v15  ;;  %9312 = vmatprep.subr.bf16.mxu1 %v14023_v19  ;;  %v14102_v15 = vld [vmem:[%s14759_s22 + $0x24a0] ss:$8 sps:$4 sm:$0xff]   ;;  %v14107_v19 = vld [vmem:[%s14759_s22 + $0x10b4] ss:$8 sps:$4 sm:$0xff]  }
 0x441   : > { %10172 = vmatprep.subr.bf16.mxu0 %v14026_v20  ;;  %v14110_v20 = vld [vmem:[%s14759_s22 + $0x24b4] ss:$8 sps:$4 sm:$0xff]  }
 0x443   : > { %9313 = vmatpush1.bf16.msra.mxu1 %v14021_v5  ;;  %v14105_v5 = vld [vmem:[%s14759_s22 + $0x10b0] ss:$8 sps:$4 sm:$0xff]  }
 0x444   : > { %10173 = vmatpush1.bf16.msra.mxu0 %v14024_v55  ;;  %9314 = vmatprep.subr.bf16.mxu1 %v14029_v9  ;;  %v14108_v55 = vld [vmem:[%s14759_s22 + $0x24b0] ss:$8 sps:$4 sm:$0xff]   ;;  %v14113_v9 = vld [vmem:[%s14759_s22 + $0x10c4] ss:$8 sps:$4 sm:$0xff]  }
 0x445   : > { %10174 = vmatprep.subr.bf16.mxu0 %v14032_v10  ;;  %v14116_v10 = vld [vmem:[%s14759_s22 + $0x24c4] ss:$8 sps:$4 sm:$0xff]  }
 0x447   : > { %9315 = vmatpush1.bf16.msra.mxu1 %v14027_v22  ;;  %v14111_v22 = vld [vmem:[%s14759_s22 + $0x10c0] ss:$8 sps:$4 sm:$0xff]  }
 0x448   : > { %10175 = vmatpush1.bf16.msra.mxu0 %v14030_v23  ;;  %9316 = vmatprep.subr.bf16.mxu1 %v14035_v27  ;;  %v14114_v23 = vld [vmem:[%s14759_s22 + $0x24c0] ss:$8 sps:$4 sm:$0xff]   ;;  %v14119_v27 = vld [vmem:[%s14759_s22 + $0x10d4] ss:$8 sps:$4 sm:$0xff]  }
 0x449   : > { %10176 = vmatprep.subr.bf16.mxu0 %v14038_v28  ;;  %v14122_v28 = vld [vmem:[%s14759_s22 + $0x24d4] ss:$8 sps:$4 sm:$0xff]  }
 0x44b   : > { %9317 = vmatpush1.bf16.msra.mxu1 %v14033_v13  ;;  %v14117_v13 = vld [vmem:[%s14759_s22 + $0x10d0] ss:$8 sps:$4 sm:$0xff]  }
 0x44c   : > { %10177 = vmatpush1.bf16.msra.mxu0 %v14036_v48  ;;  %9329 = vmatprep.subr.bf16.mxu1 %v14041_v17  ;;  %v14120_v48 = vld [vmem:[%s14759_s22 + $0x24d0] ss:$8 sps:$4 sm:$0xff]   ;;  %v14125_v17 = vld [vmem:[%s14759_s22 + $0x10e4] ss:$8 sps:$4 sm:$0xff]  }
 0x44d   : > { %10189 = vmatprep.subr.bf16.mxu0 %v14044_v18  ;;  %v14128_v18 = vld [vmem:[%s14759_s22 + $0x24e4] ss:$8 sps:$4 sm:$0xff]  }
 0x44e   : > { %9319 = vmatmul.mubr.bf16.vlgmr.msra.gmra.mrb[0].mxu1 %v10914_v30  ;;  %v14123_v30 = vld [vmem:[%s14759_s22 + $0x10e0] ss:$8 sps:$4 sm:$0xff]  }
 0x44f   : > { %10179 = vmatmul.mubr.bf16.vlgmr.msra.gmra.mrb[0].mxu0 %v10954_v31  ;;  %9330 = vmatpush1.bf16.msra.mxu1 %v14039_v35  ;;  %v14126_v31 = vld [vmem:[%s14759_s22 + $0x24e0] ss:$8 sps:$4 sm:$0xff]   ;;  %v14131_v35 = vld [vmem:[%s14759_s22 + $0x10f4] ss:$8 sps:$4 sm:$0xff]  }
 0x450   : > { %10190 = vmatpush1.bf16.msra.mxu0 %v14042_v36  ;;  %9331 = vmatprep.subr.bf16.mxu1 %v14047_v21  ;;  %v14134_v36 = vld [vmem:[%s14759_s22 + $0x24f4] ss:$8 sps:$4 sm:$0xff]   ;;  %v14129_v21 = vld [vmem:[%s14759_s22 + $0x10f0] ss:$8 sps:$4 sm:$0xff]  }
 0x451   : > { %10191 = vmatprep.subr.bf16.mxu0 %v14050_v56  ;;  %9361 = vmatprep.mubr.bf16.mxu1 %v10917_v25  ;;  %v14132_v56 = vld [vmem:[%s14759_s22 + $0x24f0] ss:$8 sps:$4 sm:$0xff]   ;;  %v14137_v25 = vld [vmem:[%s14759_s22 + $0x1104] ss:$8 sps:$4 sm:$0xff]  }
 0x452   : > { %10221 = vmatprep.mubr.bf16.mxu0 %v10957_v26  ;;  %v14140_v26 = vld [vmem:[%s14759_s22 + $0x2504] ss:$8 sps:$4 sm:$0xff]  }
 0x453   : > { %9332 = vmatpush1.bf16.msra.mxu1 %v14045_v37  ;;  %v16175_v37 = vld [vmem:[%s14761_s23 + $0x88] sm:$0xff] }
 0x454   : > { %10192 = vmatpush1.bf16.msra.mxu0 %v14048_v38  ;;  %9333 = vmatprep.subr.bf16.mxu1 %v14053_v39  ;;  %v10916_v38 = vcombine.low %v16091_v29, %v16098_v51  ;;  %v10956_v39 = vcombine.low %v16101_v33, %v16104_v34  ;;  %v14143_v29 = vld [vmem:[%s14759_s22 + $0x1114] ss:$8 sps:$4 sm:$0xff]  }
 0x455   : > { %10193 = vmatprep.subr.bf16.mxu0 %v14056_v59  ;;  %v16182_v59 = vld [vmem:[%s14761_s23 + $0x1c8] sm:$0xff]  ;;  %v14146_v51 = vld [vmem:[%s14759_s22 + $0x2514] ss:$8 sps:$4 sm:$0xff]  }
 0x456   : > { %v10919_v33 = vcombine.high %v16175_v37, %v16182_v59 }
 0x457   : > { %9334 = vmatpush1.bf16.msra.mxu1 %v14051_v43  ;;  %v16185_v43 = vld [vmem:[%s14761_s23 + $0x128] sm:$0xff] }
 0x458   : > { %10194 = vmatpush1.bf16.msra.mxu0 %v14054_v44  ;;  %9335 = vmatprep.subr.bf16.mxu1 %v14059_v49  ;;  %v16188_v44 = vld [vmem:[%s14761_s23 + $0x268] sm:$0xff] }
 0x459   : > { %10195 = vmatprep.subr.bf16.mxu0 %v14062_v50  ;;  %v14135_v49 = vld [vmem:[%s14759_s22 + $0x1100] ss:$8 sps:$4 sm:$0xff]   ;;  %v10959_v34 = vcombine.high %v16185_v43, %v16188_v44 }
 0x45a   : > { %v14138_v50 = vld [vmem:[%s14759_s22 + $0x2500] ss:$8 sps:$4 sm:$0xff]  }
 0x45b   : > { %9336 = vmatpush1.bf16.msra.mxu1 %v14057_v53  ;;  %v14141_v53 = vld [vmem:[%s14759_s22 + $0x1110] ss:$8 sps:$4 sm:$0xff]  }
 0x45c   : > { %10196 = vmatpush1.bf16.msra.mxu0 %v14060_v54  ;;  %9337 = vmatprep.subr.bf16.mxu1 %v14065_v41  ;;  %v14144_v54 = vld [vmem:[%s14759_s22 + $0x2510] ss:$8 sps:$4 sm:$0xff]   ;;  %v14149_v41 = vld [vmem:[%s14759_s22 + $0x1124] ss:$8 sps:$4 sm:$0xff]  }
 0x45d   : > { %10197 = vmatprep.subr.bf16.mxu0 %v14068_v52  ;;  %v14152_v52 = vld [vmem:[%s14759_s22 + $0x2524] ss:$8 sps:$4 sm:$0xff]  }
 0x45f   : > { %9338 = vmatpush1.bf16.msra.mxu1 %v14063_v46  ;;  %v14147_v46 = vld [vmem:[%s14759_s22 + $0x1120] ss:$8 sps:$4 sm:$0xff]  }
 0x460   : > { %10198 = vmatpush1.bf16.msra.mxu0 %v14066_v47  ;;  %9339 = vmatprep.subr.bf16.mxu1 %v14071_v57  ;;  %v14150_v47 = vld [vmem:[%s14759_s22 + $0x2520] ss:$8 sps:$4 sm:$0xff]   ;;  %v14155_v57 = vld [vmem:[%s14759_s22 + $0x1134] ss:$8 sps:$4 sm:$0xff]  }
 0x461   : > { %10199 = vmatprep.subr.bf16.mxu0 %v14074_v58  ;;  %v14158_v58 = vld [vmem:[%s14759_s22 + $0x2534] ss:$8 sps:$4 sm:$0xff]  }
 0x463   : > { %9340 = vmatpush1.bf16.msra.mxu1 %v14069_v61  ;;  %v14153_v61 = vld [vmem:[%s14759_s22 + $0x1130] ss:$8 sps:$4 sm:$0xff]  }
 0x464   : > { %10200 = vmatpush1.bf16.msra.mxu0 %v14072_v62  ;;  %9341 = vmatprep.subr.bf16.mxu1 %v14077_v63  ;;  %v14156_v62 = vld [vmem:[%s14759_s22 + $0x2530] ss:$8 sps:$4 sm:$0xff]   ;;  %v14161_v63 = vld [vmem:[%s14759_s22 + $0x1144] ss:$8 sps:$4 sm:$0xff]  }
 0x465   : > { %10201 = vmatprep.subr.bf16.mxu0 %v14080_v60  ;;  %v14164_v60 = vld [vmem:[%s14759_s22 + $0x2544] ss:$8 sps:$4 sm:$0xff]  }
 0x467   : > { %9342 = vmatpush1.bf16.msra.mxu1 %v14075_v24  ;;  %v14159_v24 = vld [vmem:[%s14759_s22 + $0x1140] ss:$8 sps:$4 sm:$0xff]  }
 0x468   : > { %10202 = vmatpush1.bf16.msra.mxu0 %v14078_v40  ;;  %9343 = vmatprep.subr.bf16.mxu1 %v14083_v3  ;;  %v14162_v40 = vld [vmem:[%s14759_s22 + $0x2540] ss:$8 sps:$4 sm:$0xff]   ;;  %v14167_v3 = vld [vmem:[%s14759_s22 + $0x1154] ss:$8 sps:$4 sm:$0xff]  }
 0x469   : > { %10203 = vmatprep.subr.bf16.mxu0 %v14086_v4  ;;  %v14170_v4 = vld [vmem:[%s14759_s22 + $0x2554] ss:$8 sps:$4 sm:$0xff]  }
 0x46b   : > { %9344 = vmatpush1.bf16.msra.mxu1 %v14081_v0  ;;  %v14165_v0 = vld [vmem:[%s14759_s22 + $0x1150] ss:$8 sps:$4 sm:$0xff]  }
 0x46c   : > { %10204 = vmatpush1.bf16.msra.mxu0 %v14084_v16  ;;  %9345 = vmatprep.subr.bf16.mxu1 %v14089_v32  ;;  %v14168_v16 = vld [vmem:[%s14759_s22 + $0x2550] ss:$8 sps:$4 sm:$0xff]   ;;  %v14173_v32 = vld [vmem:[%s14759_s22 + $0x1164] ss:$8 sps:$4 sm:$0xff]  }
 0x46d   : > { %10205 = vmatprep.subr.bf16.mxu0 %v14092_v42  ;;  %v14176_v42 = vld [vmem:[%s14759_s22 + $0x2564] ss:$8 sps:$4 sm:$0xff]  }
 0x46f   : > { %9346 = vmatpush1.bf16.msra.mxu1 %v14087_v6  ;;  %v14171_v6 = vld [vmem:[%s14759_s22 + $0x1160] ss:$8 sps:$4 sm:$0xff]  }
 0x470   : > { %10206 = vmatpush1.bf16.msra.mxu0 %v14090_v7  ;;  %9347 = vmatprep.subr.bf16.mxu1 %v14095_v11  ;;  %v14174_v7 = vld [vmem:[%s14759_s22 + $0x2560] ss:$8 sps:$4 sm:$0xff]   ;;  %v14179_v11 = vld [vmem:[%s14759_s22 + $0x1174] ss:$8 sps:$4 sm:$0xff]  }
 0x471   : > { %10207 = vmatprep.subr.bf16.mxu0 %v14098_v12  ;;  %v14182_v12 = vld [vmem:[%s14759_s22 + $0x2574] ss:$8 sps:$4 sm:$0xff]  }
 0x473   : > { %9348 = vmatpush1.bf16.msra.mxu1 %v14093_v8  ;;  %v14177_v8 = vld [vmem:[%s14759_s22 + $0x1170] ss:$8 sps:$4 sm:$0xff]  }
 0x474   : > { %10208 = vmatpush1.bf16.msra.mxu0 %v14096_v45  ;;  %9349 = vmatprep.subr.bf16.mxu1 %v14101_v1  ;;  %v14180_v45 = vld [vmem:[%s14759_s22 + $0x2570] ss:$8 sps:$4 sm:$0xff]   ;;  %v14185_v1 = vld [vmem:[%s14759_s22 + $0x1184] ss:$8 sps:$4 sm:$0xff]  }
 0x475   : > { %10209 = vmatprep.subr.bf16.mxu0 %v14104_v2  ;;  %v14188_v2 = vld [vmem:[%s14759_s22 + $0x2584] ss:$8 sps:$4 sm:$0xff]  }
 0x477   : > { %9350 = vmatpush1.bf16.msra.mxu1 %v14099_v14  ;;  %v14183_v14 = vld [vmem:[%s14759_s22 + $0x1180] ss:$8 sps:$4 sm:$0xff]  }
 0x478   : > { %10210 = vmatpush1.bf16.msra.mxu0 %v14102_v15  ;;  %9351 = vmatprep.subr.bf16.mxu1 %v14107_v19  ;;  %v14186_v15 = vld [vmem:[%s14759_s22 + $0x2580] ss:$8 sps:$4 sm:$0xff]   ;;  %v14191_v19 = vld [vmem:[%s14759_s22 + $0x1194] ss:$8 sps:$4 sm:$0xff]  }
 0x479   : > { %10211 = vmatprep.subr.bf16.mxu0 %v14110_v20  ;;  %v14194_v20 = vld [vmem:[%s14759_s22 + $0x2594] ss:$8 sps:$4 sm:$0xff]  }
 0x47b   : > { %9352 = vmatpush1.bf16.msra.mxu1 %v14105_v5  ;;  %v14189_v5 = vld [vmem:[%s14759_s22 + $0x1190] ss:$8 sps:$4 sm:$0xff]  }
 0x47c   : > { %10212 = vmatpush1.bf16.msra.mxu0 %v14108_v55  ;;  %9353 = vmatprep.subr.bf16.mxu1 %v14113_v9  ;;  %v14192_v55 = vld [vmem:[%s14759_s22 + $0x2590] ss:$8 sps:$4 sm:$0xff]   ;;  %v14197_v9 = vld [vmem:[%s14759_s22 + $0x11a4] ss:$8 sps:$4 sm:$0xff]  }
 0x47d   : > { %10213 = vmatprep.subr.bf16.mxu0 %v14116_v10  ;;  %v14200_v10 = vld [vmem:[%s14759_s22 + $0x25a4] ss:$8 sps:$4 sm:$0xff]  }
 0x47f   : > { %9354 = vmatpush1.bf16.msra.mxu1 %v14111_v22  ;;  %v14195_v22 = vld [vmem:[%s14759_s22 + $0x11a0] ss:$8 sps:$4 sm:$0xff]  }
 0x480   : > { %10214 = vmatpush1.bf16.msra.mxu0 %v14114_v23  ;;  %9355 = vmatprep.subr.bf16.mxu1 %v14119_v27  ;;  %v14198_v23 = vld [vmem:[%s14759_s22 + $0x25a0] ss:$8 sps:$4 sm:$0xff]   ;;  %v14203_v27 = vld [vmem:[%s14759_s22 + $0x11b4] ss:$8 sps:$4 sm:$0xff]  }
 0x481   : > { %10215 = vmatprep.subr.bf16.mxu0 %v14122_v28  ;;  %v14206_v28 = vld [vmem:[%s14759_s22 + $0x25b4] ss:$8 sps:$4 sm:$0xff]  }
 0x483   : > { %9356 = vmatpush1.bf16.msra.mxu1 %v14117_v13  ;;  %v14201_v13 = vld [vmem:[%s14759_s22 + $0x11b0] ss:$8 sps:$4 sm:$0xff]  }
 0x484   : > { %10216 = vmatpush1.bf16.msra.mxu0 %v14120_v48  ;;  %9357 = vmatprep.subr.bf16.mxu1 %v14125_v17  ;;  %v14204_v48 = vld [vmem:[%s14759_s22 + $0x25b0] ss:$8 sps:$4 sm:$0xff]   ;;  %v14209_v17 = vld [vmem:[%s14759_s22 + $0x11c4] ss:$8 sps:$4 sm:$0xff]  }
 0x485   : > { %10217 = vmatprep.subr.bf16.mxu0 %v14128_v18  ;;  %v14212_v18 = vld [vmem:[%s14759_s22 + $0x25c4] ss:$8 sps:$4 sm:$0xff]  }
 0x487   : > { %9358 = vmatpush1.bf16.msra.mxu1 %v14123_v30  ;;  %v14207_v30 = vld [vmem:[%s14759_s22 + $0x11c0] ss:$8 sps:$4 sm:$0xff]  }
 0x488   : > { %10218 = vmatpush1.bf16.msra.mxu0 %v14126_v31  ;;  %9359 = vmatprep.subr.bf16.mxu1 %v14131_v35  ;;  %v14210_v31 = vld [vmem:[%s14759_s22 + $0x25c0] ss:$8 sps:$4 sm:$0xff]   ;;  %v14215_v35 = vld [vmem:[%s14759_s22 + $0x11d4] ss:$8 sps:$4 sm:$0xff]  }
 0x489   : > { %10219 = vmatprep.subr.bf16.mxu0 %v14134_v36  ;;  %v14218_v36 = vld [vmem:[%s14759_s22 + $0x25d4] ss:$8 sps:$4 sm:$0xff]  }
 0x48b   : > { %9360 = vmatpush1.bf16.msra.mxu1 %v14129_v21  ;;  %v14213_v21 = vld [vmem:[%s14759_s22 + $0x11d0] ss:$8 sps:$4 sm:$0xff]  }
 0x48c   : > { %10220 = vmatpush1.bf16.msra.mxu0 %v14132_v56  ;;  %9372 = vmatprep.subr.bf16.mxu1 %v14137_v25  ;;  %v14216_v56 = vld [vmem:[%s14759_s22 + $0x25d0] ss:$8 sps:$4 sm:$0xff]   ;;  %v14221_v25 = vld [vmem:[%s14759_s22 + $0x11e4] ss:$8 sps:$4 sm:$0xff]  }
 0x48d   : > { %10232 = vmatprep.subr.bf16.mxu0 %v14140_v26  ;;  %v14224_v26 = vld [vmem:[%s14759_s22 + $0x25e4] ss:$8 sps:$4 sm:$0xff]  }
 0x48e   : > { %9362 = vmatmul.mubr.bf16.vlgmr.msra.gmra.mrb[0].mxu1 %v10916_v38  ;;  %v14219_v38 = vld [vmem:[%s14759_s22 + $0x11e0] ss:$8 sps:$4 sm:$0xff]  }
 0x48f   : > { %10222 = vmatmul.mubr.bf16.vlgmr.msra.gmra.mrb[0].mxu0 %v10956_v39  ;;  %9373 = vmatpush1.bf16.msra.mxu1 %v14135_v49  ;;  %v14222_v39 = vld [vmem:[%s14759_s22 + $0x25e0] ss:$8 sps:$4 sm:$0xff]   ;;  %v14227_v49 = vld [vmem:[%s14759_s22 + $0x11f4] ss:$8 sps:$4 sm:$0xff]  }
 0x490   : > { %10233 = vmatpush1.bf16.msra.mxu0 %v14138_v50  ;;  %9374 = vmatprep.subr.bf16.mxu1 %v14143_v29  ;;  %v14230_v50 = vld [vmem:[%s14759_s22 + $0x25f4] ss:$8 sps:$4 sm:$0xff]   ;;  %v14225_v29 = vld [vmem:[%s14759_s22 + $0x11f0] ss:$8 sps:$4 sm:$0xff]  }
 0x491   : > { %10234 = vmatprep.subr.bf16.mxu0 %v14146_v51  ;;  %9404 = vmatprep.mubr.bf16.mxu1 %v10919_v33  ;;  %v14228_v51 = vld [vmem:[%s14759_s22 + $0x25f0] ss:$8 sps:$4 sm:$0xff]   ;;  %v14233_v33 = vld [vmem:[%s14759_s22 + $0x1204] ss:$8 sps:$4 sm:$0xff]  }
 0x492   : > { %10264 = vmatprep.mubr.bf16.mxu0 %v10959_v34  ;;  %v14236_v34 = vld [vmem:[%s14759_s22 + $0x2604] ss:$8 sps:$4 sm:$0xff]  }
 0x493   : > { %9375 = vmatpush1.bf16.msra.mxu1 %v14141_v53  ;;  %v16259_v53 = vld [vmem:[%s14761_s23 + $0x90] sm:$0xff] }
 0x494   : > { %10235 = vmatpush1.bf16.msra.mxu0 %v14144_v54  ;;  %9376 = vmatprep.subr.bf16.mxu1 %v14149_v41  ;;  %v10918_v54 = vcombine.low %v16175_v37, %v16182_v59  ;;  %v10958_v41 = vcombine.low %v16185_v43, %v16188_v44  ;;  %v14239_v37 = vld [vmem:[%s14759_s22 + $0x1214] ss:$8 sps:$4 sm:$0xff]  }
 0x495   : > { %10236 = vmatprep.subr.bf16.mxu0 %v14152_v52  ;;  %v16266_v52 = vld [vmem:[%s14761_s23 + $0x1d0] sm:$0xff] }
 0x496   : > { %v14242_v59 = vld [vmem:[%s14759_s22 + $0x2614] ss:$8 sps:$4 sm:$0xff]   ;;  %v10921_v43 = vcombine.high %v16259_v53, %v16266_v52 }
 0x497   : > { %9377 = vmatpush1.bf16.msra.mxu1 %v14147_v46  ;;  %v16269_v46 = vld [vmem:[%s14761_s23 + $0x130] sm:$0xff] }
 0x498   : > { %10237 = vmatpush1.bf16.msra.mxu0 %v14150_v47  ;;  %9378 = vmatprep.subr.bf16.mxu1 %v14155_v57  ;;  %v16272_v47 = vld [vmem:[%s14761_s23 + $0x270] sm:$0xff]  ;;  %v14231_v57 = vld [vmem:[%s14759_s22 + $0x1200] ss:$8 sps:$4 sm:$0xff]  }
 0x499   : > { %10238 = vmatprep.subr.bf16.mxu0 %v14158_v58  ;;  %v14234_v58 = vld [vmem:[%s14759_s22 + $0x2600] ss:$8 sps:$4 sm:$0xff]   ;;  %v10961_v44 = vcombine.high %v16269_v46, %v16272_v47 }
 0x49b   : > { %9379 = vmatpush1.bf16.msra.mxu1 %v14153_v61  ;;  %v14237_v61 = vld [vmem:[%s14759_s22 + $0x1210] ss:$8 sps:$4 sm:$0xff]  }
 0x49c   : > { %10239 = vmatpush1.bf16.msra.mxu0 %v14156_v62  ;;  %9380 = vmatprep.subr.bf16.mxu1 %v14161_v63  ;;  %v14240_v62 = vld [vmem:[%s14759_s22 + $0x2610] ss:$8 sps:$4 sm:$0xff]   ;;  %v14245_v63 = vld [vmem:[%s14759_s22 + $0x1224] ss:$8 sps:$4 sm:$0xff]  }
 0x49d   : > { %10240 = vmatprep.subr.bf16.mxu0 %v14164_v60  ;;  %v14248_v60 = vld [vmem:[%s14759_s22 + $0x2624] ss:$8 sps:$4 sm:$0xff]  }
 0x49f   : > { %9381 = vmatpush1.bf16.msra.mxu1 %v14159_v24  ;;  %v14243_v24 = vld [vmem:[%s14759_s22 + $0x1220] ss:$8 sps:$4 sm:$0xff]  }
 0x4a0   : > { %10241 = vmatpush1.bf16.msra.mxu0 %v14162_v40  ;;  %9382 = vmatprep.subr.bf16.mxu1 %v14167_v3  ;;  %v14246_v40 = vld [vmem:[%s14759_s22 + $0x2620] ss:$8 sps:$4 sm:$0xff]   ;;  %v14251_v3 = vld [vmem:[%s14759_s22 + $0x1234] ss:$8 sps:$4 sm:$0xff]  }
 0x4a1   : > { %10242 = vmatprep.subr.bf16.mxu0 %v14170_v4  ;;  %v14254_v4 = vld [vmem:[%s14759_s22 + $0x2634] ss:$8 sps:$4 sm:$0xff]  }
 0x4a3   : > { %9383 = vmatpush1.bf16.msra.mxu1 %v14165_v0  ;;  %v14249_v0 = vld [vmem:[%s14759_s22 + $0x1230] ss:$8 sps:$4 sm:$0xff]  }
 0x4a4   : > { %10243 = vmatpush1.bf16.msra.mxu0 %v14168_v16  ;;  %9384 = vmatprep.subr.bf16.mxu1 %v14173_v32  ;;  %v14252_v16 = vld [vmem:[%s14759_s22 + $0x2630] ss:$8 sps:$4 sm:$0xff]   ;;  %v14257_v32 = vld [vmem:[%s14759_s22 + $0x1244] ss:$8 sps:$4 sm:$0xff]  }
 0x4a5   : > { %10244 = vmatprep.subr.bf16.mxu0 %v14176_v42  ;;  %v14260_v42 = vld [vmem:[%s14759_s22 + $0x2644] ss:$8 sps:$4 sm:$0xff]  }
 0x4a7   : > { %9385 = vmatpush1.bf16.msra.mxu1 %v14171_v6  ;;  %v14255_v6 = vld [vmem:[%s14759_s22 + $0x1240] ss:$8 sps:$4 sm:$0xff]  }
 0x4a8   : > { %10245 = vmatpush1.bf16.msra.mxu0 %v14174_v7  ;;  %9386 = vmatprep.subr.bf16.mxu1 %v14179_v11  ;;  %v14258_v7 = vld [vmem:[%s14759_s22 + $0x2640] ss:$8 sps:$4 sm:$0xff]   ;;  %v14263_v11 = vld [vmem:[%s14759_s22 + $0x1254] ss:$8 sps:$4 sm:$0xff]  }
 0x4a9   : > { %10246 = vmatprep.subr.bf16.mxu0 %v14182_v12  ;;  %v14266_v12 = vld [vmem:[%s14759_s22 + $0x2654] ss:$8 sps:$4 sm:$0xff]  }
 0x4ab   : > { %9387 = vmatpush1.bf16.msra.mxu1 %v14177_v8  ;;  %v14261_v8 = vld [vmem:[%s14759_s22 + $0x1250] ss:$8 sps:$4 sm:$0xff]  }
 0x4ac   : > { %10247 = vmatpush1.bf16.msra.mxu0 %v14180_v45  ;;  %9388 = vmatprep.subr.bf16.mxu1 %v14185_v1  ;;  %v14264_v45 = vld [vmem:[%s14759_s22 + $0x2650] ss:$8 sps:$4 sm:$0xff]   ;;  %v14269_v1 = vld [vmem:[%s14759_s22 + $0x1264] ss:$8 sps:$4 sm:$0xff]  }
 0x4ad   : > { %10248 = vmatprep.subr.bf16.mxu0 %v14188_v2  ;;  %v14272_v2 = vld [vmem:[%s14759_s22 + $0x2664] ss:$8 sps:$4 sm:$0xff]  }
 0x4af   : > { %9389 = vmatpush1.bf16.msra.mxu1 %v14183_v14  ;;  %v14267_v14 = vld [vmem:[%s14759_s22 + $0x1260] ss:$8 sps:$4 sm:$0xff]  }
 0x4b0   : > { %10249 = vmatpush1.bf16.msra.mxu0 %v14186_v15  ;;  %9390 = vmatprep.subr.bf16.mxu1 %v14191_v19  ;;  %v14270_v15 = vld [vmem:[%s14759_s22 + $0x2660] ss:$8 sps:$4 sm:$0xff]   ;;  %v14275_v19 = vld [vmem:[%s14759_s22 + $0x1274] ss:$8 sps:$4 sm:$0xff]  }
 0x4b1   : > { %10250 = vmatprep.subr.bf16.mxu0 %v14194_v20  ;;  %v14278_v20 = vld [vmem:[%s14759_s22 + $0x2674] ss:$8 sps:$4 sm:$0xff]  }
 0x4b3   : > { %9391 = vmatpush1.bf16.msra.mxu1 %v14189_v5  ;;  %v14273_v5 = vld [vmem:[%s14759_s22 + $0x1270] ss:$8 sps:$4 sm:$0xff]  }
 0x4b4   : > { %10251 = vmatpush1.bf16.msra.mxu0 %v14192_v55  ;;  %9392 = vmatprep.subr.bf16.mxu1 %v14197_v9  ;;  %v14276_v55 = vld [vmem:[%s14759_s22 + $0x2670] ss:$8 sps:$4 sm:$0xff]   ;;  %v14281_v9 = vld [vmem:[%s14759_s22 + $0x1284] ss:$8 sps:$4 sm:$0xff]  }
 0x4b5   : > { %10252 = vmatprep.subr.bf16.mxu0 %v14200_v10  ;;  %v14284_v10 = vld [vmem:[%s14759_s22 + $0x2684] ss:$8 sps:$4 sm:$0xff]  }
 0x4b7   : > { %9393 = vmatpush1.bf16.msra.mxu1 %v14195_v22  ;;  %v14279_v22 = vld [vmem:[%s14759_s22 + $0x1280] ss:$8 sps:$4 sm:$0xff]  }
 0x4b8   : > { %10253 = vmatpush1.bf16.msra.mxu0 %v14198_v23  ;;  %9394 = vmatprep.subr.bf16.mxu1 %v14203_v27  ;;  %v14282_v23 = vld [vmem:[%s14759_s22 + $0x2680] ss:$8 sps:$4 sm:$0xff]   ;;  %v14287_v27 = vld [vmem:[%s14759_s22 + $0x1294] ss:$8 sps:$4 sm:$0xff]  }
 0x4b9   : > { %10254 = vmatprep.subr.bf16.mxu0 %v14206_v28  ;;  %v14290_v28 = vld [vmem:[%s14759_s22 + $0x2694] ss:$8 sps:$4 sm:$0xff]  }
 0x4bb   : > { %9395 = vmatpush1.bf16.msra.mxu1 %v14201_v13  ;;  %v14285_v13 = vld [vmem:[%s14759_s22 + $0x1290] ss:$8 sps:$4 sm:$0xff]  }
 0x4bc   : > { %10255 = vmatpush1.bf16.msra.mxu0 %v14204_v48  ;;  %9396 = vmatprep.subr.bf16.mxu1 %v14209_v17  ;;  %v14288_v48 = vld [vmem:[%s14759_s22 + $0x2690] ss:$8 sps:$4 sm:$0xff]   ;;  %v14293_v17 = vld [vmem:[%s14759_s22 + $0x12a4] ss:$8 sps:$4 sm:$0xff]  }
 0x4bd   : > { %10256 = vmatprep.subr.bf16.mxu0 %v14212_v18  ;;  %v14296_v18 = vld [vmem:[%s14759_s22 + $0x26a4] ss:$8 sps:$4 sm:$0xff]  }
 0x4bf   : > { %9397 = vmatpush1.bf16.msra.mxu1 %v14207_v30  ;;  %v14291_v30 = vld [vmem:[%s14759_s22 + $0x12a0] ss:$8 sps:$4 sm:$0xff]  }
 0x4c0   : > { %10257 = vmatpush1.bf16.msra.mxu0 %v14210_v31  ;;  %9398 = vmatprep.subr.bf16.mxu1 %v14215_v35  ;;  %v14294_v31 = vld [vmem:[%s14759_s22 + $0x26a0] ss:$8 sps:$4 sm:$0xff]   ;;  %v14299_v35 = vld [vmem:[%s14759_s22 + $0x12b4] ss:$8 sps:$4 sm:$0xff]  }
 0x4c1   : > { %10258 = vmatprep.subr.bf16.mxu0 %v14218_v36  ;;  %v14302_v36 = vld [vmem:[%s14759_s22 + $0x26b4] ss:$8 sps:$4 sm:$0xff]  }
 0x4c3   : > { %9399 = vmatpush1.bf16.msra.mxu1 %v14213_v21  ;;  %v14297_v21 = vld [vmem:[%s14759_s22 + $0x12b0] ss:$8 sps:$4 sm:$0xff]  }
 0x4c4   : > { %10259 = vmatpush1.bf16.msra.mxu0 %v14216_v56  ;;  %9400 = vmatprep.subr.bf16.mxu1 %v14221_v25  ;;  %v14300_v56 = vld [vmem:[%s14759_s22 + $0x26b0] ss:$8 sps:$4 sm:$0xff]   ;;  %v14305_v25 = vld [vmem:[%s14759_s22 + $0x12c4] ss:$8 sps:$4 sm:$0xff]  }
 0x4c5   : > { %10260 = vmatprep.subr.bf16.mxu0 %v14224_v26  ;;  %v14308_v26 = vld [vmem:[%s14759_s22 + $0x26c4] ss:$8 sps:$4 sm:$0xff]  }
 0x4c7   : > { %9401 = vmatpush1.bf16.msra.mxu1 %v14219_v38  ;;  %v14303_v38 = vld [vmem:[%s14759_s22 + $0x12c0] ss:$8 sps:$4 sm:$0xff]  }
 0x4c8   : > { %10261 = vmatpush1.bf16.msra.mxu0 %v14222_v39  ;;  %9402 = vmatprep.subr.bf16.mxu1 %v14227_v49  ;;  %v14306_v39 = vld [vmem:[%s14759_s22 + $0x26c0] ss:$8 sps:$4 sm:$0xff]   ;;  %v14311_v49 = vld [vmem:[%s14759_s22 + $0x12d4] ss:$8 sps:$4 sm:$0xff]  }
 0x4c9   : > { %10262 = vmatprep.subr.bf16.mxu0 %v14230_v50  ;;  %v14314_v50 = vld [vmem:[%s14759_s22 + $0x26d4] ss:$8 sps:$4 sm:$0xff]  }
 0x4cb   : > { %9403 = vmatpush1.bf16.msra.mxu1 %v14225_v29  ;;  %v14309_v29 = vld [vmem:[%s14759_s22 + $0x12d0] ss:$8 sps:$4 sm:$0xff]  }
 0x4cc   : > { %10263 = vmatpush1.bf16.msra.mxu0 %v14228_v51  ;;  %9415 = vmatprep.subr.bf16.mxu1 %v14233_v33  ;;  %v14312_v51 = vld [vmem:[%s14759_s22 + $0x26d0] ss:$8 sps:$4 sm:$0xff]   ;;  %v14317_v33 = vld [vmem:[%s14759_s22 + $0x12e4] ss:$8 sps:$4 sm:$0xff]  }
 0x4cd   : > { %10275 = vmatprep.subr.bf16.mxu0 %v14236_v34  ;;  %v14320_v34 = vld [vmem:[%s14759_s22 + $0x26e4] ss:$8 sps:$4 sm:$0xff]  }
 0x4ce   : > { %9405 = vmatmul.mubr.bf16.vlgmr.msra.gmra.mrb[0].mxu1 %v10918_v54  ;;  %v14315_v54 = vld [vmem:[%s14759_s22 + $0x12e0] ss:$8 sps:$4 sm:$0xff]  }
 0x4cf   : > { %10265 = vmatmul.mubr.bf16.vlgmr.msra.gmra.mrb[0].mxu0 %v10958_v41  ;;  %9416 = vmatpush1.bf16.msra.mxu1 %v14231_v57  ;;  %v14318_v41 = vld [vmem:[%s14759_s22 + $0x26e0] ss:$8 sps:$4 sm:$0xff]   ;;  %v14323_v57 = vld [vmem:[%s14759_s22 + $0x12f4] ss:$8 sps:$4 sm:$0xff]  }
 0x4d0   : > { %10276 = vmatpush1.bf16.msra.mxu0 %v14234_v58  ;;  %9417 = vmatprep.subr.bf16.mxu1 %v14239_v37  ;;  %v14326_v58 = vld [vmem:[%s14759_s22 + $0x26f4] ss:$8 sps:$4 sm:$0xff]   ;;  %v14321_v37 = vld [vmem:[%s14759_s22 + $0x12f0] ss:$8 sps:$4 sm:$0xff]  }
 0x4d1   : > { %10277 = vmatprep.subr.bf16.mxu0 %v14242_v59  ;;  %9447 = vmatprep.mubr.bf16.mxu1 %v10921_v43  ;;  %v14324_v59 = vld [vmem:[%s14759_s22 + $0x26f0] ss:$8 sps:$4 sm:$0xff]   ;;  %v14329_v43 = vld [vmem:[%s14759_s22 + $0x1304] ss:$8 sps:$4 sm:$0xff]  }
 0x4d2   : > { %10307 = vmatprep.mubr.bf16.mxu0 %v10961_v44  ;;  %v14332_v44 = vld [vmem:[%s14759_s22 + $0x2704] ss:$8 sps:$4 sm:$0xff]  }
 0x4d3   : > { %9418 = vmatpush1.bf16.msra.mxu1 %v14237_v61  ;;  %v16343_v61 = vld [vmem:[%s14761_s23 + $0x98] sm:$0xff] }
 0x4d4   : > { %10278 = vmatpush1.bf16.msra.mxu0 %v14240_v62  ;;  %9419 = vmatprep.subr.bf16.mxu1 %v14245_v63  ;;  %v10920_v62 = vcombine.low %v16259_v53, %v16266_v52  ;;  %v10960_v63 = vcombine.low %v16269_v46, %v16272_v47  ;;  %v14335_v53 = vld [vmem:[%s14759_s22 + $0x1314] ss:$8 sps:$4 sm:$0xff]  }
 0x4d5   : > { %10279 = vmatprep.subr.bf16.mxu0 %v14248_v60  ;;  %v16350_v60 = vld [vmem:[%s14761_s23 + $0x1d8] sm:$0xff] }
 0x4d6   : > { %v14338_v52 = vld [vmem:[%s14759_s22 + $0x2714] ss:$8 sps:$4 sm:$0xff]   ;;  %v10923_v46 = vcombine.high %v16343_v61, %v16350_v60 }
 0x4d7   : > { %9420 = vmatpush1.bf16.msra.mxu1 %v14243_v24  ;;  %v16353_v24 = vld [vmem:[%s14761_s23 + $0x138] sm:$0xff] }
 0x4d8   : > { %10280 = vmatpush1.bf16.msra.mxu0 %v14246_v40  ;;  %9421 = vmatprep.subr.bf16.mxu1 %v14251_v3  ;;  %v16356_v40 = vld [vmem:[%s14761_s23 + $0x278] sm:$0xff]  ;;  %v14327_v3 = vld [vmem:[%s14759_s22 + $0x1300] ss:$8 sps:$4 sm:$0xff]  }
 0x4d9   : > { %10281 = vmatprep.subr.bf16.mxu0 %v14254_v4  ;;  %v14330_v4 = vld [vmem:[%s14759_s22 + $0x2700] ss:$8 sps:$4 sm:$0xff]   ;;  %v10963_v47 = vcombine.high %v16353_v24, %v16356_v40 }
 0x4db   : > { %9422 = vmatpush1.bf16.msra.mxu1 %v14249_v0  ;;  %v14333_v0 = vld [vmem:[%s14759_s22 + $0x1310] ss:$8 sps:$4 sm:$0xff]  }
 0x4dc   : > { %10282 = vmatpush1.bf16.msra.mxu0 %v14252_v16  ;;  %9423 = vmatprep.subr.bf16.mxu1 %v14257_v32  ;;  %v14336_v16 = vld [vmem:[%s14759_s22 + $0x2710] ss:$8 sps:$4 sm:$0xff]   ;;  %v14341_v32 = vld [vmem:[%s14759_s22 + $0x1324] ss:$8 sps:$4 sm:$0xff]  }
 0x4dd   : > { %10283 = vmatprep.subr.bf16.mxu0 %v14260_v42  ;;  %v14344_v42 = vld [vmem:[%s14759_s22 + $0x2724] ss:$8 sps:$4 sm:$0xff]  }
 0x4df   : > { %9424 = vmatpush1.bf16.msra.mxu1 %v14255_v6  ;;  %v14339_v6 = vld [vmem:[%s14759_s22 + $0x1320] ss:$8 sps:$4 sm:$0xff]  }
 0x4e0   : > { %10284 = vmatpush1.bf16.msra.mxu0 %v14258_v7  ;;  %9425 = vmatprep.subr.bf16.mxu1 %v14263_v11  ;;  %v14342_v7 = vld [vmem:[%s14759_s22 + $0x2720] ss:$8 sps:$4 sm:$0xff]   ;;  %v14347_v11 = vld [vmem:[%s14759_s22 + $0x1334] ss:$8 sps:$4 sm:$0xff]  }
 0x4e1   : > { %10285 = vmatprep.subr.bf16.mxu0 %v14266_v12  ;;  %v14350_v12 = vld [vmem:[%s14759_s22 + $0x2734] ss:$8 sps:$4 sm:$0xff]  }
 0x4e3   : > { %9426 = vmatpush1.bf16.msra.mxu1 %v14261_v8  ;;  %v14345_v8 = vld [vmem:[%s14759_s22 + $0x1330] ss:$8 sps:$4 sm:$0xff]  }
 0x4e4   : > { %10286 = vmatpush1.bf16.msra.mxu0 %v14264_v45  ;;  %9427 = vmatprep.subr.bf16.mxu1 %v14269_v1  ;;  %v14348_v45 = vld [vmem:[%s14759_s22 + $0x2730] ss:$8 sps:$4 sm:$0xff]   ;;  %v14353_v1 = vld [vmem:[%s14759_s22 + $0x1344] ss:$8 sps:$4 sm:$0xff]  }
 0x4e5   : > { %10287 = vmatprep.subr.bf16.mxu0 %v14272_v2  ;;  %v14356_v2 = vld [vmem:[%s14759_s22 + $0x2744] ss:$8 sps:$4 sm:$0xff]  }
 0x4e7   : > { %9428 = vmatpush1.bf16.msra.mxu1 %v14267_v14  ;;  %v14351_v14 = vld [vmem:[%s14759_s22 + $0x1340] ss:$8 sps:$4 sm:$0xff]  }
 0x4e8   : > { %10288 = vmatpush1.bf16.msra.mxu0 %v14270_v15  ;;  %9429 = vmatprep.subr.bf16.mxu1 %v14275_v19  ;;  %v14354_v15 = vld [vmem:[%s14759_s22 + $0x2740] ss:$8 sps:$4 sm:$0xff]   ;;  %v14359_v19 = vld [vmem:[%s14759_s22 + $0x1354] ss:$8 sps:$4 sm:$0xff]  }
 0x4e9   : > { %10289 = vmatprep.subr.bf16.mxu0 %v14278_v20  ;;  %v14362_v20 = vld [vmem:[%s14759_s22 + $0x2754] ss:$8 sps:$4 sm:$0xff]  }
 0x4eb   : > { %9430 = vmatpush1.bf16.msra.mxu1 %v14273_v5  ;;  %v14357_v5 = vld [vmem:[%s14759_s22 + $0x1350] ss:$8 sps:$4 sm:$0xff]  }
 0x4ec   : > { %10290 = vmatpush1.bf16.msra.mxu0 %v14276_v55  ;;  %9431 = vmatprep.subr.bf16.mxu1 %v14281_v9  ;;  %v14360_v55 = vld [vmem:[%s14759_s22 + $0x2750] ss:$8 sps:$4 sm:$0xff]   ;;  %v14365_v9 = vld [vmem:[%s14759_s22 + $0x1364] ss:$8 sps:$4 sm:$0xff]  }
 0x4ed   : > { %10291 = vmatprep.subr.bf16.mxu0 %v14284_v10  ;;  %v14368_v10 = vld [vmem:[%s14759_s22 + $0x2764] ss:$8 sps:$4 sm:$0xff]  }
 0x4ef   : > { %9432 = vmatpush1.bf16.msra.mxu1 %v14279_v22  ;;  %v14363_v22 = vld [vmem:[%s14759_s22 + $0x1360] ss:$8 sps:$4 sm:$0xff]  }
 0x4f0   : > { %10292 = vmatpush1.bf16.msra.mxu0 %v14282_v23  ;;  %9433 = vmatprep.subr.bf16.mxu1 %v14287_v27  ;;  %v14366_v23 = vld [vmem:[%s14759_s22 + $0x2760] ss:$8 sps:$4 sm:$0xff]   ;;  %v14371_v27 = vld [vmem:[%s14759_s22 + $0x1374] ss:$8 sps:$4 sm:$0xff]  }
 0x4f1   : > { %10293 = vmatprep.subr.bf16.mxu0 %v14290_v28  ;;  %v14374_v28 = vld [vmem:[%s14759_s22 + $0x2774] ss:$8 sps:$4 sm:$0xff]  }
 0x4f3   : > { %9434 = vmatpush1.bf16.msra.mxu1 %v14285_v13  ;;  %v14369_v13 = vld [vmem:[%s14759_s22 + $0x1370] ss:$8 sps:$4 sm:$0xff]  }
 0x4f4   : > { %10294 = vmatpush1.bf16.msra.mxu0 %v14288_v48  ;;  %9435 = vmatprep.subr.bf16.mxu1 %v14293_v17  ;;  %v14372_v48 = vld [vmem:[%s14759_s22 + $0x2770] ss:$8 sps:$4 sm:$0xff]   ;;  %v14377_v17 = vld [vmem:[%s14759_s22 + $0x1384] ss:$8 sps:$4 sm:$0xff]  }
 0x4f5   : > { %10295 = vmatprep.subr.bf16.mxu0 %v14296_v18  ;;  %v14380_v18 = vld [vmem:[%s14759_s22 + $0x2784] ss:$8 sps:$4 sm:$0xff]  }
 0x4f7   : > { %9436 = vmatpush1.bf16.msra.mxu1 %v14291_v30  ;;  %v14375_v30 = vld [vmem:[%s14759_s22 + $0x1380] ss:$8 sps:$4 sm:$0xff]  }
 0x4f8   : > { %10296 = vmatpush1.bf16.msra.mxu0 %v14294_v31  ;;  %9437 = vmatprep.subr.bf16.mxu1 %v14299_v35  ;;  %v14378_v31 = vld [vmem:[%s14759_s22 + $0x2780] ss:$8 sps:$4 sm:$0xff]   ;;  %v14383_v35 = vld [vmem:[%s14759_s22 + $0x1394] ss:$8 sps:$4 sm:$0xff]  }
 0x4f9   : > { %10297 = vmatprep.subr.bf16.mxu0 %v14302_v36  ;;  %v14386_v36 = vld [vmem:[%s14759_s22 + $0x2794] ss:$8 sps:$4 sm:$0xff]  }
 0x4fb   : > { %9438 = vmatpush1.bf16.msra.mxu1 %v14297_v21  ;;  %v14381_v21 = vld [vmem:[%s14759_s22 + $0x1390] ss:$8 sps:$4 sm:$0xff]  }
 0x4fc   : > { %10298 = vmatpush1.bf16.msra.mxu0 %v14300_v56  ;;  %9439 = vmatprep.subr.bf16.mxu1 %v14305_v25  ;;  %v14384_v56 = vld [vmem:[%s14759_s22 + $0x2790] ss:$8 sps:$4 sm:$0xff]   ;;  %v14389_v25 = vld [vmem:[%s14759_s22 + $0x13a4] ss:$8 sps:$4 sm:$0xff]  }
 0x4fd   : > { %10299 = vmatprep.subr.bf16.mxu0 %v14308_v26  ;;  %v14392_v26 = vld [vmem:[%s14759_s22 + $0x27a4] ss:$8 sps:$4 sm:$0xff]  }
 0x4ff   : > { %9440 = vmatpush1.bf16.msra.mxu1 %v14303_v38  ;;  %v14387_v38 = vld [vmem:[%s14759_s22 + $0x13a0] ss:$8 sps:$4 sm:$0xff]  }
 0x500   : > { %10300 = vmatpush1.bf16.msra.mxu0 %v14306_v39  ;;  %9441 = vmatprep.subr.bf16.mxu1 %v14311_v49  ;;  %v14390_v39 = vld [vmem:[%s14759_s22 + $0x27a0] ss:$8 sps:$4 sm:$0xff]   ;;  %v14395_v49 = vld [vmem:[%s14759_s22 + $0x13b4] ss:$8 sps:$4 sm:$0xff]  }
 0x501   : > { %10301 = vmatprep.subr.bf16.mxu0 %v14314_v50  ;;  %v14398_v50 = vld [vmem:[%s14759_s22 + $0x27b4] ss:$8 sps:$4 sm:$0xff]  }
 0x503   : > { %9442 = vmatpush1.bf16.msra.mxu1 %v14309_v29  ;;  %v14393_v29 = vld [vmem:[%s14759_s22 + $0x13b0] ss:$8 sps:$4 sm:$0xff]  }
 0x504   : > { %10302 = vmatpush1.bf16.msra.mxu0 %v14312_v51  ;;  %9443 = vmatprep.subr.bf16.mxu1 %v14317_v33  ;;  %v14396_v51 = vld [vmem:[%s14759_s22 + $0x27b0] ss:$8 sps:$4 sm:$0xff]   ;;  %v14401_v33 = vld [vmem:[%s14759_s22 + $0x13c4] ss:$8 sps:$4 sm:$0xff]  }
 0x505   : > { %10303 = vmatprep.subr.bf16.mxu0 %v14320_v34  ;;  %v14404_v34 = vld [vmem:[%s14759_s22 + $0x27c4] ss:$8 sps:$4 sm:$0xff]  }
 0x507   : > { %9444 = vmatpush1.bf16.msra.mxu1 %v14315_v54  ;;  %v14399_v54 = vld [vmem:[%s14759_s22 + $0x13c0] ss:$8 sps:$4 sm:$0xff]  }
 0x508   : > { %10304 = vmatpush1.bf16.msra.mxu0 %v14318_v41  ;;  %9445 = vmatprep.subr.bf16.mxu1 %v14323_v57  ;;  %v14402_v41 = vld [vmem:[%s14759_s22 + $0x27c0] ss:$8 sps:$4 sm:$0xff]   ;;  %v14407_v57 = vld [vmem:[%s14759_s22 + $0x13d4] ss:$8 sps:$4 sm:$0xff]  }
 0x509   : > { %10305 = vmatprep.subr.bf16.mxu0 %v14326_v58  ;;  %v14410_v58 = vld [vmem:[%s14759_s22 + $0x27d4] ss:$8 sps:$4 sm:$0xff]  }
 0x50b   : > { %9446 = vmatpush1.bf16.msra.mxu1 %v14321_v37  ;;  %v14405_v37 = vld [vmem:[%s14759_s22 + $0x13d0] ss:$8 sps:$4 sm:$0xff]  }
 0x50c   : > { %10306 = vmatpush1.bf16.msra.mxu0 %v14324_v59  ;;  %9458 = vmatprep.subr.bf16.mxu1 %v14329_v43  ;;  %v14408_v59 = vld [vmem:[%s14759_s22 + $0x27d0] ss:$8 sps:$4 sm:$0xff]   ;;  %v14413_v43 = vld [vmem:[%s14759_s22 + $0x13e4] ss:$8 sps:$4 sm:$0xff]  }
 0x50d   : > { %10318 = vmatprep.subr.bf16.mxu0 %v14332_v44  ;;  %v14416_v44 = vld [vmem:[%s14759_s22 + $0x27e4] ss:$8 sps:$4 sm:$0xff]  }
 0x50e   : > { %9448 = vmatmul.mubr.bf16.vlgmr.msra.gmra.mrb[0].mxu1 %v10920_v62  ;;  %v14411_v62 = vld [vmem:[%s14759_s22 + $0x13e0] ss:$8 sps:$4 sm:$0xff]  }
 0x50f   : > { %10308 = vmatmul.mubr.bf16.vlgmr.msra.gmra.mrb[0].mxu0 %v10960_v63  ;;  %9459 = vmatpush1.bf16.msra.mxu1 %v14327_v3  ;;  %v14414_v63 = vld [vmem:[%s14759_s22 + $0x27e0] ss:$8 sps:$4 sm:$0xff]   ;;  %v14419_v3 = vld [vmem:[%s14759_s22 + $0x13f4] ss:$8 sps:$4 sm:$0xff]  }
 0x510   : > { %10319 = vmatpush1.bf16.msra.mxu0 %v14330_v4  ;;  %9460 = vmatprep.subr.bf16.mxu1 %v14335_v53  ;;  %v14422_v4 = vld [vmem:[%s14759_s22 + $0x27f4] ss:$8 sps:$4 sm:$0xff]   ;;  %v14417_v53 = vld [vmem:[%s14759_s22 + $0x13f0] ss:$8 sps:$4 sm:$0xff]  }
 0x511   : > { %10320 = vmatprep.subr.bf16.mxu0 %v14338_v52  ;;  %9490 = vmatprep.mubr.bf16.mxu1 %v10923_v46  ;;  %v14420_v52 = vld [vmem:[%s14759_s22 + $0x27f0] ss:$8 sps:$4 sm:$0xff]   ;;  %v10922_v46 = vcombine.low %v16343_v61, %v16350_v60 }
 0x512   : > { %10350 = vmatprep.mubr.bf16.mxu0 %v10963_v47  ;;  %v10962_v47 = vcombine.low %v16353_v24, %v16356_v40 }
 0x513   : > { %9461 = vmatpush1.bf16.msra.mxu1 %v14333_v0 }
 0x514   : > { %10321 = vmatpush1.bf16.msra.mxu0 %v14336_v16  ;;  %9462 = vmatprep.subr.bf16.mxu1 %v14341_v32  ;;  %v477_v16 = vld [vmem:[#allocation2] sm:$0xff] }
 0x515   : > { %10322 = vmatprep.subr.bf16.mxu0 %v14344_v42 }
 0x517   : > { %9463 = vmatpush1.bf16.msra.mxu1 %v14339_v6 }
 0x518   : > { %10323 = vmatpush1.bf16.msra.mxu0 %v14342_v7  ;;  %9464 = vmatprep.subr.bf16.mxu1 %v14347_v11  ;;  %v478_v7 = vld [vmem:[#allocation2 + $0x8] sm:$0xff] }
 0x519   : > { %10324 = vmatprep.subr.bf16.mxu0 %v14350_v12 }
 0x51b   : > { %9465 = vmatpush1.bf16.msra.mxu1 %v14345_v8 }
 0x51c   : > { %10325 = vmatpush1.bf16.msra.mxu0 %v14348_v45  ;;  %9466 = vmatprep.subr.bf16.mxu1 %v14353_v1  ;;  %v479_v45 = vld [vmem:[#allocation2 + $0x10] sm:$0xff] }
 0x51d   : > { %10326 = vmatprep.subr.bf16.mxu0 %v14356_v2 }
 0x51f   : > { %9467 = vmatpush1.bf16.msra.mxu1 %v14351_v14  ;;  %v480_v14 = vld [vmem:[#allocation2 + $0x18] sm:$0xff] }
 0x520   : > { %10327 = vmatpush1.bf16.msra.mxu0 %v14354_v15  ;;  %9468 = vmatprep.subr.bf16.mxu1 %v14359_v19 }
 0x521   : > { %10328 = vmatprep.subr.bf16.mxu0 %v14362_v20 }
 0x523   : > { %9469 = vmatpush1.bf16.msra.mxu1 %v14357_v5  ;;  %v14423_v5 = vld [vmem:[%s16609_s3 + $0x4] ss:$8 sps:$4 sm:$0xff] (!%p12244_p10)  }
 0x524   : > { %10329 = vmatpush1.bf16.msra.mxu0 %v14360_v55  ;;  %9470 = vmatprep.subr.bf16.mxu1 %v14365_v9  ;;  %v14425_v55 = vld [vmem:[%s16609_s3] ss:$8 sps:$4 sm:$0xff] (!%p12244_p10)   ;;  %v14426_v9 = vld [vmem:[%s16609_s3 + $0x14] ss:$8 sps:$4 sm:$0xff] (!%p12244_p10)  }
 0x525   : > { %10330 = vmatprep.subr.bf16.mxu0 %v14368_v10  ;;  %v14428_v10 = vld [vmem:[%s16609_s3 + $0x10] ss:$8 sps:$4 sm:$0xff] (!%p12244_p10)  }
 0x527   : > { %9471 = vmatpush1.bf16.msra.mxu1 %v14363_v22  ;;  %v14429_v22 = vld [vmem:[%s16609_s3 + $0x24] ss:$8 sps:$4 sm:$0xff] (!%p12244_p10)  }
 0x528   : > { %10331 = vmatpush1.bf16.msra.mxu0 %v14366_v23  ;;  %9472 = vmatprep.subr.bf16.mxu1 %v14371_v27  ;;  %v14431_v23 = vld [vmem:[%s16609_s3 + $0x20] ss:$8 sps:$4 sm:$0xff] (!%p12244_p10)   ;;  %v14432_v27 = vld [vmem:[%s16609_s3 + $0x34] ss:$8 sps:$4 sm:$0xff] (!%p12244_p10)  }
 0x529   : > { %10332 = vmatprep.subr.bf16.mxu0 %v14374_v28  ;;  %v14434_v28 = vld [vmem:[%s16609_s3 + $0x30] ss:$8 sps:$4 sm:$0xff] (!%p12244_p10)  }
 0x52b   : > { %9473 = vmatpush1.bf16.msra.mxu1 %v14369_v13  ;;  %v10379_v13 = vlaneseq (!%p12244_p10) }
 0x52c   : > { %10333 = vmatpush1.bf16.msra.mxu0 %v14372_v48  ;;  %9474 = vmatprep.subr.bf16.mxu1 %v14377_v17  ;;  %v14435_v48 = vld [vmem:[%s16609_s3 + $0x44] ss:$8 sps:$4 sm:$0xff] (!%p12244_p10)   ;;  %v14437_v17 = vld [vmem:[%s16609_s3 + $0x40] ss:$8 sps:$4 sm:$0xff] (!%p12244_p10)  }
 0x52d   : > { %10334 = vmatprep.subr.bf16.mxu0 %v14380_v18  ;;  %v16459_v18 = vshrl.u32 (!%p12244_p10), %v10379_v13, 7 }
 0x52f   : > { %9475 = vmatpush1.bf16.msra.mxu1 %v14375_v30  ;;  %v14438_v30 = vld [vmem:[%s16609_s3 + $0x54] ss:$8 sps:$4 sm:$0xff] (!%p12244_p10)  }
 0x530   : > { %10335 = vmatpush1.bf16.msra.mxu0 %v14378_v31  ;;  %9476 = vmatprep.subr.bf16.mxu1 %v14383_v35  ;;  %v14440_v31 = vld [vmem:[%s16609_s3 + $0x50] ss:$8 sps:$4 sm:$0xff] (!%p12244_p10)   ;;  %v10385_v35 = vsub.s32 (!%p12244_p10), 1, %v16459_v18 }
 0x531   : > { %10336 = vmatprep.subr.bf16.mxu0 %v14386_v36  ;;  %v14441_v36 = vld [vmem:[%s16609_s3 + $0x64] ss:$8 sps:$4 sm:$0xff] (!%p12244_p10)  }
 0x533   : > { %9477 = vmatpush1.bf16.msra.mxu1 %v14381_v21  ;;  %v14443_v21 = vld [vmem:[%s16609_s3 + $0x60] ss:$8 sps:$4 sm:$0xff] (!%p12244_p10)  }
 0x534   : > { %10337 = vmatpush1.bf16.msra.mxu0 %v14384_v56  ;;  %9478 = vmatprep.subr.bf16.mxu1 %v14389_v25  ;;  %v14444_v56 = vld [vmem:[%s16609_s3 + $0x74] ss:$8 sps:$4 sm:$0xff] (!%p12244_p10)  }
 0x535   : > { %10338 = vmatprep.subr.bf16.mxu0 %v14392_v26 }
 0x537   : > { %9479 = vmatpush1.bf16.msra.mxu1 %v14387_v38  ;;  %v10377_v38 = vld [vmem:[%s16608_s2] sm:$0x3] (!%p12244_p10) }
 0x538   : > { %10339 = vmatpush1.bf16.msra.mxu0 %v14390_v39  ;;  %9480 = vmatprep.subr.bf16.mxu1 %v14395_v49  ;;  %v10386_v39 = vrot.slane (!%p12244_p10), %v10377_v38, %v10385_v35  ;;  %v14471_v49 = vld [vmem:[%s16611_s5 + $0x40] sm:$0xff] (!%p12244_p10)  }
 0x539   : > { %10340 = vmatprep.subr.bf16.mxu0 %v14398_v50  ;;  %v14472_v50 = vld [vmem:[%s16611_s5] sm:$0xff] (!%p12244_p10)  }
 0x53b   : > { %9481 = vmatpush1.bf16.msra.mxu1 %v14393_v29  ;;  %v14446_v29 = vld [vmem:[%s16609_s3 + $0x70] ss:$8 sps:$4 sm:$0xff] (!%p12244_p10)  }
 0x53c   : > { %10341 = vmatpush1.bf16.msra.mxu0 %v14396_v51  ;;  %9482 = vmatprep.subr.bf16.mxu1 %v14401_v33 }
 0x53d   : > { %10342 = vmatprep.subr.bf16.mxu0 %v14404_v34  ;;  %v14473_v34 = vld [vmem:[%s16611_s5 + $0x48] sm:$0xff] (!%p12244_p10)  }
 0x53f   : > { %9483 = vmatpush1.bf16.msra.mxu1 %v14399_v54  ;;  %v14474_v54 = vld [vmem:[%s16611_s5 + $0x8] sm:$0xff] (!%p12244_p10)  }
 0x540   : > { %10343 = vmatpush1.bf16.msra.mxu0 %v14402_v41  ;;  %9484 = vmatprep.subr.bf16.mxu1 %v14407_v57  ;;  %v14447_v41 = vld [vmem:[%s16609_s3 + $0x84] ss:$8 sps:$4 sm:$0xff] (!%p12244_p10)  }
 0x541   : > { %10344 = vmatprep.subr.bf16.mxu0 %v14410_v58 }
 0x543   : > { %9485 = vmatpush1.bf16.msra.mxu1 %v14405_v37  ;;  %v14475_v37 = vld [vmem:[%s16611_s5 + $0x50] sm:$0xff] (!%p12244_p10)  }
 0x544   : > { %10345 = vmatpush1.bf16.msra.mxu0 %v14408_v59  ;;  %9486 = vmatprep.subr.bf16.mxu1 %v14413_v43  ;;  %v14449_v59 = vld [vmem:[%s16609_s3 + $0x80] ss:$8 sps:$4 sm:$0xff] (!%p12244_p10)  }
 0x545   : > { %10346 = vmatprep.subr.bf16.mxu0 %v14416_v44  ;;  %v14476_v44 = vld [vmem:[%s16611_s5 + $0x10] sm:$0xff] (!%p12244_p10)  }
 0x547   : > { %9487 = vmatpush1.bf16.msra.mxu1 %v14411_v62  ;;  %v14477_v62 = vld [vmem:[%s16611_s5 + $0x58] sm:$0xff] (!%p12244_p10)  }
 0x548   : > { %10347 = vmatpush1.bf16.msra.mxu0 %v14414_v63  ;;  %9488 = vmatprep.subr.bf16.mxu1 %v14419_v3  ;;  %v14450_v63 = vld [vmem:[%s16609_s3 + $0x94] ss:$8 sps:$4 sm:$0xff] (!%p12244_p10)   ;;  %v14452_v3 = vld [vmem:[%s16609_s3 + $0x90] ss:$8 sps:$4 sm:$0xff] (!%p12244_p10)  }
 0x549   : > { %10348 = vmatprep.subr.bf16.mxu0 %v14422_v4  ;;  %v14453_v4 = vld [vmem:[%s16609_s3 + $0xa4] ss:$8 sps:$4 sm:$0xff] (!%p12244_p10)  }
 0x54b   : > { %9489 = vmatpush1.bf16.msra.mxu1 %v14417_v53  ;;  %v14478_v53 = vld [vmem:[%s16611_s5 + $0x18] sm:$0xff] (!%p12244_p10)  }
 0x54c   : > { %10349 = vmatpush1.bf16.msra.mxu0 %v14420_v52  ;;  %12298 = vmatprep.subr.bf16.mxu1 (!%p12244_p10), %v14471_v49  ;;  %v14479_v52 = vld [vmem:[%s16611_s5 + $0x60] sm:$0xff] (!%p12244_p10)  }
 0x54d   : > { %10603 = vmatprep.subr.bf16.mxu0 (!%p12244_p10), %v14423_v5  ;;  %v14482_v5 = vld [vmem:[%s16611_s5 + $0x28] sm:$0xff] (!%p12244_p10)  }
 0x54e   : > { %9491 = vmatmul.mubr.bf16.vlgmr.msra.gmra.mrb[0].mxu1 %v10922_v46  ;;  %v14480_v46 = vld [vmem:[%s16611_s5 + $0x20] sm:$0xff] (!%p12244_p10)  }
 0x54f   : > { %10351 = vmatmul.mubr.bf16.vlgmr.msra.gmra.mrb[0].mxu0 %v10962_v47  ;;  %12299 = vmatpush3.bf16.msra.mxu1 (!%p12244_p10), %v14472_v50  ;;  %v14455_v47 = vld [vmem:[%s16609_s3 + $0xa0] ss:$8 sps:$4 sm:$0xff] (!%p12244_p10)  }
 0x550   : > { %10604 = vmatpush1.bf16.msra.mxu0 (!%p12244_p10), %v14425_v55  ;;  %12300 = vmatprep.subr.bf16.mxu1 (!%p12244_p10), %v14473_v34  ;;  %v14483_v55 = vld [vmem:[%s16611_s5 + $0x70] sm:$0xff] (!%p12244_p10)  }
 0x551   : > { %10605 = vmatprep.subr.bf16.mxu0 (!%p12244_p10), %v14426_v9  ;;  %v14484_v9 = vld [vmem:[%s16611_s5 + $0x30] sm:$0xff] (!%p12244_p10)  }
 0x553   : > { %12301 = vmatpush3.bf16.msra.mxu1 (!%p12244_p10), %v14474_v54 }
 0x554   : > { %10606 = vmatpush1.bf16.msra.mxu0 (!%p12244_p10), %v14428_v10  ;;  %12302 = vmatprep.subr.bf16.mxu1 (!%p12244_p10), %v14475_v37  ;;  %v14485_v10 = vld [vmem:[%s16611_s5 + $0x78] sm:$0xff] (!%p12244_p10)  }
 0x555   : > { %10607 = vmatprep.subr.bf16.mxu0 (!%p12244_p10), %v14429_v22  ;;  %v14486_v22 = vld [vmem:[%s16611_s5 + $0x38] sm:$0xff] (!%p12244_p10)  }
 0x557   : > { %12303 = vmatpush3.bf16.msra.mxu1 (!%p12244_p10), %v14476_v44 }
 0x558   : > { %10608 = vmatpush1.bf16.msra.mxu0 (!%p12244_p10), %v14431_v23  ;;  %12304 = vmatprep.subr.bf16.mxu1 (!%p12244_p10), %v14477_v62  ;;  %v10431_v23 = vld [vmem:[%s16610_s4] sm:$0x3] (!%p12244_p10) }
 0x559   : > { %10609 = vmatprep.subr.bf16.mxu0 (!%p12244_p10), %v14432_v27 }
 0x55b   : > { %12305 = vmatpush3.bf16.msra.mxu1 (!%p12244_p10), %v14478_v53 }
 0x55c   : > { %10610 = vmatpush1.bf16.msra.mxu0 (!%p12244_p10), %v14434_v28  ;;  %12306 = vmatprep.subr.bf16.mxu1 (!%p12244_p10), %v14479_v52  ;;  %v10440_v28 = vrot.slane (!%p12244_p10), %v10431_v23, %v10385_v35 }
 0x55d   : > { %10611 = vmatprep.subr.bf16.mxu0 (!%p12244_p10), %v14435_v48 }
 0x55f   : > { %12307 = vmatpush3.bf16.msra.mxu1 (!%p12244_p10), %v14480_v46 }
 0x560   : > { %10612 = vmatpush1.bf16.msra.mxu0 (!%p12244_p10), %v14437_v17 }
 0x561   : > { %10613 = vmatprep.subr.bf16.mxu0 (!%p12244_p10), %v14438_v30 }
 0x564   : > { %10614 = vmatpush1.bf16.msra.mxu0 (!%p12244_p10), %v14440_v31 }
 0x565   : > { %10615 = vmatprep.subr.bf16.mxu0 (!%p12244_p10), %v14441_v36 }
 0x568   : > { %10616 = vmatpush1.bf16.msra.mxu0 (!%p12244_p10), %v14443_v21 }
 0x569   : > { %10617 = vmatprep.subr.bf16.mxu0 (!%p12244_p10), %v14444_v56 }
 0x56c   : > { %10618 = vmatpush1.bf16.msra.mxu0 (!%p12244_p10), %v14446_v29 }
 0x56d   : > { %10619 = vmatprep.subr.bf16.mxu0 (!%p12244_p10), %v14447_v41 }
 0x570   : > { %10620 = vmatpush1.bf16.msra.mxu0 (!%p12244_p10), %v14449_v59 }
 0x571   : > { %10621 = vmatprep.subr.bf16.mxu0 (!%p12244_p10), %v14450_v63 }
 0x574   : > { %10622 = vmatpush1.bf16.msra.mxu0 (!%p12244_p10), %v14452_v3 }
 0x575   : > { %10623 = vmatprep.subr.bf16.mxu0 (!%p12244_p10), %v14453_v4 }
 0x578   : > { %10624 = vmatpush1.bf16.msra.mxu0 (!%p12244_p10), %v14455_v47 }
 0x621   : > { %v9492_v0 = vpop.f32.mrb[0].mxu1 }
 0x622   : > { %v10352_v32 = vpop.f32.mrb[0].mxu0  ;;  %v9494_v6 = vpop.f32.mrb[1].mxu1 }
 0x623   : > { %v12320_v42 = vadd.f32 %v10352_v32, %v9492_v0  ;;  %v10354_v11 = vpop.f32.mrb[1].mxu0  ;;  %v9496_v8 = vpop.f32.mrb[2].mxu1  ;;  %v14481_v0 = vld [vmem:[%s16611_s5 + $0x68] sm:$0xff] (!%p12244_p10)   ;;  %v14458_v32 = vld [vmem:[%s16609_s3 + $0xb0] ss:$8 sps:$4 sm:$0xff] (!%p12244_p10)  }
 0x624   : > { %v12321_v12 = vadd.f32 %v10354_v11, %v9494_v6  ;;  %v10356_v1 = vpop.f32.mrb[2].mxu0  ;;  %v9498_v60 = vpop.f32.mrb[3].mxu1  ;;  %10372 = sbr.rel (%p12244_p10) target bundleno = 2036 (0x7f4), region = 79  ;;  %12308 = vmatprep.subr.bf16.mxu1 (!%p12244_p10), %v14481_v0  ;;  %v10381_v6 = vsub.s32 (!%p12244_p10), 0, %v16459_v18  ;;  %v14462_v11 = vld [vmem:[%s16609_s3 + $0xd4] ss:$8 sps:$4 sm:$0xff] (!%p12244_p10)  }
 0x625   : > { %v10361_v2 = vadd.f32 %v12320_v42, %v477_v16  ;;  %v12322_v61 = vadd.f32 %v10356_v1, %v9496_v8  ;;  %v10358_v24 = vpop.f32.mrb[3].mxu0  ;;  %v14456_v16 = vld [vmem:[%s16609_s3 + $0xb4] ss:$8 sps:$4 sm:$0xff] (!%p12244_p10)   ;;  %v14459_v42 = vld [vmem:[%s16609_s3 + $0xc4] ss:$8 sps:$4 sm:$0xff] (!%p12244_p10)   ;;  %12309 = vmatpush3.bf16.msra.mxu1 (!%p12244_p10), %v14482_v5 }
 0x626   : > { %v10362_v40 = vadd.f32 %v12321_v12, %v478_v7  ;;  %v12323_v15 = vadd.f32 %v10358_v24, %v9498_v60  ;;  %10625 = vmatprep.subr.bf16.mxu0 (!%p12244_p10), %v14456_v16  ;;  %v14461_v7 = vld [vmem:[%s16609_s3 + $0xc0] ss:$8 sps:$4 sm:$0xff] (!%p12244_p10)   ;;  %v10382_v12 = vrot.slane (!%p12244_p10), %v10377_v38, %v10381_v6  ;;  %v14464_v8 = vld [vmem:[%s16609_s3 + $0xd0] ss:$8 sps:$4 sm:$0xff] (!%p12244_p10)   ;;  %v14468_v24 = vld [vmem:[%s16609_s3 + $0xf4] ss:$8 sps:$4 sm:$0xff] (!%p12244_p10)   ;;  %12310 = vmatprep.subr.bf16.mxu1 (!%p12244_p10), %v14483_v55 }
 0x627   : > { %10365 = vst [vmem:[#allocation2] sm:$0xff] %v10361_v2  ;;  %v10363_v19 = vadd.f32 %v12322_v61, %v479_v45  ;;  %10626 = vmatpush1.bf16.msra.mxu0 (!%p12244_p10), %v14458_v32  ;;  %v14465_v2 = vld [vmem:[%s16609_s3 + $0xe4] ss:$8 sps:$4 sm:$0xff] (!%p12244_p10)   ;;  %v10436_v27 = vrot.slane (!%p12244_p10), %v10431_v23, %v10381_v6  ;;  %v12277_v18 = vld [vmem:[%s16612_s6] ss:$0 sm:$0xff] (!%p12244_p10) }
 0x628   : > { %10366 = vst [vmem:[#allocation2 + $0x8] sm:$0xff] %v10362_v40  ;;  %v10364_v20 = vadd.f32 %v12323_v15, %v480_v14  ;;  %10627 = vmatprep.subr.bf16.mxu0 (!%p12244_p10), %v14459_v42  ;;  %v14467_v14 = vld [vmem:[%s16609_s3 + $0xe0] ss:$8 sps:$4 sm:$0xff] (!%p12244_p10)  }
 0x629   : > { %10367 = vst [vmem:[#allocation2 + $0x10] sm:$0xff] %v10363_v19  ;;  %v14470_v19 = vld [vmem:[%s16609_s3 + $0xf0] ss:$8 sps:$4 sm:$0xff] (!%p12244_p10)   ;;  %12311 = vmatpush3.bf16.msra.mxu1 (!%p12244_p10), %v14484_v9 }
 0x62a   : > { %10368 = vst [vmem:[#allocation2 + $0x18] sm:$0xff] %v10364_v20  ;;  %12312 = vmatprep.subr.bf16.mxu1 (!%p12244_p10), %v14485_v10 }
 0x62b   : > { %10628 = vmatpush1.bf16.msra.mxu0 %v14461_v7 }
 0x62c   : > { %10629 = vmatprep.subr.bf16.mxu0 %v14462_v11 }
 0x62d   : > { %12313 = vmatpush3.bf16.msra.mxu1 %v14486_v22 }
 0x62e   : > { %v10373_v45 = vld [vmem:[#allocation2] sm:$0xff] }
 0x62f   : > { %v10374_v25 = vld [vmem:[#allocation2 + $0x8] sm:$0xff]  ;;  %v10389_v61 = vadd.f32 %v10382_v12, %v10373_v45  ;;  %10630 = vmatpush1.bf16.msra.mxu0 %v14464_v8 }
 0x630   : > { %v10390_v51 = vadd.f32 %v10386_v39, %v10374_v25  ;;  %v10375_v1 = vld [vmem:[#allocation2 + $0x10] sm:$0xff]  ;;  %10631 = vmatprep.subr.bf16.mxu0 %v14465_v2 }
 0x631   : > { %v10376_v26 = vld [vmem:[#allocation2 + $0x18] sm:$0xff]  ;;  %v10391_v60 = vadd.f32 %v10382_v12, %v10375_v1  ;;  %v10393_v40 = vmax.f32 %v10389_v61, 0.0 }
 0x632   : > { %v10392_v33 = vadd.f32 %v10386_v39, %v10376_v26  ;;  %v10394_v57 = vmax.f32 %v10390_v51, 0.0 }
 0x633   : > { %v10395_v15 = vmax.f32 %v10391_v60, 0.0  ;;  %10632 = vmatpush1.bf16.msra.mxu0 %v14467_v14 }
 0x634   : > { %v10396_v58 = vmax.f32 %v10392_v33, 0.0  ;;  %10633 = vmatprep.subr.bf16.mxu0 %v14468_v24 }
 0x635   : > { %v10397_v20 = vpack.c.bf16 %v10395_v15, %v10393_v40 }
 0x636   : > { %v10398_v43 = vpack.c.bf16 %v10396_v58, %v10394_v57 }
 0x637   : > { %10634 = vmatpush1.bf16.msra.mxu0 %v14470_v19 }
 0x638   : > { %10635 = vmatprep.mubr.bf16.mxu0 %v10398_v43 }
 0x63a   : > { %10636 = vmatmul.mubr.bf16.vlgmr.msra.gmra.mrb[0].mxu0 %v10397_v20 }
 0x70d   : > { %v10637_v13 = vpop.f32.mrb[0].mxu0 }
 0x70e   : > { %v10638_v48 = vadd.f32 %v10637_v13, %v10436_v27  ;;  %v10639_v17 = vpop.f32.mrb[1].mxu0 }
 0x70f   : > { %v10640_v30 = vadd.f32 %v10639_v17, %v10440_v28  ;;  %v10641_v31 = vpop.f32.mrb[2].mxu0 }
 0x710   : > { %v10642_v36 = vadd.f32 %v10641_v31, %v10436_v27  ;;  %v10643_v21 = vpop.f32.mrb[3].mxu0  ;;  %v10646_v25 = vmax.f32 %v10638_v48, 0.0 }
 0x711   : > { %v10644_v56 = vadd.f32 %v10643_v21, %v10440_v28  ;;  %v10647_v38 = vmax.f32 %v10640_v30, 0.0 }
 0x712   : > { %v10648_v26 = vmax.f32 %v10642_v36, 0.0 }
 0x713   : > { %v10649_v39 = vmax.f32 %v10644_v56, 0.0 }
 0x714   : > { %v10650_v49 = vpack.c.bf16 %v10648_v26, %v10646_v25 }
 0x715   : > { %v10651_v50 = vpack.c.bf16 %v10649_v39, %v10647_v38 }
 0x717   : > { %10819 = vmatprep.mubr.bf16.mxu1 %v10651_v50 }
 0x718   : > { %10820 = vmatmul.mubr.bf16.vlgmr.msra.gmra.mrb[0].mxu1 %v10650_v49 }
 0x7eb   : > { %v12314_v29 = vpop.f32.mrb[0].mxu1 }
 0x7ec   : > { %v12315_v35 = vpop.f32.mrb[1].mxu1 }
 0x7ed   : > { %v12316_v51 = vadd.f32 %v12315_v35, %v12314_v29  ;;  %v12317_v33 = vpop.f32.mrb[2].mxu1 }
 0x7ee   : > { %v12318_v34 = vpop.f32.mrb[3].mxu1 }
 0x7ef   : > { %v10822_v54 = vadd.f32 %v12316_v51, %v12277_v18  ;;  %v12319_v41 = vadd.f32 %v12318_v34, %v12317_v33 }
 0x7f1   : > { %10828 = vst [vmem:[%s16613_s7] sm:$0xff] %v10822_v54  ;;  %v10825_v57 = vadd.f32 %v12319_v41, %v12277_v18 }
 0x7f3   : > { %10829 = vst [vmem:[%s16613_s7 + $0x8] sm:$0xff] %v10825_v57 }
 0x7f4 PF: > { %p14_p11 = scmp.ge.s32.totalorder %s14571_s28, 4   ;;  %s16614_s24 = smov %s14505_s25 }
 0x7f5   : > { %s16615_s25 = smov %s14580_s8  ;;  %s16616_s26 = smov %s14571_s28 }
 0x7f6   :  { %16 = sbr.rel (!%p14_p11) target bundleno = 2 (0x2), region = 113 }

</bundles_post_ra>
